<compile_context>
chip_gen: v6e
topology: v6e:2x2x1
jax: 0.10.0
libtpu: 0.0.40
codegen_flags: <defaults>
</compile_context>

<pallas_src>
import jax
import jax.numpy as jnp
from jax.experimental import pallas as pl
from jax.experimental.pallas import tpu as pltpu

EPS = 1e-5
MXU_DTYPE = jnp.bfloat16                  # MXU operand dtype; accumulation is f32
VMEM_LIMIT = 48 * 1024 * 1024             # < v7x 64 MiB physical, > default scoped


def _round_up(x, m):
    return (x + m - 1) // m * m


def _pick_row_tile(R, max_rows=8192):
    """Largest multiple-of-8 divisor of R (capped), preferring >=2 grid steps."""
    cap = min(R // 2 if R >= 16 else R, max_rows)
    for cand in range(cap, 7, -1):
        if R % cand == 0 and cand % 8 == 0:
            return cand
    return R                               # full dim -> always a legal block


# --------------------------- Pallas kernels ----------------------------------

def _make_conv_bn_stats_kernel(H, W, Cin_p, Cout_p, fuse_bn):
    """[optional BN+ReLU on the input] -> 3x3 'SAME' conv via one im2col matmul
    -> per-image BN partial stats (sum, sum_sq) from the f32 accumulator."""
    HW = H * W

    def kernel(*refs):
        if fuse_bn:
            x_ref, scale_ref, shift_ref, w_ref, y_ref, s_ref, pad_ref, col_ref = refs
        else:
            x_ref, w_ref, y_ref, s_ref, pad_ref, col_ref = refs

        a = x_ref[...].astype(jnp.float32)            # (HW, Cin_p)
        if fuse_bn:
            # fused BN1 + ReLU1 (padded channels have scale=shift=0 -> stay 0)
            a = jnp.maximum(a * scale_ref[...] + shift_ref[...], 0.0)

        # In-kernel "SAME" zero padding of the (post-activation) conv input:
        # zero the halo FIRST, then write the interior.
        pad_ref[...] = jnp.zeros_like(pad_ref)
        pad_ref[1:H + 1, 1:W + 1, :] = a.reshape(H, W, Cin_p).astype(pad_ref.dtype)

        # In-VMEM im2col: hoist the dx (width) shifts (3 relayouts) and reuse
        # them for the 3 dy offsets (cheap leading-dim slices).
        for dx in range(3):
            colslab = pad_ref[:, dx:dx + W, :]        # (H+2, W, Cin_p)
            for dy in range(3):
                t = dy * 3 + dx
                col_ref[:, t * Cin_p:(t + 1) * Cin_p] = (
                    colslab[dy:dy + H].reshape(HW, Cin_p))

        # Single MXU matmul; K = 9*Cin_p is accumulated inside the MXU.
        acc = jnp.dot(col_ref[...], w_ref[...],
                      preferred_element_type=jnp.float32)
        y_ref[...] = acc.astype(y_ref.dtype)

        # Per-image BatchNorm partials (from the exact f32 accumulator).
        s_ref[0, 0:1, :] = jnp.sum(acc, axis=0, keepdims=True)
        s_ref[0, 1:2, :] = jnp.sum(acc * acc, axis=0, keepdims=True)

    return kernel


def _bn_relu_kernel(y_ref, scale_ref, shift_ref, o_ref):
    """Final fused BatchNorm affine (precomputed scale/shift) + ReLU."""
    y = y_ref[...].astype(jnp.float32) * scale_ref[...] + shift_ref[...]
    o_ref[...] = jnp.maximum(y, 0.0).astype(o_ref.dtype)


# --------------------------- pallas_call wrappers -----------------------------

def _conv_stats_pass(x_rows, w_k, N, H, W, Cin_p, Cout_p, *,
                     scale=None, shift=None, out_dtype):
    HW = H * W
    R = N * HW
    fuse_bn = scale is not None

    in_specs = [pl.BlockSpec((HW, Cin_p), lambda n: (n, 0))]
    args = [x_rows]
    if fuse_bn:
        in_specs += [pl.BlockSpec((1, Cin_p), lambda n: (0, 0)),
                     pl.BlockSpec((1, Cin_p), lambda n: (0, 0))]
        args += [scale.reshape(1, Cin_p), shift.reshape(1, Cin_p)]
    in_specs.append(pl.BlockSpec((9 * Cin_p, Cout_p), lambda n: (0, 0)))
    args.append(w_k)

    y, st = pl.pallas_call(
        _make_conv_bn_stats_kernel(H, W, Cin_p, Cout_p, fuse_bn),
        out_shape=(jax.ShapeDtypeStruct((R, Cout_p), out_dtype),
                   jax.ShapeDtypeStruct((N, 2, Cout_p), jnp.float32)),
        grid=(N,),
        in_specs=in_specs,
        out_specs=(pl.BlockSpec((HW, Cout_p), lambda n: (n, 0)),
                   pl.BlockSpec((1, 2, Cout_p), lambda n: (n, 0, 0))),
        scratch_shapes=[pltpu.VMEM((H + 2, W + 2, Cin_p), MXU_DTYPE),   # padded act
                        pltpu.VMEM((HW, 9 * Cin_p), MXU_DTYPE)],        # im2col
        compiler_params=pltpu.CompilerParams(
            dimension_semantics=("parallel",),
            vmem_limit_bytes=VMEM_LIMIT),
    )(*args)
    return y, st


def _bn_relu_pass(y, scale, shift, out_dtype):
    R, C = y.shape
    RT = _pick_row_tile(R)
    return pl.pallas_call(
        _bn_relu_kernel,
        out_shape=jax.ShapeDtypeStruct((R, C), out_dtype),
        grid=(R // RT,),
        in_specs=[pl.BlockSpec((RT, C), lambda i: (i, 0)),
                  pl.BlockSpec((1, C), lambda i: (0, 0)),
                  pl.BlockSpec((1, C), lambda i: (0, 0))],
        out_specs=pl.BlockSpec((RT, C), lambda i: (i, 0)),
        compiler_params=pltpu.CompilerParams(
            dimension_semantics=("parallel",),
            vmem_limit_bytes=VMEM_LIMIT),
    )(y, scale.reshape(1, C), shift.reshape(1, C))


def _bn_scale_shift(st, gamma, beta, R, C_p):
    """Reduce per-image (sum, sum_sq) partials to global BN scale/shift."""
    mean = jnp.sum(st[:, 0, :], axis=0) / R
    # single-pass variance in f32; clamped (fine at these magnitudes)
    var = jnp.maximum(jnp.sum(st[:, 1, :], axis=0) / R - mean * mean, 0.0)
    g = jnp.pad(gamma.astype(jnp.float32), (0, C_p - gamma.shape[0]))
    b = jnp.pad(beta.astype(jnp.float32), (0, C_p - beta.shape[0]))
    scale = g * jax.lax.rsqrt(var + EPS)
    shift = b - mean * scale
    return scale, shift


def _prep_weight(w_oihw, Cin_p, Cout_p):
    """(Cout, Cin, 3, 3) -> tap-major (9*Cin_p, Cout_p), zero padded, bf16."""
    Cout, Cin = w_oihw.shape[0], w_oihw.shape[1]
    w = jnp.transpose(w_oihw, (2, 3, 1, 0)).reshape(9, Cin, Cout)
    w = jnp.pad(w, ((0, 0), (0, Cin_p - Cin), (0, Cout_p - Cout)))
    return w.reshape(9 * Cin_p, Cout_p).astype(MXU_DTYPE)


def down_block_forward(x_nchw, params):
    """DownBlock.forward. Input/output NCHW, matching the PyTorch module."""
    N, Cin, H, W = x_nchw.shape
    out_ch = params["w1"].shape[0]
    HW = H * W
    R = N * HW
    assert N == 1 or HW % 8 == 0, "per-image row block must be sublane aligned"

    Cin_p = _round_up(Cin, 8)
    C1 = _round_up(out_ch, 128)        # lane-dense intermediates / output
    C2 = _round_up(out_ch, 128)

    # layout prep only: NCHW -> flattened NHWC rows, zero-pad input channels
    x = jnp.transpose(x_nchw, (0, 2, 3, 1))
    x = jnp.pad(x, ((0, 0), (0, 0), (0, 0), (0, Cin_p - Cin))).reshape(R, Cin_p)

    w1 = _prep_weight(params["w1"], Cin_p, C1)
    w2 = _prep_weight(params["w2"], C1, C2)

    # pass 1: conv1 + per-image BN partial stats (conv bias b1 cancels exactly
    # against the training-mode batch mean, so it is never applied).
    y1, st1 = _conv_stats_pass(x, w1, N, H, W, Cin_p, C1, out_dtype=MXU_DTYPE)
    scale1, shift1 = _bn_scale_shift(st1, params["g1"], params["be1"], R, C1)

    # pass 2: fused BN1+ReLU1 + conv2 + stats2 (no standalone BN1 pass).
    y2, st2 = _conv_stats_pass(y1, w2, N, H, W, C1, C2,
                               scale=scale1, shift=shift1,
                               out_dtype=jnp.float32)
    scale2, shift2 = _bn_scale_shift(st2, params["g2"], params["be2"], R, C2)

    # pass 3: BN2 + ReLU2
    out = _bn_relu_pass(y2, scale2, shift2, jnp.float32)

    out = out.reshape(N, H, W, C2)[..., :out_ch]        # drop channel padding
    return jnp.transpose(out, (0, 3, 1, 2))             # NHWC -> NCHW


# ------------------------- parameter init & reference ------------------------

def init_params(key, in_ch, out_ch):
    ks = jax.random.split(key, 8)
    return {
        "w1": 0.1 * jax.random.normal(ks[0], (out_ch, in_ch, 3, 3), jnp.float32),
        "b1": 0.1 * jax.random.normal(ks[1], (out_ch,), jnp.float32),
        "g1": 1.0 + 0.1 * jax.random.normal(ks[2], (out_ch,), jnp.float32),
        "be1": 0.1 * jax.random.normal(ks[3], (out_ch,), jnp.float32),
        "w2": 0.1 * jax.random.normal(ks[4], (out_ch, out_ch, 3, 3), jnp.float32),
        "b2": 0.1 * jax.random.normal(ks[5], (out_ch,), jnp.float32),
        "g2": 1.0 + 0.1 * jax.random.normal(ks[6], (out_ch,), jnp.float32),
        "be2": 0.1 * jax.random.normal(ks[7], (out_ch,), jnp.float32),
    }


def _ref_stage(x_nhwc, w_oihw, b, gamma, beta):
    y = jax.lax.conv_general_dilated(
        x_nhwc, jnp.transpose(w_oihw, (2, 3, 1, 0)),
        window_strides=(1, 1), padding="SAME",
        dimension_numbers=("NHWC", "HWIO", "NHWC"))
    y = y + b
    mean = jnp.mean(y, axis=(0, 1, 2), keepdims=True)
    var = jnp.mean(jnp.square(y - mean), axis=(0, 1, 2), keepdims=True)
    y = (y - mean) * jax.lax.rsqrt(var + EPS)
    y = y * gamma + beta
    return jnp.maximum(y, 0.0)


def _reference(x_nchw, p):
    x = jnp.transpose(x_nchw, (0, 2, 3, 1))
    y = _ref_stage(x, p["w1"], p["b1"], p["g1"], p["be1"])
    y = _ref_stage(y, p["w2"], p["b2"], p["g2"], p["be2"])
    return jnp.transpose(y, (0, 3, 1, 2))


if __name__ == "__main__":
    N, IN_CH, OUT_CH, S = 2, 4, 8, 16
    key = jax.random.PRNGKey(0)
    kx, kp = jax.random.split(key)
    x = jax.random.normal(kx, (N, IN_CH, S, S), jnp.float32)    # NCHW input
    params = init_params(kp, IN_CH, OUT_CH)

    fwd = jax.jit(down_block_forward)
    out = jax.block_until_ready(fwd(x, params))
    ref = jax.block_until_ready(_reference(x, params))

    assert out.shape == (N, OUT_CH, S, S), out.shape
    # bf16 MXU operands / bf16 intermediate (f32 accumulation & stats) vs. an
    # f32 reference -> loose tolerance.
    assert jnp.allclose(out, ref, atol=3e-2, rtol=3e-2), float(
        jnp.max(jnp.abs(out - ref)))
    print("KERNEL_OK")
</pallas_src>

<mosaic_0001>
module attributes {stable_mosaic.version = 11 : i64} {
  func.func @kernel(%arg0: i32, %arg1: memref<256x8xf32, #tpu.memory_space<vmem>>, %arg2: memref<72x128xbf16, #tpu.memory_space<vmem>>, %arg3: memref<256x128xbf16, #tpu.memory_space<vmem>>, %arg4: memref<1x2x128xf32, #tpu.memory_space<vmem>>, %arg5: memref<18x18x8xbf16, #tpu.memory_space<vmem>>, %arg6: memref<256x72xbf16, #tpu.memory_space<vmem>>) attributes {dimension_semantics = [#tpu.dimension_semantics<parallel>], iteration_bounds = array<i64: 2>, scalar_prefetch = 0 : i64, scratch_operands = 2 : i64, tpu.core_type = #tpu.core_type<tc>, window_params = [{transform_indices = @transform_0, window_bounds = array<i64: 256, 8>}, {pipeline_mode = #tpu.pipeline_mode<synchronous>, transform_indices = @transform_1, window_bounds = array<i64: 72, 128>}, {transform_indices = @transform_2, window_bounds = array<i64: 256, 128>}, {transform_indices = @transform_3, window_bounds = array<i64: 1, 2, 128>}]} {
    %c0 = arith.constant 0 : index
    %c0_0 = arith.constant 0 : index
    %0 = vector.load %arg1[%c0, %c0_0] : memref<256x8xf32, #tpu.memory_space<vmem>>, vector<256x8xf32>
    %cst = arith.constant 0.000000e+00 : bf16
    %1 = vector.broadcast %cst : bf16 to vector<18x18x8xbf16>
    %c0_1 = arith.constant 0 : index
    %c0_2 = arith.constant 0 : index
    %c0_3 = arith.constant 0 : index
    %2 = vector.load %arg5[%c0_1, %c0_2, %c0_3] : memref<18x18x8xbf16, #tpu.memory_space<vmem>>, vector<18x18x8xbf16>
    tpu.vector_store %arg5[%c0_1, %c0_2, %c0_3], %1 {strides = array<i32>} : memref<18x18x8xbf16, #tpu.memory_space<vmem>>, vector<18x18x8xbf16>,
    %3 = vector.shape_cast %0 : vector<256x8xf32> to vector<16x16x8xf32>
    %4 = arith.truncf %3 : vector<16x16x8xf32> to vector<16x16x8xbf16>
    %c1 = arith.constant 1 : index
    %c1_4 = arith.constant 1 : index
    %c0_5 = arith.constant 0 : index
    %5 = vector.load %arg5[%c1, %c1_4, %c0_5] : memref<18x18x8xbf16, #tpu.memory_space<vmem>>, vector<16x16x8xbf16>
    tpu.vector_store %arg5[%c1, %c1_4, %c0_5], %4 {strides = array<i32>} : memref<18x18x8xbf16, #tpu.memory_space<vmem>>, vector<16x16x8xbf16>,
    %c0_6 = arith.constant 0 : index
    %c0_7 = arith.constant 0 : index
    %c0_8 = arith.constant 0 : index
    %6 = vector.load %arg5[%c0_6, %c0_7, %c0_8] : memref<18x18x8xbf16, #tpu.memory_space<vmem>>, vector<18x16x8xbf16>
    %7 = vector.extract_strided_slice %6 {offsets = [0, 0, 0], sizes = [16, 16, 8], strides = [1, 1, 1]} : vector<18x16x8xbf16> to vector<16x16x8xbf16>
    %8 = vector.shape_cast %7 : vector<16x16x8xbf16> to vector<256x8xbf16>
    %c0_9 = arith.constant 0 : index
    %c0_10 = arith.constant 0 : index
    %9 = vector.load %arg6[%c0_9, %c0_10] : memref<256x72xbf16, #tpu.memory_space<vmem>>, vector<256x8xbf16>
    tpu.vector_store %arg6[%c0_9, %c0_10], %8 {strides = array<i32>} : memref<256x72xbf16, #tpu.memory_space<vmem>>, vector<256x8xbf16>,
    %10 = vector.extract_strided_slice %6 {offsets = [1, 0, 0], sizes = [16, 16, 8], strides = [1, 1, 1]} : vector<18x16x8xbf16> to vector<16x16x8xbf16>
    %11 = vector.shape_cast %10 : vector<16x16x8xbf16> to vector<256x8xbf16>
    %c0_11 = arith.constant 0 : index
    %c24 = arith.constant 24 : index
    %12 = vector.load %arg6[%c0_11, %c24] : memref<256x72xbf16, #tpu.memory_space<vmem>>, vector<256x8xbf16>
    tpu.vector_store %arg6[%c0_11, %c24], %11 {strides = array<i32>} : memref<256x72xbf16, #tpu.memory_space<vmem>>, vector<256x8xbf16>,
    %13 = vector.extract_strided_slice %6 {offsets = [2, 0, 0], sizes = [16, 16, 8], strides = [1, 1, 1]} : vector<18x16x8xbf16> to vector<16x16x8xbf16>
    %14 = vector.shape_cast %13 : vector<16x16x8xbf16> to vector<256x8xbf16>
    %c0_12 = arith.constant 0 : index
    %c48 = arith.constant 48 : index
    %15 = vector.load %arg6[%c0_12, %c48] : memref<256x72xbf16, #tpu.memory_space<vmem>>, vector<256x8xbf16>
    tpu.vector_store %arg6[%c0_12, %c48], %14 {strides = array<i32>} : memref<256x72xbf16, #tpu.memory_space<vmem>>, vector<256x8xbf16>,
    %c0_13 = arith.constant 0 : index
    %c1_14 = arith.constant 1 : index
    %c0_15 = arith.constant 0 : index
    %16 = vector.load %arg5[%c0_13, %c1_14, %c0_15] : memref<18x18x8xbf16, #tpu.memory_space<vmem>>, vector<18x16x8xbf16>
    %17 = vector.extract_strided_slice %16 {offsets = [0, 0, 0], sizes = [16, 16, 8], strides = [1, 1, 1]} : vector<18x16x8xbf16> to vector<16x16x8xbf16>
    %18 = vector.shape_cast %17 : vector<16x16x8xbf16> to vector<256x8xbf16>
    %c0_16 = arith.constant 0 : index
    %c8 = arith.constant 8 : index
    %19 = vector.load %arg6[%c0_16, %c8] : memref<256x72xbf16, #tpu.memory_space<vmem>>, vector<256x8xbf16>
    tpu.vector_store %arg6[%c0_16, %c8], %18 {strides = array<i32>} : memref<256x72xbf16, #tpu.memory_space<vmem>>, vector<256x8xbf16>,
    %20 = vector.extract_strided_slice %16 {offsets = [1, 0, 0], sizes = [16, 16, 8], strides = [1, 1, 1]} : vector<18x16x8xbf16> to vector<16x16x8xbf16>
    %21 = vector.shape_cast %20 : vector<16x16x8xbf16> to vector<256x8xbf16>
    %c0_17 = arith.constant 0 : index
    %c32 = arith.constant 32 : index
    %22 = vector.load %arg6[%c0_17, %c32] : memref<256x72xbf16, #tpu.memory_space<vmem>>, vector<256x8xbf16>
    tpu.vector_store %arg6[%c0_17, %c32], %21 {strides = array<i32>} : memref<256x72xbf16, #tpu.memory_space<vmem>>, vector<256x8xbf16>,
    %23 = vector.extract_strided_slice %16 {offsets = [2, 0, 0], sizes = [16, 16, 8], strides = [1, 1, 1]} : vector<18x16x8xbf16> to vector<16x16x8xbf16>
    %24 = vector.shape_cast %23 : vector<16x16x8xbf16> to vector<256x8xbf16>
    %c0_18 = arith.constant 0 : index
    %c56 = arith.constant 56 : index
    %25 = vector.load %arg6[%c0_18, %c56] : memref<256x72xbf16, #tpu.memory_space<vmem>>, vector<256x8xbf16>
    tpu.vector_store %arg6[%c0_18, %c56], %24 {strides = array<i32>} : memref<256x72xbf16, #tpu.memory_space<vmem>>, vector<256x8xbf16>,
    %c0_19 = arith.constant 0 : index
    %c2 = arith.constant 2 : index
    %c0_20 = arith.constant 0 : index
    %26 = vector.load %arg5[%c0_19, %c2, %c0_20] : memref<18x18x8xbf16, #tpu.memory_space<vmem>>, vector<18x16x8xbf16>
    %27 = vector.extract_strided_slice %26 {offsets = [0, 0, 0], sizes = [16, 16, 8], strides = [1, 1, 1]} : vector<18x16x8xbf16> to vector<16x16x8xbf16>
    %28 = vector.shape_cast %27 : vector<16x16x8xbf16> to vector<256x8xbf16>
    %c0_21 = arith.constant 0 : index
    %c16 = arith.constant 16 : index
    %29 = vector.load %arg6[%c0_21, %c16] : memref<256x72xbf16, #tpu.memory_space<vmem>>, vector<256x8xbf16>
    tpu.vector_store %arg6[%c0_21, %c16], %28 {strides = array<i32>} : memref<256x72xbf16, #tpu.memory_space<vmem>>, vector<256x8xbf16>,
    %30 = vector.extract_strided_slice %26 {offsets = [1, 0, 0], sizes = [16, 16, 8], strides = [1, 1, 1]} : vector<18x16x8xbf16> to vector<16x16x8xbf16>
    %31 = vector.shape_cast %30 : vector<16x16x8xbf16> to vector<256x8xbf16>
    %c0_22 = arith.constant 0 : index
    %c40 = arith.constant 40 : index
    %32 = vector.load %arg6[%c0_22, %c40] : memref<256x72xbf16, #tpu.memory_space<vmem>>, vector<256x8xbf16>
    tpu.vector_store %arg6[%c0_22, %c40], %31 {strides = array<i32>} : memref<256x72xbf16, #tpu.memory_space<vmem>>, vector<256x8xbf16>,
    %33 = vector.extract_strided_slice %26 {offsets = [2, 0, 0], sizes = [16, 16, 8], strides = [1, 1, 1]} : vector<18x16x8xbf16> to vector<16x16x8xbf16>
    %34 = vector.shape_cast %33 : vector<16x16x8xbf16> to vector<256x8xbf16>
    %c0_23 = arith.constant 0 : index
    %c64 = arith.constant 64 : index
    %35 = vector.load %arg6[%c0_23, %c64] : memref<256x72xbf16, #tpu.memory_space<vmem>>, vector<256x8xbf16>
    tpu.vector_store %arg6[%c0_23, %c64], %34 {strides = array<i32>} : memref<256x72xbf16, #tpu.memory_space<vmem>>, vector<256x8xbf16>,
    %c0_24 = arith.constant 0 : index
    %c0_25 = arith.constant 0 : index
    %36 = vector.load %arg6[%c0_24, %c0_25] : memref<256x72xbf16, #tpu.memory_space<vmem>>, vector<256x72xbf16>
    %c0_26 = arith.constant 0 : index
    %c0_27 = arith.constant 0 : index
    %37 = vector.load %arg2[%c0_26, %c0_27] : memref<72x128xbf16, #tpu.memory_space<vmem>>, vector<72x128xbf16>
    %cst_28 = arith.constant dense<0.000000e+00> : vector<256x128xf32>
    %38 = tpu.matmul %36, %37, %cst_28 {dimension_numbers = #tpu.dot_dimension_numbers<[1], [0], [0], [1], [0, 0, 1, 1], [], []>} : vector<256x72xbf16>, vector<72x128xbf16>, vector<256x128xf32> -> vector<256x128xf32>
    %39 = arith.truncf %38 : vector<256x128xf32> to vector<256x128xbf16>
    %c0_29 = arith.constant 0 : index
    %c0_30 = arith.constant 0 : index
    %40 = vector.load %arg3[%c0_29, %c0_30] : memref<256x128xbf16, #tpu.memory_space<vmem>>, vector<256x128xbf16>
    tpu.vector_store %arg3[%c0_29, %c0_30], %39 {strides = array<i32>} : memref<256x128xbf16, #tpu.memory_space<vmem>>, vector<256x128xbf16>,
    %cst_31 = arith.constant dense<0.000000e+00> : vector<128xf32>
    %41 = vector.multi_reduction <add>, %38, %cst_31 [0] : vector<256x128xf32> to vector<128xf32>
    %42 = vector.shape_cast %41 : vector<128xf32> to vector<1x128xf32>
    %c0_32 = arith.constant 0 : index
    %c0_33 = arith.constant 0 : index
    %c0_34 = arith.constant 0 : index
    %43 = vector.load %arg4[%c0_32, %c0_33, %c0_34] : memref<1x2x128xf32, #tpu.memory_space<vmem>>, vector<1x1x128xf32>
    %44 = vector.shape_cast %43 : vector<1x1x128xf32> to vector<1x128xf32>
    %45 = vector.shape_cast %42 : vector<1x128xf32> to vector<1x1x128xf32>
    tpu.vector_store %arg4[%c0_32, %c0_33, %c0_34], %45 {strides = array<i32>} : memref<1x2x128xf32, #tpu.memory_space<vmem>>, vector<1x1x128xf32>,
    %46 = arith.mulf %38, %38 : vector<256x128xf32>
    %cst_35 = arith.constant dense<0.000000e+00> : vector<128xf32>
    %47 = vector.multi_reduction <add>, %46, %cst_35 [0] : vector<256x128xf32> to vector<128xf32>
    %48 = vector.shape_cast %47 : vector<128xf32> to vector<1x128xf32>
    %c0_36 = arith.constant 0 : index
    %c1_37 = arith.constant 1 : index
    %c0_38 = arith.constant 0 : index
    %49 = vector.load %arg4[%c0_36, %c1_37, %c0_38] : memref<1x2x128xf32, #tpu.memory_space<vmem>>, vector<1x1x128xf32>
    %50 = vector.shape_cast %49 : vector<1x1x128xf32> to vector<1x128xf32>
    %51 = vector.shape_cast %48 : vector<1x128xf32> to vector<1x1x128xf32>
    tpu.vector_store %arg4[%c0_36, %c1_37, %c0_38], %51 {strides = array<i32>} : memref<1x2x128xf32, #tpu.memory_space<vmem>>, vector<1x1x128xf32>,
    return
  }
  func.func @transform_0(%arg0: i32) -> (i32, i32) {
    %c0_i32 = arith.constant 0 : i32
    %c0_i32_0 = arith.constant 0 : i32
    return %arg0, %c0_i32 : i32, i32
  }
  func.func @transform_1(%arg0: i32) -> (i32, i32) {
    %c0_i32 = arith.constant 0 : i32
    %c0_i32_0 = arith.constant 0 : i32
    %c0_i32_1 = arith.constant 0 : i32
    return %c0_i32, %c0_i32_0 : i32, i32
  }
  func.func @transform_2(%arg0: i32) -> (i32, i32) {
    %c0_i32 = arith.constant 0 : i32
    %c0_i32_0 = arith.constant 0 : i32
    return %arg0, %c0_i32 : i32, i32
  }
  func.func @transform_3(%arg0: i32) -> (i32, i32, i32) {
    %c0_i32 = arith.constant 0 : i32
    %c0_i32_0 = arith.constant 0 : i32
    %c0_i32_1 = arith.constant 0 : i32
    return %arg0, %c0_i32, %c0_i32_0 : i32, i32, i32
  }
}

module attributes {stable_mosaic.version = 11 : i64} {
  func.func @kernel(%arg0: i32, %arg1: memref<256x128xbf16, #tpu.memory_space<vmem>>, %arg2: memref<1x128xf32, #tpu.memory_space<vmem>>, %arg3: memref<1x128xf32, #tpu.memory_space<vmem>>, %arg4: memref<1152x128xbf16, #tpu.memory_space<vmem>>, %arg5: memref<256x128xf32, #tpu.memory_space<vmem>>, %arg6: memref<1x2x128xf32, #tpu.memory_space<vmem>>, %arg7: memref<18x18x128xbf16, #tpu.memory_space<vmem>>, %arg8: memref<256x1152xbf16, #tpu.memory_space<vmem>>) attributes {dimension_semantics = [#tpu.dimension_semantics<parallel>], iteration_bounds = array<i64: 2>, scalar_prefetch = 0 : i64, scratch_operands = 2 : i64, tpu.core_type = #tpu.core_type<tc>, window_params = [{transform_indices = @transform_0, window_bounds = array<i64: 256, 128>}, {pipeline_mode = #tpu.pipeline_mode<synchronous>, transform_indices = @transform_1, window_bounds = array<i64: 1, 128>}, {pipeline_mode = #tpu.pipeline_mode<synchronous>, transform_indices = @transform_2, window_bounds = array<i64: 1, 128>}, {pipeline_mode = #tpu.pipeline_mode<synchronous>, transform_indices = @transform_3, window_bounds = array<i64: 1152, 128>}, {transform_indices = @transform_4, window_bounds = array<i64: 256, 128>}, {transform_indices = @transform_5, window_bounds = array<i64: 1, 2, 128>}]} {
    %c0 = arith.constant 0 : index
    %c0_0 = arith.constant 0 : index
    %0 = vector.load %arg1[%c0, %c0_0] : memref<256x128xbf16, #tpu.memory_space<vmem>>, vector<256x128xbf16>
    %1 = arith.extf %0 : vector<256x128xbf16> to vector<256x128xf32>
    %c0_1 = arith.constant 0 : index
    %c0_2 = arith.constant 0 : index
    %2 = vector.load %arg2[%c0_1, %c0_2] : memref<1x128xf32, #tpu.memory_space<vmem>>, vector<1x128xf32>
    %3 = vector.broadcast %2 : vector<1x128xf32> to vector<256x128xf32>
    %4 = arith.mulf %1, %3 : vector<256x128xf32>
    %c0_3 = arith.constant 0 : index
    %c0_4 = arith.constant 0 : index
    %5 = vector.load %arg3[%c0_3, %c0_4] : memref<1x128xf32, #tpu.memory_space<vmem>>, vector<1x128xf32>
    %6 = vector.broadcast %5 : vector<1x128xf32> to vector<256x128xf32>
    %7 = arith.addf %4, %6 : vector<256x128xf32>
    %cst = arith.constant 0.000000e+00 : f32
    %8 = vector.broadcast %cst : f32 to vector<256x128xf32>
    %9 = arith.maximumf %7, %8 : vector<256x128xf32>
    %cst_5 = arith.constant 0.000000e+00 : bf16
    %10 = vector.broadcast %cst_5 : bf16 to vector<18x18x128xbf16>
    %c0_6 = arith.constant 0 : index
    %c0_7 = arith.constant 0 : index
    %c0_8 = arith.constant 0 : index
    %11 = vector.load %arg7[%c0_6, %c0_7, %c0_8] : memref<18x18x128xbf16, #tpu.memory_space<vmem>>, vector<18x18x128xbf16>
    tpu.vector_store %arg7[%c0_6, %c0_7, %c0_8], %10 {strides = array<i32>} : memref<18x18x128xbf16, #tpu.memory_space<vmem>>, vector<18x18x128xbf16>,
    %12 = vector.shape_cast %9 : vector<256x128xf32> to vector<16x16x128xf32>
    %13 = arith.truncf %12 : vector<16x16x128xf32> to vector<16x16x128xbf16>
    %c1 = arith.constant 1 : index
    %c1_9 = arith.constant 1 : index
    %c0_10 = arith.constant 0 : index
    %14 = vector.load %arg7[%c1, %c1_9, %c0_10] : memref<18x18x128xbf16, #tpu.memory_space<vmem>>, vector<16x16x128xbf16>
    tpu.vector_store %arg7[%c1, %c1_9, %c0_10], %13 {strides = array<i32>} : memref<18x18x128xbf16, #tpu.memory_space<vmem>>, vector<16x16x128xbf16>,
    %c0_11 = arith.constant 0 : index
    %c0_12 = arith.constant 0 : index
    %c0_13 = arith.constant 0 : index
    %15 = vector.load %arg7[%c0_11, %c0_12, %c0_13] : memref<18x18x128xbf16, #tpu.memory_space<vmem>>, vector<18x16x128xbf16>
    %16 = vector.extract_strided_slice %15 {offsets = [0, 0, 0], sizes = [16, 16, 128], strides = [1, 1, 1]} : vector<18x16x128xbf16> to vector<16x16x128xbf16>
    %17 = vector.shape_cast %16 : vector<16x16x128xbf16> to vector<256x128xbf16>
    %c0_14 = arith.constant 0 : index
    %c0_15 = arith.constant 0 : index
    %18 = vector.load %arg8[%c0_14, %c0_15] : memref<256x1152xbf16, #tpu.memory_space<vmem>>, vector<256x128xbf16>
    tpu.vector_store %arg8[%c0_14, %c0_15], %17 {strides = array<i32>} : memref<256x1152xbf16, #tpu.memory_space<vmem>>, vector<256x128xbf16>,
    %19 = vector.extract_strided_slice %15 {offsets = [1, 0, 0], sizes = [16, 16, 128], strides = [1, 1, 1]} : vector<18x16x128xbf16> to vector<16x16x128xbf16>
    %20 = vector.shape_cast %19 : vector<16x16x128xbf16> to vector<256x128xbf16>
    %c0_16 = arith.constant 0 : index
    %c384 = arith.constant 384 : index
    %21 = vector.load %arg8[%c0_16, %c384] : memref<256x1152xbf16, #tpu.memory_space<vmem>>, vector<256x128xbf16>
    tpu.vector_store %arg8[%c0_16, %c384], %20 {strides = array<i32>} : memref<256x1152xbf16, #tpu.memory_space<vmem>>, vector<256x128xbf16>,
    %22 = vector.extract_strided_slice %15 {offsets = [2, 0, 0], sizes = [16, 16, 128], strides = [1, 1, 1]} : vector<18x16x128xbf16> to vector<16x16x128xbf16>
    %23 = vector.shape_cast %22 : vector<16x16x128xbf16> to vector<256x128xbf16>
    %c0_17 = arith.constant 0 : index
    %c768 = arith.constant 768 : index
    %24 = vector.load %arg8[%c0_17, %c768] : memref<256x1152xbf16, #tpu.memory_space<vmem>>, vector<256x128xbf16>
    tpu.vector_store %arg8[%c0_17, %c768], %23 {strides = array<i32>} : memref<256x1152xbf16, #tpu.memory_space<vmem>>, vector<256x128xbf16>,
    %c0_18 = arith.constant 0 : index
    %c1_19 = arith.constant 1 : index
    %c0_20 = arith.constant 0 : index
    %25 = vector.load %arg7[%c0_18, %c1_19, %c0_20] : memref<18x18x128xbf16, #tpu.memory_space<vmem>>, vector<18x16x128xbf16>
    %26 = vector.extract_strided_slice %25 {offsets = [0, 0, 0], sizes = [16, 16, 128], strides = [1, 1, 1]} : vector<18x16x128xbf16> to vector<16x16x128xbf16>
    %27 = vector.shape_cast %26 : vector<16x16x128xbf16> to vector<256x128xbf16>
    %c0_21 = arith.constant 0 : index
    %c128 = arith.constant 128 : index
    %28 = vector.load %arg8[%c0_21, %c128] : memref<256x1152xbf16, #tpu.memory_space<vmem>>, vector<256x128xbf16>
    tpu.vector_store %arg8[%c0_21, %c128], %27 {strides = array<i32>} : memref<256x1152xbf16, #tpu.memory_space<vmem>>, vector<256x128xbf16>,
    %29 = vector.extract_strided_slice %25 {offsets = [1, 0, 0], sizes = [16, 16, 128], strides = [1, 1, 1]} : vector<18x16x128xbf16> to vector<16x16x128xbf16>
    %30 = vector.shape_cast %29 : vector<16x16x128xbf16> to vector<256x128xbf16>
    %c0_22 = arith.constant 0 : index
    %c512 = arith.constant 512 : index
    %31 = vector.load %arg8[%c0_22, %c512] : memref<256x1152xbf16, #tpu.memory_space<vmem>>, vector<256x128xbf16>
    tpu.vector_store %arg8[%c0_22, %c512], %30 {strides = array<i32>} : memref<256x1152xbf16, #tpu.memory_space<vmem>>, vector<256x128xbf16>,
    %32 = vector.extract_strided_slice %25 {offsets = [2, 0, 0], sizes = [16, 16, 128], strides = [1, 1, 1]} : vector<18x16x128xbf16> to vector<16x16x128xbf16>
    %33 = vector.shape_cast %32 : vector<16x16x128xbf16> to vector<256x128xbf16>
    %c0_23 = arith.constant 0 : index
    %c896 = arith.constant 896 : index
    %34 = vector.load %arg8[%c0_23, %c896] : memref<256x1152xbf16, #tpu.memory_space<vmem>>, vector<256x128xbf16>
    tpu.vector_store %arg8[%c0_23, %c896], %33 {strides = array<i32>} : memref<256x1152xbf16, #tpu.memory_space<vmem>>, vector<256x128xbf16>,
    %c0_24 = arith.constant 0 : index
    %c2 = arith.constant 2 : index
    %c0_25 = arith.constant 0 : index
    %35 = vector.load %arg7[%c0_24, %c2, %c0_25] : memref<18x18x128xbf16, #tpu.memory_space<vmem>>, vector<18x16x128xbf16>
    %36 = vector.extract_strided_slice %35 {offsets = [0, 0, 0], sizes = [16, 16, 128], strides = [1, 1, 1]} : vector<18x16x128xbf16> to vector<16x16x128xbf16>
    %37 = vector.shape_cast %36 : vector<16x16x128xbf16> to vector<256x128xbf16>
    %c0_26 = arith.constant 0 : index
    %c256 = arith.constant 256 : index
    %38 = vector.load %arg8[%c0_26, %c256] : memref<256x1152xbf16, #tpu.memory_space<vmem>>, vector<256x128xbf16>
    tpu.vector_store %arg8[%c0_26, %c256], %37 {strides = array<i32>} : memref<256x1152xbf16, #tpu.memory_space<vmem>>, vector<256x128xbf16>,
    %39 = vector.extract_strided_slice %35 {offsets = [1, 0, 0], sizes = [16, 16, 128], strides = [1, 1, 1]} : vector<18x16x128xbf16> to vector<16x16x128xbf16>
    %40 = vector.shape_cast %39 : vector<16x16x128xbf16> to vector<256x128xbf16>
    %c0_27 = arith.constant 0 : index
    %c640 = arith.constant 640 : index
    %41 = vector.load %arg8[%c0_27, %c640] : memref<256x1152xbf16, #tpu.memory_space<vmem>>, vector<256x128xbf16>
    tpu.vector_store %arg8[%c0_27, %c640], %40 {strides = array<i32>} : memref<256x1152xbf16, #tpu.memory_space<vmem>>, vector<256x128xbf16>,
    %42 = vector.extract_strided_slice %35 {offsets = [2, 0, 0], sizes = [16, 16, 128], strides = [1, 1, 1]} : vector<18x16x128xbf16> to vector<16x16x128xbf16>
    %43 = vector.shape_cast %42 : vector<16x16x128xbf16> to vector<256x128xbf16>
    %c0_28 = arith.constant 0 : index
    %c1024 = arith.constant 1024 : index
    %44 = vector.load %arg8[%c0_28, %c1024] : memref<256x1152xbf16, #tpu.memory_space<vmem>>, vector<256x128xbf16>
    tpu.vector_store %arg8[%c0_28, %c1024], %43 {strides = array<i32>} : memref<256x1152xbf16, #tpu.memory_space<vmem>>, vector<256x128xbf16>,
    %c0_29 = arith.constant 0 : index
    %c0_30 = arith.constant 0 : index
    %45 = vector.load %arg8[%c0_29, %c0_30] : memref<256x1152xbf16, #tpu.memory_space<vmem>>, vector<256x1152xbf16>
    %c0_31 = arith.constant 0 : index
    %c0_32 = arith.constant 0 : index
    %46 = vector.load %arg4[%c0_31, %c0_32] : memref<1152x128xbf16, #tpu.memory_space<vmem>>, vector<1152x128xbf16>
    %cst_33 = arith.constant dense<0.000000e+00> : vector<256x128xf32>
    %47 = tpu.matmul %45, %46, %cst_33 {dimension_numbers = #tpu.dot_dimension_numbers<[1], [0], [0], [1], [0, 0, 1, 1], [], []>} : vector<256x1152xbf16>, vector<1152x128xbf16>, vector<256x128xf32> -> vector<256x128xf32>
    %c0_34 = arith.constant 0 : index
    %c0_35 = arith.constant 0 : index
    %48 = vector.load %arg5[%c0_34, %c0_35] : memref<256x128xf32, #tpu.memory_space<vmem>>, vector<256x128xf32>
    tpu.vector_store %arg5[%c0_34, %c0_35], %47 {strides = array<i32>} : memref<256x128xf32, #tpu.memory_space<vmem>>, vector<256x128xf32>,
    %cst_36 = arith.constant dense<0.000000e+00> : vector<128xf32>
    %49 = vector.multi_reduction <add>, %47, %cst_36 [0] : vector<256x128xf32> to vector<128xf32>
    %50 = vector.shape_cast %49 : vector<128xf32> to vector<1x128xf32>
    %c0_37 = arith.constant 0 : index
    %c0_38 = arith.constant 0 : index
    %c0_39 = arith.constant 0 : index
    %51 = vector.load %arg6[%c0_37, %c0_38, %c0_39] : memref<1x2x128xf32, #tpu.memory_space<vmem>>, vector<1x1x128xf32>
    %52 = vector.shape_cast %51 : vector<1x1x128xf32> to vector<1x128xf32>
    %53 = vector.shape_cast %50 : vector<1x128xf32> to vector<1x1x128xf32>
    tpu.vector_store %arg6[%c0_37, %c0_38, %c0_39], %53 {strides = array<i32>} : memref<1x2x128xf32, #tpu.memory_space<vmem>>, vector<1x1x128xf32>,
    %54 = arith.mulf %47, %47 : vector<256x128xf32>
    %cst_40 = arith.constant dense<0.000000e+00> : vector<128xf32>
    %55 = vector.multi_reduction <add>, %54, %cst_40 [0] : vector<256x128xf32> to vector<128xf32>
    %56 = vector.shape_cast %55 : vector<128xf32> to vector<1x128xf32>
    %c0_41 = arith.constant 0 : index
    %c1_42 = arith.constant 1 : index
    %c0_43 = arith.constant 0 : index
    %57 = vector.load %arg6[%c0_41, %c1_42, %c0_43] : memref<1x2x128xf32, #tpu.memory_space<vmem>>, vector<1x1x128xf32>
    %58 = vector.shape_cast %57 : vector<1x1x128xf32> to vector<1x128xf32>
    %59 = vector.shape_cast %56 : vector<1x128xf32> to vector<1x1x128xf32>
    tpu.vector_store %arg6[%c0_41, %c1_42, %c0_43], %59 {strides = array<i32>} : memref<1x2x128xf32, #tpu.memory_space<vmem>>, vector<1x1x128xf32>,
    return
  }
  func.func @transform_0(%arg0: i32) -> (i32, i32) {
    %c0_i32 = arith.constant 0 : i32
    %c0_i32_0 = arith.constant 0 : i32
    return %arg0, %c0_i32 : i32, i32
  }
  func.func @transform_1(%arg0: i32) -> (i32, i32) {
    %c0_i32 = arith.constant 0 : i32
    %c0_i32_0 = arith.constant 0 : i32
    %c0_i32_1 = arith.constant 0 : i32
    return %c0_i32, %c0_i32_0 : i32, i32
  }
  func.func @transform_2(%arg0: i32) -> (i32, i32) {
    %c0_i32 = arith.constant 0 : i32
    %c0_i32_0 = arith.constant 0 : i32
    %c0_i32_1 = arith.constant 0 : i32
    return %c0_i32, %c0_i32_0 : i32, i32
  }
  func.func @transform_3(%arg0: i32) -> (i32, i32) {
    %c0_i32 = arith.constant 0 : i32
    %c0_i32_0 = arith.constant 0 : i32
    %c0_i32_1 = arith.constant 0 : i32
    return %c0_i32, %c0_i32_0 : i32, i32
  }
  func.func @transform_4(%arg0: i32) -> (i32, i32) {
    %c0_i32 = arith.constant 0 : i32
    %c0_i32_0 = arith.constant 0 : i32
    return %arg0, %c0_i32 : i32, i32
  }
  func.func @transform_5(%arg0: i32) -> (i32, i32, i32) {
    %c0_i32 = arith.constant 0 : i32
    %c0_i32_0 = arith.constant 0 : i32
    %c0_i32_1 = arith.constant 0 : i32
    return %arg0, %c0_i32, %c0_i32_0 : i32, i32, i32
  }
}

module attributes {stable_mosaic.version = 11 : i64} {
  func.func @_bn_relu_kernel(%arg0: i32, %arg1: memref<256x128xf32, #tpu.memory_space<vmem>>, %arg2: memref<1x128xf32, #tpu.memory_space<vmem>>, %arg3: memref<1x128xf32, #tpu.memory_space<vmem>>, %arg4: memref<256x128xf32, #tpu.memory_space<vmem>>) attributes {dimension_semantics = [#tpu.dimension_semantics<parallel>], iteration_bounds = array<i64: 2>, scalar_prefetch = 0 : i64, scratch_operands = 0 : i64, tpu.core_type = #tpu.core_type<tc>, window_params = [{transform_indices = @transform_0, window_bounds = array<i64: 256, 128>}, {pipeline_mode = #tpu.pipeline_mode<synchronous>, transform_indices = @transform_1, window_bounds = array<i64: 1, 128>}, {pipeline_mode = #tpu.pipeline_mode<synchronous>, transform_indices = @transform_2, window_bounds = array<i64: 1, 128>}, {transform_indices = @transform_3, window_bounds = array<i64: 256, 128>}]} {
    %c0 = arith.constant 0 : index
    %c0_0 = arith.constant 0 : index
    %0 = vector.load %arg1[%c0, %c0_0] : memref<256x128xf32, #tpu.memory_space<vmem>>, vector<256x128xf32>
    %c0_1 = arith.constant 0 : index
    %c0_2 = arith.constant 0 : index
    %1 = vector.load %arg2[%c0_1, %c0_2] : memref<1x128xf32, #tpu.memory_space<vmem>>, vector<1x128xf32>
    %2 = vector.broadcast %1 : vector<1x128xf32> to vector<256x128xf32>
    %3 = arith.mulf %0, %2 : vector<256x128xf32>
    %c0_3 = arith.constant 0 : index
    %c0_4 = arith.constant 0 : index
    %4 = vector.load %arg3[%c0_3, %c0_4] : memref<1x128xf32, #tpu.memory_space<vmem>>, vector<1x128xf32>
    %5 = vector.broadcast %4 : vector<1x128xf32> to vector<256x128xf32>
    %6 = arith.addf %3, %5 : vector<256x128xf32>
    %cst = arith.constant 0.000000e+00 : f32
    %7 = vector.broadcast %cst : f32 to vector<256x128xf32>
    %8 = arith.maximumf %6, %7 : vector<256x128xf32>
    %c0_5 = arith.constant 0 : index
    %c0_6 = arith.constant 0 : index
    %9 = vector.load %arg4[%c0_5, %c0_6] : memref<256x128xf32, #tpu.memory_space<vmem>>, vector<256x128xf32>
    tpu.vector_store %arg4[%c0_5, %c0_6], %8 {strides = array<i32>} : memref<256x128xf32, #tpu.memory_space<vmem>>, vector<256x128xf32>,
    return
  }
  func.func @transform_0(%arg0: i32) -> (i32, i32) {
    %c0_i32 = arith.constant 0 : i32
    %c0_i32_0 = arith.constant 0 : i32
    return %arg0, %c0_i32 : i32, i32
  }
  func.func @transform_1(%arg0: i32) -> (i32, i32) {
    %c0_i32 = arith.constant 0 : i32
    %c0_i32_0 = arith.constant 0 : i32
    %c0_i32_1 = arith.constant 0 : i32
    return %c0_i32, %c0_i32_0 : i32, i32
  }
  func.func @transform_2(%arg0: i32) -> (i32, i32) {
    %c0_i32 = arith.constant 0 : i32
    %c0_i32_0 = arith.constant 0 : i32
    %c0_i32_1 = arith.constant 0 : i32
    return %c0_i32, %c0_i32_0 : i32, i32
  }
  func.func @transform_3(%arg0: i32) -> (i32, i32) {
    %c0_i32 = arith.constant 0 : i32
    %c0_i32_0 = arith.constant 0 : i32
    return %arg0, %c0_i32 : i32, i32
  }
}

</mosaic_0001>

<bundles_post_ra>
// kernel: down_block_forward.5
= control target key start
LH: loop header
LB: loop body
LE: loop exit
PB: predicated region body
PF: predicated region fallthrough
CT: control target
= control target key end

     0   :  { %s453_s12 = smov 0   ;;  %s612_s0 = inlined_call_operand.vmem [shape: f32[512,128], index: 0, kind: input, shape index: {}]   ;;  %s613_s1 = inlined_call_operand.vmem [shape: f32[1,128], index: 1, kind: input, shape index: {}]   ;;  %s614_s2 = inlined_call_operand.vmem [shape: f32[1,128], index: 2, kind: input, shape index: {}]   ;;  %s615_s3 = inlined_call_operand.vmem [shape: f32[512,128], index: 3, kind: output, shape index: {}]  }
   0x1 LB: > { %s404_s13 = sadd.s32 4294967295, %s431_s12   ;;  %p408_p0 = scmp.ge.s32.totalorder %s431_s12, 1  ;;  %s431_s12 = sphi %s453_s12, %s13_s12  }
   0x2   : > { %p138_p1 = scmp.lt.s32.totalorder %s431_s12, 3 }
   0x4   : > { %p139_p2 = pnand %p408_p0, %p138_p1 }
   0x5   : > { %s409_s14 = sshll.u32 (!%p139_p2), %s404_s13, 5 }
   0x6   : > { %142 = sbr.rel (%p139_p2) target bundleno = 44 (0x2c), region = 32  ;;  %p163_p3 = scmp.lt.s32.totalorder (!%p139_p2), %s409_s14, 63 }
   0xb   : > { %s617_s14 = smov (!%p163_p3, %s409_s14), 63  ;;  %v464_v0 = vld [vmem:[%s613_s1] ss:$0 sm:$0xff] }
   0xc   : > { %s410_s15 = sshll.u32 %s617_s14, 3  ;;  %v474_v1 = vld [vmem:[%s614_s2] ss:$0 sm:$0xff] }
   0xd   : > { %s469_s20 = scalar_lea.vmem %s612_s0, %s410_s15  ;;  %s497_s25 = scalar_lea.vmem %s615_s3, %s410_s15 }
   0xe   : > { %v174_v2 = vld [vmem:[%s469_s20] sm:$0xff]  ;;  %v175_v3 = vld [vmem:[%s469_s20 + $0x8] sm:$0xff]  ;;  %v176_v4 = vld [vmem:[%s469_s20 + $0x10] sm:$0xff] }
   0xf   : > { %v213_v5 = vmul.f32 %v464_v0, %v174_v2  ;;  %v214_v6 = vmul.f32 %v464_v0, %v175_v3  ;;  %v215_v7 = vmul.f32 %v464_v0, %v176_v4  ;;  %v177_v8 = vld [vmem:[%s469_s20 + $0x18] sm:$0xff]  ;;  %v178_v9 = vld [vmem:[%s469_s20 + $0x20] sm:$0xff]  ;;  %v179_v10 = vld [vmem:[%s469_s20 + $0x28] sm:$0xff] }
  0x10   : > { %v216_v11 = vmul.f32 %v464_v0, %v177_v8  ;;  %v217_v12 = vmul.f32 %v464_v0, %v178_v9  ;;  %v218_v13 = vmul.f32 %v464_v0, %v179_v10  ;;  %v180_v14 = vld [vmem:[%s469_s20 + $0x30] sm:$0xff]  ;;  %v181_v15 = vld [vmem:[%s469_s20 + $0x38] sm:$0xff]  ;;  %v182_v24 = vld [vmem:[%s469_s20 + $0x40] sm:$0xff] }
  0x11   : > { %v252_v16 = vadd.f32 %v474_v1, %v213_v5  ;;  %v253_v17 = vadd.f32 %v474_v1, %v214_v6  ;;  %v254_v18 = vadd.f32 %v474_v1, %v215_v7  ;;  %v219_v19 = vmul.f32 %v464_v0, %v180_v14  ;;  %v183_v25 = vld [vmem:[%s469_s20 + $0x48] sm:$0xff]  ;;  %v184_v26 = vld [vmem:[%s469_s20 + $0x50] sm:$0xff]  ;;  %v185_v31 = vld [vmem:[%s469_s20 + $0x58] sm:$0xff] }
  0x12   : > { %v255_v20 = vadd.f32 %v474_v1, %v216_v11  ;;  %v256_v21 = vadd.f32 %v474_v1, %v217_v12  ;;  %v257_v22 = vadd.f32 %v474_v1, %v218_v13  ;;  %v220_v23 = vmul.f32 %v464_v0, %v181_v15  ;;  %v186_v32 = vld [vmem:[%s469_s20 + $0x60] sm:$0xff]  ;;  %v187_v33 = vld [vmem:[%s469_s20 + $0x68] sm:$0xff]  ;;  %v188_v38 = vld [vmem:[%s469_s20 + $0x70] sm:$0xff] }
  0x13   : > { %v284_v27 = vmax.f32 %v252_v16, 0.0  ;;  %v285_v28 = vmax.f32 %v253_v17, 0.0  ;;  %v286_v29 = vmax.f32 %v254_v18, 0.0  ;;  %v258_v30 = vadd.f32 %v474_v1, %v219_v19  ;;  %v189_v43 = vld [vmem:[%s469_s20 + $0x78] sm:$0xff]  ;;  %v190_v56 = vld [vmem:[%s469_s20 + $0x80] sm:$0xff]  ;;  %v191_v57 = vld [vmem:[%s469_s20 + $0x88] sm:$0xff] }
  0x14   : > { %v287_v34 = vmax.f32 %v255_v20, 0.0  ;;  %v288_v35 = vmax.f32 %v256_v21, 0.0  ;;  %v289_v36 = vmax.f32 %v257_v22, 0.0  ;;  %v259_v37 = vadd.f32 %v474_v1, %v220_v23  ;;  %v192_v58 = vld [vmem:[%s469_s20 + $0x90] sm:$0xff]  ;;  %v193_v63 = vld [vmem:[%s469_s20 + $0x98] sm:$0xff]  ;;  %v194_v2 = vld [vmem:[%s469_s20 + $0xa0] sm:$0xff] }
  0x15   : > { %316 = vst [vmem:[%s497_s25] sm:$0xff] %v284_v27  ;;  %317 = vst [vmem:[%s497_s25 + $0x8] sm:$0xff] %v285_v28  ;;  %v290_v39 = vmax.f32 %v258_v30, 0.0  ;;  %v221_v40 = vmul.f32 %v464_v0, %v182_v24  ;;  %v222_v41 = vmul.f32 %v464_v0, %v183_v25  ;;  %v223_v42 = vmul.f32 %v464_v0, %v184_v26  ;;  %v195_v3 = vld [vmem:[%s469_s20 + $0xa8] sm:$0xff]  ;;  %v196_v8 = vld [vmem:[%s469_s20 + $0xb0] sm:$0xff] }
  0x16   : > { %318 = vst [vmem:[%s497_s25 + $0x10] sm:$0xff] %v286_v29  ;;  %319 = vst [vmem:[%s497_s25 + $0x18] sm:$0xff] %v287_v34  ;;  %v291_v44 = vmax.f32 %v259_v37, 0.0  ;;  %v224_v45 = vmul.f32 %v464_v0, %v185_v31  ;;  %v225_v46 = vmul.f32 %v464_v0, %v186_v32  ;;  %v226_v47 = vmul.f32 %v464_v0, %v187_v33  ;;  %v197_v13 = vld [vmem:[%s469_s20 + $0xb8] sm:$0xff]  ;;  %v198_v26 = vld [vmem:[%s469_s20 + $0xc0] sm:$0xff] }
  0x17   : > { %320 = vst [vmem:[%s497_s25 + $0x20] sm:$0xff] %v288_v35  ;;  %321 = vst [vmem:[%s497_s25 + $0x28] sm:$0xff] %v289_v36  ;;  %v260_v48 = vadd.f32 %v474_v1, %v221_v40  ;;  %v261_v49 = vadd.f32 %v474_v1, %v222_v41  ;;  %v262_v50 = vadd.f32 %v474_v1, %v223_v42  ;;  %v199_v27 = vld [vmem:[%s469_s20 + $0xc8] sm:$0xff]  ;;  %v200_v28 = vld [vmem:[%s469_s20 + $0xd0] sm:$0xff] }
  0x18   : > { %322 = vst [vmem:[%s497_s25 + $0x30] sm:$0xff] %v290_v39  ;;  %v227_v51 = vmul.f32 %v464_v0, %v188_v38  ;;  %323 = vst [vmem:[%s497_s25 + $0x38] sm:$0xff] %v291_v44  ;;  %v263_v52 = vadd.f32 %v474_v1, %v224_v45  ;;  %v264_v53 = vadd.f32 %v474_v1, %v225_v46  ;;  %v201_v33 = vld [vmem:[%s469_s20 + $0xd8] sm:$0xff]  ;;  %v202_v34 = vld [vmem:[%s469_s20 + $0xe0] sm:$0xff] }
  0x19   : > { %v265_v54 = vadd.f32 %v474_v1, %v226_v47  ;;  %v228_v55 = vmul.f32 %v464_v0, %v189_v43  ;;  %v292_v59 = vmax.f32 %v260_v48, 0.0  ;;  %v293_v60 = vmax.f32 %v261_v49, 0.0  ;;  %v203_v35 = vld [vmem:[%s469_s20 + $0xe8] sm:$0xff]  ;;  %v204_v40 = vld [vmem:[%s469_s20 + $0xf0] sm:$0xff]  ;;  %v205_v45 = vld [vmem:[%s469_s20 + $0xf8] sm:$0xff] }
  0x1a   : > { %v294_v61 = vmax.f32 %v262_v50, 0.0  ;;  %v266_v62 = vadd.f32 %v474_v1, %v227_v51  ;;  %v295_v4 = vmax.f32 %v263_v52, 0.0  ;;  %v296_v5 = vmax.f32 %v264_v53, 0.0 }
  0x1b   : > { %v297_v6 = vmax.f32 %v265_v54, 0.0  ;;  %v267_v7 = vadd.f32 %v474_v1, %v228_v55  ;;  %324 = vst [vmem:[%s497_s25 + $0x40] sm:$0xff] %v292_v59  ;;  %325 = vst [vmem:[%s497_s25 + $0x48] sm:$0xff] %v293_v60  ;;  %v229_v10 = vmul.f32 %v464_v0, %v190_v56  ;;  %v230_v11 = vmul.f32 %v464_v0, %v191_v57 }
  0x1c   : > { %326 = vst [vmem:[%s497_s25 + $0x50] sm:$0xff] %v294_v61  ;;  %v298_v9 = vmax.f32 %v266_v62, 0.0  ;;  %v231_v12 = vmul.f32 %v464_v0, %v192_v58  ;;  %327 = vst [vmem:[%s497_s25 + $0x58] sm:$0xff] %v295_v4  ;;  %v232_v15 = vmul.f32 %v464_v0, %v193_v63  ;;  %v233_v16 = vmul.f32 %v464_v0, %v194_v2 }
  0x1d   : > { %328 = vst [vmem:[%s497_s25 + $0x60] sm:$0xff] %v296_v5  ;;  %329 = vst [vmem:[%s497_s25 + $0x68] sm:$0xff] %v297_v6  ;;  %v299_v14 = vmax.f32 %v267_v7, 0.0  ;;  %v234_v17 = vmul.f32 %v464_v0, %v195_v3  ;;  %v268_v18 = vadd.f32 %v474_v1, %v229_v10  ;;  %v269_v19 = vadd.f32 %v474_v1, %v230_v11 }
  0x1e   : > { %330 = vst [vmem:[%s497_s25 + $0x70] sm:$0xff] %v298_v9  ;;  %v270_v20 = vadd.f32 %v474_v1, %v231_v12  ;;  %v235_v21 = vmul.f32 %v464_v0, %v196_v8  ;;  %v271_v22 = vadd.f32 %v474_v1, %v232_v15  ;;  %v272_v23 = vadd.f32 %v474_v1, %v233_v16 }
  0x1f   : > { %331 = vst [vmem:[%s497_s25 + $0x78] sm:$0xff] %v299_v14  ;;  %v273_v24 = vadd.f32 %v474_v1, %v234_v17  ;;  %v236_v25 = vmul.f32 %v464_v0, %v197_v13  ;;  %v300_v29 = vmax.f32 %v268_v18, 0.0  ;;  %v301_v30 = vmax.f32 %v269_v19, 0.0 }
  0x20   : > { %v302_v31 = vmax.f32 %v270_v20, 0.0  ;;  %v274_v32 = vadd.f32 %v474_v1, %v235_v21  ;;  %v303_v36 = vmax.f32 %v271_v22, 0.0  ;;  %v304_v37 = vmax.f32 %v272_v23, 0.0 }
  0x21   : > { %v305_v38 = vmax.f32 %v273_v24, 0.0  ;;  %v275_v39 = vadd.f32 %v474_v1, %v236_v25  ;;  %332 = vst [vmem:[%s497_s25 + $0x80] sm:$0xff] %v300_v29  ;;  %333 = vst [vmem:[%s497_s25 + $0x88] sm:$0xff] %v301_v30  ;;  %v237_v42 = vmul.f32 %v464_v0, %v198_v26  ;;  %v238_v43 = vmul.f32 %v464_v0, %v199_v27 }
  0x22   : > { %334 = vst [vmem:[%s497_s25 + $0x90] sm:$0xff] %v302_v31  ;;  %v306_v41 = vmax.f32 %v274_v32, 0.0  ;;  %v239_v44 = vmul.f32 %v464_v0, %v200_v28  ;;  %335 = vst [vmem:[%s497_s25 + $0x98] sm:$0xff] %v303_v36  ;;  %v240_v47 = vmul.f32 %v464_v0, %v201_v33  ;;  %v241_v48 = vmul.f32 %v464_v0, %v202_v34 }
  0x23   : > { %336 = vst [vmem:[%s497_s25 + $0xa0] sm:$0xff] %v304_v37  ;;  %337 = vst [vmem:[%s497_s25 + $0xa8] sm:$0xff] %v305_v38  ;;  %v307_v46 = vmax.f32 %v275_v39, 0.0  ;;  %v242_v49 = vmul.f32 %v464_v0, %v203_v35  ;;  %v276_v50 = vadd.f32 %v474_v1, %v237_v42  ;;  %v277_v51 = vadd.f32 %v474_v1, %v238_v43 }
  0x24   : > { %338 = vst [vmem:[%s497_s25 + $0xb0] sm:$0xff] %v306_v41  ;;  %v278_v52 = vadd.f32 %v474_v1, %v239_v44  ;;  %v243_v53 = vmul.f32 %v464_v0, %v204_v40  ;;  %v279_v54 = vadd.f32 %v474_v1, %v240_v47  ;;  %v280_v55 = vadd.f32 %v474_v1, %v241_v48 }
  0x25   : > { %339 = vst [vmem:[%s497_s25 + $0xb8] sm:$0xff] %v307_v46  ;;  %v281_v56 = vadd.f32 %v474_v1, %v242_v49  ;;  %v244_v57 = vmul.f32 %v464_v0, %v205_v45  ;;  %v308_v58 = vmax.f32 %v276_v50, 0.0  ;;  %v309_v59 = vmax.f32 %v277_v51, 0.0 }
  0x26   : > { %v310_v60 = vmax.f32 %v278_v52, 0.0  ;;  %v282_v61 = vadd.f32 %v474_v1, %v243_v53  ;;  %v311_v62 = vmax.f32 %v279_v54, 0.0  ;;  %v312_v63 = vmax.f32 %v280_v55, 0.0 }
  0x27   : > { %v313_v2 = vmax.f32 %v281_v56, 0.0  ;;  %v283_v3 = vadd.f32 %v474_v1, %v244_v57  ;;  %340 = vst [vmem:[%s497_s25 + $0xc0] sm:$0xff] %v308_v58  ;;  %341 = vst [vmem:[%s497_s25 + $0xc8] sm:$0xff] %v309_v59 }
  0x28   : > { %342 = vst [vmem:[%s497_s25 + $0xd0] sm:$0xff] %v310_v60  ;;  %v314_v4 = vmax.f32 %v282_v61, 0.0  ;;  %343 = vst [vmem:[%s497_s25 + $0xd8] sm:$0xff] %v311_v62 }
  0x29   : > { %344 = vst [vmem:[%s497_s25 + $0xe0] sm:$0xff] %v312_v63  ;;  %345 = vst [vmem:[%s497_s25 + $0xe8] sm:$0xff] %v313_v2  ;;  %v315_v0 = vmax.f32 %v283_v3, 0.0 }
  0x2a   : > { %346 = vst [vmem:[%s497_s25 + $0xf0] sm:$0xff] %v314_v4 }
  0x2b   : > { %347 = vst [vmem:[%s497_s25 + $0xf8] sm:$0xff] %v315_v0 }
  0x2c PF: > { %s13_s12 = sadd.s32 1, %s431_s12  }
  0x2d   : > { %p10_p4 = scmp.ge.s32.totalorder %s13_s12, 4  }
  0x2f   :  { %12 = sbr.rel (!%p10_p4) target bundleno = 1 (0x1), region = 62 }

// kernel: down_block_forward.3
= control target key start
LH: loop header
LB: loop body
LE: loop exit
PB: predicated region body
PF: predicated region fallthrough
CT: control target
= control target key end

     0   :  { %s3828_s12 = smov 0   ;;  %s5358_s0 = inlined_call_operand.vmem [shape: f32[512,8], index: 0, kind: input, shape index: {}]   ;;  %s5359_s1 = inlined_call_operand.vmem [shape: bf16[72,128], index: 1, kind: input, shape index: {}]   ;;  %s5360_s2 = inlined_call_operand.vmem [shape: bf16[512,128], index: 2, kind: output, shape index: {0}]   ;;  %s5361_s3 = inlined_call_operand.vmem [shape: f32[2,2,128], index: 3, kind: output, shape index: {1}]  }
   0x1 LB: > { %s3834_s13 = sadd.s32 4294967295, %s3797_s12   ;;  %p3392_p0 = scmp.ge.s32.totalorder %s3797_s12, 1  ;;  %s3797_s12 = sphi %s3828_s12, %s14_s12  }
   0x2   : > { %p141_p1 = scmp.lt.s32.totalorder %s3797_s12, 3 }
   0x4   : > { %p142_p2 = pnand %p3392_p0, %p141_p1 }
   0x5   : > { %s3393_s14 = sshll.u32 (!%p142_p2), %s3834_s13, 5  ;;  %s3800_s20 = smov (!%p142_p2), 24  }
   0x6   : > { %145 = sbr.rel (%p142_p2) target bundleno = 900 (0x384), region = 28  ;;  %p3841_p3 = scmp.lt.s32.totalorder (!%p142_p2), %s3393_s14, 63 }
   0x7   : > { %s3801_s21 = smov (!%p142_p2), 48   ;;  %s3802_s22 = smov (!%p142_p2), 8  }
   0x8   : > { %s3803_s23 = smov (!%p142_p2), 32   ;;  %s3804_s24 = smov (!%p142_p2), 56  }
   0x9   : > { %s3805_s29 = smov (!%p142_p2), 16   ;;  %s3806_s7 = smov (!%p142_p2), 40  }
   0xa   : > { %s3807_s10 = smov (!%p142_p2), 64   ;;  %p181_p4 = scmp.lt.s32.totalorder (!%p142_p2), %s3834_s13, 1 }
   0xb   : > { %vm218_vm0 = vcmask 60416   ;;  %v3799_v0 = vmov 0   ;;  %vm221_vm1 = vcmask 57344   ;;  %s5374_s14 = smov (!%p3841_p3, %s3393_s14), 63  ;;  %vm695_vm2 = vsmask.f32 7938 }
   0xc   : > { %226 = vst.msk [vmem:[#allocation2 + $0x18] sm:$0xf] %vm218_vm0, %v3799_v0  ;;  %219 = vst.msk [vmem:[#allocation2] sm:$0xf] %vm218_vm0, %v3799_v0  ;;  %s3394_s16 = sshll.u32 %s5374_s14, 3  ;;  %vm1007_vm8 = vcmask 257216  }
   0xd   : > { %220 = vst.msk [vmem:[#allocation2 + $0x4] sm:$0xf] %vm218_vm0, %v3799_v0  ;;  %223 = vst.msk [vmem:[#allocation2 + $0xc] sm:$0xf] %vm218_vm0, %v3799_v0  ;;  %s3909_s19 = scalar_lea.vmem %s5358_s0, %s3394_s16  ;;  %vm370_vm3 = vsmask.f32 256 }
   0xe   : > { %224 = vst.msk [vmem:[#allocation2 + $0x10] sm:$0xf] %vm218_vm0, %v3799_v0  ;;  %227 = vst.msk [vmem:[#allocation2 + $0x1c] sm:$0xf] %vm218_vm0, %v3799_v0  ;;  %v188_v1 = vld [vmem:[%s3909_s19 + $0x10] sm:$0xff]  ;;  %v186_v2 = vld [vmem:[%s3909_s19] sm:$0xff] }
   0xf   : > { %229 = vst.msk [vmem:[#allocation2 + $0x24] sm:$0xf] %vm218_vm0, %v3799_v0  ;;  %230 = vst.msk [vmem:[#allocation2 + $0x28] sm:$0xf] %vm218_vm0, %v3799_v0  ;;  %v189_v3 = vld [vmem:[%s3909_s19 + $0x18] sm:$0xff]  ;;  %v3521_v4 = vpack.c.bf16 %v188_v1, %v188_v1  ;;  %v3519_v5 = vpack.c.bf16 %v186_v2, %v186_v2  ;;  %v187_v7 = vld [vmem:[%s3909_s19 + $0x8] sm:$0xff] }
  0x10   : > { %232 = vst.msk [vmem:[#allocation2 + $0x30] sm:$0xf] %vm218_vm0, %v3799_v0  ;;  %233 = vst.msk [vmem:[#allocation2 + $0x34] sm:$0xf] %vm218_vm0, %v3799_v0  ;;  %v3522_v6 = vpack.c.bf16 %v189_v3, %v189_v3  ;;  %vm371_vm4 = vsmask.f32 4368  ;;  %v3520_v8 = vpack.c.bf16 %v187_v7, %v187_v7 }
  0x11   : > { %235 = vst.msk [vmem:[#allocation2 + $0x3c] sm:$0xf] %vm218_vm0, %v3799_v0  ;;  %236 = vst.msk [vmem:[#allocation2 + $0x40] sm:$0xf] %vm218_vm0, %v3799_v0  ;;  %v190_v9 = vld [vmem:[%s3909_s19 + $0x20] sm:$0xff]  ;;  %v191_v10 = vld [vmem:[%s3909_s19 + $0x28] sm:$0xff] }
  0x12   : > { %238 = vst.msk [vmem:[#allocation2 + $0x48] sm:$0xf] %vm218_vm0, %v3799_v0  ;;  %239 = vst.msk [vmem:[#allocation2 + $0x4c] sm:$0xf] %vm218_vm0, %v3799_v0  ;;  %v391_v11 = vshrl.u32 %v3521_v4, 16  ;;  %v394_v12 = vshll.u32 %v3521_v4, 16  ;;  %v3523_v23 = vpack.c.bf16 %v190_v9, %v190_v9  ;;  %v3524_v24 = vpack.c.bf16 %v191_v10, %v191_v10 }
  0x13   : > { %241 = vst.msk [vmem:[#allocation2 + $0x54] sm:$0xf] %vm218_vm0, %v3799_v0  ;;  %242 = vst.msk [vmem:[#allocation2 + $0x58] sm:$0xf] %vm218_vm0, %v3799_v0  ;;  %v374_v13 = vshrl.u32 %v3519_v5, 16  ;;  %v377_v14 = vshll.u32 %v3519_v5, 16 }
  0x14   : > { %244 = vst.msk [vmem:[#allocation2 + $0x60] sm:$0xf] %vm218_vm0, %v3799_v0  ;;  %245 = vst.msk [vmem:[#allocation2 + $0x64] sm:$0xf] %vm218_vm0, %v3799_v0  ;;  %v192_v15 = vld [vmem:[%s3909_s19 + $0x30] sm:$0xff]  ;;  %v193_v16 = vld [vmem:[%s3909_s19 + $0x38] sm:$0xff] }
  0x15   : > { %247 = vst.msk [vmem:[#allocation2 + $0x6c] sm:$0xf] %vm218_vm0, %v3799_v0  ;;  %248 = vst.msk [vmem:[#allocation2 + $0x70] sm:$0xf] %vm218_vm0, %v3799_v0  ;;  %v399_v17 = vshrl.u32 %v3522_v6, 16  ;;  %v402_v18 = vshll.u32 %v3522_v6, 16  ;;  %v3525_v30 = vpack.c.bf16 %v192_v15, %v192_v15  ;;  %v3526_v31 = vpack.c.bf16 %v193_v16, %v193_v16 }
  0x16   : > { %250 = vst.msk [vmem:[#allocation2 + $0x78] sm:$0xf] %vm218_vm0, %v3799_v0  ;;  %251 = vst.msk [vmem:[#allocation2 + $0x7c] sm:$0xf] %vm218_vm0, %v3799_v0  ;;  %v382_v19 = vshrl.u32 %v3520_v8, 16  ;;  %v385_v20 = vshll.u32 %v3520_v8, 16 }
  0x17   : > { %253 = vst.msk [vmem:[#allocation2 + $0x84] sm:$0xf] %vm218_vm0, %v3799_v0  ;;  %254 = vst.msk [vmem:[#allocation2 + $0x88] sm:$0xf] %vm218_vm0, %v3799_v0  ;;  %v393_v21 = vrot.slane %v391_v11, 7  ;;  %v376_v22 = vrot.slane %v374_v13, 7 }
  0x18   : > { %256 = vst.msk [vmem:[#allocation2 + $0x90] sm:$0xf] %vm218_vm0, %v3799_v0  ;;  %257 = vst.msk [vmem:[#allocation2 + $0x94] sm:$0xf] %vm218_vm0, %v3799_v0  ;;  %v706_v26 = vld [vmem:[#allocation2 + $0x18] sm:$0xf] }
  0x19   : > { %259 = vst.msk [vmem:[#allocation2 + $0x9c] sm:$0xf] %vm218_vm0, %v3799_v0  ;;  %260 = vst.msk [vmem:[#allocation2 + $0xa0] sm:$0xf] %vm218_vm0, %v3799_v0  ;;  %v697_v27 = vld [vmem:[#allocation2 + $0xc] sm:$0xf]  ;;  %v396_v32 = vor.u32 %v394_v12, %v393_v21  ;;  %v379_v33 = vor.u32 %v377_v14, %v376_v22 }
  0x1a   : > { %262 = vst.msk [vmem:[#allocation2 + $0xa8] sm:$0xf] %vm218_vm0, %v3799_v0  ;;  %263 = vst.msk [vmem:[#allocation2 + $0xac] sm:$0xf] %vm218_vm0, %v3799_v0  ;;  %v3925_v28 = vrot.slane %v399_v17, 7  ;;  %v3927_v29 = vrot.slane %v382_v19, 7 }
  0x1b   : > { %265 = vst.msk [vmem:[#allocation2 + $0xb4] sm:$0xf] %vm218_vm0, %v3799_v0  ;;  %266 = vst.msk [vmem:[#allocation2 + $0xb8] sm:$0xf] %vm218_vm0, %v3799_v0  ;;  %v397_v35 = vrot.slane %v393_v21, 4  ;;  %v380_v36 = vrot.slane %v376_v22, 4 }
  0x1c   : > { %268 = vst.msk [vmem:[#allocation2 + $0xc0] sm:$0xf] %vm218_vm0, %v3799_v0  ;;  %269 = vst.msk [vmem:[#allocation2 + $0xc4] sm:$0xf] %vm218_vm0, %v3799_v0  ;;  %v404_v37 = vor.u32 %v402_v18, %v3925_v28  ;;  %v387_v38 = vor.u32 %v385_v20, %v3927_v29  ;;  %v408_v41 = vshrl.u32 %v3523_v23, 16  ;;  %v416_v42 = vshrl.u32 %v3524_v24, 16 }
  0x1d   : > { %271 = vst.msk [vmem:[#allocation2 + $0xcc] sm:$0xf] %vm218_vm0, %v3799_v0  ;;  %272 = vst.msk [vmem:[#allocation2 + $0xd0] sm:$0xf] %vm218_vm0, %v3799_v0  ;;  %v194_v43 = vld [vmem:[%s3909_s19 + $0x40] sm:$0xff]  ;;  %v195_v44 = vld [vmem:[%s3909_s19 + $0x48] sm:$0xff] }
  0x1e   : > { %222 = vst.msk [vmem:[#allocation2 + $0x8] sm:$0x1] %vm221_vm1, %v3799_v0  ;;  %225 = vst.msk [vmem:[#allocation2 + $0x14] sm:$0x1] %vm221_vm1, %v3799_v0  ;;  %v419_v47 = vshll.u32 %v3524_v24, 16  ;;  %v411_v48 = vshll.u32 %v3523_v23, 16  ;;  %v3527_v56 = vpack.c.bf16 %v194_v43, %v194_v43  ;;  %v3528_v57 = vpack.c.bf16 %v195_v44, %v195_v44 }
  0x1f   : > { %228 = vst.msk [vmem:[#allocation2 + $0x20] sm:$0x1] %vm221_vm1, %v3799_v0  ;;  %231 = vst.msk [vmem:[#allocation2 + $0x2c] sm:$0x1] %vm221_vm1, %v3799_v0  ;;  %v410_v49 = vrot.slane %v408_v41, 7  ;;  %v3949_v50 = vrot.slane %v416_v42, 7 }
  0x20   : > { %234 = vst.msk [vmem:[#allocation2 + $0x38] sm:$0x1] %vm221_vm1, %v3799_v0  ;;  %237 = vst.msk [vmem:[#allocation2 + $0x44] sm:$0x1] %vm221_vm1, %v3799_v0  ;;  %v425_v51 = vshrl.u32 %v3525_v30, 16  ;;  %v433_v52 = vshrl.u32 %v3526_v31, 16 }
  0x21   : > { %240 = vst.msk [vmem:[#allocation2 + $0x50] sm:$0x1] %vm221_vm1, %v3799_v0  ;;  %243 = vst.msk [vmem:[#allocation2 + $0x5c] sm:$0x1] %vm221_vm1, %v3799_v0  ;;  %v713_v53 = vld [vmem:[#allocation2 + $0x24] sm:$0xf]  ;;  %v421_v59 = vor.u32 %v419_v47, %v3949_v50  ;;  %v413_v60 = vor.u32 %v411_v48, %v410_v49 }
  0x22   : > { %246 = vst.msk [vmem:[#allocation2 + $0x68] sm:$0x1] %vm221_vm1, %v3799_v0  ;;  %249 = vst.msk [vmem:[#allocation2 + $0x74] sm:$0x1] %vm221_vm1, %v3799_v0  ;;  %v436_v54 = vshll.u32 %v3526_v31, 16  ;;  %v428_v55 = vshll.u32 %v3525_v30, 16 }
  0x23   : > { %252 = vst.msk [vmem:[#allocation2 + $0x80] sm:$0x1] %vm221_vm1, %v3799_v0  ;;  %255 = vst.msk [vmem:[#allocation2 + $0x8c] sm:$0x1] %vm221_vm1, %v3799_v0  ;;  %v414_v58 = vrot.slane %v410_v49, 4  ;;  %v427_v61 = vrot.slane %v425_v51, 7 }
  0x24   : > { %258 = vst.msk [vmem:[#allocation2 + $0x98] sm:$0x1] %vm221_vm1, %v3799_v0  ;;  %261 = vst.msk [vmem:[#allocation2 + $0xa4] sm:$0x1] %vm221_vm1, %v3799_v0  ;;  %v3952_v62 = vrot.slane %v433_v52, 7  ;;  %v442_v63 = vshrl.u32 %v3527_v56, 16 }
  0x25   : > { %264 = vst.msk [vmem:[#allocation2 + $0xb0] sm:$0x1] %vm221_vm1, %v3799_v0  ;;  %267 = vst.msk [vmem:[#allocation2 + $0xbc] sm:$0x1] %vm221_vm1, %v3799_v0  ;;  %v196_v1 = vld [vmem:[%s3909_s19 + $0x50] sm:$0xff]  ;;  %v197_v2 = vld [vmem:[%s3909_s19 + $0x58] sm:$0xff]  ;;  %v430_v11 = vor.u32 %v428_v55, %v427_v61 }
  0x26   : > { %270 = vst.msk [vmem:[#allocation2 + $0xc8] sm:$0x1] %vm221_vm1, %v3799_v0  ;;  %273 = vst.msk [vmem:[#allocation2 + $0xd4] sm:$0x1] %vm221_vm1, %v3799_v0  ;;  %v450_v0 = vshrl.u32 %v3528_v57, 16  ;;  %v453_v6 = vshll.u32 %v3528_v57, 16  ;;  %v438_v10 = vor.u32 %v436_v54, %v3952_v62  ;;  %v3529_v17 = vpack.c.bf16 %v196_v1, %v196_v1 }
  0x27   : > { %vm3921_vm5 = vmand %vm218_vm0, %vm695_vm2  ;;  %v720_v5 = vld [vmem:[#allocation2 + $0x30] sm:$0xf]  ;;  %v445_v7 = vshll.u32 %v3527_v56, 16  ;;  %v198_v8 = vld [vmem:[%s3909_s19 + $0x60] sm:$0xff]  ;;  %v431_v9 = vrot.slane %v427_v61, 4  ;;  %v444_v15 = vrot.slane %v442_v63, 7  ;;  %v3530_v18 = vpack.c.bf16 %v197_v2, %v197_v2 }
  0x28   : > { %vm3931_vm6 = vmor %vm370_vm3, %vm371_vm4  ;;  %v707_v39 = vsel %vm3921_vm5, %v396_v32, %v706_v26  ;;  %v698_v40 = vsel %vm3921_vm5, %v379_v33, %v697_v27  ;;  %v714_v4 = vsel %vm3921_vm5, %v413_v60, %v713_v53  ;;  %v727_v12 = vld [vmem:[#allocation2 + $0x3c] sm:$0xf]  ;;  %v3965_v16 = vrot.slane %v450_v0, 7  ;;  %v199_v23 = vld [vmem:[%s3909_s19 + $0x68] sm:$0xff]  ;;  %s3396_s11 = sshll.u32 %s5374_s14, 2  ;;  %s5376_s13 = smov (!%p181_p4, %s3834_s13), 1 }
  0x29   : > { %708 = vst [vmem:[#allocation2 + $0x18] sm:$0xf] %v707_v39  ;;  %699 = vst [vmem:[#allocation2 + $0xc] sm:$0xf] %v698_v40  ;;  %v405_v45 = vsel %vm3931_vm6, %v397_v35, %v404_v37  ;;  %v388_v46 = vsel %vm3931_vm6, %v380_v36, %v387_v38  ;;  %v422_v3 = vsel %vm3931_vm6, %v414_v58, %v421_v59  ;;  %v448_v26 = vrot.slane %v444_v15, 4  ;;  %v200_v31 = vld [vmem:[%s3909_s19 + $0x70] sm:$0xff]  ;;  %s5274_s17 = scalar_lea.vmem %s5360_s2, %s3396_s11 }
  0x2a   : > { %709 = vst.msk [vmem:[#allocation2 + $0x1c] sm:$0xf] %vm218_vm0, %v405_v45  ;;  %700 = vst.msk [vmem:[#allocation2 + $0x10] sm:$0xf] %vm218_vm0, %v388_v46  ;;  %v439_v21 = vsel %vm3931_vm6, %v431_v9, %v438_v10  ;;  %v721_v22 = vsel %vm3921_vm5, %v430_v11, %v720_v5  ;;  %v3531_v24 = vpack.c.bf16 %v198_v8, %v198_v8  ;;  %v201_v32 = vld [vmem:[%s3909_s19 + $0x78] sm:$0xff]  ;;  %v459_v33 = vshrl.u32 %v3529_v17, 16 }
  0x2b   : > { %716 = vst.msk [vmem:[#allocation2 + $0x28] sm:$0xf] %vm218_vm0, %v422_v3  ;;  %715 = vst [vmem:[#allocation2 + $0x24] sm:$0xf] %v714_v4  ;;  %v455_v27 = vor.u32 %v453_v6, %v3965_v16  ;;  %v447_v30 = vor.u32 %v445_v7, %v444_v15  ;;  %v467_v35 = vshrl.u32 %v3530_v18, 16  ;;  %v470_v36 = vshll.u32 %v3530_v18, 16 }
  0x2c   : > { %723 = vst.msk [vmem:[#allocation2 + $0x34] sm:$0xf] %vm218_vm0, %v439_v21  ;;  %722 = vst [vmem:[#allocation2 + $0x30] sm:$0xf] %v721_v22  ;;  %v462_v37 = vshll.u32 %v3529_v17, 16  ;;  %v3532_v41 = vpack.c.bf16 %v199_v23, %v199_v23  ;;  %v476_v42 = vshrl.u32 %v3531_v24, 16  ;;  %v3533_v49 = vpack.c.bf16 %v200_v31, %v200_v31 }
  0x2d   : > { %v811_v38 = vld [vmem:[#allocation2] sm:$0xf]  ;;  %v456_v39 = vsel %vm3931_vm6, %v448_v26, %v455_v27  ;;  %v728_v40 = vsel %vm3921_vm5, %v447_v30, %v727_v12  ;;  %v812_v44 = vld [vmem:[#allocation2 + $0x4] sm:$0xf]  ;;  %v461_v45 = vrot.slane %v459_v33, 7  ;;  %v3997_v46 = vrot.slane %v467_v35, 7  ;;  %vm4183_vm7 = vmand %vm221_vm1, %vm370_vm3 }
  0x2e   : > { %v202_v43 = vld [vmem:[%s3909_s19 + $0x80] sm:$0xff]  ;;  %847 = vst.msk [vmem:[#allocation3] sm:$0xf] %vm218_vm0, %v811_v38  ;;  %730 = vst.msk [vmem:[#allocation2 + $0x40] sm:$0xf] %vm218_vm0, %v456_v39  ;;  %v479_v48 = vshll.u32 %v3531_v24, 16  ;;  %v3534_v55 = vpack.c.bf16 %v201_v32, %v201_v32 }
  0x2f   : > { %729 = vst [vmem:[#allocation2 + $0x3c] sm:$0xf] %v728_v40  ;;  %v734_v47 = vld [vmem:[#allocation2 + $0x48] sm:$0xf]  ;;  %848 = vst.msk [vmem:[#allocation3 + $0x4] sm:$0xf] %vm218_vm0, %v812_v44  ;;  %v472_v57 = vor.u32 %v470_v36, %v3997_v46  ;;  %v464_v58 = vor.u32 %v462_v37, %v461_v45  ;;  %v3535_v60 = vpack.c.bf16 %v202_v43, %v202_v43 }
  0x30   : > { %v3963_v13 = vld [vmem:[#allocation2 + $0x18] sm:$0xf]  ;;  %v813_v14 = vld [vmem:[#allocation2 + $0xc] sm:$0xf]  ;;  %v478_v53 = vrot.slane %v476_v42, 7  ;;  %v484_v54 = vshrl.u32 %v3532_v41, 16 }
  0x31   : > { %915 = vrot.lane.b32.xlu1 %v3963_v13, %s3800_s20  ;;  %851 = vst.msk [vmem:[#allocation3 + $0x10] sm:$0xf] %vm218_vm0, %v3963_v13  ;;  %911 = vrot.lane.b32.xlu0 %v813_v14, %s3800_s20  ;;  %849 = vst.msk [vmem:[#allocation3 + $0x8] sm:$0xf] %vm218_vm0, %v813_v14  ;;  %v3973_v19 = vld [vmem:[#allocation2 + $0x1c] sm:$0xf]  ;;  %v735_v7 = vsel %vm3921_vm5, %v464_v58, %v734_v47 }
  0x32   : > { %v814_v20 = vld [vmem:[#allocation2 + $0x10] sm:$0xf]  ;;  %852 = vst.msk [vmem:[#allocation3 + $0x14] sm:$0xf] %vm218_vm0, %v3973_v19  ;;  %v4000_v51 = vld [vmem:[#allocation2 + $0x28] sm:$0xf]  ;;  %v481_v1 = vor.u32 %v479_v48, %v478_v53 }
  0x33   : > { %850 = vst.msk [vmem:[#allocation3 + $0xc] sm:$0xf] %vm218_vm0, %v814_v20  ;;  %v4002_v52 = vld [vmem:[#allocation2 + $0x24] sm:$0xf]  ;;  %854 = vst.msk [vmem:[#allocation3 + $0x1c] sm:$0xf] %vm218_vm0, %v4000_v51 }
  0x34   : > { %853 = vst.msk [vmem:[#allocation3 + $0x18] sm:$0xf] %vm218_vm0, %v4002_v52  ;;  %v465_v56 = vrot.slane %v461_v45, 4  ;;  %v741_v59 = vld [vmem:[#allocation2 + $0x54] sm:$0xf]  ;;  %v482_v61 = vrot.slane %v478_v53, 4 }
  0x35   : > { %917 = vrot.lane.b32.xlu1 %v3973_v19, %s3800_s20  ;;  %913 = vrot.lane.b32.xlu0 %v814_v20, %s3800_s20  ;;  %v4009_v63 = vrot.slane %v484_v54, 7  ;;  %v487_v0 = vshll.u32 %v3532_v41, 16  ;;  %v203_v2 = vld [vmem:[%s3909_s19 + $0x88] sm:$0xff]  ;;  %v204_v3 = vld [vmem:[%s3909_s19 + $0x90] sm:$0xff]  ;;  %v493_v8 = vshrl.u32 %v3533_v49, 16  ;;  %v501_v9 = vshrl.u32 %v3534_v55, 16 }
  0x36   : > { %v4017_v4 = vld [vmem:[#allocation2 + $0x34] sm:$0xf]  ;;  %v4019_v5 = vld [vmem:[#allocation2 + $0x30] sm:$0xf]  ;;  %v473_v6 = vsel %vm3931_vm6, %v465_v56, %v472_v57  ;;  %736 = vst [vmem:[#allocation2 + $0x48] sm:$0xf] %v735_v7  ;;  %v742_v11 = vsel %vm3921_vm5, %v481_v1, %v741_v59  ;;  %v3536_v20 = vpack.c.bf16 %v203_v2, %v203_v2  ;;  %v3537_v30 = vpack.c.bf16 %v204_v3, %v204_v3 }
  0x37   : > { %856 = vst.msk [vmem:[#allocation3 + $0x24] sm:$0xf] %vm218_vm0, %v4017_v4  ;;  %855 = vst.msk [vmem:[#allocation3 + $0x20] sm:$0xf] %vm218_vm0, %v4019_v5  ;;  %v489_v10 = vor.u32 %v487_v0, %v4009_v63  ;;  %v504_v12 = vshll.u32 %v3534_v55, 16  ;;  %v495_v14 = vrot.slane %v493_v8, 7 }
  0x38   : > { %737 = vst.msk [vmem:[#allocation2 + $0x4c] sm:$0xf] %vm218_vm0, %v473_v6  ;;  %743 = vst [vmem:[#allocation2 + $0x54] sm:$0xf] %v742_v11  ;;  %v4033_v15 = vrot.slane %v501_v9, 7  ;;  %v496_v17 = vshll.u32 %v3533_v49, 16 }
  0x39   : > { %921 = vrot.lane.b32.xlu1 %v4000_v51, %s3800_s20  ;;  %919 = vrot.lane.b32.xlu0 %v4002_v52, %s3800_s20  ;;  %v748_v18 = vld [vmem:[#allocation2 + $0x60] sm:$0xf]  ;;  %v205_v21 = vld [vmem:[%s3909_s19 + $0x98] sm:$0xff]  ;;  %v490_v24 = vsel %vm3931_vm6, %v482_v61, %v489_v10  ;;  %v510_v26 = vshrl.u32 %v3535_v60, 16  ;;  %v513_v27 = vshll.u32 %v3535_v60, 16  ;;  %v499_v31 = vrot.slane %v495_v14, 4 }
  0x3a   : > { %v4036_v22 = vld [vmem:[#allocation2 + $0x40] sm:$0xf]  ;;  %v4038_v23 = vld [vmem:[#allocation2 + $0x3c] sm:$0xf]  ;;  %744 = vst.msk [vmem:[#allocation2 + $0x58] sm:$0xf] %vm218_vm0, %v490_v24  ;;  %v506_v32 = vor.u32 %v504_v12, %v4033_v15  ;;  %v498_v33 = vor.u32 %v496_v17, %v495_v14  ;;  %v3538_v38 = vpack.c.bf16 %v205_v21, %v205_v21 }
  0x3b   : > { %858 = vst.msk [vmem:[#allocation3 + $0x2c] sm:$0xf] %vm218_vm0, %v4036_v22  ;;  %857 = vst.msk [vmem:[#allocation3 + $0x28] sm:$0xf] %vm218_vm0, %v4038_v23  ;;  %v512_v35 = vrot.slane %v510_v26, 7  ;;  %v518_v36 = vshrl.u32 %v3536_v20, 16 }
  0x3c   : > { %v521_v37 = vshll.u32 %v3536_v20, 16  ;;  %v206_v39 = vld [vmem:[%s3909_s19 + $0xa0] sm:$0xff]  ;;  %v207_v40 = vld [vmem:[%s3909_s19 + $0xa8] sm:$0xff]  ;;  %v507_v41 = vsel %vm3931_vm6, %v499_v31, %v506_v32  ;;  %v749_v42 = vsel %vm3921_vm5, %v498_v33, %v748_v18  ;;  %v527_v44 = vshrl.u32 %v3537_v30, 16  ;;  %v762_v2 = vld [vmem:[#allocation2 + $0x78] sm:$0xf] }
  0x3d   : > { %925 = vrot.lane.b32.xlu1 %v4017_v4, %s3800_s20  ;;  %923 = vrot.lane.b32.xlu0 %v4019_v5, %s3800_s20  ;;  %v755_v43 = vld [vmem:[#allocation2 + $0x6c] sm:$0xf]  ;;  %v530_v45 = vshll.u32 %v3537_v30, 16  ;;  %751 = vst.msk [vmem:[#allocation2 + $0x64] sm:$0xf] %vm218_vm0, %v507_v41  ;;  %v516_v47 = vrot.slane %v512_v35, 4  ;;  %v515_v49 = vor.u32 %v513_v27, %v512_v35  ;;  %v3539_v58 = vpack.c.bf16 %v206_v39, %v206_v39 }
  0x3e   : > { %750 = vst [vmem:[#allocation2 + $0x60] sm:$0xf] %v749_v42  ;;  %v4059_v48 = vrot.slane %v518_v36, 7  ;;  %v535_v53 = vshrl.u32 %v3538_v38, 16  ;;  %v4067_v55 = vld [vmem:[#allocation2 + $0x48] sm:$0xf]  ;;  %v3540_v59 = vpack.c.bf16 %v207_v40, %v207_v40 }
  0x3f   : > { %v4065_v54 = vld [vmem:[#allocation2 + $0x4c] sm:$0xf]  ;;  %v529_v56 = vrot.slane %v527_v44, 7  ;;  %v538_v57 = vshll.u32 %v3538_v38, 16  ;;  %859 = vst.msk [vmem:[#allocation3 + $0x30] sm:$0xf] %vm218_vm0, %v4067_v55  ;;  %v756_v0 = vsel %vm3921_vm5, %v515_v49, %v755_v43 }
  0x40   : > { %860 = vst.msk [vmem:[#allocation3 + $0x34] sm:$0xf] %vm218_vm0, %v4065_v54  ;;  %v4073_v60 = vld [vmem:[#allocation2 + $0x54] sm:$0xf]  ;;  %v523_v61 = vor.u32 %v521_v37, %v4059_v48  ;;  %v4078_v1 = vrot.slane %v535_v53, 7  ;;  %v544_v7 = vshrl.u32 %v3539_v58, 16 }
  0x41   : > { %929 = vrot.lane.b32.xlu1 %v4036_v22, %s3800_s20  ;;  %927 = vrot.lane.b32.xlu0 %v4038_v23, %s3800_s20  ;;  %861 = vst.msk [vmem:[#allocation3 + $0x38] sm:$0xf] %vm218_vm0, %v4073_v60  ;;  %757 = vst [vmem:[#allocation2 + $0x6c] sm:$0xf] %v756_v0  ;;  %v533_v3 = vrot.slane %v529_v56, 4  ;;  %v532_v6 = vor.u32 %v530_v45, %v529_v56  ;;  %v552_v8 = vshrl.u32 %v3540_v59, 16 }
  0x42   : > { %v208_v9 = vld [vmem:[%s3909_s19 + $0xb0] sm:$0xff]  ;;  %v209_v10 = vld [vmem:[%s3909_s19 + $0xb8] sm:$0xff]  ;;  %v210_v11 = vld [vmem:[%s3909_s19 + $0xc0] sm:$0xff]  ;;  %v524_v14 = vsel %vm3931_vm6, %v516_v47, %v523_v61  ;;  %v540_v17 = vor.u32 %v538_v57, %v4078_v1  ;;  %v555_v18 = vshll.u32 %v3540_v59, 16  ;;  %v546_v21 = vrot.slane %v544_v7, 7  ;;  %s3397_s14 = sshll.u32 %s5376_s13, 1 }
  0x43   : > { %v4085_v12 = vld [vmem:[#allocation2 + $0x58] sm:$0xf]  ;;  %758 = vst.msk [vmem:[#allocation2 + $0x70] sm:$0xf] %vm218_vm0, %v524_v14  ;;  %v763_v20 = vsel %vm3921_vm5, %v532_v6, %v762_v2  ;;  %v4099_v24 = vrot.slane %v552_v8, 7  ;;  %v547_v26 = vshll.u32 %v3539_v58, 16  ;;  %v3541_v31 = vpack.c.bf16 %v208_v9, %v208_v9 }
  0x44   : > { %862 = vst.msk [vmem:[#allocation3 + $0x3c] sm:$0xf] %vm218_vm0, %v4085_v12  ;;  %v541_v27 = vsel %vm3931_vm6, %v533_v3, %v540_v17  ;;  %764 = vst [vmem:[#allocation2 + $0x78] sm:$0xf] %v763_v20  ;;  %v769_v30 = vld [vmem:[#allocation2 + $0x84] sm:$0xf]  ;;  %v3542_v32 = vpack.c.bf16 %v209_v10, %v209_v10  ;;  %v3543_v35 = vpack.c.bf16 %v210_v11, %v210_v11 }
  0x45   : > { %933 = vrot.lane.b32.xlu1 %v4065_v54, %s3800_s20  ;;  %931 = vrot.lane.b32.xlu0 %v4067_v55, %s3800_s20  ;;  %v211_v33 = vld [vmem:[%s3909_s19 + $0xc8] sm:$0xff]  ;;  %v4104_v36 = vld [vmem:[#allocation2 + $0x64] sm:$0xf]  ;;  %v4106_v37 = vld [vmem:[#allocation2 + $0x60] sm:$0xf]  ;;  %v550_v38 = vrot.slane %v546_v21, 4  ;;  %v557_v39 = vor.u32 %v555_v18, %v4099_v24  ;;  %v549_v40 = vor.u32 %v547_v26, %v546_v21 }
  0x46   : > { %765 = vst.msk [vmem:[#allocation2 + $0x7c] sm:$0xf] %vm218_vm0, %v541_v27  ;;  %v212_v41 = vld [vmem:[%s3909_s19 + $0xd0] sm:$0xff]  ;;  %864 = vst.msk [vmem:[#allocation3 + $0x44] sm:$0xf] %vm218_vm0, %v4104_v36  ;;  %v561_v42 = vshrl.u32 %v3541_v31, 16  ;;  %v3544_v56 = vpack.c.bf16 %v211_v33, %v211_v33 }
  0x47   : > { %863 = vst.msk [vmem:[#allocation3 + $0x40] sm:$0xf] %vm218_vm0, %v4106_v37  ;;  %v569_v43 = vshrl.u32 %v3542_v32, 16  ;;  %v572_v44 = vshll.u32 %v3542_v32, 16  ;;  %v564_v45 = vshll.u32 %v3541_v31, 16  ;;  %v213_v47 = vld [vmem:[%s3909_s19 + $0xd8] sm:$0xff]  ;;  %v558_v49 = vsel %vm3931_vm6, %v550_v38, %v557_v39 }
  0x48   : > { %v770_v53 = vsel %vm3921_vm5, %v549_v40, %v769_v30  ;;  %v578_v57 = vshrl.u32 %v3543_v35, 16  ;;  %v4124_v58 = vld [vmem:[#allocation2 + $0x6c] sm:$0xf]  ;;  %772 = vst.msk [vmem:[#allocation2 + $0x88] sm:$0xf] %vm218_vm0, %v558_v49  ;;  %v563_v59 = vrot.slane %v561_v42, 7  ;;  %v3545_v2 = vpack.c.bf16 %v212_v41, %v212_v41 }
  0x49   : > { %937 = vrot.lane.b32.xlu1 %v4085_v12, %s3800_s20  ;;  %935 = vrot.lane.b32.xlu0 %v4073_v60, %s3800_s20  ;;  %771 = vst [vmem:[#allocation2 + $0x84] sm:$0xf] %v770_v53  ;;  %v4127_v61 = vrot.slane %v569_v43, 7  ;;  %v581_v0 = vshll.u32 %v3543_v35, 16  ;;  %865 = vst.msk [vmem:[#allocation3 + $0x48] sm:$0xf] %vm218_vm0, %v4124_v58  ;;  %v3546_v9 = vpack.c.bf16 %v213_v47, %v213_v47 }
  0x4a   : > { %v776_v3 = vld [vmem:[#allocation2 + $0x90] sm:$0xf]  ;;  %v580_v6 = vrot.slane %v578_v57, 7  ;;  %v586_v7 = vshrl.u32 %v3544_v56, 16  ;;  %v589_v8 = vshll.u32 %v3544_v56, 16  ;;  %v567_v11 = vrot.slane %v563_v59, 4 }
  0x4b   : > { %v4131_v10 = vld [vmem:[#allocation2 + $0x70] sm:$0xf]  ;;  %v574_v14 = vor.u32 %v572_v44, %v4127_v61  ;;  %v566_v17 = vor.u32 %v564_v45, %v563_v59  ;;  %v783_v18 = vld [vmem:[#allocation2 + $0x9c] sm:$0xf]  ;;  %v214_v20 = vld [vmem:[%s3909_s19 + $0xe0] sm:$0xff]  ;;  %v595_v31 = vshrl.u32 %v3545_v2, 16 }
  0x4c   : > { %866 = vst.msk [vmem:[#allocation3 + $0x4c] sm:$0xf] %vm218_vm0, %v4131_v10  ;;  %v4141_v21 = vld [vmem:[#allocation2 + $0x78] sm:$0xf]  ;;  %v584_v26 = vrot.slane %v580_v6, 4  ;;  %v4143_v27 = vrot.slane %v586_v7, 7  ;;  %v583_v30 = vor.u32 %v581_v0, %v580_v6  ;;  %v3547_v56 = vpack.c.bf16 %v214_v20, %v214_v20 }
  0x4d   : > { %941 = vrot.lane.b32.xlu1 %v4104_v36, %s3800_s20  ;;  %939 = vrot.lane.b32.xlu0 %v4106_v37, %s3800_s20  ;;  %v215_v32 = vld [vmem:[%s3909_s19 + $0xe8] sm:$0xff]  ;;  %v4146_v33 = vld [vmem:[#allocation2 + $0x7c] sm:$0xf]  ;;  %867 = vst.msk [vmem:[#allocation3 + $0x50] sm:$0xf] %vm218_vm0, %v4141_v21  ;;  %v575_v35 = vsel %vm3931_vm6, %v567_v11, %v574_v14  ;;  %v777_v38 = vsel %vm3921_vm5, %v566_v17, %v776_v3  ;;  %v603_v39 = vshrl.u32 %v3546_v9, 16 }
  0x4e   : > { %v606_v40 = vshll.u32 %v3546_v9, 16  ;;  %v216_v41 = vld [vmem:[%s3909_s19 + $0xf0] sm:$0xff]  ;;  %v217_v42 = vld [vmem:[%s3909_s19 + $0xf8] sm:$0xff]  ;;  %868 = vst.msk [vmem:[#allocation3 + $0x54] sm:$0xf] %vm218_vm0, %v4146_v33  ;;  %v591_v43 = vor.u32 %v589_v8, %v4143_v27  ;;  %v784_v44 = vsel %vm3921_vm5, %v583_v30, %v783_v18  ;;  %v597_v45 = vrot.slane %v595_v31, 7 }
  0x4f   : > { %779 = vst.msk [vmem:[#allocation2 + $0x94] sm:$0xf] %vm218_vm0, %v575_v35  ;;  %778 = vst [vmem:[#allocation2 + $0x90] sm:$0xf] %v777_v38  ;;  %v4162_v47 = vrot.slane %v603_v39, 7  ;;  %v598_v49 = vshll.u32 %v3545_v2, 16  ;;  %v3548_v57 = vpack.c.bf16 %v215_v32, %v215_v32  ;;  %v3549_v7 = vpack.c.bf16 %v216_v41, %v216_v41 }
  0x50   : > { %785 = vst [vmem:[#allocation2 + $0x9c] sm:$0xf] %v784_v44  ;;  %v790_v53 = vld [vmem:[#allocation2 + $0xa8] sm:$0xf]  ;;  %v4170_v0 = vld [vmem:[#allocation2 + $0x84] sm:$0xf]  ;;  %v592_v3 = vsel %vm3931_vm6, %v584_v26, %v591_v43  ;;  %v3550_v8 = vpack.c.bf16 %v217_v42, %v217_v42 }
  0x51   : > { %945 = vrot.lane.b32.xlu1 %v4131_v10, %s3800_s20  ;;  %943 = vrot.lane.b32.xlu0 %v4124_v58, %s3800_s20  ;;  %v4168_v59 = vld [vmem:[#allocation2 + $0x88] sm:$0xf]  ;;  %v601_v6 = vrot.slane %v597_v45, 4  ;;  %v389_v2 = vrot.slane %v3927_v29, 4  ;;  %869 = vst.msk [vmem:[#allocation3 + $0x58] sm:$0xf] %vm218_vm0, %v4170_v0  ;;  %v608_v9 = vor.u32 %v606_v40, %v4162_v47  ;;  %v600_v11 = vor.u32 %v598_v49, %v597_v45 }
  0x52   : > { %870 = vst.msk [vmem:[#allocation3 + $0x5c] sm:$0xf] %vm218_vm0, %v4168_v59  ;;  %786 = vst.msk [vmem:[#allocation2 + $0xa0] sm:$0xf] %vm218_vm0, %v592_v3  ;;  %v612_v14 = vshrl.u32 %v3547_v56, 16  ;;  %v620_v18 = vshrl.u32 %v3548_v57, 16 }
  0x53   : > { %v623_v29 = vshll.u32 %v3548_v57, 16  ;;  %v615_v20 = vshll.u32 %v3547_v56, 16  ;;  %v629_v26 = vshrl.u32 %v3549_v7, 16  ;;  %v703_v30 = vld [vmem:[#allocation2 + $0x14] sm:$0x1]  ;;  %v609_v31 = vsel %vm3931_vm6, %v601_v6, %v608_v9 }
  0x54   : > { %v791_v32 = vsel %vm3921_vm5, %v600_v11, %v790_v53  ;;  %v614_v35 = vrot.slane %v612_v14, 7  ;;  %v797_v38 = vld [vmem:[#allocation2 + $0xb4] sm:$0xf]  ;;  %v637_v39 = vshrl.u32 %v3550_v8, 16  ;;  %793 = vst.msk [vmem:[#allocation2 + $0xac] sm:$0xf] %vm218_vm0, %v609_v31  ;;  %v704_v3 = vsel %vm4183_vm7, %v389_v2, %v703_v30 }
  0x55   : > { %949 = vrot.lane.b32.xlu1 %v4146_v33, %s3800_s20  ;;  %947 = vrot.lane.b32.xlu0 %v4141_v21, %s3800_s20  ;;  %792 = vst [vmem:[#allocation2 + $0xa8] sm:$0xf] %v791_v32  ;;  %v4196_v40 = vrot.slane %v620_v18, 7  ;;  %v631_v41 = vrot.slane %v629_v26, 7  ;;  %v640_v42 = vshll.u32 %v3550_v8, 16  ;;  %v632_v43 = vshll.u32 %v3549_v7, 16 }
  0x56   : > { %v804_v44 = vld [vmem:[#allocation2 + $0xc0] sm:$0xf]  ;;  %v4198_v45 = vld [vmem:[#allocation2 + $0x94] sm:$0xf]  ;;  %v4200_v49 = vld [vmem:[#allocation2 + $0x90] sm:$0xf]  ;;  %v617_v56 = vor.u32 %v615_v20, %v614_v35 }
  0x57   : > { %v618_v53 = vrot.slane %v614_v35, 4  ;;  %v4202_v57 = vrot.slane %v637_v39, 7  ;;  %872 = vst.msk [vmem:[#allocation3 + $0x64] sm:$0xf] %vm218_vm0, %v4198_v45  ;;  %871 = vst.msk [vmem:[#allocation3 + $0x60] sm:$0xf] %vm218_vm0, %v4200_v49  ;;  %v625_v7 = vor.u32 %v623_v29, %v4196_v40  ;;  %v634_v9 = vor.u32 %v632_v43, %v631_v41 }
  0x58   : > { %v4210_v6 = vld [vmem:[#allocation2 + $0x9c] sm:$0xf]  ;;  %v635_v8 = vrot.slane %v631_v41, 4  ;;  %705 = vst [vmem:[#allocation2 + $0x14] sm:$0x1] %v704_v3  ;;  %v406_v11 = vrot.slane %v3925_v28, 4  ;;  %v798_v2 = vsel %vm3921_vm5, %v617_v56, %v797_v38 }
  0x59   : > { %v423_v14 = vrot.slane %v3949_v50, 4  ;;  %873 = vst.msk [vmem:[#allocation3 + $0x68] sm:$0xf] %vm218_vm0, %v4210_v6  ;;  %v642_v18 = vor.u32 %v640_v42, %v4202_v57  ;;  %953 = vrot.lane.b32.xlu1 %v4168_v59, %s3800_s20  ;;  %951 = vrot.lane.b32.xlu0 %v4170_v0, %s3800_s20  ;;  %v4224_v29 = vld [vmem:[#allocation2 + $0xa0] sm:$0xf]  ;;  %v626_v28 = vsel %vm3931_vm6, %v618_v53, %v625_v7  ;;  %v440_v38 = vrot.slane %v3952_v62, 4 }
  0x5a   : > { %799 = vst [vmem:[#allocation2 + $0xb4] sm:$0xf] %v798_v2  ;;  %v805_v50 = vsel %vm3921_vm5, %v634_v9, %v804_v44  ;;  %v710_v20 = vld [vmem:[#allocation2 + $0x20] sm:$0x1]  ;;  %v717_v26 = vld [vmem:[#allocation2 + $0x2c] sm:$0x1] }
  0x5b   : > { %874 = vst.msk [vmem:[#allocation3 + $0x6c] sm:$0xf] %vm218_vm0, %v4224_v29  ;;  %800 = vst.msk [vmem:[#allocation2 + $0xb8] sm:$0xf] %vm218_vm0, %v626_v28  ;;  %v643_v30 = vsel %vm3931_vm6, %v635_v8, %v642_v18  ;;  %v4236_v31 = vld [vmem:[#allocation2 + $0xac] sm:$0xf]  ;;  %v711_v25 = vsel %vm4183_vm7, %v406_v11, %v710_v20  ;;  %v718_v35 = vsel %vm4183_vm7, %v423_v14, %v717_v26 }
  0x5c   : > { %806 = vst [vmem:[#allocation2 + $0xc0] sm:$0xf] %v805_v50  ;;  %807 = vst.msk [vmem:[#allocation2 + $0xc4] sm:$0xf] %vm218_vm0, %v643_v30  ;;  %v4238_v32 = vld [vmem:[#allocation2 + $0xa8] sm:$0xf] }
  0x5d   : > { %v457_v39 = vrot.slane %v3965_v16, 4  ;;  %957 = vrot.lane.b32.xlu1 %v4198_v45, %s3800_s20  ;;  %955 = vrot.lane.b32.xlu0 %v4200_v49, %s3800_s20  ;;  %876 = vst.msk [vmem:[#allocation3 + $0x74] sm:$0xf] %vm218_vm0, %v4236_v31  ;;  %875 = vst.msk [vmem:[#allocation3 + $0x70] sm:$0xf] %vm218_vm0, %v4238_v32  ;;  %v474_v56 = vrot.slane %v3997_v46, 4 }
  0x5e   : > { %712 = vst [vmem:[#allocation2 + $0x20] sm:$0x1] %v711_v25  ;;  %719 = vst [vmem:[#allocation2 + $0x2c] sm:$0x1] %v718_v35  ;;  %v724_v34 = vld [vmem:[#allocation2 + $0x38] sm:$0x1] }
  0x5f   : > { %v731_v41 = vld [vmem:[#allocation2 + $0x44] sm:$0x1]  ;;  %v725_v16 = vsel %vm4183_vm7, %v440_v38, %v724_v34  ;;  %v738_v3 = vld [vmem:[#allocation2 + $0x50] sm:$0x1]  ;;  %v491_v7 = vrot.slane %v4009_v63, 4  ;;  %v508_v11 = vrot.slane %v4033_v15, 4 }
  0x60   : > { %v732_v43 = vsel %vm4183_vm7, %v457_v39, %v731_v41  ;;  %726 = vst [vmem:[#allocation2 + $0x38] sm:$0x1] %v725_v16  ;;  %v745_v8 = vld [vmem:[#allocation2 + $0x5c] sm:$0x1]  ;;  %v739_v9 = vsel %vm4183_vm7, %v474_v56, %v738_v3  ;;  %v752_v14 = vld [vmem:[#allocation2 + $0x68] sm:$0x1] }
  0x61   : > { %v4254_v42 = vld [vmem:[#allocation2 + $0xb4] sm:$0xf]  ;;  %961 = vrot.lane.b32.xlu1 %v4224_v29, %s3800_s20  ;;  %959 = vrot.lane.b32.xlu0 %v4210_v6, %s3800_s20  ;;  %733 = vst [vmem:[#allocation2 + $0x44] sm:$0x1] %v732_v43  ;;  %740 = vst [vmem:[#allocation2 + $0x50] sm:$0x1] %v739_v9  ;;  %v746_v46 = vsel %vm4183_vm7, %v491_v7, %v745_v8 }
  0x62   : > { %v4260_v62 = vld [vmem:[#allocation2 + $0xb8] sm:$0xf]  ;;  %877 = vst.msk [vmem:[#allocation3 + $0x78] sm:$0xf] %vm218_vm0, %v4254_v42  ;;  %747 = vst [vmem:[#allocation2 + $0x5c] sm:$0x1] %v746_v46 }
  0x63   : > { %878 = vst.msk [vmem:[#allocation3 + $0x7c] sm:$0xf] %vm218_vm0, %v4260_v62  ;;  %v4278_v44 = vld [vmem:[#allocation2 + $0xc4] sm:$0xf]  ;;  %v4280_v53 = vld [vmem:[#allocation2 + $0xc0] sm:$0xf] }
  0x64   : > { %v1175_v15 = vld [vmem:[#allocation2 + $0x10] sm:$0xf]  ;;  %v1176_v28 = vld [vmem:[#allocation2 + $0x14] sm:$0x1]  ;;  %vm1225_vm9 = vsmask.f32 3328 }
  0x65   : > { %965 = vrot.lane.b32.xlu1 %v4236_v31, %s3800_s20  ;;  %963 = vrot.lane.b32.xlu0 %v4238_v32, %s3800_s20  ;;  %vm1226_vm10 = vsmask.f32 7440  ;;  %v1180_v25 = vld [vmem:[#allocation2 + $0x24] sm:$0xf]  ;;  %v1272_v34 = vshll.u32 %v1176_v28, 16  ;;  %vm2149_vm12 = vcmask 1042432  }
  0x66   : > { %v1184_v41 = vld [vmem:[#allocation2 + $0x34] sm:$0xf]  ;;  %vm4364_vm11 = vmor %vm1225_vm9, %vm1226_vm10  ;;  %vm2150_vm13 = vcmask 1046532   ;;  %vm2868_vm15 = vcmask 1043456   ;;  %vm1138_vm0 = vcmask 454016   ;;  %vm1708_vm1 = vcmask 126016  }
  0x67   : > { %vm4546_vm14 = vmor %vm2149_vm12, %vm2150_vm13  ;;  %vm1861_vm2 = vcmask 322816   ;;  %vm2014_vm3 = vcmask 519616   ;;  %vm2360_vm4 = vcmask 191616   ;;  %vm2499_vm5 = vcmask 388416  }
  0x68   : > { %vm2638_vm6 = vcmask 585216  }
  0x69   : > { %969 = vrot.lane.b32.xlu1 %v4260_v62, %s3800_s20  ;;  %967 = vrot.lane.b32.xlu0 %v4254_v42, %s3800_s20 }
  0x6d   : > { %973 = vrot.lane.b32.xlu1 %v4278_v44, %s3800_s20  ;;  %971 = vrot.lane.b32.xlu0 %v4280_v53, %s3800_s20  ;;  %s184_s20 = scalar_lea.vmem %s5361_s3, %s3397_s14 }
  0x71   : > { %1044 = vrot.lane.b32.xlu1 %v3973_v19, %s3801_s21  ;;  %1042 = vrot.lane.b32.xlu0 %v3963_v13, %s3801_s21  ;;  %v753_v19 = vsel %vm4183_vm7, %v508_v11, %v752_v14  ;;  %v1172_v13 = vld [vmem:[#allocation2 + $0x4] sm:$0xf]  ;;  %v1179_v14 = vld [vmem:[#allocation2 + $0x20] sm:$0x1] }
  0x72   : > { %754 = vst [vmem:[#allocation2 + $0x68] sm:$0x1] %v753_v19  ;;  %v1242_v63 = vshrl.u32 %v1172_v13, 16  ;;  %v1301_v19 = vshrl.u32 %v1180_v25, 16 }
  0x75   : > { %1048 = vrot.lane.b32.xlu1 %v4000_v51, %s3801_s21  ;;  %1046 = vrot.lane.b32.xlu0 %v4002_v52, %s3801_s21  ;;  %v1171_v51 = vld [vmem:[#allocation2] sm:$0xf]  ;;  %v1238_v52 = vshll.u32 %v1172_v13, 16  ;;  %v1304_v13 = vshll.u32 %v1180_v25, 16 }
  0x79   : > { %1052 = vrot.lane.b32.xlu1 %v4017_v4, %s3801_s21  ;;  %1050 = vrot.lane.b32.xlu0 %v4019_v5, %s3801_s21  ;;  %v1229_v4 = vshrl.u32 %v1171_v51, 16  ;;  %v1232_v5 = vshll.u32 %v1171_v51, 16  ;;  %v1334_v51 = vshll.u32 %v1184_v41, 16 }
  0x7d   : > { %1056 = vrot.lane.b32.xlu1 %v4036_v22, %s3801_s21  ;;  %1054 = vrot.lane.b32.xlu0 %v4038_v23, %s3801_s21  ;;  %v1174_v22 = vld [vmem:[#allocation2 + $0xc] sm:$0xf]  ;;  %v1173_v23 = vld [vmem:[#allocation2 + $0x8] sm:$0x1] }
  0x81   : > { %1060 = vrot.lane.b32.xlu1 %v4065_v54, %s3801_s21  ;;  %1058 = vrot.lane.b32.xlu0 %v4067_v55, %s3801_s21  ;;  %v4343_v54 = vrot.slane %v1238_v52, 5  ;;  %v1244_v55 = vrot.slane %v1242_v63, 4  ;;  %v1338_v52 = vshrl.u32 %v1184_v41, 16  ;;  %v846_v63 = vld [vmem:[#allocation2 + $0xd0] sm:$0xf] }
  0x82   : > { %v1190_v41 = vld [vmem:[#allocation2 + $0x4c] sm:$0xf] }
  0x85   : > { %1064 = vrot.lane.b32.xlu1 %v4085_v12, %s3801_s21  ;;  %1062 = vrot.lane.b32.xlu0 %v4073_v60, %s3801_s21  ;;  %v1262_v60 = vshll.u32 %v1175_v15, 16  ;;  %v1266_v12 = vshrl.u32 %v1175_v15, 16 }
  0x89   : > { %1068 = vrot.lane.b32.xlu1 %v4104_v36, %s3801_s21  ;;  %1066 = vrot.lane.b32.xlu0 %v4106_v37, %s3801_s21  ;;  %v1231_v36 = vrot.slane %v1229_v4, 4  ;;  %v1234_v37 = vrot.slane %v1232_v5, 5  ;;  %v845_v4 = vld [vmem:[#allocation2 + $0xcc] sm:$0xf] }
  0x8d   : > { %1072 = vrot.lane.b32.xlu1 %v4131_v10, %s3801_s21  ;;  %1070 = vrot.lane.b32.xlu0 %v4124_v58, %s3801_s21  ;;  %v1253_v58 = vshrl.u32 %v1174_v22, 16  ;;  %v1256_v10 = vshll.u32 %v1174_v22, 16 }
  0x8f   : > { %v1255_v50 = vrot.slane %v1253_v58, 4  ;;  %v1258_v20 = vrot.slane %v1256_v10, 5 }
  0x91   : > { %1076 = vrot.lane.b32.xlu1 %v4146_v33, %s3801_s21  ;;  %1074 = vrot.lane.b32.xlu0 %v4141_v21, %s3801_s21  ;;  %v1178_v21 = vld [vmem:[#allocation2 + $0x1c] sm:$0xf]  ;;  %v1248_v33 = vshll.u32 %v1173_v23, 16 }
  0x92   : > { %v1290_v26 = vshrl.u32 %v1178_v21, 16 }
  0x93   : > { %v4360_v38 = vrot.slane %v1248_v33, 5  ;;  %v1186_v33 = vld [vmem:[#allocation2 + $0x3c] sm:$0xf] }
  0x94   : > { %v1292_v7 = vrot.slane %v1290_v26, 4  ;;  %v1352_v25 = vshll.u32 %v1186_v33, 16 }
  0x95   : > { %1080 = vrot.lane.b32.xlu1 %v4168_v59, %s3801_s21  ;;  %1078 = vrot.lane.b32.xlu0 %v4170_v0, %s3801_s21  ;;  %v1177_v59 = vld [vmem:[#allocation2 + $0x18] sm:$0xf]  ;;  %v1245_v0 = vor.u32 %v1244_v55, %v4343_v54 }
  0x96   : > { %v1277_v30 = vshrl.u32 %v1177_v59, 16 }
  0x97   : > { %v4358_v35 = vrot.slane %v1245_v0, 4  ;;  %v1306_v0 = vrot.slane %v1304_v13, 5 }
  0x98   : > { %v1279_v8 = vrot.slane %v1277_v30, 4 }
  0x99   : > { %1084 = vrot.lane.b32.xlu1 %v4198_v45, %s3801_s21  ;;  %1082 = vrot.lane.b32.xlu0 %v4200_v49, %s3801_s21  ;;  %v4350_v45 = vrot.slane %v1262_v60, 5  ;;  %v1268_v49 = vrot.slane %v1266_v12, 4  ;;  %v1251_v5 = vsel %vm4364_vm11, %v4358_v35, %v4360_v38  ;;  %v1183_v12 = vld [vmem:[#allocation2 + $0x30] sm:$0xf] }
  0x9b   : > { %v1269_v39 = vor.u32 %v1268_v49, %v4350_v45  ;;  %v4393_v49 = vrot.slane %v1334_v51, 5  ;;  %v1354_v51 = vrot.slane %v1352_v25, 5  ;;  %v1191_v25 = vld [vmem:[#allocation2 + $0x50] sm:$0x1] }
  0x9d   : > { %1088 = vrot.lane.b32.xlu1 %v4224_v29, %s3801_s21  ;;  %1086 = vrot.lane.b32.xlu0 %v4210_v6, %s3801_s21  ;;  %v1286_v6 = vshll.u32 %v1178_v21, 16  ;;  %v1235_v29 = vor.u32 %v1234_v37, %v1231_v36  ;;  %v1270_v15 = vrot.slane %v1269_v39, 4  ;;  %v1187_v36 = vld [vmem:[#allocation2 + $0x40] sm:$0xf]  ;;  %v1296_v37 = vshll.u32 %v1179_v14, 16 }
  0x9e   : > { %v1358_v28 = vshll.u32 %v1187_v36, 16 }
  0x9f   : > { %v4370_v3 = vrot.slane %v1286_v6, 5  ;;  %v1340_v6 = vrot.slane %v1338_v52, 4  ;;  %v1298_v38 = vrot.slane %v1296_v37, 5  ;;  %v1382_v52 = vshll.u32 %v1190_v41, 16 }
  0xa1   : > { %1092 = vrot.lane.b32.xlu1 %v4236_v31, %s3801_s21  ;;  %1090 = vrot.lane.b32.xlu0 %v4238_v32, %s3801_s21  ;;  %v1280_v31 = vshll.u32 %v1177_v59, 16  ;;  %v1181_v32 = vld [vmem:[#allocation2 + $0x28] sm:$0xf]  ;;  %v1293_v60 = vor.u32 %v1292_v7, %v4370_v3  ;;  %v1303_v59 = vrot.slane %v1301_v19, 4  ;;  %v1188_v19 = vld [vmem:[#allocation2 + $0x44] sm:$0x1] }
  0xa2   : > { %v1310_v46 = vshll.u32 %v1181_v32, 16  ;;  %v1314_v11 = vshrl.u32 %v1181_v32, 16  ;;  %v1349_v32 = vshrl.u32 %v1186_v33, 16  ;;  %v1368_v37 = vshll.u32 %v1188_v19, 16 }
  0xa3   : > { %v916_v2 = vpop.permute.xlu1 %915  ;;  %v912_v18 = vpop.permute.xlu0 %911  ;;  %v1282_v9 = vrot.slane %v1280_v31, 5  ;;  %v1294_v35 = vrot.slane %v1293_v60, 4 }
  0xa4   : > { %1010 = vst.msk [vmem:[#allocation3 + $0x8] sm:$0xf] %vm1007_vm8, %v916_v2  ;;  %1008 = vst.msk [vmem:[#allocation3] sm:$0xf] %vm1007_vm8, %v912_v18  ;;  %v4389_v10 = vrot.slane %v1310_v46, 5  ;;  %v1316_v21 = vrot.slane %v1314_v11, 4 }
  0xa5   : > { %1096 = vrot.lane.b32.xlu1 %v4260_v62, %s3801_s21  ;;  %1094 = vrot.lane.b32.xlu0 %v4254_v42, %s3801_s21  ;;  %v4368_v62 = vrot.slane %v1235_v29, 4  ;;  %v1259_v42 = vor.u32 %v1258_v20, %v1255_v50  ;;  %v1283_v58 = vor.u32 %v1282_v9, %v1279_v8  ;;  %v1185_v2 = vld [vmem:[#allocation2 + $0x38] sm:$0x1]  ;;  %v1325_v18 = vshrl.u32 %v1183_v12, 16 }
  0xa6   : > { %v1328_v29 = vshll.u32 %v1183_v12, 16  ;;  %v1362_v50 = vshrl.u32 %v1187_v36, 16  ;;  %v1317_v39 = vor.u32 %v1316_v21, %v4389_v10  ;;  %v4410_v9 = vrot.slane %v1358_v28, 5 }
  0xa7   : > { %v918_v16 = vpop.permute.xlu1 %917  ;;  %v914_v43 = vpop.permute.xlu0 %913  ;;  %v1260_v55 = vrot.slane %v1259_v42, 4  ;;  %v1189_v42 = vld [vmem:[#allocation2 + $0x48] sm:$0xf]  ;;  %v1327_v7 = vrot.slane %v1325_v18, 4  ;;  %v1351_v13 = vrot.slane %v1349_v32, 4 }
  0xa8   : > { %1011 = vst.msk [vmem:[#allocation3 + $0xc] sm:$0xf] %vm1007_vm8, %v918_v16  ;;  %1009 = vst.msk [vmem:[#allocation3 + $0x4] sm:$0xf] %vm1007_vm8, %v914_v43  ;;  %v1284_v16 = vrot.slane %v1283_v58, 4  ;;  %v1341_v43 = vor.u32 %v1340_v6, %v4393_v49  ;;  %v1330_v8 = vrot.slane %v1328_v29, 5 }
  0xa9   : > { %1100 = vrot.lane.b32.xlu1 %v4278_v44, %s3801_s21  ;;  %1098 = vrot.lane.b32.xlu0 %v4280_v53, %s3801_s21  ;;  %v1241_v44 = vsel %vm4364_vm11, %v4368_v62, %v4343_v54  ;;  %v1274_v53 = vrot.slane %v1272_v34, 5  ;;  %v1182_v54 = vld [vmem:[#allocation2 + $0x2c] sm:$0x1]  ;;  %v4402_v31 = vsel %vm4364_vm11, %v1260_v55, %v4350_v45  ;;  %v1307_v45 = vor.u32 %v1306_v0, %v1303_v59  ;;  %v1193_v55 = vld [vmem:[#allocation2 + $0x58] sm:$0xf] }
  0xaa   : > { %v1320_v34 = vshll.u32 %v1182_v54, 16  ;;  %v1344_v62 = vshll.u32 %v1185_v2, 16  ;;  %v1364_v46 = vrot.slane %v1362_v50, 4  ;;  %v1342_v12 = vrot.slane %v1341_v43, 4  ;;  %v1192_v58 = vld [vmem:[#allocation2 + $0x54] sm:$0xf] }
  0xab   : > { %v922_v22 = vpop.permute.xlu1 %921  ;;  %v920_v23 = vpop.permute.xlu0 %919  ;;  %v4397_v30 = vsel %vm4364_vm11, %v1270_v15, %v1274_v53  ;;  %v1376_v15 = vshll.u32 %v1189_v42, 16  ;;  %v1308_v60 = vrot.slane %v1307_v45, 4  ;;  %v1331_v36 = vor.u32 %v1330_v8, %v1327_v7  ;;  %v1195_v43 = vld [vmem:[#allocation2 + $0x60] sm:$0xf] }
  0xac   : > { %1013 = vst.msk [vmem:[#allocation3 + $0x14] sm:$0xf] %vm1007_vm8, %v922_v22  ;;  %1012 = vst.msk [vmem:[#allocation3 + $0x10] sm:$0xf] %vm1007_vm8, %v920_v23  ;;  %v4420_v22 = vsel %vm4364_vm11, %v1294_v35, %v1298_v38  ;;  %v4425_v23 = vsel %vm4364_vm11, %v1284_v16, %v4370_v3  ;;  %v1346_v53 = vrot.slane %v1344_v62, 5  ;;  %v1365_v54 = vor.u32 %v1364_v46, %v4410_v9 }
  0xad   : > { %1104 = vrot.lane.b32.xlu1 %v846_v63, %s3801_s21  ;;  %1102 = vrot.lane.b32.xlu0 %v845_v4, %s3801_s21  ;;  %v1386_v63 = vshrl.u32 %v1190_v41, 16  ;;  %v1322_v4 = vrot.slane %v1320_v34, 5  ;;  %v1355_v59 = vor.u32 %v1354_v51, %v1351_v13  ;;  %v4428_v0 = vrot.slane %v1382_v52, 5  ;;  %v1196_v35 = vld [vmem:[#allocation2 + $0x64] sm:$0xf] }
  0xae   : > { %v1378_v2 = vrot.slane %v1376_v15, 5  ;;  %v1406_v18 = vshll.u32 %v1193_v55, 16  ;;  %v1410_v29 = vshrl.u32 %v1193_v55, 16  ;;  %v1397_v28 = vshrl.u32 %v1192_v58, 16 }
  0xaf   : > { %v926_v20 = vpop.permute.xlu1 %925  ;;  %v924_v26 = vpop.permute.xlu0 %923  ;;  %v1388_v6 = vrot.slane %v1386_v63, 4  ;;  %v1400_v50 = vshll.u32 %v1192_v58, 16  ;;  %v1332_v32 = vrot.slane %v1331_v36, 4  ;;  %v4447_v34 = vsel %vm4364_vm11, %v1342_v12, %v1346_v53 }
  0xb0   : > { %1015 = vst.msk [vmem:[#allocation3 + $0x1c] sm:$0xf] %vm1007_vm8, %v926_v20  ;;  %1014 = vst.msk [vmem:[#allocation3 + $0x18] sm:$0xf] %vm1007_vm8, %v924_v26  ;;  %v4443_v26 = vsel %vm4364_vm11, %v1308_v60, %v4389_v10  ;;  %v1366_v41 = vrot.slane %v1365_v54, 4  ;;  %v1370_v16 = vrot.slane %v1368_v37, 5 }
  0xb1   : > { %1614 = vrot.lane.b32.xlu1 %v1251_v5, %s3802_s22  ;;  %1612 = vrot.lane.b32.xlu0 %v1241_v44, %s3802_s22  ;;  %v1373_v5 = vshrl.u32 %v1189_v42, 16  ;;  %v1318_v44 = vrot.slane %v1317_v39, 4  ;;  %v1356_v45 = vrot.slane %v1355_v59, 4  ;;  %v1389_v10 = vor.u32 %v1388_v6, %v4428_v0 }
  0xb2   : > { %v1408_v42 = vrot.slane %v1406_v18, 5  ;;  %v1412_v7 = vrot.slane %v1410_v29, 4  ;;  %v1392_v8 = vshll.u32 %v1191_v25, 16  ;;  %v1399_v46 = vrot.slane %v1397_v28, 4 }
  0xb3   : > { %v930_v11 = vpop.permute.xlu1 %929  ;;  %v928_v14 = vpop.permute.xlu0 %927  ;;  %v1375_v3 = vrot.slane %v1373_v5, 4  ;;  %v4438_v20 = vsel %vm4364_vm11, %v1318_v44, %v1322_v4  ;;  %v4459_v19 = vsel %vm4364_vm11, %v1332_v32, %v4393_v49  ;;  %v1434_v13 = vshrl.u32 %v1196_v35, 16  ;;  %v1194_v5 = vld [vmem:[#allocation2 + $0x5c] sm:$0x1] }
  0xb4   : > { %1017 = vst.msk [vmem:[#allocation3 + $0x24] sm:$0xf] %vm1007_vm8, %v930_v11  ;;  %1016 = vst.msk [vmem:[#allocation3 + $0x20] sm:$0xf] %vm1007_vm8, %v928_v14  ;;  %v1402_v11 = vrot.slane %v1400_v50, 5  ;;  %v1430_v14 = vshll.u32 %v1196_v35, 16  ;;  %v4465_v15 = vsel %vm4364_vm11, %v1366_v41, %v1370_v16  ;;  %v4470_v44 = vsel %vm4364_vm11, %v1356_v45, %v4410_v9 }
  0xb5   : > { %1618 = vrot.lane.b32.xlu1 %v4397_v30, %s3802_s22  ;;  %1616 = vrot.lane.b32.xlu0 %v4402_v31, %s3802_s22  ;;  %v1379_v62 = vor.u32 %v1378_v2, %v1375_v3  ;;  %v1421_v51 = vshrl.u32 %v1195_v43, 16  ;;  %v1424_v52 = vshll.u32 %v1195_v43, 16  ;;  %v1390_v49 = vrot.slane %v1389_v10, 4  ;;  %v1197_v9 = vld [vmem:[#allocation2 + $0x68] sm:$0x1] }
  0xb6   : > { %v1394_v55 = vrot.slane %v1392_v8, 5  ;;  %v1413_v60 = vor.u32 %v1412_v7, %v1408_v42  ;;  %v1403_v12 = vor.u32 %v1402_v11, %v1399_v46  ;;  %v1432_v36 = vrot.slane %v1430_v14, 5  ;;  %v759_v45 = vld [vmem:[#allocation2 + $0x74] sm:$0x1] }
  0xb7   : > { %v934_v21 = vpop.permute.xlu1 %933  ;;  %v932_v33 = vpop.permute.xlu0 %931  ;;  %v1380_v53 = vrot.slane %v1379_v62, 4  ;;  %v1416_v37 = vshll.u32 %v1194_v5, 16  ;;  %v1436_v58 = vrot.slane %v1434_v13, 4  ;;  %v1440_v50 = vshll.u32 %v1197_v9, 16 }
  0xb8   : > { %1019 = vst.msk [vmem:[#allocation3 + $0x2c] sm:$0xf] %vm1007_vm8, %v934_v21  ;;  %1018 = vst.msk [vmem:[#allocation3 + $0x28] sm:$0xf] %vm1007_vm8, %v932_v33  ;;  %v1423_v21 = vrot.slane %v1421_v51, 4  ;;  %v1426_v33 = vrot.slane %v1424_v52, 5  ;;  %v4484_v6 = vsel %vm4364_vm11, %v1390_v49, %v1394_v55 }
  0xb9   : > { %1622 = vrot.lane.b32.xlu1 %v4420_v22, %s3802_s22  ;;  %1620 = vrot.lane.b32.xlu0 %v4425_v23, %s3802_s22  ;;  %v4489_v3 = vsel %vm4364_vm11, %v1380_v53, %v4428_v0  ;;  %v1414_v2 = vrot.slane %v1413_v60, 4  ;;  %v1404_v18 = vrot.slane %v1403_v12, 4  ;;  %v1418_v29 = vrot.slane %v1416_v37, 5  ;;  %v2048_v52 = vld [vmem:[#allocation2 + $0x4] sm:$0xf] }
  0xba   : > { %v1437_v28 = vor.u32 %v1436_v58, %v1432_v36  ;;  %v1427_v32 = vor.u32 %v1426_v33, %v1423_v21  ;;  %v525_v25 = vrot.slane %v4059_v48, 4  ;;  %v1442_v41 = vrot.slane %v1440_v50, 5  ;;  %v2049_v49 = vld [vmem:[#allocation2 + $0x8] sm:$0x1]  ;;  %v2052_v21 = vld [vmem:[#allocation2 + $0x14] sm:$0x1] }
  0xbb   : > { %v938_v38 = vpop.permute.xlu1 %937  ;;  %v936_v39 = vpop.permute.xlu0 %935  ;;  %v4500_v0 = vsel %vm4364_vm11, %v1404_v18, %v1408_v42  ;;  %v2157_v12 = vrot.slane %v2049_v49, 5  ;;  %v2050_v33 = vld [vmem:[#allocation2 + $0xc] sm:$0xe]  ;;  %v2054_v50 = vld [vmem:[#allocation2 + $0x1c] sm:$0xf] }
  0xbc   : > { %1021 = vst.msk [vmem:[#allocation3 + $0x34] sm:$0xf] %vm1007_vm8, %v938_v38  ;;  %1020 = vst.msk [vmem:[#allocation3 + $0x30] sm:$0xf] %vm1007_vm8, %v936_v39  ;;  %v4504_v39 = vsel %vm4364_vm11, %v1414_v2, %v1418_v29  ;;  %v1438_v48 = vrot.slane %v1437_v28, 4  ;;  %v1428_v16 = vrot.slane %v1427_v32, 4  ;;  %v760_v62 = vsel %vm4183_vm7, %v525_v25, %v759_v45 }
  0xbd   : > { %1626 = vrot.lane.b32.xlu1 %v4438_v20, %s3802_s22  ;;  %1624 = vrot.lane.b32.xlu0 %v4443_v26, %s3802_s22  ;;  %761 = vst [vmem:[#allocation2 + $0x74] sm:$0x1] %v760_v62  ;;  %v2164_v2 = vrot.slane %v2052_v21, 5  ;;  %v3431_v18 = vrot.slane %v2050_v33, 9  ;;  %v3771_v32 = vld [vmem:[%s5359_s1 + $0x18] sm:$0xff]   ;;  %v559_v33 = vrot.slane %v4099_v24, 4 }
  0xbe   : > { %v4516_v42 = vsel %vm4364_vm11, %v1438_v48, %v1442_v41  ;;  %v4520_v7 = vsel %vm4364_vm11, %v1428_v16, %v1432_v36  ;;  %v2055_v16 = vld [vmem:[#allocation2 + $0x20] sm:$0x1]  ;;  %v2053_v45 = vld [vmem:[#allocation2 + $0x18] sm:$0xe]  ;;  %v2056_v49 = vld [vmem:[#allocation2 + $0x24] sm:$0xe] }
  0xbf   : > { %v942_v63 = vpop.permute.xlu1 %941  ;;  %v940_v4 = vpop.permute.xlu0 %939  ;;  %v2171_v62 = vrot.slane %v2055_v16, 5  ;;  %v773_v24 = vld [vmem:[#allocation2 + $0x8c] sm:$0x1]  ;;  %v2059_v16 = vld [vmem:[#allocation2 + $0x30] sm:$0xe] }
  0xc0   : > { %1023 = vst.msk [vmem:[#allocation3 + $0x3c] sm:$0xf] %vm1007_vm8, %v942_v63  ;;  %1022 = vst.msk [vmem:[#allocation3 + $0x38] sm:$0xf] %vm1007_vm8, %v940_v4  ;;  %v2154_v63 = vrot.slane %v2048_v52, 5 }
  0xc1   : > { %1630 = vrot.lane.b32.xlu1 %v4447_v34, %s3802_s22  ;;  %1628 = vrot.lane.b32.xlu0 %v4459_v19, %s3802_s22  ;;  %v2047_v4 = vld [vmem:[#allocation2] sm:$0xe] }
  0xc2   : > { %v3430_v53 = vrot.slane %v2047_v4, 9  ;;  %v2156_v60 = vrot.slane %v2154_v63, 4  ;;  %v2058_v4 = vld [vmem:[#allocation2 + $0x2c] sm:$0x1] }
  0xc3   : > { %v946_v54 = vpop.permute.xlu1 %945  ;;  %v944_v59 = vpop.permute.xlu0 %943 }
  0xc4   : > { %1025 = vst.msk [vmem:[#allocation3 + $0x44] sm:$0xf] %vm1007_vm8, %v946_v54  ;;  %1024 = vst.msk [vmem:[#allocation3 + $0x40] sm:$0xf] %vm1007_vm8, %v944_v59  ;;  %v3770_v54 = vld [vmem:[%s5359_s1 + $0x20] ss:$0 sps:$4 sm:$0xff]   ;;  %v2158_v59 = vsel %vm4546_vm14, %v2156_v60, %v2157_v12 }
  0xc5   : > { %1634 = vrot.lane.b32.xlu1 %v4465_v15, %s3802_s22  ;;  %1632 = vrot.lane.b32.xlu0 %v4470_v44, %s3802_s22 }
  0xc6   : > { %3751 = vmatprep.subr.msk.bf16.mxu0 %vm2868_vm15, %v3770_v54  ;;  %3752 = vmatprep.subr.msk.bf16.mxu1 %vm2868_vm15, %v3770_v54 }
  0xc7   : > { %v950_v35 = vpop.permute.xlu1 %949  ;;  %v948_v38 = vpop.permute.xlu0 %947 }
  0xc8   : > { %1027 = vst.msk [vmem:[#allocation3 + $0x4c] sm:$0xf] %vm1007_vm8, %v950_v35  ;;  %1026 = vst.msk [vmem:[#allocation3 + $0x48] sm:$0xf] %vm1007_vm8, %v948_v38  ;;  %v2168_v38 = vrot.slane %v2054_v50, 5 }
  0xc9   : > { %1638 = vrot.lane.b32.xlu1 %v4484_v6, %s3802_s22  ;;  %1636 = vrot.lane.b32.xlu0 %v4489_v3, %s3802_s22 }
  0xcb   : > { %v954_v43 = vpop.permute.xlu1 %953  ;;  %v952_v10 = vpop.permute.xlu0 %951 }
  0xcc   : > { %1029 = vst.msk [vmem:[#allocation3 + $0x54] sm:$0xf] %vm1007_vm8, %v954_v43  ;;  %1028 = vst.msk [vmem:[#allocation3 + $0x50] sm:$0xf] %vm1007_vm8, %v952_v10  ;;  %v3772_v43 = vld [vmem:[%s5359_s1 + $0x10] sm:$0xff]   ;;  %v2170_v10 = vrot.slane %v2168_v38, 4 }
  0xcd   : > { %1642 = vrot.lane.b32.xlu1 %v4504_v39, %s3802_s22  ;;  %1640 = vrot.lane.b32.xlu0 %v4500_v0, %s3802_s22 }
  0xce   : > { %v4591_v52 = vsel %vm4546_vm14, %v2170_v10, %v2171_v62  ;;  %v3434_v10 = vrot.slane %v2059_v16, 9  ;;  %v2070_v16 = vld [vmem:[#allocation2 + $0x5c] sm:$0x1] }
  0xcf   : > { %v958_v8 = vpop.permute.xlu1 %957  ;;  %v956_v46 = vpop.permute.xlu0 %955 }
  0xd0   : > { %1031 = vst.msk [vmem:[#allocation3 + $0x5c] sm:$0xf] %vm1007_vm8, %v958_v8  ;;  %1030 = vst.msk [vmem:[#allocation3 + $0x58] sm:$0xf] %vm1007_vm8, %v956_v46  ;;  %v3432_v8 = vrot.slane %v2053_v45, 9 }
  0xd1   : > { %1646 = vrot.lane.b32.xlu1 %v4516_v42, %s3802_s22  ;;  %1644 = vrot.lane.b32.xlu0 %v4520_v7, %s3802_s22 }
  0xd3   : > { %v962_v11 = vpop.permute.xlu1 %961  ;;  %v960_v14 = vpop.permute.xlu0 %959 }
  0xd4   : > { %1033 = vst.msk [vmem:[#allocation3 + $0x64] sm:$0xf] %vm1007_vm8, %v962_v11  ;;  %1032 = vst.msk [vmem:[#allocation3 + $0x60] sm:$0xf] %vm1007_vm8, %v960_v14  ;;  %v2057_v14 = vld [vmem:[#allocation2 + $0x28] sm:$0xf] }
  0xd5   : > { %1767 = vrot.lane.b32.xlu1 %v4397_v30, %s3803_s23  ;;  %1765 = vrot.lane.b32.xlu0 %v4402_v31, %s3803_s23  ;;  %v2051_v31 = vld [vmem:[#allocation2 + $0x10] sm:$0xf] }
  0xd6   : > { %v2161_v36 = vrot.slane %v2051_v31, 5  ;;  %v3774_v31 = vld [vmem:[%s5359_s1] sm:$0xff]  }
  0xd7   : > { %v966_v13 = vpop.permute.xlu1 %965  ;;  %v964_v51 = vpop.permute.xlu0 %963 }
  0xd8   : > { %1035 = vst.msk [vmem:[#allocation3 + $0x6c] sm:$0xf] %vm1007_vm8, %v966_v13  ;;  %1034 = vst.msk [vmem:[#allocation3 + $0x68] sm:$0xf] %vm1007_vm8, %v964_v51  ;;  %v2163_v9 = vrot.slane %v2161_v36, 4  ;;  %v2162_v35 = vsel %vm4546_vm14, %v3431_v18, %v2161_v36  ;;  %v3773_v13 = vld [vmem:[%s5359_s1 + $0x8] sm:$0xff]  }
  0xd9   : > { %1771 = vrot.lane.b32.xlu1 %v4420_v22, %s3803_s23  ;;  %1769 = vrot.lane.b32.xlu0 %v4425_v23, %s3803_s23  ;;  %v542_v51 = vrot.slane %v4078_v1, 4  ;;  %v2178_v36 = vrot.slane %v2058_v4, 5  ;;  %v2062_v4 = vld [vmem:[#allocation2 + $0x3c] sm:$0xe] }
  0xda   : > { %v2165_v25 = vsel %vm4546_vm14, %v2163_v9, %v2164_v2  ;;  %v774_v9 = vsel %vm4183_vm7, %v559_v33, %v773_v24 }
  0xdb   : > { %v970_v5 = vpop.permute.xlu1 %969  ;;  %v968_v30 = vpop.permute.xlu0 %967  ;;  %775 = vst [vmem:[#allocation2 + $0x8c] sm:$0x1] %v774_v9 }
  0xdc   : > { %1037 = vst.msk [vmem:[#allocation3 + $0x74] sm:$0xf] %vm1007_vm8, %v970_v5  ;;  %1036 = vst.msk [vmem:[#allocation3 + $0x70] sm:$0xf] %vm1007_vm8, %v968_v30  ;;  %v2175_v5 = vrot.slane %v2057_v14, 5 }
  0xdd   : > { %1920 = vrot.lane.b32.xlu1 %v4420_v22, %s3804_s24  ;;  %1918 = vrot.lane.b32.xlu0 %v4425_v23, %s3804_s24  ;;  %v2155_v22 = vsel %vm4546_vm14, %v3430_v53, %v2154_v63  ;;  %v2870_v23 = vsel %vm2868_vm15, %v3770_v54, 0  ;;  %v4595_v63 = vsel %vm4546_vm14, %v3432_v8, %v2168_v38  ;;  %v766_v53 = vld [vmem:[#allocation2 + $0x80] sm:$0x1]  ;;  %v2060_v38 = vld [vmem:[#allocation2 + $0x34] sm:$0xf] }
  0xde   : > { %3700 = vmatpush3.bf16.msra.mxu0 %v2870_v23  ;;  %3746 = vmatpush3.bf16.msra.mxu1 %v2870_v23  ;;  %v767_v60 = vsel %vm4183_vm7, %v542_v51, %v766_v53  ;;  %v2177_v12 = vrot.slane %v2175_v5, 4  ;;  %v576_v53 = vrot.slane %v4127_v61, 4 }
  0xdf   : > { %v974_v37 = vpop.permute.xlu1 %973  ;;  %v972_v58 = vpop.permute.xlu0 %971  ;;  %3701 = vmatprep.subr.bf16.mxu0 %v3771_v32  ;;  %3742 = vmatprep.subr.bf16.mxu1 %v3771_v32  ;;  %768 = vst [vmem:[#allocation2 + $0x80] sm:$0x1] %v767_v60 }
  0xe0   : > { %1039 = vst.msk [vmem:[#allocation3 + $0x7c] sm:$0xf] %vm1007_vm8, %v974_v37  ;;  %1038 = vst.msk [vmem:[#allocation3 + $0x78] sm:$0xf] %vm1007_vm8, %v972_v58  ;;  %v3433_v37 = vrot.slane %v2056_v49, 9  ;;  %v2179_v54 = vsel %vm4546_vm14, %v2177_v12, %v2178_v36  ;;  %vm2819_vm8 = vcmask 588800  }
  0xe1   : > { %1924 = vrot.lane.b32.xlu1 %v4438_v20, %s3804_s24  ;;  %1922 = vrot.lane.b32.xlu0 %v4443_v26, %s3804_s24 }
  0xe2   : > { %3702 = vmatpush3.bf16.msra.mxu0 %v3771_v32  ;;  %3747 = vmatpush3.bf16.msra.mxu1 %v3771_v32 }
  0xe3   : > { %v1045_v29 = vpop.permute.xlu1 %1044  ;;  %v1043_v28 = vpop.permute.xlu0 %1042  ;;  %3703 = vmatprep.subr.bf16.mxu0 %v3772_v43  ;;  %3743 = vmatprep.subr.bf16.mxu1 %v3772_v43 }
  0xe4   : > { %1140 = vst.msk [vmem:[#allocation3 + $0x4] sm:$0xf] %vm1138_vm0, %v1045_v29  ;;  %1139 = vst.msk [vmem:[#allocation3] sm:$0xf] %vm1138_vm0, %v1043_v28 }
  0xe5   : > { %2266 = vrot.lane.b32.xlu1 %v2158_v59, %s3805_s29  ;;  %2264 = vrot.lane.b32.xlu0 %v2155_v22, %s3805_s29  ;;  %v2176_v22 = vsel %vm4546_vm14, %v3433_v37, %v2175_v5  ;;  %v780_v37 = vld [vmem:[#allocation2 + $0x98] sm:$0x1] }
  0xe6   : > { %3704 = vmatpush3.bf16.msra.mxu0 %v3772_v43  ;;  %3748 = vmatpush3.bf16.msra.mxu1 %v3772_v43 }
  0xe7   : > { %v1049_v48 = vpop.permute.xlu1 %1048  ;;  %v1047_v41 = vpop.permute.xlu0 %1046  ;;  %3705 = vmatprep.subr.bf16.mxu0 %v3773_v13  ;;  %3744 = vmatprep.subr.bf16.mxu1 %v3773_v13 }
  0xe8   : > { %1142 = vst.msk [vmem:[#allocation3 + $0xc] sm:$0xf] %vm1138_vm0, %v1049_v48  ;;  %1141 = vst.msk [vmem:[#allocation3 + $0x8] sm:$0xf] %vm1138_vm0, %v1047_v41  ;;  %v2061_v41 = vld [vmem:[#allocation2 + $0x38] sm:$0x1] }
  0xe9   : > { %2270 = vrot.lane.b32.xlu1 %v2165_v25, %s3805_s29  ;;  %2268 = vrot.lane.b32.xlu0 %v2162_v35, %s3805_s29  ;;  %v2185_v43 = vrot.slane %v2061_v41, 5 }
  0xea   : > { %3706 = vmatpush3.bf16.msra.mxu0 %v3773_v13  ;;  %3749 = vmatpush3.bf16.msra.mxu1 %v3773_v13 }
  0xeb   : > { %v1053_v46 = vpop.permute.xlu1 %1052  ;;  %v1051_v11 = vpop.permute.xlu0 %1050  ;;  %3707 = vmatprep.subr.bf16.mxu0 %v3774_v31  ;;  %3745 = vmatprep.subr.bf16.mxu1 %v3774_v31 }
  0xec   : > { %1144 = vst.msk [vmem:[#allocation3 + $0x14] sm:$0xf] %vm1138_vm0, %v1053_v46  ;;  %1143 = vst.msk [vmem:[#allocation3 + $0x10] sm:$0xf] %vm1138_vm0, %v1051_v11  ;;  %v2063_v46 = vld [vmem:[#allocation2 + $0x40] sm:$0xf] }
  0xed   : > { %2405 = vrot.lane.b32.xlu1 %v2165_v25, %s3806_s7  ;;  %2403 = vrot.lane.b32.xlu0 %v2162_v35, %s3806_s7  ;;  %v2189_v13 = vrot.slane %v2063_v46, 5 }
  0xee   : > { %3708 = vmatpush3.bf16.msra.mxu0 %v3774_v31  ;;  %3750 = vmatpush3.bf16.msra.mxu1 %v3774_v31 }
  0xef   : > { %v1057_v1 = vpop.permute.xlu1 %1056  ;;  %v1055_v30 = vpop.permute.xlu0 %1054  ;;  %v2191_v5 = vrot.slane %v2189_v13, 4 }
  0xf0   : > { %1146 = vst.msk [vmem:[#allocation3 + $0x1c] sm:$0xf] %vm1138_vm0, %v1057_v1  ;;  %1145 = vst.msk [vmem:[#allocation3 + $0x18] sm:$0xf] %vm1138_vm0, %v1055_v30  ;;  %v3435_v30 = vrot.slane %v2062_v4, 9 }
  0xf1   : > { %2409 = vrot.lane.b32.xlu1 %v4591_v52, %s3806_s7  ;;  %2407 = vrot.lane.b32.xlu0 %v4595_v63, %s3806_s7 }
  0xf2   : > { %v4690_v12 = vsel %vm4546_vm14, %v3435_v30, %v2189_v13  ;;  %v1199_v13 = vld [vmem:[#allocation2 + $0x70] sm:$0xf] }
  0xf3   : > { %v1061_v58 = vpop.permute.xlu1 %1060  ;;  %v1059_v21 = vpop.permute.xlu0 %1058  ;;  %v1454_v4 = vshll.u32 %v1199_v13, 16 }
  0xf4   : > { %1148 = vst.msk [vmem:[#allocation3 + $0x24] sm:$0xf] %vm1138_vm0, %v1061_v58  ;;  %1147 = vst.msk [vmem:[#allocation3 + $0x20] sm:$0xf] %vm1138_vm0, %v1059_v21  ;;  %v781_v58 = vsel %vm4183_vm7, %v576_v53, %v780_v37 }
  0xf5   : > { %2544 = vrot.lane.b32.xlu1 %v4591_v52, %s3807_s10  ;;  %2542 = vrot.lane.b32.xlu0 %v4595_v63, %s3807_s10  ;;  %782 = vst [vmem:[#allocation2 + $0x98] sm:$0x1] %v781_v58  ;;  %v1456_v53 = vrot.slane %v1454_v4, 5  ;;  %v1200_v58 = vld [vmem:[#allocation2 + $0x74] sm:$0x1] }
  0xf7   : > { %v1065_v23 = vpop.permute.xlu1 %1064  ;;  %v1063_v59 = vpop.permute.xlu0 %1062 }
  0xf8   : > { %1150 = vst.msk [vmem:[#allocation3 + $0x2c] sm:$0xf] %vm1138_vm0, %v1065_v23  ;;  %1149 = vst.msk [vmem:[#allocation3 + $0x28] sm:$0xf] %vm1138_vm0, %v1063_v59  ;;  %v787_v59 = vld [vmem:[#allocation2 + $0xa4] sm:$0x1] }
  0xf9   : > { %2548 = vrot.lane.b32.xlu1 %v2179_v54, %s3807_s10  ;;  %2546 = vrot.lane.b32.xlu0 %v2176_v22, %s3807_s10 }
  0xfb   : > { %v1069_v2 = vpop.permute.xlu1 %1068  ;;  %v1067_v18 = vpop.permute.xlu0 %1066 }
  0xfc   : > { %1152 = vst.msk [vmem:[#allocation3 + $0x34] sm:$0xf] %vm1138_vm0, %v1069_v2  ;;  %1151 = vst.msk [vmem:[#allocation3 + $0x30] sm:$0xf] %vm1138_vm0, %v1067_v18 }
  0xfd   : > { %1775 = vrot.lane.b32.xlu1 %v4438_v20, %s3803_s23  ;;  %1773 = vrot.lane.b32.xlu0 %v4443_v26, %s3803_s23 }
  0xff   : > { %v1073_v29 = vpop.permute.xlu1 %1072  ;;  %v1071_v28 = vpop.permute.xlu0 %1070 }
 0x100   : > { %1154 = vst.msk [vmem:[#allocation3 + $0x3c] sm:$0xf] %vm1138_vm0, %v1073_v29  ;;  %1153 = vst.msk [vmem:[#allocation3 + $0x38] sm:$0xf] %vm1138_vm0, %v1071_v28  ;;  %v2066_v29 = vld [vmem:[#allocation2 + $0x4c] sm:$0xf] }
 0x101   : > { %1779 = vrot.lane.b32.xlu1 %v4447_v34, %s3803_s23  ;;  %1777 = vrot.lane.b32.xlu0 %v4459_v19, %s3803_s23 }
 0x103   : > { %v1077_v50 = vpop.permute.xlu1 %1076  ;;  %v1075_v32 = vpop.permute.xlu0 %1074 }
 0x104   : > { %1156 = vst.msk [vmem:[#allocation3 + $0x44] sm:$0xf] %vm1138_vm0, %v1077_v50  ;;  %1155 = vst.msk [vmem:[#allocation3 + $0x40] sm:$0xf] %vm1138_vm0, %v1075_v32  ;;  %v2067_v50 = vld [vmem:[#allocation2 + $0x50] sm:$0x1] }
 0x105   : > { %1928 = vrot.lane.b32.xlu1 %v4447_v34, %s3804_s24  ;;  %1926 = vrot.lane.b32.xlu0 %v4459_v19, %s3804_s24  ;;  %v2182_v34 = vrot.slane %v2060_v38, 5  ;;  %v2065_v32 = vld [vmem:[#allocation2 + $0x48] sm:$0xe] }
 0x107   : > { %v1081_v20 = vpop.permute.xlu1 %1080  ;;  %v1079_v26 = vpop.permute.xlu0 %1078  ;;  %v2184_v45 = vrot.slane %v2182_v34, 4  ;;  %v4669_v14 = vsel %vm4546_vm14, %v3434_v10, %v2182_v34 }
 0x108   : > { %1158 = vst.msk [vmem:[#allocation3 + $0x4c] sm:$0xf] %vm1138_vm0, %v1081_v20  ;;  %1157 = vst.msk [vmem:[#allocation3 + $0x48] sm:$0xf] %vm1138_vm0, %v1079_v26  ;;  %v2199_v26 = vrot.slane %v2067_v50, 5 }
 0x109   : > { %1932 = vrot.lane.b32.xlu1 %v4465_v15, %s3804_s24  ;;  %1930 = vrot.lane.b32.xlu0 %v4470_v44, %s3804_s24  ;;  %v4665_v11 = vsel %vm4546_vm14, %v2184_v45, %v2185_v43  ;;  %v2068_v45 = vld [vmem:[#allocation2 + $0x54] sm:$0xe] }
 0x10a   : > { %v3437_v46 = vrot.slane %v2068_v45, 9 }
 0x10b   : > { %v1085_v25 = vpop.permute.xlu1 %1084  ;;  %v1083_v35 = vpop.permute.xlu0 %1082 }
 0x10c   : > { %1160 = vst.msk [vmem:[#allocation3 + $0x54] sm:$0xf] %vm1138_vm0, %v1085_v25  ;;  %1159 = vst.msk [vmem:[#allocation3 + $0x50] sm:$0xf] %vm1138_vm0, %v1083_v35  ;;  %v3436_v25 = vrot.slane %v2065_v32, 9 }
 0x10d   : > { %2274 = vrot.lane.b32.xlu1 %v4591_v52, %s3805_s29  ;;  %2272 = vrot.lane.b32.xlu0 %v4595_v63, %s3805_s29  ;;  %v2064_v63 = vld [vmem:[#allocation2 + $0x44] sm:$0x1]  ;;  %v2069_v35 = vld [vmem:[#allocation2 + $0x58] sm:$0xf] }
 0x10e   : > { %v2192_v1 = vrot.slane %v2064_v63, 5 }
 0x10f   : > { %v1089_v19 = vpop.permute.xlu1 %1088  ;;  %v1087_v48 = vpop.permute.xlu0 %1086 }
 0x110   : > { %1162 = vst.msk [vmem:[#allocation3 + $0x5c] sm:$0xf] %vm1138_vm0, %v1089_v19  ;;  %1161 = vst.msk [vmem:[#allocation3 + $0x58] sm:$0xf] %vm1138_vm0, %v1087_v48  ;;  %v4686_v60 = vsel %vm4546_vm14, %v2191_v5, %v2192_v1  ;;  %v2203_v19 = vrot.slane %v2069_v35, 5  ;;  %v1458_v5 = vshrl.u32 %v1199_v13, 16 }
 0x111   : > { %2278 = vrot.lane.b32.xlu1 %v2179_v54, %s3805_s29  ;;  %2276 = vrot.lane.b32.xlu0 %v2176_v22, %s3805_s29 }
 0x112   : > { %v4771_v63 = vsel %vm4546_vm14, %v3437_v46, %v2203_v19 }
 0x113   : > { %v1093_v62 = vpop.permute.xlu1 %1092  ;;  %v1091_v8 = vpop.permute.xlu0 %1090 }
 0x114   : > { %1164 = vst.msk [vmem:[#allocation3 + $0x64] sm:$0xf] %vm1138_vm0, %v1093_v62  ;;  %1163 = vst.msk [vmem:[#allocation3 + $0x60] sm:$0xf] %vm1138_vm0, %v1091_v8  ;;  %v2205_v62 = vrot.slane %v2203_v19, 4  ;;  %v2206_v8 = vrot.slane %v2070_v16, 5 }
 0x115   : > { %2413 = vrot.lane.b32.xlu1 %v2179_v54, %s3806_s7  ;;  %2411 = vrot.lane.b32.xlu0 %v2176_v22, %s3806_s7  ;;  %v593_v54 = vrot.slane %v4143_v27, 4 }
 0x117   : > { %v1097_v51 = vpop.permute.xlu1 %1096  ;;  %v1095_v52 = vpop.permute.xlu0 %1094  ;;  %v788_v27 = vsel %vm4183_vm7, %v593_v54, %v787_v59  ;;  %v1464_v54 = vshll.u32 %v1200_v58, 16  ;;  %v1205_v58 = vld [vmem:[#allocation2 + $0x88] sm:$0xf] }
 0x118   : > { %1166 = vst.msk [vmem:[#allocation3 + $0x6c] sm:$0xf] %vm1138_vm0, %v1097_v51  ;;  %1165 = vst.msk [vmem:[#allocation3 + $0x68] sm:$0xf] %vm1138_vm0, %v1095_v52  ;;  %v1198_v51 = vld [vmem:[#allocation2 + $0x6c] sm:$0xf]  ;;  %v4767_v52 = vsel %vm4546_vm14, %v2205_v62, %v2206_v8 }
 0x119   : > { %2417 = vrot.lane.b32.xlu1 %v4665_v11, %s3806_s7  ;;  %2415 = vrot.lane.b32.xlu0 %v4669_v14, %s3806_s7  ;;  %789 = vst [vmem:[#allocation2 + $0xa4] sm:$0x1] %v788_v27  ;;  %v1445_v1 = vshrl.u32 %v1198_v51, 16  ;;  %v1448_v30 = vshll.u32 %v1198_v51, 16  ;;  %v794_v27 = vld [vmem:[#allocation2 + $0xb0] sm:$0x1] }
 0x11a   : > { %v1201_v62 = vld [vmem:[#allocation2 + $0x78] sm:$0xf] }
 0x11b   : > { %v1101_v49 = vpop.permute.xlu1 %1100  ;;  %v1099_v31 = vpop.permute.xlu0 %1098 }
 0x11c   : > { %1168 = vst.msk [vmem:[#allocation3 + $0x74] sm:$0xf] %vm1138_vm0, %v1101_v49  ;;  %1167 = vst.msk [vmem:[#allocation3 + $0x70] sm:$0xf] %vm1138_vm0, %v1099_v31 }
 0x11d   : > { %2552 = vrot.lane.b32.xlu1 %v4665_v11, %s3807_s10  ;;  %2550 = vrot.lane.b32.xlu0 %v4669_v14, %s3807_s10 }
 0x11f   : > { %v1105_v36 = vpop.permute.xlu1 %1104  ;;  %v1103_v61 = vpop.permute.xlu0 %1102 }
 0x120   : > { %1170 = vst.msk [vmem:[#allocation3 + $0x7c] sm:$0xf] %vm1138_vm0, %v1105_v36  ;;  %1169 = vst.msk [vmem:[#allocation3 + $0x78] sm:$0xf] %vm1138_vm0, %v1103_v61  ;;  %v1450_v36 = vrot.slane %v1448_v30, 5 }
 0x121   : > { %2556 = vrot.lane.b32.xlu1 %v4686_v60, %s3807_s10  ;;  %2554 = vrot.lane.b32.xlu0 %v4690_v12, %s3807_s10 }
 0x123   : > { %v1615_v21 = vpop.permute.xlu1 %1614  ;;  %v1613_v33 = vpop.permute.xlu0 %1612 }
 0x124   : > { %1710 = vst.msk [vmem:[#allocation3 + $0x4] sm:$0xf] %vm1708_vm1, %v1615_v21  ;;  %1709 = vst.msk [vmem:[#allocation3] sm:$0xf] %vm1708_vm1, %v1613_v33  ;;  %v610_v21 = vrot.slane %v4162_v47, 4 }
 0x125   : > { %1783 = vrot.lane.b32.xlu1 %v4465_v15, %s3803_s23  ;;  %1781 = vrot.lane.b32.xlu0 %v4470_v44, %s3803_s23 }
 0x126   : > { %v795_v47 = vsel %vm4183_vm7, %v610_v21, %v794_v27  ;;  %v1204_v21 = vld [vmem:[#allocation2 + $0x84] sm:$0xf] }
 0x127   : > { %v1619_v22 = vpop.permute.xlu1 %1618  ;;  %v1617_v23 = vpop.permute.xlu0 %1616  ;;  %796 = vst [vmem:[#allocation2 + $0xb0] sm:$0x1] %v795_v47  ;;  %v1502_v47 = vshll.u32 %v1205_v58, 16 }
 0x128   : > { %1712 = vst.msk [vmem:[#allocation3 + $0xc] sm:$0xf] %vm1708_vm1, %v1619_v22  ;;  %1711 = vst.msk [vmem:[#allocation3 + $0x8] sm:$0xf] %vm1708_vm1, %v1617_v23 }
 0x129   : > { %1787 = vrot.lane.b32.xlu1 %v4484_v6, %s3803_s23  ;;  %1785 = vrot.lane.b32.xlu0 %v4489_v3, %s3803_s23 }
 0x12b   : > { %v1623_v15 = vpop.permute.xlu1 %1622  ;;  %v1621_v24 = vpop.permute.xlu0 %1620 }
 0x12c   : > { %1714 = vst.msk [vmem:[#allocation3 + $0x14] sm:$0xf] %vm1708_vm1, %v1623_v15  ;;  %1713 = vst.msk [vmem:[#allocation3 + $0x10] sm:$0xf] %vm1708_vm1, %v1621_v24 }
 0x12d   : > { %1936 = vrot.lane.b32.xlu1 %v4484_v6, %s3804_s24  ;;  %1934 = vrot.lane.b32.xlu0 %v4489_v3, %s3804_s24  ;;  %v2196_v6 = vrot.slane %v2066_v29, 5 }
 0x12f   : > { %v1627_v44 = vpop.permute.xlu1 %1626  ;;  %v1625_v9 = vpop.permute.xlu0 %1624  ;;  %v2198_v20 = vrot.slane %v2196_v6, 4  ;;  %v4751_v41 = vsel %vm4546_vm14, %v3436_v25, %v2196_v6  ;;  %v801_v6 = vld [vmem:[#allocation2 + $0xbc] sm:$0x1]  ;;  %v2071_v25 = vld [vmem:[#allocation2 + $0x60] sm:$0xe] }
 0x130   : > { %1716 = vst.msk [vmem:[#allocation3 + $0x1c] sm:$0xf] %vm1708_vm1, %v1627_v44  ;;  %1715 = vst.msk [vmem:[#allocation3 + $0x18] sm:$0xf] %vm1708_vm1, %v1625_v9  ;;  %v627_v9 = vrot.slane %v4196_v40, 4 }
 0x131   : > { %1940 = vrot.lane.b32.xlu1 %v4504_v39, %s3804_s24  ;;  %1938 = vrot.lane.b32.xlu0 %v4500_v0, %s3804_s24  ;;  %v4747_v48 = vsel %vm4546_vm14, %v2198_v20, %v2199_v26  ;;  %v2073_v26 = vld [vmem:[#allocation2 + $0x68] sm:$0x1] }
 0x133   : > { %v1631_v2 = vpop.permute.xlu1 %1630  ;;  %v1629_v18 = vpop.permute.xlu0 %1628 }
 0x134   : > { %1718 = vst.msk [vmem:[#allocation3 + $0x24] sm:$0xf] %vm1708_vm1, %v1631_v2  ;;  %1717 = vst.msk [vmem:[#allocation3 + $0x20] sm:$0xf] %vm1708_vm1, %v1629_v18 }
 0x135   : > { %2282 = vrot.lane.b32.xlu1 %v4665_v11, %s3805_s29  ;;  %2280 = vrot.lane.b32.xlu0 %v4669_v14, %s3805_s29 }
 0x137   : > { %v1635_v3 = vpop.permute.xlu1 %1634  ;;  %v1633_v28 = vpop.permute.xlu0 %1632 }
 0x138   : > { %1720 = vst.msk [vmem:[#allocation3 + $0x2c] sm:$0xf] %vm1708_vm1, %v1635_v3  ;;  %1719 = vst.msk [vmem:[#allocation3 + $0x28] sm:$0xf] %vm1708_vm1, %v1633_v28  ;;  %v2072_v28 = vld [vmem:[#allocation2 + $0x64] sm:$0xf] }
 0x139   : > { %2286 = vrot.lane.b32.xlu1 %v4686_v60, %s3805_s29  ;;  %2284 = vrot.lane.b32.xlu0 %v4690_v12, %s3805_s29  ;;  %v2210_v50 = vrot.slane %v2072_v28, 5 }
 0x13b   : > { %v1639_v38 = vpop.permute.xlu1 %1638  ;;  %v1637_v34 = vpop.permute.xlu0 %1636  ;;  %v2212_v35 = vrot.slane %v2210_v50, 4 }
 0x13c   : > { %1722 = vst.msk [vmem:[#allocation3 + $0x34] sm:$0xf] %vm1708_vm1, %v1639_v38  ;;  %1721 = vst.msk [vmem:[#allocation3 + $0x30] sm:$0xf] %vm1708_vm1, %v1637_v34  ;;  %v2213_v38 = vrot.slane %v2073_v26, 5  ;;  %v3438_v34 = vrot.slane %v2071_v25, 9 }
 0x13d   : > { %2421 = vrot.lane.b32.xlu1 %v4686_v60, %s3806_s7  ;;  %2419 = vrot.lane.b32.xlu0 %v4690_v12, %s3806_s7  ;;  %v1460_v60 = vrot.slane %v1458_v5, 4  ;;  %v1447_v12 = vrot.slane %v1445_v1, 4 }
 0x13e   : > { %v4837_v16 = vsel %vm4546_vm14, %v2212_v35, %v2213_v38  ;;  %v4841_v45 = vsel %vm4546_vm14, %v3438_v34, %v2210_v50 }
 0x13f   : > { %v1643_v43 = vpop.permute.xlu1 %1642  ;;  %v1641_v10 = vpop.permute.xlu0 %1640  ;;  %v1461_v33 = vor.u32 %v1460_v60, %v1456_v53  ;;  %v1451_v22 = vor.u32 %v1450_v36, %v1447_v12 }
 0x140   : > { %1724 = vst.msk [vmem:[#allocation3 + $0x3c] sm:$0xf] %vm1708_vm1, %v1643_v43  ;;  %1723 = vst.msk [vmem:[#allocation3 + $0x38] sm:$0xf] %vm1708_vm1, %v1641_v10  ;;  %v1202_v10 = vld [vmem:[#allocation2 + $0x7c] sm:$0xf] }
 0x141   : > { %2425 = vrot.lane.b32.xlu1 %v4747_v48, %s3806_s7  ;;  %2423 = vrot.lane.b32.xlu0 %v4751_v41, %s3806_s7  ;;  %v1452_v15 = vrot.slane %v1451_v22, 4  ;;  %v1478_v13 = vshll.u32 %v1202_v10, 16  ;;  %v1482_v51 = vshrl.u32 %v1202_v10, 16 }
 0x143   : > { %v1647_v11 = vpop.permute.xlu1 %1646  ;;  %v1645_v14 = vpop.permute.xlu0 %1644  ;;  %v4807_v18 = vsel %vm4364_vm11, %v1452_v15, %v1456_v53  ;;  %v1484_v53 = vrot.slane %v1482_v51, 4  ;;  %v1496_v15 = vshll.u32 %v1204_v21, 16 }
 0x144   : > { %1726 = vst.msk [vmem:[#allocation3 + $0x44] sm:$0xf] %vm1708_vm1, %v1647_v11  ;;  %1725 = vst.msk [vmem:[#allocation3 + $0x40] sm:$0xf] %vm1708_vm1, %v1645_v14  ;;  %v2076_v11 = vld [vmem:[#allocation2 + $0x74] sm:$0x1] }
 0x145   : > { %2560 = vrot.lane.b32.xlu1 %v4747_v48, %s3807_s10  ;;  %2558 = vrot.lane.b32.xlu0 %v4751_v41, %s3807_s10  ;;  %v2074_v14 = vld [vmem:[#allocation2 + $0x6c] sm:$0xe]  ;;  %v2220_v5 = vrot.slane %v2076_v11, 5  ;;  %v1498_v28 = vrot.slane %v1496_v15, 5 }
 0x146   : > { %v3439_v1 = vrot.slane %v2074_v14, 9 }
 0x147   : > { %v1768_v49 = vpop.permute.xlu1 %1767  ;;  %v1766_v31 = vpop.permute.xlu0 %1765 }
 0x148   : > { %1863 = vst.msk [vmem:[#allocation3 + $0x4] sm:$0xf] %vm1861_vm2, %v1768_v49  ;;  %1862 = vst.msk [vmem:[#allocation3] sm:$0xf] %vm1861_vm2, %v1766_v31  ;;  %v1480_v31 = vrot.slane %v1478_v13, 5 }
 0x149   : > { %2564 = vrot.lane.b32.xlu1 %v4767_v52, %s3807_s10  ;;  %2562 = vrot.lane.b32.xlu0 %v4771_v63, %s3807_s10 }
 0x14b   : > { %v1772_v61 = vpop.permute.xlu1 %1771  ;;  %v1770_v37 = vpop.permute.xlu0 %1769 }
 0x14c   : > { %1865 = vst.msk [vmem:[#allocation3 + $0xc] sm:$0xf] %vm1861_vm2, %v1772_v61  ;;  %1864 = vst.msk [vmem:[#allocation3 + $0x8] sm:$0xf] %vm1861_vm2, %v1770_v37  ;;  %v1203_v37 = vld [vmem:[#allocation2 + $0x80] sm:$0x1] }
 0x14d   : > { %1791 = vrot.lane.b32.xlu1 %v4504_v39, %s3803_s23  ;;  %1789 = vrot.lane.b32.xlu0 %v4500_v0, %s3803_s23  ;;  %v1462_v0 = vrot.slane %v1461_v33, 4  ;;  %v1466_v39 = vrot.slane %v1464_v54, 5 }
 0x14f   : > { %v1921_v23 = vpop.permute.xlu1 %1920  ;;  %v1919_v59 = vpop.permute.xlu0 %1918  ;;  %v4803_v2 = vsel %vm4364_vm11, %v1462_v0, %v1466_v39  ;;  %v1506_v0 = vshrl.u32 %v1205_v58, 16  ;;  %v1493_v39 = vshrl.u32 %v1204_v21, 16 }
 0x150   : > { %2016 = vst.msk [vmem:[#allocation3 + $0x4] sm:$0xf] %vm2014_vm3, %v1921_v23  ;;  %2015 = vst.msk [vmem:[#allocation3] sm:$0xf] %vm2014_vm3, %v1919_v59  ;;  %v1485_v23 = vor.u32 %v1484_v53, %v1480_v31  ;;  %v1488_v59 = vshll.u32 %v1203_v37, 16 }
 0x151   : > { %1795 = vrot.lane.b32.xlu1 %v4516_v42, %s3803_s23  ;;  %1793 = vrot.lane.b32.xlu0 %v4520_v7, %s3803_s23  ;;  %v2081_v53 = vld [vmem:[#allocation2 + $0x88] sm:$0xf] }
 0x153   : > { %v1925_v24 = vpop.permute.xlu1 %1924  ;;  %v1923_v44 = vpop.permute.xlu0 %1922 }
 0x154   : > { %2018 = vst.msk [vmem:[#allocation3 + $0xc] sm:$0xf] %vm2014_vm3, %v1925_v24  ;;  %2017 = vst.msk [vmem:[#allocation3 + $0x8] sm:$0xf] %vm2014_vm3, %v1923_v44 }
 0x155   : > { %1944 = vrot.lane.b32.xlu1 %v4516_v42, %s3804_s24  ;;  %1942 = vrot.lane.b32.xlu0 %v4520_v7, %s3804_s24  ;;  %v802_v42 = vsel %vm4183_vm7, %v627_v9, %v801_v6 }
 0x156   : > { %803 = vst [vmem:[#allocation2 + $0xbc] sm:$0x1] %v802_v42  ;;  %v1504_v42 = vrot.slane %v1502_v47, 5 }
 0x157   : > { %v2267_v40 = vpop.permute.xlu1 %2266  ;;  %v2265_v29 = vpop.permute.xlu0 %2264 }
 0x158   : > { %2362 = vst.msk [vmem:[#allocation3 + $0x4] sm:$0xf] %vm2360_vm4, %v2267_v40  ;;  %2361 = vst.msk [vmem:[#allocation3] sm:$0xf] %vm2360_vm4, %v2265_v29  ;;  %v1486_v40 = vrot.slane %v1485_v23, 4  ;;  %v1490_v29 = vrot.slane %v1488_v59, 5 }
 0x159   : > { %1948 = vrot.lane.b32.xlu1 %v4803_v2, %s3804_s24  ;;  %1946 = vrot.lane.b32.xlu0 %v4807_v18, %s3804_s24  ;;  %v1208_v59 = vld [vmem:[#allocation2 + $0x94] sm:$0xf] }
 0x15a   : > { %v4885_v26 = vsel %vm4364_vm11, %v1486_v40, %v1490_v29  ;;  %v1526_v15 = vshll.u32 %v1208_v59, 16 }
 0x15b   : > { %v2271_v7 = vpop.permute.xlu1 %2270  ;;  %v2269_v3 = vpop.permute.xlu0 %2268 }
 0x15c   : > { %2364 = vst.msk [vmem:[#allocation3 + $0xc] sm:$0xf] %vm2360_vm4, %v2271_v7  ;;  %2363 = vst.msk [vmem:[#allocation3 + $0x8] sm:$0xf] %vm2360_vm4, %v2269_v3  ;;  %v1508_v7 = vrot.slane %v1506_v0, 4  ;;  %v1495_v3 = vrot.slane %v1493_v39, 4 }
 0x15d   : > { %2290 = vrot.lane.b32.xlu1 %v4747_v48, %s3805_s29  ;;  %2288 = vrot.lane.b32.xlu0 %v4751_v41, %s3805_s29  ;;  %v2075_v41 = vld [vmem:[#allocation2 + $0x70] sm:$0xf] }
 0x15e   : > { %v2217_v43 = vrot.slane %v2075_v41, 5  ;;  %v1509_v35 = vor.u32 %v1508_v7, %v1504_v42  ;;  %v1499_v34 = vor.u32 %v1498_v28, %v1495_v3  ;;  %v644_v41 = vrot.slane %v4202_v57, 4 }
 0x15f   : > { %v2406_v32 = vpop.permute.xlu1 %2405  ;;  %v2404_v20 = vpop.permute.xlu0 %2403  ;;  %v1528_v3 = vrot.slane %v1526_v15, 5  ;;  %v2083_v15 = vld [vmem:[#allocation2 + $0x90] sm:$0xe] }
 0x160   : > { %2501 = vst.msk [vmem:[#allocation3 + $0x4] sm:$0xf] %vm2499_vm5, %v2406_v32  ;;  %2500 = vst.msk [vmem:[#allocation3] sm:$0xf] %vm2499_vm5, %v2404_v20  ;;  %v2219_v4 = vrot.slane %v2217_v43, 4  ;;  %v4861_v61 = vsel %vm4546_vm14, %v3439_v1, %v2217_v43  ;;  %v1500_v43 = vrot.slane %v1499_v34, 4 }
 0x161   : > { %2294 = vrot.lane.b32.xlu1 %v4767_v52, %s3805_s29  ;;  %2292 = vrot.lane.b32.xlu0 %v4771_v63, %s3805_s29  ;;  %v1206_v20 = vld [vmem:[#allocation2 + $0x8c] sm:$0x1]  ;;  %v2079_v1 = vld [vmem:[#allocation2 + $0x80] sm:$0x1] }
 0x162   : > { %v4857_v36 = vsel %vm4546_vm14, %v2219_v4, %v2220_v5  ;;  %v1512_v38 = vshll.u32 %v1206_v20, 16  ;;  %v4912_v11 = vsel %vm4364_vm11, %v1500_v43, %v1504_v42  ;;  %v1209_v20 = vld [vmem:[#allocation2 + $0x98] sm:$0x1]  ;;  %v1211_v34 = vld [vmem:[#allocation2 + $0xa0] sm:$0xf] }
 0x163   : > { %v2410_v19 = vpop.permute.xlu1 %2409  ;;  %v2408_v48 = vpop.permute.xlu0 %2407  ;;  %v1554_v43 = vshrl.u32 %v1211_v34, 16 }
 0x164   : > { %2503 = vst.msk [vmem:[#allocation3 + $0xc] sm:$0xf] %vm2499_vm5, %v2410_v19  ;;  %2502 = vst.msk [vmem:[#allocation3 + $0x8] sm:$0xf] %vm2499_vm5, %v2408_v48 }
 0x165   : > { %2429 = vrot.lane.b32.xlu1 %v4767_v52, %s3806_s7  ;;  %2427 = vrot.lane.b32.xlu0 %v4771_v63, %s3806_s7  ;;  %v1469_v52 = vshrl.u32 %v1201_v62, 16  ;;  %v1472_v63 = vshll.u32 %v1201_v62, 16 }
 0x167   : > { %v2545_v8 = vpop.permute.xlu1 %2544  ;;  %v2543_v46 = vpop.permute.xlu0 %2542  ;;  %v1471_v60 = vrot.slane %v1469_v52, 4  ;;  %v1474_v12 = vrot.slane %v1472_v63, 5  ;;  %v2078_v52 = vld [vmem:[#allocation2 + $0x7c] sm:$0xf] }
 0x168   : > { %2640 = vst.msk [vmem:[#allocation3 + $0x4] sm:$0xf] %vm2638_vm6, %v2545_v8  ;;  %2639 = vst.msk [vmem:[#allocation3] sm:$0xf] %vm2638_vm6, %v2543_v46  ;;  %v808_v8 = vld [vmem:[#allocation2 + $0xc8] sm:$0x1] }
 0x169   : > { %2433 = vrot.lane.b32.xlu1 %v4837_v16, %s3806_s7  ;;  %2431 = vrot.lane.b32.xlu0 %v4841_v45, %s3806_s7  ;;  %v1475_v27 = vor.u32 %v1474_v12, %v1471_v60  ;;  %v809_v57 = vsel %vm4183_vm7, %v644_v41, %v808_v8  ;;  %v2224_v63 = vrot.slane %v2078_v52, 5  ;;  %v2231_v12 = vrot.slane %v2081_v53, 5 }
 0x16a   : > { %810 = vst [vmem:[#allocation2 + $0xc8] sm:$0x1] %v809_v57  ;;  %v1536_v41 = vshll.u32 %v1209_v20, 16 }
 0x16b   : > { %v2549_v30 = vpop.permute.xlu1 %2548  ;;  %v2547_v49 = vpop.permute.xlu0 %2546  ;;  %v1476_v6 = vrot.slane %v1475_v27, 4  ;;  %v1207_v27 = vld [vmem:[#allocation2 + $0x90] sm:$0xf] }
 0x16c   : > { %2642 = vst.msk [vmem:[#allocation3 + $0xc] sm:$0xf] %vm2638_vm6, %v2549_v30  ;;  %2641 = vst.msk [vmem:[#allocation3 + $0x8] sm:$0xf] %vm2638_vm6, %v2547_v49  ;;  %v2077_v30 = vld [vmem:[#allocation2 + $0x78] sm:$0xe] }
 0x16d   : > { %2568 = vrot.lane.b32.xlu1 %v4837_v16, %s3807_s10  ;;  %2566 = vrot.lane.b32.xlu0 %v4841_v45, %s3807_s10  ;;  %v4889_v25 = vsel %vm4364_vm11, %v1476_v6, %v1480_v31  ;;  %v2226_v49 = vrot.slane %v2224_v63, 4  ;;  %v3440_v31 = vrot.slane %v2077_v30, 9 }
 0x16f   : > { %v1776_v33 = vpop.permute.xlu1 %1775  ;;  %v1774_v54 = vpop.permute.xlu0 %1773  ;;  %v3775_v22 = vld [vmem:[#allocation3] sm:$0xff]   ;;  %v4944_v58 = vsel %vm4546_vm14, %v3440_v31, %v2224_v63 }
 0x170   : > { %1867 = vst.msk [vmem:[#allocation3 + $0x14] sm:$0xf] %vm1861_vm2, %v1776_v33  ;;  %1866 = vst.msk [vmem:[#allocation3 + $0x10] sm:$0xf] %vm1861_vm2, %v1774_v54  ;;  %3709 = vmatprep.mubr.msk.bf16.mxu0 %vm2819_vm8, %v3775_v22  ;;  %v2082_v54 = vld [vmem:[#allocation2 + $0x8c] sm:$0x1] }
 0x171   : > { %2572 = vrot.lane.b32.xlu1 %v4857_v36, %s3807_s10  ;;  %2570 = vrot.lane.b32.xlu0 %v4861_v61, %s3807_s10  ;;  %v2080_v22 = vld [vmem:[#allocation2 + $0x84] sm:$0xe] }
 0x172   : > { %v3441_v23 = vrot.slane %v2080_v22, 9 }
 0x173   : > { %v1780_v24 = vpop.permute.xlu1 %1779  ;;  %v1778_v44 = vpop.permute.xlu0 %1777  ;;  %v3776_v9 = vld [vmem:[#allocation3 + $0x8] sm:$0xff]  }
 0x174   : > { %1869 = vst.msk [vmem:[#allocation3 + $0x1c] sm:$0xf] %vm1861_vm2, %v1780_v24  ;;  %1868 = vst.msk [vmem:[#allocation3 + $0x18] sm:$0xf] %vm1861_vm2, %v1778_v44  ;;  %3710 = vmatmul.mubr.msk.bf16.vlgmr.msra.gmra.mxu0 %vm2819_vm8, %v3776_v9  ;;  %v1530_v24 = vshrl.u32 %v1208_v59, 16  ;;  %v1517_v44 = vshrl.u32 %v1207_v27, 16  ;;  %v4965_v29 = vsel %vm4546_vm14, %v3441_v23, %v2231_v12 }
 0x175   : > { %1650 = vrot.lane.b32.xlu1 %v4803_v2, %s3802_s22  ;;  %1648 = vrot.lane.b32.xlu0 %v4807_v18, %s3802_s22  ;;  %v1520_v9 = vshll.u32 %v1207_v27, 16  ;;  %v2084_v59 = vld [vmem:[#allocation2 + $0x94] sm:$0xf] }
 0x176   : > { %v1532_v28 = vrot.slane %v1530_v24, 4  ;;  %v2238_v27 = vrot.slane %v2084_v59, 5 }
 0x177   : > { %v1929_v50 = vpop.permute.xlu1 %1928  ;;  %v1927_v32 = vpop.permute.xlu0 %1926 }
 0x178   : > { %2020 = vst.msk [vmem:[#allocation3 + $0x14] sm:$0xf] %vm2014_vm3, %v1929_v50  ;;  %2019 = vst.msk [vmem:[#allocation3 + $0x10] sm:$0xf] %vm2014_vm3, %v1927_v32  ;;  %v1519_v50 = vrot.slane %v1517_v44, 4  ;;  %v1522_v32 = vrot.slane %v1520_v9, 5 }
 0x179   : > { %1799 = vrot.lane.b32.xlu1 %v4803_v2, %s3803_s23  ;;  %1797 = vrot.lane.b32.xlu0 %v4807_v18, %s3803_s23  ;;  %v1510_v2 = vrot.slane %v1509_v35, 4  ;;  %v1514_v18 = vrot.slane %v1512_v38, 5  ;;  %v2240_v24 = vrot.slane %v2238_v27, 4  ;;  %v3442_v44 = vrot.slane %v2083_v15, 9  ;;  %v2087_v9 = vld [vmem:[#allocation2 + $0xa0] sm:$0xf] }
 0x17b   : > { %v1933_v19 = vpop.permute.xlu1 %1932  ;;  %v1931_v48 = vpop.permute.xlu0 %1930  ;;  %v4908_v46 = vsel %vm4364_vm11, %v1510_v2, %v1514_v18  ;;  %v1523_v2 = vor.u32 %v1522_v32, %v1519_v50  ;;  %v1550_v18 = vshll.u32 %v1211_v34, 16  ;;  %v2088_v50 = vld [vmem:[#allocation2 + $0xa4] sm:$0x1]  ;;  %v2086_v32 = vld [vmem:[#allocation2 + $0x9c] sm:$0xe] }
 0x17c   : > { %2022 = vst.msk [vmem:[#allocation3 + $0x1c] sm:$0xf] %vm2014_vm3, %v1933_v19  ;;  %2021 = vst.msk [vmem:[#allocation3 + $0x18] sm:$0xf] %vm2014_vm3, %v1931_v48  ;;  %v1210_v19 = vld [vmem:[#allocation2 + $0x9c] sm:$0xf]  ;;  %v1533_v48 = vor.u32 %v1532_v28, %v1528_v3  ;;  %v5051_v28 = vsel %vm4546_vm14, %v3442_v44, %v2238_v27 }
 0x17d   : > { %1803 = vrot.lane.b32.xlu1 %v4885_v26, %s3803_s23  ;;  %1801 = vrot.lane.b32.xlu0 %v4889_v25, %s3803_s23  ;;  %v3443_v34 = vrot.slane %v2086_v32, 9 }
 0x17f   : > { %v2275_v10 = vpop.permute.xlu1 %2274  ;;  %v2273_v62 = vpop.permute.xlu0 %2272 }
 0x180   : > { %2366 = vst.msk [vmem:[#allocation3 + $0x14] sm:$0xf] %vm2360_vm4, %v2275_v10  ;;  %2365 = vst.msk [vmem:[#allocation3 + $0x10] sm:$0xf] %vm2360_vm4, %v2273_v62  ;;  %v1541_v10 = vshrl.u32 %v1210_v19, 16  ;;  %v1544_v62 = vshll.u32 %v1210_v19, 16 }
 0x181   : > { %1952 = vrot.lane.b32.xlu1 %v4885_v26, %s3804_s24  ;;  %1950 = vrot.lane.b32.xlu0 %v4889_v25, %s3804_s24  ;;  %v1214_v19 = vld [vmem:[#allocation2 + $0xac] sm:$0xf] }
 0x182   : > { %v1546_v52 = vrot.slane %v1544_v62, 5 }
 0x183   : > { %v2279_v14 = vpop.permute.xlu1 %2278  ;;  %v2277_v13 = vpop.permute.xlu0 %2276 }
 0x184   : > { %2368 = vst.msk [vmem:[#allocation3 + $0x1c] sm:$0xf] %vm2360_vm4, %v2279_v14  ;;  %2367 = vst.msk [vmem:[#allocation3 + $0x18] sm:$0xf] %vm2360_vm4, %v2277_v13  ;;  %v1524_v14 = vrot.slane %v1523_v2, 4  ;;  %v1552_v13 = vrot.slane %v1550_v18, 5 }
 0x185   : > { %1956 = vrot.lane.b32.xlu1 %v4908_v46, %s3804_s24  ;;  %1954 = vrot.lane.b32.xlu0 %v4912_v11, %s3804_s24  ;;  %v1574_v18 = vshll.u32 %v1214_v19, 16 }
 0x186   : > { %v4998_v30 = vsel %vm4364_vm11, %v1524_v14, %v1528_v3 }
 0x187   : > { %v2414_v17 = vpop.permute.xlu1 %2413  ;;  %v2412_v51 = vpop.permute.xlu0 %2411  ;;  %v1576_v14 = vrot.slane %v1574_v18, 5 }
 0x188   : > { %2505 = vst.msk [vmem:[#allocation3 + $0x14] sm:$0xf] %vm2499_vm5, %v2414_v17  ;;  %2504 = vst.msk [vmem:[#allocation3 + $0x10] sm:$0xf] %vm2499_vm5, %v2412_v51  ;;  %v1556_v17 = vrot.slane %v1554_v43, 4  ;;  %v1543_v51 = vrot.slane %v1541_v10, 4 }
 0x189   : > { %2298 = vrot.lane.b32.xlu1 %v4837_v16, %s3805_s29  ;;  %2296 = vrot.lane.b32.xlu0 %v4841_v45, %s3805_s29  ;;  %v2227_v16 = vrot.slane %v2079_v1, 5  ;;  %v1578_v43 = vshrl.u32 %v1214_v19, 16  ;;  %v2091_v19 = vld [vmem:[#allocation2 + $0xb0] sm:$0x1] }
 0x18a   : > { %v1547_v31 = vor.u32 %v1546_v52, %v1543_v51  ;;  %v1215_v52 = vld [vmem:[#allocation2 + $0xb0] sm:$0x1] }
 0x18b   : > { %v2418_v4 = vpop.permute.xlu1 %2417  ;;  %v2416_v5 = vpop.permute.xlu0 %2415  ;;  %v4940_v37 = vsel %vm4546_vm14, %v2226_v49, %v2227_v16  ;;  %v1557_v49 = vor.u32 %v1556_v17, %v1552_v13 }
 0x18c   : > { %2507 = vst.msk [vmem:[#allocation3 + $0x1c] sm:$0xf] %vm2499_vm5, %v2418_v4  ;;  %2506 = vst.msk [vmem:[#allocation3 + $0x18] sm:$0xf] %vm2499_vm5, %v2416_v5  ;;  %v1212_v5 = vld [vmem:[#allocation2 + $0xa4] sm:$0x1] }
 0x18d   : > { %2302 = vrot.lane.b32.xlu1 %v4857_v36, %s3805_s29  ;;  %2300 = vrot.lane.b32.xlu0 %v4861_v61, %s3805_s29  ;;  %v1560_v16 = vshll.u32 %v1212_v5, 16  ;;  %v1217_v5 = vld [vmem:[#allocation2 + $0xb8] sm:$0xf] }
 0x18f   : > { %v2553_v45 = vpop.permute.xlu1 %2552  ;;  %v2551_v60 = vpop.permute.xlu0 %2550 }
 0x190   : > { %2644 = vst.msk [vmem:[#allocation3 + $0x14] sm:$0xf] %vm2638_vm6, %v2553_v45  ;;  %2643 = vst.msk [vmem:[#allocation3 + $0x10] sm:$0xf] %vm2638_vm6, %v2551_v60  ;;  %v1548_v60 = vrot.slane %v1547_v31, 4  ;;  %v1584_v31 = vshll.u32 %v1215_v52, 16 }
 0x191   : > { %2437 = vrot.lane.b32.xlu1 %v4857_v36, %s3806_s7  ;;  %2435 = vrot.lane.b32.xlu0 %v4861_v61, %s3806_s7  ;;  %v2233_v36 = vrot.slane %v2231_v12, 4  ;;  %v2234_v61 = vrot.slane %v2082_v54, 5 }
 0x192   : > { %v5018_v54 = vsel %vm4364_vm11, %v1548_v60, %v1552_v13  ;;  %v1580_v13 = vrot.slane %v1578_v43, 4 }
 0x193   : > { %v2557_v21 = vpop.permute.xlu1 %2556  ;;  %v2555_v33 = vpop.permute.xlu0 %2554  ;;  %v4961_v40 = vsel %vm4546_vm14, %v2233_v36, %v2234_v61 }
 0x194   : > { %2646 = vst.msk [vmem:[#allocation3 + $0x1c] sm:$0xf] %vm2638_vm6, %v2557_v21  ;;  %2645 = vst.msk [vmem:[#allocation3 + $0x18] sm:$0xf] %vm2638_vm6, %v2555_v33 }
 0x195   : > { %2441 = vrot.lane.b32.xlu1 %v4940_v37, %s3806_s7  ;;  %2439 = vrot.lane.b32.xlu0 %v4944_v58, %s3806_s7 }
 0x197   : > { %v1784_v47 = vpop.permute.xlu1 %1783  ;;  %v1782_v0 = vpop.permute.xlu0 %1781  ;;  %v3777_v39 = vld [vmem:[#allocation3 + $0x10] sm:$0xff]  }
 0x198   : > { %1871 = vst.msk [vmem:[#allocation3 + $0x24] sm:$0xf] %vm1861_vm2, %v1784_v47  ;;  %1870 = vst.msk [vmem:[#allocation3 + $0x20] sm:$0xf] %vm1861_vm2, %v1782_v0  ;;  %3713 = vmatprep.mubr.msk.bf16.mxu0 %vm2819_vm8, %v3777_v39  ;;  %v2085_v39 = vld [vmem:[#allocation2 + $0x98] sm:$0x1] }
 0x199   : > { %2576 = vrot.lane.b32.xlu1 %v4940_v37, %s3807_s10  ;;  %2574 = vrot.lane.b32.xlu0 %v4944_v58, %s3807_s10 }
 0x19b   : > { %v1788_v6 = vpop.permute.xlu1 %1787  ;;  %v1786_v42 = vpop.permute.xlu0 %1785  ;;  %v3778_v7 = vld [vmem:[#allocation3 + $0x18] sm:$0xff]  }
 0x19c   : > { %1873 = vst.msk [vmem:[#allocation3 + $0x2c] sm:$0xf] %vm1861_vm2, %v1788_v6  ;;  %1872 = vst.msk [vmem:[#allocation3 + $0x28] sm:$0xf] %vm1861_vm2, %v1786_v42  ;;  %3714 = vmatmul.mubr.msk.bf16.gmra.mxu0 %vm2819_vm8, %v3778_v7  ;;  %v2245_v7 = vrot.slane %v2087_v9, 5 }
 0x19d   : > { %2580 = vrot.lane.b32.xlu1 %v4961_v40, %s3807_s10  ;;  %2578 = vrot.lane.b32.xlu0 %v4965_v29, %s3807_s10 }
 0x19f   : > { %v1937_v35 = vpop.permute.xlu1 %1936  ;;  %v1935_v38 = vpop.permute.xlu0 %1934 }
 0x1a0   : > { %2024 = vst.msk [vmem:[#allocation3 + $0x24] sm:$0xf] %vm2014_vm3, %v1937_v35  ;;  %2023 = vst.msk [vmem:[#allocation3 + $0x20] sm:$0xf] %vm2014_vm3, %v1935_v38 }
 0x1a1   : > { %1654 = vrot.lane.b32.xlu1 %v4885_v26, %s3802_s22  ;;  %1652 = vrot.lane.b32.xlu0 %v4889_v25, %s3802_s22  ;;  %v1534_v26 = vrot.slane %v1533_v48, 4  ;;  %v1538_v25 = vrot.slane %v1536_v41, 5  ;;  %v1213_v48 = vld [vmem:[#allocation2 + $0xa8] sm:$0xf] }
 0x1a2   : > { %v1565_v10 = vshrl.u32 %v1213_v48, 16  ;;  %v1568_v62 = vshll.u32 %v1213_v48, 16 }
 0x1a3   : > { %v1941_v8 = vpop.permute.xlu1 %1940  ;;  %v1939_v57 = vpop.permute.xlu0 %1938  ;;  %v4994_v1 = vsel %vm4364_vm11, %v1534_v26, %v1538_v25 }
 0x1a4   : > { %2026 = vst.msk [vmem:[#allocation3 + $0x2c] sm:$0xf] %vm2014_vm3, %v1941_v8  ;;  %2025 = vst.msk [vmem:[#allocation3 + $0x28] sm:$0xf] %vm2014_vm3, %v1939_v57  ;;  %v5072_v57 = vsel %vm4546_vm14, %v3443_v34, %v2245_v7  ;;  %v1567_v17 = vrot.slane %v1565_v10, 4  ;;  %v1570_v51 = vrot.slane %v1568_v62, 5 }
 0x1a5   : > { %1658 = vrot.lane.b32.xlu1 %v4908_v46, %s3802_s22  ;;  %1656 = vrot.lane.b32.xlu0 %v4912_v11, %s3802_s22  ;;  %v2093_v62 = vld [vmem:[#allocation2 + $0xb8] sm:$0xf] }
 0x1a7   : > { %v2283_v63 = vpop.permute.xlu1 %2282  ;;  %v2281_v4 = vpop.permute.xlu0 %2280 }
 0x1a8   : > { %2370 = vst.msk [vmem:[#allocation3 + $0x24] sm:$0xf] %vm2360_vm4, %v2283_v63  ;;  %2369 = vst.msk [vmem:[#allocation3 + $0x20] sm:$0xf] %vm2360_vm4, %v2281_v4 }
 0x1a9   : > { %1807 = vrot.lane.b32.xlu1 %v4908_v46, %s3803_s23  ;;  %1805 = vrot.lane.b32.xlu0 %v4912_v11, %s3803_s23  ;;  %v1558_v46 = vrot.slane %v1557_v49, 4  ;;  %v1562_v11 = vrot.slane %v1560_v16, 5  ;;  %v1216_v49 = vld [vmem:[#allocation2 + $0xb4] sm:$0xf]  ;;  %v1581_v16 = vor.u32 %v1580_v13, %v1576_v14 }
 0x1aa   : > { %v1592_v60 = vshll.u32 %v1216_v49, 16 }
 0x1ab   : > { %v2287_v53 = vpop.permute.xlu1 %2286  ;;  %v2285_v45 = vpop.permute.xlu0 %2284  ;;  %v5014_v33 = vsel %vm4364_vm11, %v1558_v46, %v1562_v11  ;;  %v1602_v46 = vshrl.u32 %v1217_v5, 16  ;;  %v1589_v11 = vshrl.u32 %v1216_v49, 16  ;;  %v1220_v49 = vld [vmem:[#allocation2 + $0xc4] sm:$0xf] }
 0x1ac   : > { %2372 = vst.msk [vmem:[#allocation3 + $0x2c] sm:$0xf] %vm2360_vm4, %v2287_v53  ;;  %2371 = vst.msk [vmem:[#allocation3 + $0x28] sm:$0xf] %vm2360_vm4, %v2285_v45  ;;  %v1571_v53 = vor.u32 %v1570_v51, %v1567_v17  ;;  %v1598_v45 = vshll.u32 %v1217_v5, 16  ;;  %v1594_v59 = vrot.slane %v1592_v60, 5 }
 0x1ad   : > { %1811 = vrot.lane.b32.xlu1 %v4994_v1, %s3803_s23  ;;  %1809 = vrot.lane.b32.xlu0 %v4998_v30, %s3803_s23 }
 0x1af   : > { %v2422_v12 = vpop.permute.xlu1 %2421  ;;  %v2420_v21 = vpop.permute.xlu0 %2419 }
 0x1b0   : > { %2509 = vst.msk [vmem:[#allocation3 + $0x24] sm:$0xf] %vm2499_vm5, %v2422_v12  ;;  %2508 = vst.msk [vmem:[#allocation3 + $0x20] sm:$0xf] %vm2499_vm5, %v2420_v21 }
 0x1b1   : > { %1960 = vrot.lane.b32.xlu1 %v4994_v1, %s3804_s24  ;;  %1958 = vrot.lane.b32.xlu0 %v4998_v30, %s3804_s24 }
 0x1b3   : > { %v2426_v22 = vpop.permute.xlu1 %2425  ;;  %v2424_v36 = vpop.permute.xlu0 %2423 }
 0x1b4   : > { %2511 = vst.msk [vmem:[#allocation3 + $0x2c] sm:$0xf] %vm2499_vm5, %v2426_v22  ;;  %2510 = vst.msk [vmem:[#allocation3 + $0x28] sm:$0xf] %vm2499_vm5, %v2424_v36  ;;  %v1572_v22 = vrot.slane %v1571_v53, 4  ;;  %v1600_v36 = vrot.slane %v1598_v45, 5 }
 0x1b5   : > { %1964 = vrot.lane.b32.xlu1 %v5014_v33, %s3804_s24  ;;  %1962 = vrot.lane.b32.xlu0 %v5018_v54, %s3804_s24  ;;  %v1751_v45 = vshll.u32 %v1220_v49, 16 }
 0x1b6   : > { %v5104_v15 = vsel %vm4364_vm11, %v1572_v22, %v1576_v14  ;;  %v2259_v14 = vrot.slane %v2093_v62, 5 }
 0x1b7   : > { %v2561_v61 = vpop.permute.xlu1 %2560  ;;  %v2559_v23 = vpop.permute.xlu0 %2558  ;;  %v1753_v22 = vrot.slane %v1751_v45, 5  ;;  %v2095_v45 = vld [vmem:[#allocation2 + $0xc0] sm:$0xe] }
 0x1b8   : > { %2648 = vst.msk [vmem:[#allocation3 + $0x24] sm:$0xf] %vm2638_vm6, %v2561_v61  ;;  %2647 = vst.msk [vmem:[#allocation3 + $0x20] sm:$0xf] %vm2638_vm6, %v2559_v23  ;;  %v1604_v61 = vrot.slane %v1602_v46, 4  ;;  %v1591_v23 = vrot.slane %v1589_v11, 4 }
 0x1b9   : > { %2306 = vrot.lane.b32.xlu1 %v4940_v37, %s3805_s29  ;;  %2304 = vrot.lane.b32.xlu0 %v4944_v58, %s3805_s29  ;;  %v2241_v37 = vrot.slane %v2085_v39, 5  ;;  %v1755_v46 = vshrl.u32 %v1220_v49, 16 }
 0x1ba   : > { %v1595_v44 = vor.u32 %v1594_v59, %v1591_v23  ;;  %v1221_v59 = vld [vmem:[#allocation2 + $0xc8] sm:$0x1] }
 0x1bb   : > { %v2565_v47 = vpop.permute.xlu1 %2564  ;;  %v2563_v0 = vpop.permute.xlu0 %2562  ;;  %v5047_v3 = vsel %vm4546_vm14, %v2240_v24, %v2241_v37  ;;  %v1605_v24 = vor.u32 %v1604_v61, %v1600_v36 }
 0x1bc   : > { %2650 = vst.msk [vmem:[#allocation3 + $0x2c] sm:$0xf] %vm2638_vm6, %v2565_v47  ;;  %2649 = vst.msk [vmem:[#allocation3 + $0x28] sm:$0xf] %vm2638_vm6, %v2563_v0  ;;  %v1218_v0 = vld [vmem:[#allocation2 + $0xbc] sm:$0x1] }
 0x1bd   : > { %2310 = vrot.lane.b32.xlu1 %v4961_v40, %s3805_s29  ;;  %2308 = vrot.lane.b32.xlu0 %v4965_v29, %s3805_s29  ;;  %v1608_v37 = vshll.u32 %v1218_v0, 16  ;;  %v1223_v0 = vld [vmem:[#allocation2 + $0xd0] sm:$0xf] }
 0x1bf   : > { %v1792_v58 = vpop.permute.xlu1 %1791  ;;  %v1790_v6 = vpop.permute.xlu0 %1789  ;;  %v3779_v42 = vld [vmem:[#allocation3 + $0x20] sm:$0xff]  }
 0x1c0   : > { %1875 = vst.msk [vmem:[#allocation3 + $0x34] sm:$0xf] %vm1861_vm2, %v1792_v58  ;;  %1874 = vst.msk [vmem:[#allocation3 + $0x30] sm:$0xf] %vm1861_vm2, %v1790_v6  ;;  %3717 = vmatprep.mubr.msk.bf16.mxu0 %vm2819_vm8, %v3779_v42  ;;  %v1596_v6 = vrot.slane %v1595_v44, 4  ;;  %v1761_v44 = vshll.u32 %v1221_v59, 16 }
 0x1c1   : > { %2445 = vrot.lane.b32.xlu1 %v4961_v40, %s3806_s7  ;;  %2443 = vrot.lane.b32.xlu0 %v4965_v29, %s3806_s7  ;;  %v2247_v40 = vrot.slane %v2245_v7, 4  ;;  %v2248_v29 = vrot.slane %v2088_v50, 5  ;;  %v2100_v59 = vld [vmem:[#allocation2 + $0xd4] sm:$0x1] }
 0x1c2   : > { %v5124_v32 = vsel %vm4364_vm11, %v1596_v6, %v1600_v36  ;;  %v1757_v36 = vrot.slane %v1755_v46, 4 }
 0x1c3   : > { %v1796_v20 = vpop.permute.xlu1 %1795  ;;  %v1794_v35 = vpop.permute.xlu0 %1793  ;;  %v3780_v38 = vld [vmem:[#allocation3 + $0x28] sm:$0xff]   ;;  %v5068_v8 = vsel %vm4546_vm14, %v2247_v40, %v2248_v29 }
 0x1c4   : > { %1877 = vst.msk [vmem:[#allocation3 + $0x3c] sm:$0xf] %vm1861_vm2, %v1796_v20  ;;  %1876 = vst.msk [vmem:[#allocation3 + $0x38] sm:$0xf] %vm1861_vm2, %v1794_v35  ;;  %3718 = vmatmul.mubr.msk.bf16.gmra.mxu0 %vm2819_vm8, %v3780_v38  ;;  %v2090_v38 = vld [vmem:[#allocation2 + $0xac] sm:$0xf] }
 0x1c5   : > { %2449 = vrot.lane.b32.xlu1 %v5047_v3, %s3806_s7  ;;  %2447 = vrot.lane.b32.xlu0 %v5051_v28, %s3806_s7  ;;  %v2252_v48 = vrot.slane %v2090_v38, 5 }
 0x1c7   : > { %v1945_v41 = vpop.permute.xlu1 %1944  ;;  %v1943_v2 = vpop.permute.xlu0 %1942 }
 0x1c8   : > { %2028 = vst.msk [vmem:[#allocation3 + $0x34] sm:$0xf] %vm2014_vm3, %v1945_v41  ;;  %2027 = vst.msk [vmem:[#allocation3 + $0x30] sm:$0xf] %vm2014_vm3, %v1943_v2  ;;  %v2089_v41 = vld [vmem:[#allocation2 + $0xa8] sm:$0xe] }
 0x1c9   : > { %2584 = vrot.lane.b32.xlu1 %v5047_v3, %s3807_s10  ;;  %2582 = vrot.lane.b32.xlu0 %v5051_v28, %s3807_s10  ;;  %v3444_v10 = vrot.slane %v2089_v41, 9 }
 0x1cb   : > { %v1949_v26 = vpop.permute.xlu1 %1948  ;;  %v1947_v25 = vpop.permute.xlu0 %1946  ;;  %v5158_v17 = vsel %vm4546_vm14, %v3444_v10, %v2252_v48 }
 0x1cc   : > { %2030 = vst.msk [vmem:[#allocation3 + $0x3c] sm:$0xf] %vm2014_vm3, %v1949_v26  ;;  %2029 = vst.msk [vmem:[#allocation3 + $0x38] sm:$0xf] %vm2014_vm3, %v1947_v25 }
 0x1cd   : > { %2588 = vrot.lane.b32.xlu1 %v5068_v8, %s3807_s10  ;;  %2586 = vrot.lane.b32.xlu0 %v5072_v57, %s3807_s10 }
 0x1cf   : > { %v2291_v63 = vpop.permute.xlu1 %2290  ;;  %v2289_v4 = vpop.permute.xlu0 %2288 }
 0x1d0   : > { %2374 = vst.msk [vmem:[#allocation3 + $0x34] sm:$0xf] %vm2360_vm4, %v2291_v63  ;;  %2373 = vst.msk [vmem:[#allocation3 + $0x30] sm:$0xf] %vm2360_vm4, %v2289_v4  ;;  %v2094_v63 = vld [vmem:[#allocation2 + $0xbc] sm:$0x1] }
 0x1d1   : > { %1662 = vrot.lane.b32.xlu1 %v4994_v1, %s3802_s22  ;;  %1660 = vrot.lane.b32.xlu0 %v4998_v30, %s3802_s22  ;;  %v1582_v1 = vrot.slane %v1581_v16, 4  ;;  %v1586_v30 = vrot.slane %v1584_v31, 5  ;;  %v2092_v4 = vld [vmem:[#allocation2 + $0xb4] sm:$0xe]  ;;  %v1219_v16 = vld [vmem:[#allocation2 + $0xc0] sm:$0xf] }
 0x1d2   : > { %v3445_v5 = vrot.slane %v2092_v4, 9  ;;  %v1742_v11 = vshrl.u32 %v1219_v16, 16  ;;  %v1745_v60 = vshll.u32 %v1219_v16, 16 }
 0x1d3   : > { %v2295_v12 = vpop.permute.xlu1 %2294  ;;  %v2293_v21 = vpop.permute.xlu0 %2292  ;;  %v5100_v39 = vsel %vm4364_vm11, %v1582_v1, %v1586_v30 }
 0x1d4   : > { %2376 = vst.msk [vmem:[#allocation3 + $0x3c] sm:$0xf] %vm2360_vm4, %v2295_v12  ;;  %2375 = vst.msk [vmem:[#allocation3 + $0x38] sm:$0xf] %vm2360_vm4, %v2293_v21  ;;  %v5178_v21 = vsel %vm4546_vm14, %v3445_v5, %v2259_v14  ;;  %v1744_v61 = vrot.slane %v1742_v11, 4  ;;  %v1747_v23 = vrot.slane %v1745_v60, 5 }
 0x1d5   : > { %1666 = vrot.lane.b32.xlu1 %v5014_v33, %s3802_s22  ;;  %1664 = vrot.lane.b32.xlu0 %v5018_v54, %s3802_s22 }
 0x1d7   : > { %v2430_v27 = vpop.permute.xlu1 %2429  ;;  %v2428_v47 = vpop.permute.xlu0 %2427 }
 0x1d8   : > { %2513 = vst.msk [vmem:[#allocation3 + $0x34] sm:$0xf] %vm2499_vm5, %v2430_v27  ;;  %2512 = vst.msk [vmem:[#allocation3 + $0x30] sm:$0xf] %vm2499_vm5, %v2428_v47 }
 0x1d9   : > { %1815 = vrot.lane.b32.xlu1 %v5014_v33, %s3803_s23  ;;  %1813 = vrot.lane.b32.xlu0 %v5018_v54, %s3803_s23  ;;  %v1606_v33 = vrot.slane %v1605_v24, 4  ;;  %v1610_v54 = vrot.slane %v1608_v37, 5  ;;  %v1222_v24 = vld [vmem:[#allocation2 + $0xcc] sm:$0xf]  ;;  %v1758_v37 = vor.u32 %v1757_v36, %v1753_v22 }
 0x1da   : > { %v1898_v6 = vshll.u32 %v1222_v24, 16 }
 0x1db   : > { %v2434_v9 = vpop.permute.xlu1 %2433  ;;  %v2432_v58 = vpop.permute.xlu0 %2431  ;;  %v5120_v50 = vsel %vm4364_vm11, %v1606_v33, %v1610_v54  ;;  %v1908_v33 = vshrl.u32 %v1223_v0, 16  ;;  %v1895_v54 = vshrl.u32 %v1222_v24, 16 }
 0x1dc   : > { %2515 = vst.msk [vmem:[#allocation3 + $0x3c] sm:$0xf] %vm2499_vm5, %v2434_v9  ;;  %2514 = vst.msk [vmem:[#allocation3 + $0x38] sm:$0xf] %vm2499_vm5, %v2432_v58  ;;  %v1748_v9 = vor.u32 %v1747_v23, %v1744_v61  ;;  %v1904_v58 = vshll.u32 %v1223_v0, 16 }
 0x1dd   : > { %1819 = vrot.lane.b32.xlu1 %v5100_v39, %s3803_s23  ;;  %1817 = vrot.lane.b32.xlu0 %v5104_v15, %s3803_s23  ;;  %v1910_v38 = vrot.slane %v1908_v33, 4 }
 0x1df   : > { %v2569_v42 = vpop.permute.xlu1 %2568  ;;  %v2567_v7 = vpop.permute.xlu0 %2566 }
 0x1e0   : > { %2652 = vst.msk [vmem:[#allocation3 + $0x34] sm:$0xf] %vm2638_vm6, %v2569_v42  ;;  %2651 = vst.msk [vmem:[#allocation3 + $0x30] sm:$0xf] %vm2638_vm6, %v2567_v7 }
 0x1e1   : > { %1968 = vrot.lane.b32.xlu1 %v5100_v39, %s3804_s24  ;;  %1966 = vrot.lane.b32.xlu0 %v5104_v15, %s3804_s24 }
 0x1e3   : > { %v2573_v20 = vpop.permute.xlu1 %2572  ;;  %v2571_v35 = vpop.permute.xlu0 %2570 }
 0x1e4   : > { %2654 = vst.msk [vmem:[#allocation3 + $0x3c] sm:$0xf] %vm2638_vm6, %v2573_v20  ;;  %2653 = vst.msk [vmem:[#allocation3 + $0x38] sm:$0xf] %vm2638_vm6, %v2571_v35  ;;  %v1749_v20 = vrot.slane %v1748_v9, 4  ;;  %v1906_v35 = vrot.slane %v1904_v58, 5 }
 0x1e5   : > { %1972 = vrot.lane.b32.xlu1 %v5120_v50, %s3804_s24  ;;  %1970 = vrot.lane.b32.xlu0 %v5124_v32, %s3804_s24 }
 0x1e7   : > { %v1651_v40 = vpop.permute.xlu1 %1650  ;;  %v1649_v29 = vpop.permute.xlu0 %1648  ;;  %v3781_v34 = vld [vmem:[#allocation3 + $0x30] sm:$0xff]  }
 0x1e8   : > { %1728 = vst.msk [vmem:[#allocation3 + $0x4c] sm:$0xf] %vm1708_vm1, %v1651_v40  ;;  %1727 = vst.msk [vmem:[#allocation3 + $0x48] sm:$0xf] %vm1708_vm1, %v1649_v29  ;;  %3721 = vmatprep.mubr.msk.bf16.mxu0 %vm2819_vm8, %v3781_v34  ;;  %v1897_v40 = vrot.slane %v1895_v54, 4  ;;  %v1900_v29 = vrot.slane %v1898_v6, 5 }
 0x1e9   : > { %2314 = vrot.lane.b32.xlu1 %v5047_v3, %s3805_s29  ;;  %2312 = vrot.lane.b32.xlu0 %v5051_v28, %s3805_s29  ;;  %v2254_v3 = vrot.slane %v2252_v48, 4  ;;  %v2255_v28 = vrot.slane %v2091_v19, 5  ;;  %v1224_v48 = vld [vmem:[#allocation2 + $0xd4] sm:$0x1] }
 0x1eb   : > { %v1800_v2 = vpop.permute.xlu1 %1799  ;;  %v1798_v18 = vpop.permute.xlu0 %1797  ;;  %v3782_v43 = vld [vmem:[#allocation3 + $0x38] sm:$0xff]   ;;  %v5154_v13 = vsel %vm4546_vm14, %v2254_v3, %v2255_v28  ;;  %v1901_v3 = vor.u32 %v1900_v29, %v1897_v40 }
 0x1ec   : > { %1879 = vst.msk [vmem:[#allocation3 + $0x44] sm:$0xf] %vm1861_vm2, %v1800_v2  ;;  %1878 = vst.msk [vmem:[#allocation3 + $0x40] sm:$0xf] %vm1861_vm2, %v1798_v18  ;;  %3722 = vmatmul.mubr.msk.bf16.gmra.mxu0 %vm2819_vm8, %v3782_v43  ;;  %v1754_v2 = vsel %vm4364_vm11, %v1749_v20, %v1753_v22  ;;  %v1911_v18 = vor.u32 %v1910_v38, %v1906_v35  ;;  %v1914_v43 = vshll.u32 %v1224_v48, 16 }
 0x1ed   : > { %2318 = vrot.lane.b32.xlu1 %v5068_v8, %s3805_s29  ;;  %2316 = vrot.lane.b32.xlu0 %v5072_v57, %s3805_s29  ;;  %v1902_v62 = vrot.slane %v1901_v3, 4 }
 0x1ef   : > { %v1804_v26 = vpop.permute.xlu1 %1803  ;;  %v1802_v25 = vpop.permute.xlu0 %1801 }
 0x1f0   : > { %1881 = vst.msk [vmem:[#allocation3 + $0x4c] sm:$0xf] %vm1861_vm2, %v1804_v26  ;;  %1880 = vst.msk [vmem:[#allocation3 + $0x48] sm:$0xf] %vm1861_vm2, %v1802_v25 }
 0x1f1   : > { %2453 = vrot.lane.b32.xlu1 %v5068_v8, %s3806_s7  ;;  %2451 = vrot.lane.b32.xlu0 %v5072_v57, %s3806_s7  ;;  %v2261_v8 = vrot.slane %v2259_v14, 4  ;;  %v2262_v57 = vrot.slane %v2094_v63, 5 }
 0x1f3   : > { %v1953_v51 = vpop.permute.xlu1 %1952  ;;  %v1951_v52 = vpop.permute.xlu0 %1950  ;;  %v5174_v12 = vsel %vm4546_vm14, %v2261_v8, %v2262_v57  ;;  %v2096_v8 = vld [vmem:[#allocation2 + $0xc4] sm:$0xf] }
 0x1f4   : > { %2032 = vst.msk [vmem:[#allocation3 + $0x44] sm:$0xf] %vm2014_vm3, %v1953_v51  ;;  %2031 = vst.msk [vmem:[#allocation3 + $0x40] sm:$0xf] %vm2014_vm3, %v1951_v52  ;;  %v1907_v51 = vsel %vm4364_vm11, %v1902_v62, %v1906_v35  ;;  %v2398_v56 = vrot.slane %v2096_v8, 5 }
 0x1f5   : > { %2457 = vrot.lane.b32.xlu1 %v5154_v13, %s3806_s7  ;;  %2455 = vrot.lane.b32.xlu0 %v5158_v17, %s3806_s7 }
 0x1f7   : > { %v1957_v31 = vpop.permute.xlu1 %1956  ;;  %v1955_v53 = vpop.permute.xlu0 %1954 }
 0x1f8   : > { %2034 = vst.msk [vmem:[#allocation3 + $0x4c] sm:$0xf] %vm2014_vm3, %v1957_v31  ;;  %2033 = vst.msk [vmem:[#allocation3 + $0x48] sm:$0xf] %vm2014_vm3, %v1955_v53  ;;  %v2097_v53 = vld [vmem:[#allocation2 + $0xc8] sm:$0x1] }
 0x1f9   : > { %2592 = vrot.lane.b32.xlu1 %v5154_v13, %s3807_s10  ;;  %2590 = vrot.lane.b32.xlu0 %v5158_v17, %s3807_s10  ;;  %v2401_v46 = vrot.slane %v2097_v53, 5 }
 0x1fb   : > { %v2299_v1 = vpop.permute.xlu1 %2298  ;;  %v2297_v30 = vpop.permute.xlu0 %2296 }
 0x1fc   : > { %2378 = vst.msk [vmem:[#allocation3 + $0x44] sm:$0xf] %vm2360_vm4, %v2299_v1  ;;  %2377 = vst.msk [vmem:[#allocation3 + $0x40] sm:$0xf] %vm2360_vm4, %v2297_v30  ;;  %v2099_v1 = vld [vmem:[#allocation2 + $0xd0] sm:$0xf] }
 0x1fd   : > { %2596 = vrot.lane.b32.xlu1 %v5174_v12, %s3807_s10  ;;  %2594 = vrot.lane.b32.xlu0 %v5178_v21, %s3807_s10  ;;  %v2537_v36 = vrot.slane %v2099_v1, 5 }
 0x1ff   : > { %v2303_v27 = vpop.permute.xlu1 %2302  ;;  %v2301_v47 = vpop.permute.xlu0 %2300 }
 0x200   : > { %2380 = vst.msk [vmem:[#allocation3 + $0x4c] sm:$0xf] %vm2360_vm4, %v2303_v27  ;;  %2379 = vst.msk [vmem:[#allocation3 + $0x48] sm:$0xf] %vm2360_vm4, %v2301_v47  ;;  %v2098_v27 = vld [vmem:[#allocation2 + $0xcc] sm:$0xe] }
 0x201   : > { %1670 = vrot.lane.b32.xlu1 %v5100_v39, %s3802_s22  ;;  %1668 = vrot.lane.b32.xlu0 %v5104_v15, %s3802_s22  ;;  %v1759_v39 = vrot.slane %v1758_v37, 4  ;;  %v1763_v15 = vrot.slane %v1761_v44, 5  ;;  %v3447_v47 = vrot.slane %v2098_v27, 9 }
 0x203   : > { %v2438_v42 = vpop.permute.xlu1 %2437  ;;  %v2436_v7 = vpop.permute.xlu0 %2435  ;;  %v1764_v41 = vsel %vm4364_vm11, %v1759_v39, %v1763_v15  ;;  %v2538_v44 = vsel %vm4546_vm14, %v3447_v47, %v2537_v36 }
 0x204   : > { %2517 = vst.msk [vmem:[#allocation3 + $0x44] sm:$0xf] %vm2499_vm5, %v2438_v42  ;;  %2516 = vst.msk [vmem:[#allocation3 + $0x40] sm:$0xf] %vm2499_vm5, %v2436_v7 }
 0x205   : > { %1674 = vrot.lane.b32.xlu1 %v5120_v50, %s3802_s22  ;;  %1672 = vrot.lane.b32.xlu0 %v5124_v32, %s3802_s22 }
 0x207   : > { %v2442_v34 = vpop.permute.xlu1 %2441  ;;  %v2440_v19 = vpop.permute.xlu0 %2439 }
 0x208   : > { %2519 = vst.msk [vmem:[#allocation3 + $0x4c] sm:$0xf] %vm2499_vm5, %v2442_v34  ;;  %2518 = vst.msk [vmem:[#allocation3 + $0x48] sm:$0xf] %vm2499_vm5, %v2440_v19 }
 0x209   : > { %1823 = vrot.lane.b32.xlu1 %v5120_v50, %s3803_s23  ;;  %1821 = vrot.lane.b32.xlu0 %v5124_v32, %s3803_s23  ;;  %v1912_v50 = vrot.slane %v1911_v18, 4  ;;  %v1916_v32 = vrot.slane %v1914_v43, 5 }
 0x20b   : > { %v2577_v28 = vpop.permute.xlu1 %2576  ;;  %v2575_v10 = vpop.permute.xlu0 %2574  ;;  %v1917_v14 = vsel %vm4364_vm11, %v1912_v50, %v1916_v32 }
 0x20c   : > { %2656 = vst.msk [vmem:[#allocation3 + $0x44] sm:$0xf] %vm2638_vm6, %v2577_v28  ;;  %2655 = vst.msk [vmem:[#allocation3 + $0x40] sm:$0xf] %vm2638_vm6, %v2575_v10 }
 0x20d   : > { %1827 = vrot.lane.b32.xlu1 %v1764_v41, %s3803_s23  ;;  %1825 = vrot.lane.b32.xlu0 %v1754_v2, %s3803_s23 }
 0x20f   : > { %v2581_v26 = vpop.permute.xlu1 %2580  ;;  %v2579_v25 = vpop.permute.xlu0 %2578 }
 0x210   : > { %2658 = vst.msk [vmem:[#allocation3 + $0x4c] sm:$0xf] %vm2638_vm6, %v2581_v26  ;;  %2657 = vst.msk [vmem:[#allocation3 + $0x48] sm:$0xf] %vm2638_vm6, %v2579_v25 }
 0x211   : > { %1976 = vrot.lane.b32.xlu1 %v1764_v41, %s3804_s24  ;;  %1974 = vrot.lane.b32.xlu0 %v1754_v2, %s3804_s24 }
 0x213   : > { %v1655_v52 = vpop.permute.xlu1 %1654  ;;  %v1653_v63 = vpop.permute.xlu0 %1652  ;;  %v3783_v4 = vld [vmem:[#allocation3 + $0x40] sm:$0xff]  }
 0x214   : > { %1730 = vst.msk [vmem:[#allocation3 + $0x54] sm:$0xf] %vm1708_vm1, %v1655_v52  ;;  %1729 = vst.msk [vmem:[#allocation3 + $0x50] sm:$0xf] %vm1708_vm1, %v1653_v63  ;;  %3725 = vmatprep.mubr.msk.bf16.mxu1 %vm2819_vm8, %v3783_v4 }
 0x215   : > { %1980 = vrot.lane.b32.xlu1 %v1917_v14, %s3804_s24  ;;  %1978 = vrot.lane.b32.xlu0 %v1907_v51, %s3804_s24 }
 0x217   : > { %v1659_v57 = vpop.permute.xlu1 %1658  ;;  %v1657_v5 = vpop.permute.xlu0 %1656  ;;  %v3784_v49 = vld [vmem:[#allocation3 + $0x48] sm:$0xff]  }
 0x218   : > { %1732 = vst.msk [vmem:[#allocation3 + $0x5c] sm:$0xf] %vm1708_vm1, %v1659_v57  ;;  %1731 = vst.msk [vmem:[#allocation3 + $0x58] sm:$0xf] %vm1708_vm1, %v1657_v5  ;;  %3726 = vmatmul.mubr.msk.bf16.vlgmr.msra.gmra.mxu1 %vm2819_vm8, %v3784_v49 }
 0x219   : > { %2322 = vrot.lane.b32.xlu1 %v5154_v13, %s3805_s29  ;;  %2320 = vrot.lane.b32.xlu0 %v5158_v17, %s3805_s29  ;;  %v2400_v13 = vrot.slane %v2398_v56, 4  ;;  %v3446_v17 = vrot.slane %v2095_v45, 9 }
 0x21b   : > { %v1808_v16 = vpop.permute.xlu1 %1807  ;;  %v1806_v31 = vpop.permute.xlu0 %1805  ;;  %v2402_v30 = vsel %vm4546_vm14, %v2400_v13, %v2401_v46  ;;  %v2399_v22 = vsel %vm4546_vm14, %v3446_v17, %v2398_v56 }
 0x21c   : > { %1883 = vst.msk [vmem:[#allocation3 + $0x54] sm:$0xf] %vm1861_vm2, %v1808_v16  ;;  %1882 = vst.msk [vmem:[#allocation3 + $0x50] sm:$0xf] %vm1861_vm2, %v1806_v31 }
 0x21d   : > { %2326 = vrot.lane.b32.xlu1 %v5174_v12, %s3805_s29  ;;  %2324 = vrot.lane.b32.xlu0 %v5178_v21, %s3805_s29 }
 0x21f   : > { %v1812_v11 = vpop.permute.xlu1 %1811  ;;  %v1810_v60 = vpop.permute.xlu0 %1809 }
 0x220   : > { %1885 = vst.msk [vmem:[#allocation3 + $0x5c] sm:$0xf] %vm1861_vm2, %v1812_v11  ;;  %1884 = vst.msk [vmem:[#allocation3 + $0x58] sm:$0xf] %vm1861_vm2, %v1810_v60 }
 0x221   : > { %2461 = vrot.lane.b32.xlu1 %v5174_v12, %s3806_s7  ;;  %2459 = vrot.lane.b32.xlu0 %v5178_v21, %s3806_s7  ;;  %v2539_v12 = vrot.slane %v2537_v36, 4  ;;  %v2540_v21 = vrot.slane %v2100_v59, 5 }
 0x223   : > { %v1961_v61 = vpop.permute.xlu1 %1960  ;;  %v1959_v23 = vpop.permute.xlu0 %1958  ;;  %v2541_v37 = vsel %vm4546_vm14, %v2539_v12, %v2540_v21 }
 0x224   : > { %2036 = vst.msk [vmem:[#allocation3 + $0x54] sm:$0xf] %vm2014_vm3, %v1961_v61  ;;  %2035 = vst.msk [vmem:[#allocation3 + $0x50] sm:$0xf] %vm2014_vm3, %v1959_v23 }
 0x225   : > { %2465 = vrot.lane.b32.xlu1 %v2402_v30, %s3806_s7  ;;  %2463 = vrot.lane.b32.xlu0 %v2399_v22, %s3806_s7 }
 0x227   : > { %v1965_v0 = vpop.permute.xlu1 %1964  ;;  %v1963_v24 = vpop.permute.xlu0 %1962 }
 0x228   : > { %2038 = vst.msk [vmem:[#allocation3 + $0x5c] sm:$0xf] %vm2014_vm3, %v1965_v0  ;;  %2037 = vst.msk [vmem:[#allocation3 + $0x58] sm:$0xf] %vm2014_vm3, %v1963_v24 }
 0x229   : > { %2600 = vrot.lane.b32.xlu1 %v2402_v30, %s3807_s10  ;;  %2598 = vrot.lane.b32.xlu0 %v2399_v22, %s3807_s10 }
 0x22b   : > { %v2307_v9 = vpop.permute.xlu1 %2306  ;;  %v2305_v58 = vpop.permute.xlu0 %2304 }
 0x22c   : > { %2382 = vst.msk [vmem:[#allocation3 + $0x54] sm:$0xf] %vm2360_vm4, %v2307_v9  ;;  %2381 = vst.msk [vmem:[#allocation3 + $0x50] sm:$0xf] %vm2360_vm4, %v2305_v58 }
 0x22d   : > { %2604 = vrot.lane.b32.xlu1 %v2541_v37, %s3807_s10  ;;  %2602 = vrot.lane.b32.xlu0 %v2538_v44, %s3807_s10 }
 0x22f   : > { %v2311_v33 = vpop.permute.xlu1 %2310  ;;  %v2309_v54 = vpop.permute.xlu0 %2308 }
 0x230   : > { %2384 = vst.msk [vmem:[#allocation3 + $0x5c] sm:$0xf] %vm2360_vm4, %v2311_v33  ;;  %2383 = vst.msk [vmem:[#allocation3 + $0x58] sm:$0xf] %vm2360_vm4, %v2309_v54 }
 0x233   : > { %v2446_v6 = vpop.permute.xlu1 %2445  ;;  %v2444_v55 = vpop.permute.xlu0 %2443 }
 0x234   : > { %2521 = vst.msk [vmem:[#allocation3 + $0x54] sm:$0xf] %vm2499_vm5, %v2446_v6  ;;  %2520 = vst.msk [vmem:[#allocation3 + $0x50] sm:$0xf] %vm2499_vm5, %v2444_v55  ;;  %v3711_v42 = vpop.f32.mrf.mxu0 }
 0x235   : > { %v3233_v2 = vmul.f32 %v3711_v42, %v3711_v42 }
 0x236   : > { %v2906_v15 = vpop.f32.mrf.mxu0 }
 0x237   : > { %v2450_v7 = vpop.permute.xlu1 %2449  ;;  %v2448_v39 = vpop.permute.xlu0 %2447  ;;  %v3231_v34 = vmul.f32 %v2906_v15, %v2906_v15 }
 0x238   : > { %2523 = vst.msk [vmem:[#allocation3 + $0x5c] sm:$0xf] %vm2499_vm5, %v2450_v7  ;;  %2522 = vst.msk [vmem:[#allocation3 + $0x58] sm:$0xf] %vm2499_vm5, %v2448_v39  ;;  %v3712_v20 = vpop.f32.mrf.mxu0 }
 0x239   : > { %v3591_v35 = vpack.c.bf16 %v3712_v20, %v3711_v42  ;;  %v3234_v10 = vmul.f32 %v3712_v20, %v3712_v20 }
 0x23a   : > { %v2909_v29 = vpop.f32.mrf.mxu0 }
 0x23b   : > { %v2585_v38 = vpop.permute.xlu1 %2584  ;;  %v2583_v40 = vpop.permute.xlu0 %2582  ;;  %3663 = vst [vmem:[%s5274_s17 + $0x8] sm:$0xff] %v3591_v35   ;;  %v3586_v19 = vpack.c.bf16 %v2909_v29, %v2906_v15  ;;  %v3193_v48 = vadd.f32 %v2909_v29, %v2906_v15  ;;  %v3232_v41 = vmul.f32 %v2909_v29, %v2909_v29 }
 0x23c   : > { %2660 = vst.msk [vmem:[#allocation3 + $0x54] sm:$0xf] %vm2638_vm6, %v2585_v38  ;;  %2659 = vst.msk [vmem:[#allocation3 + $0x50] sm:$0xf] %vm2638_vm6, %v2583_v40 }
 0x23d   : > { %3587 = vst [vmem:[%s5274_s17] sm:$0xff] %v3586_v19   ;;  %v3194_v18 = vadd.f32 %v3711_v42, %v3193_v48  ;;  %v3263_v43 = vadd.f32 %v3232_v41, %v3231_v34 }
 0x23f   : > { %v2589_v3 = vpop.permute.xlu1 %2588  ;;  %v2587_v28 = vpop.permute.xlu0 %2586  ;;  %v3264_v50 = vadd.f32 %v3263_v43, %v3233_v2  ;;  %v3195_v32 = vadd.f32 %v3712_v20, %v3194_v18 }
 0x240   : > { %2662 = vst.msk [vmem:[#allocation3 + $0x5c] sm:$0xf] %vm2638_vm6, %v2589_v3  ;;  %2661 = vst.msk [vmem:[#allocation3 + $0x58] sm:$0xf] %vm2638_vm6, %v2587_v28 }
 0x241   : > { %v3265_v14 = vadd.f32 %v3264_v50, %v3234_v10 }
 0x243   : > { %v1663_v62 = vpop.permute.xlu1 %1662  ;;  %v1661_v26 = vpop.permute.xlu0 %1660  ;;  %v3785_v25 = vld [vmem:[#allocation3 + $0x50] sm:$0xff]  }
 0x244   : > { %1734 = vst.msk [vmem:[#allocation3 + $0x64] sm:$0xf] %vm1708_vm1, %v1663_v62  ;;  %1733 = vst.msk [vmem:[#allocation3 + $0x60] sm:$0xf] %vm1708_vm1, %v1661_v26  ;;  %3729 = vmatprep.mubr.msk.bf16.mxu1 %vm2819_vm8, %v3785_v25 }
 0x247   : > { %v1667_v51 = vpop.permute.xlu1 %1666  ;;  %v1665_v52 = vpop.permute.xlu0 %1664  ;;  %v3786_v63 = vld [vmem:[#allocation3 + $0x58] sm:$0xff]  }
 0x248   : > { %1736 = vst.msk [vmem:[#allocation3 + $0x6c] sm:$0xf] %vm1708_vm1, %v1667_v51  ;;  %1735 = vst.msk [vmem:[#allocation3 + $0x68] sm:$0xf] %vm1708_vm1, %v1665_v52  ;;  %3730 = vmatmul.mubr.msk.bf16.gmra.mxu1 %vm2819_vm8, %v3786_v63 }
 0x24b   : > { %v1816_v4 = vpop.permute.xlu1 %1815  ;;  %v1814_v8 = vpop.permute.xlu0 %1813 }
 0x24c   : > { %1887 = vst.msk [vmem:[#allocation3 + $0x64] sm:$0xf] %vm1861_vm2, %v1816_v4  ;;  %1886 = vst.msk [vmem:[#allocation3 + $0x60] sm:$0xf] %vm1861_vm2, %v1814_v8 }
 0x24f   : > { %v1820_v57 = vpop.permute.xlu1 %1819  ;;  %v1818_v5 = vpop.permute.xlu0 %1817 }
 0x250   : > { %1889 = vst.msk [vmem:[#allocation3 + $0x6c] sm:$0xf] %vm1861_vm2, %v1820_v57  ;;  %1888 = vst.msk [vmem:[#allocation3 + $0x68] sm:$0xf] %vm1861_vm2, %v1818_v5 }
 0x253   : > { %v1969_v49 = vpop.permute.xlu1 %1968  ;;  %v1967_v56 = vpop.permute.xlu0 %1966 }
 0x254   : > { %2040 = vst.msk [vmem:[#allocation3 + $0x64] sm:$0xf] %vm2014_vm3, %v1969_v49  ;;  %2039 = vst.msk [vmem:[#allocation3 + $0x60] sm:$0xf] %vm2014_vm3, %v1967_v56 }
 0x257   : > { %v1973_v16 = vpop.permute.xlu1 %1972  ;;  %v1971_v31 = vpop.permute.xlu0 %1970 }
 0x258   : > { %2042 = vst.msk [vmem:[#allocation3 + $0x6c] sm:$0xf] %vm2014_vm3, %v1973_v16  ;;  %2041 = vst.msk [vmem:[#allocation3 + $0x68] sm:$0xf] %vm2014_vm3, %v1971_v31 }
 0x25b   : > { %v2315_v53 = vpop.permute.xlu1 %2314  ;;  %v2313_v45 = vpop.permute.xlu0 %2312 }
 0x25c   : > { %2386 = vst.msk [vmem:[#allocation3 + $0x64] sm:$0xf] %vm2360_vm4, %v2315_v53  ;;  %2385 = vst.msk [vmem:[#allocation3 + $0x60] sm:$0xf] %vm2360_vm4, %v2313_v45  ;;  %v3715_v13 = vpop.f32.mrf.mxu0 }
 0x25d   : > { %v3237_v47 = vmul.f32 %v3715_v13, %v3715_v13 }
 0x25e   : > { %v2922_v11 = vpop.f32.mrf.mxu0 }
 0x25f   : > { %v2319_v46 = vpop.permute.xlu1 %2318  ;;  %v2317_v17 = vpop.permute.xlu0 %2316  ;;  %v3196_v60 = vadd.f32 %v3195_v32, %v2922_v11  ;;  %v3235_v1 = vmul.f32 %v2922_v11, %v2922_v11 }
 0x260   : > { %2388 = vst.msk [vmem:[#allocation3 + $0x6c] sm:$0xf] %vm2360_vm4, %v2319_v46  ;;  %2387 = vst.msk [vmem:[#allocation3 + $0x68] sm:$0xf] %vm2360_vm4, %v2317_v17  ;;  %v3716_v30 = vpop.f32.mrf.mxu0 }
 0x261   : > { %v3266_v22 = vadd.f32 %v3265_v14, %v3235_v1  ;;  %v3601_v36 = vpack.c.bf16 %v3716_v30, %v3715_v13  ;;  %v3238_v9 = vmul.f32 %v3716_v30, %v3716_v30 }
 0x262   : > { %v2925_v59 = vpop.f32.mrf.mxu0 }
 0x263   : > { %v2454_v61 = vpop.permute.xlu1 %2453  ;;  %v2452_v23 = vpop.permute.xlu0 %2451  ;;  %3665 = vst [vmem:[%s5274_s17 + $0x18] sm:$0xff] %v3601_v36   ;;  %v3596_v27 = vpack.c.bf16 %v2925_v59, %v2922_v11  ;;  %v3197_v12 = vadd.f32 %v3196_v60, %v2925_v59  ;;  %v3236_v21 = vmul.f32 %v2925_v59, %v2925_v59 }
 0x264   : > { %2525 = vst.msk [vmem:[#allocation3 + $0x64] sm:$0xf] %vm2499_vm5, %v2454_v61  ;;  %2524 = vst.msk [vmem:[#allocation3 + $0x60] sm:$0xf] %vm2499_vm5, %v2452_v23 }
 0x265   : > { %3664 = vst [vmem:[%s5274_s17 + $0x10] sm:$0xff] %v3596_v27   ;;  %v3198_v0 = vadd.f32 %v3715_v13, %v3197_v12  ;;  %v3267_v24 = vadd.f32 %v3266_v22, %v3236_v21 }
 0x267   : > { %v2458_v37 = vpop.permute.xlu1 %2457  ;;  %v2456_v44 = vpop.permute.xlu0 %2455  ;;  %v3268_v58 = vadd.f32 %v3267_v24, %v3237_v47  ;;  %v3199_v33 = vadd.f32 %v3716_v30, %v3198_v0 }
 0x268   : > { %2527 = vst.msk [vmem:[#allocation3 + $0x6c] sm:$0xf] %vm2499_vm5, %v2458_v37  ;;  %2526 = vst.msk [vmem:[#allocation3 + $0x68] sm:$0xf] %vm2499_vm5, %v2456_v44 }
 0x269   : > { %v3269_v55 = vadd.f32 %v3268_v58, %v3238_v9 }
 0x26b   : > { %v2593_v54 = vpop.permute.xlu1 %2592  ;;  %v2591_v6 = vpop.permute.xlu0 %2590 }
 0x26c   : > { %2664 = vst.msk [vmem:[#allocation3 + $0x64] sm:$0xf] %vm2638_vm6, %v2593_v54  ;;  %2663 = vst.msk [vmem:[#allocation3 + $0x60] sm:$0xf] %vm2638_vm6, %v2591_v6 }
 0x26f   : > { %v2597_v42 = vpop.permute.xlu1 %2596  ;;  %v2595_v7 = vpop.permute.xlu0 %2594 }
 0x270   : > { %2666 = vst.msk [vmem:[#allocation3 + $0x6c] sm:$0xf] %vm2638_vm6, %v2597_v42  ;;  %2665 = vst.msk [vmem:[#allocation3 + $0x68] sm:$0xf] %vm2638_vm6, %v2595_v7 }
 0x273   : > { %v1671_v39 = vpop.permute.xlu1 %1670  ;;  %v1669_v15 = vpop.permute.xlu0 %1668  ;;  %v3787_v20 = vld [vmem:[#allocation3 + $0x60] sm:$0xff]  }
 0x274   : > { %1738 = vst.msk [vmem:[#allocation3 + $0x74] sm:$0xf] %vm1708_vm1, %v1671_v39  ;;  %1737 = vst.msk [vmem:[#allocation3 + $0x70] sm:$0xf] %vm1708_vm1, %v1669_v15  ;;  %3733 = vmatprep.mubr.msk.bf16.mxu1 %vm2819_vm8, %v3787_v20 }
 0x277   : > { %v1675_v35 = vpop.permute.xlu1 %1674  ;;  %v1673_v38 = vpop.permute.xlu0 %1672  ;;  %v3788_v40 = vld [vmem:[#allocation3 + $0x68] sm:$0xff]  }
 0x278   : > { %1740 = vst.msk [vmem:[#allocation3 + $0x7c] sm:$0xf] %vm1708_vm1, %v1675_v35  ;;  %1739 = vst.msk [vmem:[#allocation3 + $0x78] sm:$0xf] %vm1708_vm1, %v1673_v38  ;;  %3734 = vmatmul.mubr.msk.bf16.gmra.mxu1 %vm2819_vm8, %v3788_v40 }
 0x27b   : > { %v1824_v29 = vpop.permute.xlu1 %1823  ;;  %v1822_v34 = vpop.permute.xlu0 %1821 }
 0x27c   : > { %1891 = vst.msk [vmem:[#allocation3 + $0x74] sm:$0xf] %vm1861_vm2, %v1824_v29  ;;  %1890 = vst.msk [vmem:[#allocation3 + $0x70] sm:$0xf] %vm1861_vm2, %v1822_v34 }
 0x27f   : > { %v1828_v19 = vpop.permute.xlu1 %1827  ;;  %v1826_v48 = vpop.permute.xlu0 %1825 }
 0x280   : > { %1893 = vst.msk [vmem:[#allocation3 + $0x7c] sm:$0xf] %vm1861_vm2, %v1828_v19  ;;  %1892 = vst.msk [vmem:[#allocation3 + $0x78] sm:$0xf] %vm1861_vm2, %v1826_v48 }
 0x283   : > { %v1977_v41 = vpop.permute.xlu1 %1976  ;;  %v1975_v2 = vpop.permute.xlu0 %1974 }
 0x284   : > { %2044 = vst.msk [vmem:[#allocation3 + $0x74] sm:$0xf] %vm2014_vm3, %v1977_v41  ;;  %2043 = vst.msk [vmem:[#allocation3 + $0x70] sm:$0xf] %vm2014_vm3, %v1975_v2  ;;  %v3719_v18 = vpop.f32.mrf.mxu0 }
 0x285   : > { %v3241_v8 = vmul.f32 %v3719_v18, %v3719_v18 }
 0x286   : > { %v2938_v28 = vpop.f32.mrf.mxu0 }
 0x287   : > { %v1981_v43 = vpop.permute.xlu1 %1980  ;;  %v1979_v3 = vpop.permute.xlu0 %1978  ;;  %v3200_v10 = vadd.f32 %v3199_v33, %v2938_v28  ;;  %v3239_v50 = vmul.f32 %v2938_v28, %v2938_v28 }
 0x288   : > { %2046 = vst.msk [vmem:[#allocation3 + $0x7c] sm:$0xf] %vm2014_vm3, %v1981_v43  ;;  %2045 = vst.msk [vmem:[#allocation3 + $0x78] sm:$0xf] %vm2014_vm3, %v1979_v3  ;;  %v3720_v32 = vpop.f32.mrf.mxu0 }
 0x289   : > { %v3270_v62 = vadd.f32 %v3269_v55, %v3239_v50  ;;  %v3611_v26 = vpack.c.bf16 %v3720_v32, %v3719_v18  ;;  %v3242_v16 = vmul.f32 %v3720_v32, %v3720_v32 }
 0x28a   : > { %v2941_v51 = vpop.f32.mrf.mxu0 }
 0x28b   : > { %v2323_v25 = vpop.permute.xlu1 %2322  ;;  %v2321_v14 = vpop.permute.xlu0 %2320  ;;  %3667 = vst [vmem:[%s5274_s17 + $0x28] sm:$0xff] %v3611_v26   ;;  %v3606_v52 = vpack.c.bf16 %v2941_v51, %v2938_v28  ;;  %v3201_v63 = vadd.f32 %v3200_v10, %v2941_v51  ;;  %v3240_v4 = vmul.f32 %v2941_v51, %v2941_v51 }
 0x28c   : > { %2390 = vst.msk [vmem:[#allocation3 + $0x74] sm:$0xf] %vm2360_vm4, %v2323_v25  ;;  %2389 = vst.msk [vmem:[#allocation3 + $0x70] sm:$0xf] %vm2360_vm4, %v2321_v14 }
 0x28d   : > { %3666 = vst [vmem:[%s5274_s17 + $0x20] sm:$0xff] %v3606_v52   ;;  %v3202_v57 = vadd.f32 %v3719_v18, %v3201_v63  ;;  %v3271_v5 = vadd.f32 %v3270_v62, %v3240_v4 }
 0x28f   : > { %v2327_v49 = vpop.permute.xlu1 %2326  ;;  %v2325_v56 = vpop.permute.xlu0 %2324  ;;  %v3272_v31 = vadd.f32 %v3271_v5, %v3241_v8  ;;  %v3203_v53 = vadd.f32 %v3720_v32, %v3202_v57 }
 0x290   : > { %2392 = vst.msk [vmem:[#allocation3 + $0x7c] sm:$0xf] %vm2360_vm4, %v2327_v49  ;;  %2391 = vst.msk [vmem:[#allocation3 + $0x78] sm:$0xf] %vm2360_vm4, %v2325_v56 }
 0x291   : > { %v3273_v46 = vadd.f32 %v3272_v31, %v3242_v16 }
 0x293   : > { %v2462_v45 = vpop.permute.xlu1 %2461  ;;  %v2460_v13 = vpop.permute.xlu0 %2459 }
 0x294   : > { %2529 = vst.msk [vmem:[#allocation3 + $0x74] sm:$0xf] %vm2499_vm5, %v2462_v45  ;;  %2528 = vst.msk [vmem:[#allocation3 + $0x70] sm:$0xf] %vm2499_vm5, %v2460_v13 }
 0x297   : > { %v2466_v17 = vpop.permute.xlu1 %2465  ;;  %v2464_v11 = vpop.permute.xlu0 %2463 }
 0x298   : > { %2531 = vst.msk [vmem:[#allocation3 + $0x7c] sm:$0xf] %vm2499_vm5, %v2466_v17  ;;  %2530 = vst.msk [vmem:[#allocation3 + $0x78] sm:$0xf] %vm2499_vm5, %v2464_v11 }
 0x29b   : > { %v2601_v60 = vpop.permute.xlu1 %2600  ;;  %v2599_v1 = vpop.permute.xlu0 %2598 }
 0x29c   : > { %2668 = vst.msk [vmem:[#allocation3 + $0x74] sm:$0xf] %vm2638_vm6, %v2601_v60  ;;  %2667 = vst.msk [vmem:[#allocation3 + $0x70] sm:$0xf] %vm2638_vm6, %v2599_v1 }
 0x29f   : > { %v2605_v30 = vpop.permute.xlu1 %2604  ;;  %v2603_v22 = vpop.permute.xlu0 %2602 }
 0x2a0   : > { %2670 = vst.msk [vmem:[#allocation3 + $0x7c] sm:$0xf] %vm2638_vm6, %v2605_v30  ;;  %2669 = vst.msk [vmem:[#allocation3 + $0x78] sm:$0xf] %vm2638_vm6, %v2603_v22 }
 0x2a3   : > { %v3789_v36 = vld [vmem:[#allocation3 + $0x70] sm:$0xff]  }
 0x2a4   : > { %3737 = vmatprep.mubr.msk.bf16.mxu1 %vm2819_vm8, %v3789_v36 }
 0x2a7   : > { %v3790_v61 = vld [vmem:[#allocation3 + $0x78] sm:$0xff]  }
 0x2a8   : > { %3738 = vmatmul.mubr.msk.bf16.gmra.mxu1 %vm2819_vm8, %v3790_v61 }
 0x2ac   : > { %v3723_v23 = vpop.f32.mrf.mxu0 }
 0x2ad   : > { %v3245_v58 = vmul.f32 %v3723_v23, %v3723_v23 }
 0x2ae   : > { %v2954_v59 = vpop.f32.mrf.mxu0 }
 0x2af   : > { %v3204_v27 = vadd.f32 %v3203_v53, %v2954_v59  ;;  %v3243_v12 = vmul.f32 %v2954_v59, %v2954_v59 }
 0x2b0   : > { %v3724_v21 = vpop.f32.mrf.mxu0 }
 0x2b1   : > { %v3274_v47 = vadd.f32 %v3273_v46, %v3243_v12  ;;  %v3621_v0 = vpack.c.bf16 %v3724_v21, %v3723_v23  ;;  %v3246_v6 = vmul.f32 %v3724_v21, %v3724_v21 }
 0x2b2   : > { %v2957_v24 = vpop.f32.mrf.mxu0 }
 0x2b3   : > { %3669 = vst [vmem:[%s5274_s17 + $0x38] sm:$0xff] %v3621_v0   ;;  %v3616_v37 = vpack.c.bf16 %v2957_v24, %v2954_v59  ;;  %v3205_v44 = vadd.f32 %v3204_v27, %v2957_v24  ;;  %v3244_v9 = vmul.f32 %v2957_v24, %v2957_v24 }
 0x2b5   : > { %3668 = vst [vmem:[%s5274_s17 + $0x30] sm:$0xff] %v3616_v37   ;;  %v3206_v33 = vadd.f32 %v3723_v23, %v3205_v44  ;;  %v3275_v54 = vadd.f32 %v3274_v47, %v3244_v9 }
 0x2b7   : > { %v3276_v55 = vadd.f32 %v3275_v54, %v3245_v58  ;;  %v3207_v42 = vadd.f32 %v3724_v21, %v3206_v33 }
 0x2b9   : > { %v3277_v7 = vadd.f32 %v3276_v55, %v3246_v6 }
 0x2d8   : > { %v3727_v39 = vpop.f32.mrf.mxu1 }
 0x2d9   : > { %v3249_v2 = vmul.f32 %v3727_v39, %v3727_v39 }
 0x2da   : > { %v2970_v15 = vpop.f32.mrf.mxu1 }
 0x2db   : > { %v3208_v20 = vadd.f32 %v3207_v42, %v2970_v15  ;;  %v3247_v35 = vmul.f32 %v2970_v15, %v2970_v15 }
 0x2dc   : > { %v3728_v38 = vpop.f32.mrf.mxu1 }
 0x2dd   : > { %v3278_v40 = vadd.f32 %v3277_v7, %v3247_v35  ;;  %v3631_v29 = vpack.c.bf16 %v3728_v38, %v3727_v39  ;;  %v3250_v3 = vmul.f32 %v3728_v38, %v3728_v38 }
 0x2de   : > { %v2973_v34 = vpop.f32.mrf.mxu1 }
 0x2df   : > { %3671 = vst [vmem:[%s5274_s17 + $0x48] sm:$0xff] %v3631_v29   ;;  %v3626_v19 = vpack.c.bf16 %v2973_v34, %v2970_v15  ;;  %v3209_v48 = vadd.f32 %v3208_v20, %v2973_v34  ;;  %v3248_v41 = vmul.f32 %v2973_v34, %v2973_v34 }
 0x2e1   : > { %3670 = vst [vmem:[%s5274_s17 + $0x40] sm:$0xff] %v3626_v19   ;;  %v3210_v18 = vadd.f32 %v3727_v39, %v3209_v48  ;;  %v3279_v43 = vadd.f32 %v3278_v40, %v3248_v41 }
 0x2e3   : > { %v3280_v28 = vadd.f32 %v3279_v43, %v3249_v2  ;;  %v3211_v10 = vadd.f32 %v3728_v38, %v3210_v18 }
 0x2e5   : > { %v3281_v50 = vadd.f32 %v3280_v28, %v3250_v3 }
 0x308   : > { %v3731_v32 = vpop.f32.mrf.mxu1 }
 0x309   : > { %v3253_v5 = vmul.f32 %v3731_v32, %v3731_v32 }
 0x30a   : > { %v2986_v62 = vpop.f32.mrf.mxu1 }
 0x30b   : > { %v3212_v26 = vadd.f32 %v3211_v10, %v2986_v62  ;;  %v3251_v25 = vmul.f32 %v2986_v62, %v2986_v62 }
 0x30c   : > { %v3732_v14 = vpop.f32.mrf.mxu1 }
 0x30d   : > { %v3282_v51 = vadd.f32 %v3281_v50, %v3251_v25  ;;  %v3641_v52 = vpack.c.bf16 %v3732_v14, %v3731_v32  ;;  %v3254_v16 = vmul.f32 %v3732_v14, %v3732_v14 }
 0x30e   : > { %v2989_v63 = vpop.f32.mrf.mxu1 }
 0x30f   : > { %3673 = vst [vmem:[%s5274_s17 + $0x58] sm:$0xff] %v3641_v52   ;;  %v3636_v4 = vpack.c.bf16 %v2989_v63, %v2986_v62  ;;  %v3213_v8 = vadd.f32 %v3212_v26, %v2989_v63  ;;  %v3252_v57 = vmul.f32 %v2989_v63, %v2989_v63 }
 0x311   : > { %3672 = vst [vmem:[%s5274_s17 + $0x50] sm:$0xff] %v3636_v4   ;;  %v3214_v49 = vadd.f32 %v3731_v32, %v3213_v8  ;;  %v3283_v56 = vadd.f32 %v3282_v51, %v3252_v57 }
 0x313   : > { %v3284_v31 = vadd.f32 %v3283_v56, %v3253_v5  ;;  %v3215_v53 = vadd.f32 %v3732_v14, %v3214_v49 }
 0x315   : > { %v3285_v45 = vadd.f32 %v3284_v31, %v3254_v16 }
 0x338   : > { %v3735_v13 = vpop.f32.mrf.mxu1 }
 0x339   : > { %v3257_v27 = vmul.f32 %v3735_v13, %v3735_v13 }
 0x33a   : > { %v3002_v46 = vpop.f32.mrf.mxu1 }
 0x33b   : > { %v3255_v30 = vmul.f32 %v3002_v46, %v3002_v46  ;;  %v3216_v22 = vadd.f32 %v3215_v53, %v3002_v46 }
 0x33c   : > { %v3736_v17 = vpop.f32.mrf.mxu1 }
 0x33d   : > { %v3651_v11 = vpack.c.bf16 %v3736_v17, %v3735_v13  ;;  %v3286_v61 = vadd.f32 %v3285_v45, %v3255_v30  ;;  %v3258_v24 = vmul.f32 %v3736_v17, %v3736_v17 }
 0x33e   : > { %v3005_v60 = vpop.f32.mrf.mxu1 }
 0x33f   : > { %3675 = vst [vmem:[%s5274_s17 + $0x68] sm:$0xff] %v3651_v11   ;;  %v3646_v1 = vpack.c.bf16 %v3005_v60, %v3002_v46  ;;  %v3256_v36 = vmul.f32 %v3005_v60, %v3005_v60  ;;  %v3217_v23 = vadd.f32 %v3216_v22, %v3005_v60 }
 0x341   : > { %3674 = vst [vmem:[%s5274_s17 + $0x60] sm:$0xff] %v3646_v1   ;;  %v3287_v59 = vadd.f32 %v3286_v61, %v3256_v36  ;;  %v3218_v12 = vadd.f32 %v3735_v13, %v3217_v23 }
 0x343   : > { %v3288_v47 = vadd.f32 %v3287_v59, %v3257_v27  ;;  %v3219_v37 = vadd.f32 %v3736_v17, %v3218_v12 }
 0x345   : > { %v3289_v33 = vadd.f32 %v3288_v47, %v3258_v24 }
 0x368   : > { %v3739_v21 = vpop.f32.mrf.mxu1 }
 0x369   : > { %v3261_v15 = vmul.f32 %v3739_v21, %v3739_v21 }
 0x36a   : > { %v3018_v0 = vpop.f32.mrf.mxu1 }
 0x36b   : > { %v3259_v44 = vmul.f32 %v3018_v0, %v3018_v0  ;;  %v3220_v58 = vadd.f32 %v3219_v37, %v3018_v0 }
 0x36c   : > { %v3740_v9 = vpop.f32.mrf.mxu1 }
 0x36d   : > { %v3661_v54 = vpack.c.bf16 %v3740_v9, %v3739_v21  ;;  %v3290_v55 = vadd.f32 %v3289_v33, %v3259_v44  ;;  %v3262_v38 = vmul.f32 %v3740_v9, %v3740_v9 }
 0x36e   : > { %v3021_v6 = vpop.f32.mrf.mxu1 }
 0x36f   : > { %3677 = vst [vmem:[%s5274_s17 + $0x78] sm:$0xff] %v3661_v54   ;;  %v3656_v42 = vpack.c.bf16 %v3021_v6, %v3018_v0  ;;  %v3221_v7 = vadd.f32 %v3220_v58, %v3021_v6  ;;  %v3260_v39 = vmul.f32 %v3021_v6, %v3021_v6 }
 0x371   : > { %3676 = vst [vmem:[%s5274_s17 + $0x70] sm:$0xff] %v3656_v42   ;;  %v3222_v20 = vadd.f32 %v3739_v21, %v3221_v7  ;;  %v3291_v35 = vadd.f32 %v3290_v55, %v3260_v39 }
 0x373   : > { %v3223_v40 = vadd.f32 %v3740_v9, %v3222_v20  ;;  %v3292_v29 = vadd.f32 %v3291_v35, %v3261_v15 }
 0x375   : > { %v3224_v34 = vrot.slane %v3223_v40, 4  ;;  %v3293_v19 = vadd.f32 %v3292_v29, %v3262_v38 }
 0x377   : > { %v3225_v48 = vadd.f32 %v3224_v34, %v3223_v40  ;;  %v3294_v41 = vrot.slane %v3293_v19, 4 }
 0x379   : > { %v3226_v2 = vrot.slane %v3225_v48, 2  ;;  %v3295_v18 = vadd.f32 %v3294_v41, %v3293_v19 }
 0x37b   : > { %v3227_v43 = vadd.f32 %v3226_v2, %v3225_v48  ;;  %v3296_v3 = vrot.slane %v3295_v18, 2 }
 0x37d   : > { %v3228_v28 = vrot.slane %v3227_v43, 1  ;;  %v3297_v10 = vadd.f32 %v3296_v3, %v3295_v18 }
 0x37f   : > { %v3229_v50 = vadd.f32 %v3228_v28, %v3227_v43  ;;  %v3298_v32 = vrot.slane %v3297_v10, 1 }
 0x381   : > { %3230 = vst [vmem:[%s184_s20] sm:$0x1] %v3229_v50  ;;  %v3299_v62 = vadd.f32 %v3298_v32, %v3297_v10 }
 0x383   : > { %3300 = vst [vmem:[%s184_s20 + $0x1] sm:$0x1] %v3299_v62 }
 0x384 PF: > { %s14_s12 = sadd.s32 1, %s3797_s12  }
 0x385   : > { %p11_p5 = scmp.ge.s32.totalorder %s14_s12, 4  }
 0x387   :  { %13 = sbr.rel (!%p11_p5) target bundleno = 1 (0x1), region = 71 }

// kernel: down_block_forward.4
= control target key start
LH: loop header
LB: loop body
LE: loop exit
PB: predicated region body
PF: predicated region fallthrough
CT: control target
= control target key end

     0   :  { %s5891_s18 = smov 0   ;;  %s7248_s0 = inlined_call_operand.vmem [shape: bf16[512,128], index: 0, kind: input, shape index: {}]   ;;  %s7249_s1 = inlined_call_operand.vmem [shape: f32[1,128], index: 1, kind: input, shape index: {}]   ;;  %s7250_s2 = inlined_call_operand.vmem [shape: f32[1,128], index: 2, kind: input, shape index: {}]   ;;  %s7251_s3 = inlined_call_operand.vmem [shape: bf16[1152,128], index: 3, kind: input, shape index: {}]   ;;  %s7252_s4 = inlined_call_operand.vmem [shape: f32[512,128], index: 4, kind: output, shape index: {0}]   ;;  %s7253_s5 = inlined_call_operand.vmem [shape: f32[2,2,128], index: 5, kind: output, shape index: {1}]  }
   0x1 LB: > { %s5897_s19 = sadd.s32 4294967295, %s5858_s18   ;;  %p4635_p0 = scmp.ge.s32.totalorder %s5858_s18, 1  ;;  %s5858_s18 = sphi %s5891_s18, %s16_s18  }
   0x2   : > { %p191_p1 = scmp.lt.s32.totalorder %s5858_s18, 3 }
   0x4   : > { %p192_p2 = pnand %p4635_p0, %p191_p1 }
   0x6   : > { %195 = sbr.rel (%p192_p2) target bundleno = 696 (0x2b8), region = 36 }
   0xb   : > { %v5567_v0 = vld [vmem:[%s7251_s3 + $0x78] sm:$0xff]   ;;  %v5860_v2 = vmov 0   ;;  %s4636_s24 = sshll.u32 %s5897_s19, 5  ;;  %v5569_v3 = vld [vmem:[%s7251_s3 + $0x70] sm:$0xff]   ;;  %v5571_v5 = vld [vmem:[%s7251_s3 + $0x68] sm:$0xff]   ;;  %vm895_vm2 = vcmask 1040384  }
   0xc   : > { %v5568_v1 = vld [vmem:[%s7251_s3 + $0x38] sm:$0xff]   ;;  %414 = vst [vmem:[#allocation2] sm:$0xf] %v5860_v2  ;;  %415 = vst [vmem:[#allocation2 + $0x4] sm:$0xf] %v5860_v2  ;;  %5022 = vmatprep.subr.bf16.mxu0 %v5567_v0  ;;  %5542 = vmatprep.subr.bf16.mxu1 %v5567_v0  ;;  %v5570_v4 = vld [vmem:[%s7251_s3 + $0x30] sm:$0xff]  }
   0xd   : > { %416 = vst [vmem:[#allocation2 + $0x8] sm:$0x1] %v5860_v2  ;;  %417 = vst [vmem:[#allocation2 + $0xc] sm:$0xf] %v5860_v2  ;;  %5023 = vmatpush3.bf16.msra.mxu0 %v5568_v1  ;;  %5550 = vmatpush3.bf16.msra.mxu1 %v5568_v1  ;;  %p224_p3 = scmp.lt.s32.totalorder %s4636_s24, 63  ;;  %v5572_v6 = vld [vmem:[%s7251_s3 + $0x28] sm:$0xff]  }
   0xe   : > { %418 = vst [vmem:[#allocation2 + $0x10] sm:$0xf] %v5860_v2  ;;  %419 = vst [vmem:[#allocation2 + $0x14] sm:$0x1] %v5860_v2  ;;  %5024 = vmatprep.subr.bf16.mxu0 %v5569_v3  ;;  %5543 = vmatprep.subr.bf16.mxu1 %v5569_v3  ;;  %v5573_v7 = vld [vmem:[%s7251_s3 + $0x60] sm:$0xff]   ;;  %v5575_v9 = vld [vmem:[%s7251_s3 + $0x58] sm:$0xff]  }
   0xf   : > { %420 = vst [vmem:[#allocation2 + $0x18] sm:$0xf] %v5860_v2  ;;  %421 = vst [vmem:[#allocation2 + $0x1c] sm:$0xf] %v5860_v2  ;;  %s7297_s24 = smov (!%p224_p3, %s4636_s24), 63  ;;  %v5574_v8 = vld [vmem:[%s7251_s3 + $0x20] sm:$0xff]  }
  0x10   : > { %422 = vst [vmem:[#allocation2 + $0x20] sm:$0x1] %v5860_v2  ;;  %423 = vst [vmem:[#allocation2 + $0x24] sm:$0xf] %v5860_v2  ;;  %s4637_s14 = sshll.u32 %s7297_s24, 2  ;;  %v5576_v10 = vld [vmem:[%s7251_s3 + $0x18] sm:$0xff]  }
  0x11   : > { %424 = vst [vmem:[#allocation2 + $0x28] sm:$0xf] %v5860_v2  ;;  %425 = vst [vmem:[#allocation2 + $0x2c] sm:$0x1] %v5860_v2  ;;  %5025 = vmatpush3.bf16.msra.mxu0 %v5570_v4  ;;  %5551 = vmatpush3.bf16.msra.mxu1 %v5570_v4  ;;  %v5577_v11 = vld [vmem:[%s7251_s3 + $0x50] sm:$0xff]   ;;  %s5941_s23 = scalar_lea.vmem %s7248_s0, %s4637_s14  ;;  %v5579_v22 = vld [vmem:[%s7251_s3 + $0x48] sm:$0xff]  }
  0x12   : > { %426 = vst [vmem:[#allocation2 + $0x30] sm:$0xf] %v5860_v2  ;;  %427 = vst [vmem:[#allocation2 + $0x34] sm:$0xf] %v5860_v2  ;;  %5026 = vmatprep.subr.bf16.mxu0 %v5571_v5  ;;  %5544 = vmatprep.subr.bf16.mxu1 %v5571_v5  ;;  %vm1191_vm0 = vsmask.f32 3328 }
  0x13   : > { %428 = vst [vmem:[#allocation2 + $0x38] sm:$0x1] %v5860_v2  ;;  %429 = vst [vmem:[#allocation2 + $0x3c] sm:$0xf] %v5860_v2  ;;  %v1005_v12 = vld [vmem:[#allocation2] sm:$0xf] }
  0x14   : > { %430 = vst [vmem:[#allocation2 + $0x40] sm:$0xf] %v5860_v2  ;;  %431 = vst [vmem:[#allocation2 + $0x44] sm:$0x1] %v5860_v2  ;;  %v1006_v13 = vld [vmem:[#allocation2 + $0x4] sm:$0xf] }
  0x15   : > { %432 = vst [vmem:[#allocation2 + $0x48] sm:$0xf] %v5860_v2  ;;  %433 = vst [vmem:[#allocation2 + $0x4c] sm:$0xf] %v5860_v2  ;;  %5027 = vmatpush3.bf16.msra.mxu0 %v5572_v6  ;;  %5552 = vmatpush3.bf16.msra.mxu1 %v5572_v6  ;;  %v1137_v14 = vld [vmem:[#allocation2] sm:$0xf] }
  0x16   : > { %434 = vst [vmem:[#allocation2 + $0x50] sm:$0x1] %v5860_v2  ;;  %435 = vst [vmem:[#allocation2 + $0x54] sm:$0xf] %v5860_v2  ;;  %5028 = vmatprep.subr.bf16.mxu0 %v5573_v7  ;;  %5545 = vmatprep.subr.bf16.mxu1 %v5573_v7  ;;  %v1138_v15 = vld [vmem:[#allocation2 + $0x4] sm:$0xf] }
  0x17   : > { %436 = vst [vmem:[#allocation2 + $0x58] sm:$0xf] %v5860_v2  ;;  %437 = vst [vmem:[#allocation2 + $0x5c] sm:$0x1] %v5860_v2  ;;  %v1139_v16 = vld [vmem:[#allocation2 + $0x8] sm:$0x1] }
  0x18   : > { %438 = vst [vmem:[#allocation2 + $0x60] sm:$0xf] %v5860_v2  ;;  %439 = vst [vmem:[#allocation2 + $0x64] sm:$0xf] %v5860_v2  ;;  %vm1192_vm1 = vsmask.f32 7440 }
  0x19   : > { %440 = vst [vmem:[#allocation2 + $0x68] sm:$0x1] %v5860_v2  ;;  %441 = vst [vmem:[#allocation2 + $0x6c] sm:$0xf] %v5860_v2  ;;  %5029 = vmatpush3.bf16.msra.mxu0 %v5574_v8  ;;  %5553 = vmatpush3.bf16.msra.mxu1 %v5574_v8  ;;  %v1195_v17 = vshrl.u32 %v1137_v14, 16  ;;  %v1198_v18 = vshll.u32 %v1137_v14, 16 }
  0x1a   : > { %442 = vst [vmem:[#allocation2 + $0x70] sm:$0xf] %v5860_v2  ;;  %443 = vst [vmem:[#allocation2 + $0x74] sm:$0x1] %v5860_v2  ;;  %5030 = vmatprep.subr.bf16.mxu0 %v5575_v9  ;;  %5546 = vmatprep.subr.bf16.mxu1 %v5575_v9  ;;  %v1204_v19 = vshll.u32 %v1138_v15, 16  ;;  %v4944_v20 = vld [vmem:[%s5941_s23] sm:$0xff]  }
  0x1b   : > { %444 = vst [vmem:[#allocation2 + $0x78] sm:$0xf] %v5860_v2  ;;  %445 = vst [vmem:[#allocation2 + $0x7c] sm:$0xf] %v5860_v2  ;;  %v5578_v21 = vld [vmem:[%s7251_s3 + $0x10] sm:$0xff]   ;;  %v1208_v23 = vshrl.u32 %v1138_v15, 16  ;;  %v4945_v25 = vunpack.c.l.bf16 %v4944_v20  ;;  %v4946_v26 = vunpack.c.h.bf16 %v4944_v20 }
  0x1c   : > { %446 = vst [vmem:[#allocation2 + $0x80] sm:$0x1] %v5860_v2  ;;  %447 = vst [vmem:[#allocation2 + $0x84] sm:$0xf] %v5860_v2  ;;  %v1214_v24 = vshll.u32 %v1139_v16, 16  ;;  %v1197_v28 = vrot.slane %v1195_v17, 4 }
  0x1d   : > { %448 = vst [vmem:[#allocation2 + $0x88] sm:$0xf] %v5860_v2  ;;  %449 = vst [vmem:[#allocation2 + $0x8c] sm:$0x1] %v5860_v2  ;;  %5031 = vmatpush3.bf16.msra.mxu0 %v5576_v10  ;;  %5554 = vmatpush3.bf16.msra.mxu1 %v5576_v10  ;;  %v5953_v27 = vld [vmem:[%s7249_s1] ss:$0 sm:$0xff] }
  0x1e   : > { %450 = vst [vmem:[#allocation2 + $0x90] sm:$0xf] %v5860_v2  ;;  %451 = vst [vmem:[#allocation2 + $0x94] sm:$0xf] %v5860_v2  ;;  %5032 = vmatprep.subr.bf16.mxu0 %v5577_v11  ;;  %5547 = vmatprep.subr.bf16.mxu1 %v5577_v11  ;;  %v1200_v29 = vrot.slane %v1198_v18, 5  ;;  %v1206_v30 = vrot.slane %v1204_v19, 5  ;;  %v311_v34 = vmul.f32 %v4945_v25, %v5953_v27 }
  0x1f   : > { %452 = vst [vmem:[#allocation2 + $0x98] sm:$0x1] %v5860_v2  ;;  %453 = vst [vmem:[#allocation2 + $0x9c] sm:$0xf] %v5860_v2  ;;  %v5958_v31 = vld [vmem:[%s7250_s2] ss:$0 sm:$0xff]  ;;  %v312_v35 = vmul.f32 %v4946_v26, %v5953_v27 }
  0x20   : > { %454 = vst [vmem:[#allocation2 + $0xa0] sm:$0xf] %v5860_v2  ;;  %455 = vst [vmem:[#allocation2 + $0xa4] sm:$0x1] %v5860_v2  ;;  %v5017_v32 = vld [vmem:[%s5941_s23 + $0x58] sm:$0xff]   ;;  %v1210_v33 = vrot.slane %v1208_v23, 4  ;;  %v1201_v36 = vor.u32 %v1200_v29, %v1197_v28  ;;  %v350_v42 = vadd.f32 %v5958_v31, %v311_v34 }
  0x21   : > { %456 = vst [vmem:[#allocation2 + $0xa8] sm:$0xf] %v5860_v2  ;;  %457 = vst [vmem:[#allocation2 + $0xac] sm:$0xf] %v5860_v2  ;;  %vm564_vm3 = vsmask.f32 256  ;;  %v4989_v38 = vunpack.c.l.bf16 %v5017_v32  ;;  %5033 = vmatpush3.bf16.msra.mxu0 %v5578_v21  ;;  %5555 = vmatpush3.bf16.msra.mxu1 %v5578_v21  ;;  %v351_v43 = vadd.f32 %v5958_v31, %v312_v35  ;;  %v4990_v44 = vunpack.c.h.bf16 %v5017_v32 }
  0x22   : > { %458 = vst [vmem:[#allocation2 + $0xb0] sm:$0x1] %v5860_v2  ;;  %459 = vst [vmem:[#allocation2 + $0xb4] sm:$0xf] %v5860_v2  ;;  %v1216_v37 = vrot.slane %v1214_v24, 5  ;;  %v5580_v39 = vld [vmem:[%s7251_s3 + $0x8] sm:$0xff]   ;;  %v1211_v41 = vor.u32 %v1210_v33, %v1206_v30  ;;  %5034 = vmatprep.subr.bf16.mxu0 %v5579_v22  ;;  %5548 = vmatprep.subr.bf16.mxu1 %v5579_v22 }
  0x23   : > { %460 = vst [vmem:[#allocation2 + $0xb8] sm:$0xf] %v5860_v2  ;;  %461 = vst [vmem:[#allocation2 + $0xbc] sm:$0x1] %v5860_v2  ;;  %vm565_vm4 = vsmask.f32 4368  ;;  %v333_v47 = vmul.f32 %v4989_v38, %v5953_v27  ;;  %v334_v52 = vmul.f32 %v4990_v44, %v5953_v27 }
  0x24   : > { %462 = vst [vmem:[#allocation2 + $0xc0] sm:$0xf] %v5860_v2  ;;  %463 = vst [vmem:[#allocation2 + $0xc4] sm:$0xf] %v5860_v2  ;;  %v5581_v45 = vld [vmem:[%s7251_s3 + $0x40] sm:$0xff]   ;;  %v1202_v46 = vrot.slane %v1201_v36, 4 }
  0x25   : > { %464 = vst [vmem:[#allocation2 + $0xc8] sm:$0x1] %v5860_v2  ;;  %465 = vst [vmem:[#allocation2 + $0xcc] sm:$0xf] %v5860_v2  ;;  %vm889_vm6 = vsmask.f32 7938  ;;  %v372_v54 = vadd.f32 %v5958_v31, %v333_v47  ;;  %5035 = vmatpush3.bf16.msra.mxu0 %v5580_v39  ;;  %5556 = vmatpush3.bf16.msra.mxu1 %v5580_v39  ;;  %v373_v59 = vadd.f32 %v5958_v31, %v334_v52 }
  0x26   : > { %466 = vst [vmem:[#allocation2 + $0xd0] sm:$0xf] %v5860_v2  ;;  %467 = vst [vmem:[#allocation2 + $0xd4] sm:$0x1] %v5860_v2  ;;  %v5582_v48 = vld [vmem:[%s7251_s3] sm:$0xff]   ;;  %v1212_v49 = vrot.slane %v1211_v41, 4  ;;  %5036 = vmatprep.subr.bf16.mxu0 %v5581_v45  ;;  %5549 = vmatprep.subr.bf16.mxu1 %v5581_v45 }
  0x27   : > { %1041 = vst [vmem:[#allocation3] sm:$0xf] %v1005_v12  ;;  %1042 = vst [vmem:[#allocation3 + $0x24] sm:$0xf] %v1006_v13  ;;  %v382_v50 = vmax.f32 %v350_v42, 0.0  ;;  %v383_v51 = vmax.f32 %v351_v43, 0.0 }
  0x28   : > { %vm5968_vm5 = vmor %vm1191_vm0, %vm1192_vm1  ;;  %vm888_vm7 = vcmask 1043456   ;;  %v5591_v58 = vld [vmem:[%s7251_s3 + $0xf8] sm:$0xff]   ;;  %v404_v60 = vmax.f32 %v372_v54, 0.0  ;;  %v405_v3 = vmax.f32 %v373_v59, 0.0  ;;  %v5007_v5 = vld [vmem:[%s5941_s23 + $0x8] sm:$0xff]   ;;  %vm1860_vm11 = vcmask 1042432  }
  0x29   : > { %v1207_v53 = vsel %vm5968_vm5, %v1202_v46, %v1206_v30  ;;  %v1217_v55 = vsel %vm5968_vm5, %v1212_v49, %v1216_v37  ;;  %v4911_v56 = vpack.c.bf16 %v382_v50, %v382_v50  ;;  %v4912_v57 = vpack.c.bf16 %v383_v51, %v383_v51  ;;  %v5592_v61 = vld [vmem:[%s7251_s3 + $0x178] sm:$0xff]   ;;  %vm5996_vm8 = vmand %vm895_vm2, %vm564_vm3  ;;  %5037 = vmatpush3.bf16.msra.mxu0 %v5582_v48  ;;  %v891_v12 = vld [vmem:[#allocation2 + $0xc] sm:$0xf]  ;;  %s4639_s9 = sshll.u32 %s7297_s24, 3  ;;  %p235_p4 = scmp.lt.s32.totalorder %s5897_s19, 1 }
  0x2a   : > { %1610 = vst [vmem:[#allocation3 + $0x4] sm:$0xf] %v1207_v53  ;;  %1611 = vst [vmem:[#allocation3 + $0x28] sm:$0xf] %v1217_v55  ;;  %v4933_v4 = vpack.c.bf16 %v404_v60, %v404_v60  ;;  %5557 = vmatpush3.bf16.msra.mxu1 %v5582_v48  ;;  %v4949_v9 = vunpack.c.l.bf16 %v5007_v5  ;;  %v4950_v10 = vunpack.c.h.bf16 %v5007_v5  ;;  %v897_v13 = vld [vmem:[#allocation2 + $0x14] sm:$0x1]  ;;  %v4934_v14 = vpack.c.bf16 %v405_v3, %v405_v3  ;;  %s7095_s12 = scalar_lea.vmem %s7252_s4, %s4639_s9 }
  0x2b   : > { %v568_v62 = vshrl.u32 %v4911_v56, 16  ;;  %v571_v63 = vshll.u32 %v4911_v56, 16  ;;  %v576_v0 = vshrl.u32 %v4912_v57, 16  ;;  %v579_v1 = vshll.u32 %v4912_v57, 16  ;;  %vm6003_vm9 = vmor %vm564_vm3, %vm565_vm4  ;;  %5134 = vmatprep.subr.bf16.mxu1 %v5591_v58  ;;  %5246 = vmatprep.subr.bf16.mxu0 %v5592_v61  ;;  %v970_v21 = vld [vmem:[#allocation2 + $0x90] sm:$0xf] }
  0x2c   : > { %vm6009_vm10 = vmand %vm888_vm7, %vm889_vm6  ;;  %v755_v15 = vshrl.u32 %v4933_v4, 16  ;;  %v758_v16 = vshll.u32 %v4933_v4, 16  ;;  %v5595_v22 = vld [vmem:[%s7251_s3 + $0x138] sm:$0xff]   ;;  %v5018_v23 = vld [vmem:[%s5941_s23 + $0x60] sm:$0xff]   ;;  %v763_v25 = vshrl.u32 %v4934_v14, 16  ;;  %v766_v26 = vshll.u32 %v4934_v14, 16 }
  0x2d   : > { %v570_v7 = vrot.slane %v568_v62, 7  ;;  %v578_v8 = vrot.slane %v576_v0, 7  ;;  %v313_v28 = vmul.f32 %v4949_v9, %v5953_v27  ;;  %v314_v35 = vmul.f32 %v4950_v10, %v5953_v27  ;;  %v974_v41 = vld [vmem:[#allocation2 + $0x98] sm:$0x1]  ;;  %v5607_v49 = vld [vmem:[%s7251_s3 + $0x170] sm:$0xff]   ;;  %v5801_v2 = vld [vmem:[%s7251_s3 + $0x200] sm:$0xff]  }
  0x2e   : > { %v757_v24 = vrot.slane %v755_v15, 7  ;;  %v5583_v29 = vld [vmem:[#allocation3] ss:$36 sps:$4 sm:$0xff]   ;;  %v765_v38 = vrot.slane %v763_v25, 7  ;;  %v4993_v43 = vunpack.c.l.bf16 %v5018_v23  ;;  %v4994_v44 = vunpack.c.h.bf16 %v5018_v23  ;;  %v5609_v57 = vld [vmem:[%s7251_s3 + $0x130] sm:$0xff]   ;;  %s7299_s19 = smov (!%p235_p4, %s5897_s19), 1 }
  0x2f   : > { %v573_v17 = vor.u32 %v571_v63, %v570_v7  ;;  %v574_v18 = vrot.slane %v570_v7, 4  ;;  %v581_v19 = vor.u32 %v579_v1, %v578_v8  ;;  %v583_v20 = vrot.slane %v578_v8, 4  ;;  %v5008_v58 = vld [vmem:[%s5941_s23 + $0x10] sm:$0xff]   ;;  %v5019_v63 = vld [vmem:[%s5941_s23 + $0x68] sm:$0xff]   ;;  %s4640_s24 = sshll.u32 %s7299_s19, 1 }
  0x30   : > { %v760_v36 = vor.u32 %v758_v16, %v757_v24  ;;  %v761_v37 = vrot.slane %v757_v24, 4  ;;  %v352_v39 = vadd.f32 %v5958_v31, %v313_v28  ;;  %v353_v42 = vadd.f32 %v5958_v31, %v314_v35  ;;  %v5775_v11 = vld [vmem:[%s7251_s3 + $0x210] sm:$0xff]   ;;  %s238_s15 = scalar_lea.vmem %s7253_s5, %s4640_s24 }
  0x31   : > { %v5585_v30 = vld [vmem:[#allocation3 + $0x4] ss:$36 sps:$4 sm:$0xff]   ;;  %v582_v32 = vsel %vm6003_vm9, %v574_v18, %v581_v19  ;;  %v892_v33 = vsel %vm6009_vm10, %v573_v17, %v891_v12  ;;  %v898_v34 = vsel %vm5996_vm8, %v583_v20, %v897_v13  ;;  %v768_v45 = vor.u32 %v766_v26, %v765_v38 }
  0x32   : > { %893 = vst [vmem:[#allocation2 + $0xc] sm:$0xf] %v892_v33  ;;  %894 = vst [vmem:[#allocation2 + $0x10] sm:$0xf] %v582_v32  ;;  %3631 = vmatprep.mubr.bf16.mxu0 %v5585_v30  ;;  %v770_v46 = vrot.slane %v765_v38, 4  ;;  %v971_v47 = vsel %vm6009_vm10, %v760_v36, %v970_v21  ;;  %v384_v48 = vmax.f32 %v352_v39, 0.0  ;;  %v335_v51 = vmul.f32 %v4993_v43, %v5953_v27 }
  0x33   : > { %899 = vst [vmem:[#allocation2 + $0x14] sm:$0x1] %v898_v34  ;;  %3632 = vmatmul.mubr.bf16.vlgmr.msra.gmra.mxu0 %v5583_v29  ;;  %972 = vst [vmem:[#allocation2 + $0x90] sm:$0xf] %v971_v47  ;;  %v385_v50 = vmax.f32 %v353_v42, 0.0  ;;  %v336_v52 = vmul.f32 %v4994_v44, %v5953_v27  ;;  %v769_v53 = vsel %vm6003_vm9, %v761_v37, %v768_v45  ;;  %v4953_v61 = vunpack.c.l.bf16 %v5008_v58 }
  0x34   : > { %5247 = vmatpush3.bf16.msra.mxu0 %v5595_v22  ;;  %v975_v54 = vsel %vm5996_vm8, %v770_v46, %v974_v41  ;;  %v4913_v55 = vpack.c.bf16 %v384_v48, %v384_v48  ;;  %973 = vst [vmem:[#allocation2 + $0x94] sm:$0xf] %v769_v53  ;;  %v4954_v62 = vunpack.c.h.bf16 %v5008_v58  ;;  %v6046_v4 = vadd.f32 %v5958_v31, %v335_v51  ;;  %v900_v37 = vld [vmem:[#allocation2 + $0x18] sm:$0xf]  ;;  %v904_v58 = vld [vmem:[#allocation2 + $0x20] sm:$0x1] }
  0x35   : > { %5248 = vmatprep.subr.bf16.mxu0 %v5607_v49  ;;  %976 = vst [vmem:[#allocation2 + $0x98] sm:$0x1] %v975_v54  ;;  %v6038_v56 = vpack.c.bf16 %v385_v50, %v385_v50  ;;  %v6049_v5 = vadd.f32 %v5958_v31, %v336_v52  ;;  %v4997_v7 = vunpack.c.l.bf16 %v5019_v63  ;;  %v4998_v8 = vunpack.c.h.bf16 %v5019_v63 }
  0x36   : > { %v585_v59 = vshrl.u32 %v4913_v55, 16  ;;  %v588_v60 = vshll.u32 %v4913_v55, 16  ;;  %v315_v14 = vmul.f32 %v4953_v61, %v5953_v27  ;;  %v316_v15 = vmul.f32 %v4954_v62, %v5953_v27 }
  0x37   : > { %v6059_v38 = vmul.f32 %v4997_v7, %v5953_v27  ;;  %v6062_v39 = vmul.f32 %v4998_v8, %v5953_v27  ;;  %v593_v52 = vshrl.u32 %v6038_v56, 16  ;;  %vm1861_vm12 = vcmask 1046532  }
  0x38   : > { %5249 = vmatpush3.bf16.msra.mxu0 %v5609_v57  ;;  %v6053_v19 = vrot.slane %v585_v59, 7  ;;  %v354_v24 = vadd.f32 %v5958_v31, %v315_v14  ;;  %v355_v25 = vadd.f32 %v5958_v31, %v316_v15  ;;  %v596_v57 = vshll.u32 %v6038_v56, 16  ;;  %vm6238_vm13 = vmor %vm1860_vm11, %vm1861_vm12 }
  0x39   : > { %v1007_v0 = vld [vmem:[#allocation2 + $0xc] sm:$0xf]  ;;  %v1008_v1 = vld [vmem:[#allocation2 + $0x10] sm:$0xf]  ;;  %v595_v61 = vrot.slane %v593_v52, 7  ;;  %v407_v56 = vmax.f32 %v6049_v5, 0.0 }
  0x3a   : > { %v1140_v3 = vld [vmem:[#allocation2 + $0xc] sm:$0xf]  ;;  %1043 = vst [vmem:[#allocation3 + $0x48] sm:$0xf] %v1007_v0  ;;  %1044 = vst [vmem:[#allocation3 + $0x6c] sm:$0xf] %v1008_v1  ;;  %v590_v36 = vor.u32 %v588_v60, %v6053_v19 }
  0x3b   : > { %v1141_v9 = vld [vmem:[#allocation2 + $0x10] sm:$0xf]  ;;  %v1142_v10 = vld [vmem:[#allocation2 + $0x14] sm:$0x1]  ;;  %v1219_v12 = vshrl.u32 %v1140_v3, 16  ;;  %v1222_v13 = vshll.u32 %v1140_v3, 16  ;;  %v598_v7 = vor.u32 %v596_v57, %v595_v61 }
  0x3c   : > { %1073 = vst [vmem:[#allocation3 + $0xc] sm:$0xf] %v1007_v0  ;;  %1074 = vst [vmem:[#allocation3 + $0x30] sm:$0xf] %v1008_v1  ;;  %v1228_v16 = vshll.u32 %v1141_v9, 16  ;;  %v1232_v17 = vshrl.u32 %v1141_v9, 16  ;;  %v901_v62 = vsel %vm6009_vm10, %v590_v36, %v900_v37 }
  0x3d   : > { %v1238_v18 = vshll.u32 %v1142_v10, 16  ;;  %v1221_v20 = vrot.slane %v1219_v12, 4  ;;  %v1224_v21 = vrot.slane %v1222_v13, 5  ;;  %v1029_v22 = vld [vmem:[#allocation2 + $0x90] sm:$0xf]  ;;  %v591_v48 = vrot.slane %v6053_v19, 4 }
  0x3e   : > { %v1173_v23 = vld [vmem:[#allocation2 + $0x90] sm:$0xf]  ;;  %v1230_v26 = vrot.slane %v1228_v16, 5  ;;  %v1234_v28 = vrot.slane %v1232_v17, 4  ;;  %1065 = vst [vmem:[#allocation3 + $0x360] sm:$0xf] %v1029_v22  ;;  %v4936_v13 = vpack.c.bf16 %v407_v56, %v407_v56 }
  0x3f   : > { %v1240_v29 = vrot.slane %v1238_v18, 5  ;;  %v1483_v30 = vshrl.u32 %v1173_v23, 16  ;;  %1095 = vst [vmem:[#allocation3 + $0x324] sm:$0xf] %v1029_v22  ;;  %1125 = vst [vmem:[#allocation3 + $0x2e8] sm:$0xf] %v1029_v22  ;;  %v1225_v32 = vor.u32 %v1224_v21, %v1221_v20  ;;  %v599_v16 = vsel %vm6003_vm9, %v591_v48, %v598_v7 }
  0x40   : > { %v1030_v33 = vld [vmem:[#allocation2 + $0x94] sm:$0xf]  ;;  %v1175_v35 = vld [vmem:[#allocation2 + $0x98] sm:$0x1]  ;;  %v1235_v41 = vor.u32 %v1234_v28, %v1230_v26  ;;  %v1486_v43 = vshll.u32 %v1173_v23, 16  ;;  %v406_v0 = vmax.f32 %v6046_v4, 0.0 }
  0x41   : > { %v1174_v34 = vld [vmem:[#allocation2 + $0x94] sm:$0xf]  ;;  %1066 = vst [vmem:[#allocation3 + $0x384] sm:$0xf] %v1030_v33  ;;  %v1485_v42 = vrot.slane %v1483_v30, 4  ;;  %v1226_v45 = vrot.slane %v1225_v32, 4 }
  0x42   : > { %v1492_v44 = vshll.u32 %v1174_v34, 16  ;;  %1096 = vst [vmem:[#allocation3 + $0x348] sm:$0xf] %v1030_v33  ;;  %1126 = vst [vmem:[#allocation3 + $0x30c] sm:$0xf] %v1030_v33  ;;  %v1496_v46 = vshrl.u32 %v1174_v34, 16  ;;  %v4935_v12 = vpack.c.bf16 %v406_v0, %v406_v0 }
  0x43   : > { %v1502_v47 = vshll.u32 %v1175_v35, 16  ;;  %v1236_v49 = vrot.slane %v1235_v41, 4  ;;  %v1488_v50 = vrot.slane %v1486_v43, 5  ;;  %v1231_v53 = vsel %vm5968_vm5, %v1226_v45, %v1230_v26  ;;  %902 = vst [vmem:[#allocation2 + $0x18] sm:$0xf] %v901_v62  ;;  %v6084_v5 = vld [vmem:[%s5941_s23 + $0x18] sm:$0xff]  }
  0x44   : > { %v1494_v51 = vrot.slane %v1492_v44, 5  ;;  %v1498_v54 = vrot.slane %v1496_v46, 4  ;;  %1612 = vst [vmem:[#allocation3 + $0x4c] sm:$0xf] %v1231_v53  ;;  %1668 = vst [vmem:[#allocation3 + $0x10] sm:$0xf] %v1231_v53  ;;  %v6095_v35 = vadd.f32 %v5958_v31, %v6059_v38  ;;  %v4957_v43 = vunpack.c.l.bf16 %v6084_v5 }
  0x45   : > { %v1504_v55 = vrot.slane %v1502_v47, 5  ;;  %v1241_v59 = vsel %vm5968_vm5, %v1236_v49, %v1240_v29  ;;  %v1489_v60 = vor.u32 %v1488_v50, %v1485_v42  ;;  %v386_v1 = vmax.f32 %v354_v24, 0.0  ;;  %903 = vst [vmem:[#allocation2 + $0x1c] sm:$0xf] %v599_v16  ;;  %v5625_v22 = vld [vmem:[%s7251_s3 + $0x168] sm:$0xff]   ;;  %v6104_v53 = vld [vmem:[%s5941_s23 + $0x70] sm:$0xff]  }
  0x46   : > { %1613 = vst [vmem:[#allocation3 + $0x70] sm:$0xf] %v1241_v59  ;;  %1669 = vst [vmem:[#allocation3 + $0x34] sm:$0xf] %v1241_v59  ;;  %v1499_v63 = vor.u32 %v1498_v54, %v1494_v51  ;;  %v600_v8 = vrot.slane %v595_v61, 4  ;;  %v387_v9 = vmax.f32 %v355_v25, 0.0  ;;  %5250 = vmatprep.subr.bf16.mxu0 %v5625_v22  ;;  %v6099_v42 = vadd.f32 %v5958_v31, %v6062_v39 }
  0x47   : > { %v1490_v3 = vrot.slane %v1489_v60, 4  ;;  %v4915_v14 = vpack.c.bf16 %v386_v1, %v386_v1  ;;  %v772_v19 = vshrl.u32 %v4935_v12, 16  ;;  %v775_v20 = vshll.u32 %v4935_v12, 16  ;;  %v977_v24 = vld [vmem:[#allocation2 + $0x9c] sm:$0xf]  ;;  %v5629_v61 = vld [vmem:[%s7251_s3 + $0x128] sm:$0xff]  }
  0x48   : > { %v1500_v10 = vrot.slane %v1499_v63, 4  ;;  %v905_v4 = vsel %vm5996_vm8, %v600_v8, %v904_v58  ;;  %v6081_v17 = vpack.c.bf16 %v387_v9, %v387_v9  ;;  %v780_v21 = vshrl.u32 %v4936_v13, 16  ;;  %v981_v25 = vld [vmem:[#allocation2 + $0xa4] sm:$0x1]  ;;  %v5594_v54 = vld [vmem:[%s7251_s3 + $0xb8] sm:$0xff]   ;;  %v5596_v62 = vld [vmem:[%s7251_s3 + $0xf0] sm:$0xff]   ;;  %5251 = vmatpush3.bf16.msra.mxu0 %v5629_v61 }
  0x49   : > { %v1495_v15 = vsel %vm5968_vm5, %v1490_v3, %v1494_v51  ;;  %906 = vst [vmem:[#allocation2 + $0x20] sm:$0x1] %v905_v4  ;;  %v783_v23 = vshll.u32 %v4936_v13, 16  ;;  %v602_v26 = vshrl.u32 %v4915_v14, 16  ;;  %v605_v28 = vshll.u32 %v4915_v14, 16  ;;  %v5597_v22 = vld [vmem:[%s7251_s3 + $0xb0] sm:$0xff]  }
  0x4a   : > { %v1505_v18 = vsel %vm5968_vm5, %v1500_v10, %v1504_v55  ;;  %1634 = vst [vmem:[#allocation3 + $0x364] sm:$0xf] %v1495_v15  ;;  %1690 = vst [vmem:[#allocation3 + $0x328] sm:$0xf] %v1495_v15  ;;  %v610_v29 = vshrl.u32 %v6081_v17, 16  ;;  %v774_v30 = vrot.slane %v772_v19, 7  ;;  %v4958_v44 = vunpack.c.h.bf16 %v6084_v5 }
  0x4b   : > { %1746 = vst [vmem:[#allocation3 + $0x2ec] sm:$0xf] %v1495_v15  ;;  %1635 = vst [vmem:[#allocation3 + $0x388] sm:$0xf] %v1505_v18  ;;  %v782_v32 = vrot.slane %v780_v21, 7  ;;  %v613_v33 = vshll.u32 %v6081_v17, 16  ;;  %v317_v3 = vmul.f32 %v4957_v43, %v5953_v27  ;;  %v5001_v13 = vunpack.c.l.bf16 %v6104_v53 }
  0x4c   : > { %1691 = vst [vmem:[#allocation3 + $0x34c] sm:$0xf] %v1505_v18  ;;  %1747 = vst [vmem:[#allocation3 + $0x310] sm:$0xf] %v1505_v18  ;;  %v907_v34 = vld [vmem:[#allocation2 + $0x24] sm:$0xf]  ;;  %v777_v47 = vor.u32 %v775_v20, %v774_v30  ;;  %v318_v7 = vmul.f32 %v4958_v44, %v5953_v27  ;;  %v5002_v14 = vunpack.c.h.bf16 %v6104_v53 }
  0x4d   : > { %v5586_v36 = vld [vmem:[#allocation3 + $0x4c] ss:$36 sps:$4 sm:$0xff]   ;;  %v604_v41 = vrot.slane %v602_v26, 7  ;;  %v1009_v45 = vld [vmem:[#allocation2 + $0x18] sm:$0xf]  ;;  %v778_v48 = vrot.slane %v774_v30, 4  ;;  %v785_v49 = vor.u32 %v783_v23, %v782_v32 }
  0x4e   : > { %v5593_v37 = vld [vmem:[#allocation3 + $0x48] ss:$36 sps:$4 sm:$0xff]   ;;  %v1143_v46 = vld [vmem:[#allocation2 + $0x18] sm:$0xf]  ;;  %v787_v38 = vrot.slane %v782_v32, 4  ;;  %3639 = vmatprep.mubr.bf16.mxu0 %v5586_v36  ;;  %v978_v57 = vsel %vm6009_vm10, %v777_v47, %v977_v24  ;;  %v612_v59 = vrot.slane %v610_v29, 7  ;;  %v6146_v36 = vadd.f32 %v5958_v31, %v317_v3 }
  0x4f   : > { %1045 = vst [vmem:[#allocation3 + $0x90] sm:$0xf] %v1009_v45  ;;  %v1243_v50 = vshrl.u32 %v1143_v46, 16  ;;  %v1246_v51 = vshll.u32 %v1143_v46, 16  ;;  %1075 = vst [vmem:[#allocation3 + $0x54] sm:$0xf] %v1009_v45  ;;  %v607_v52 = vor.u32 %v605_v28, %v604_v41  ;;  %3640 = vmatmul.mubr.bf16.gmra.mxu0 %v5593_v37  ;;  %v786_v55 = vsel %vm6003_vm9, %v778_v48, %v785_v49 }
  0x50   : > { %1105 = vst [vmem:[#allocation3 + $0x18] sm:$0xf] %v1009_v45  ;;  %v608_v39 = vrot.slane %v604_v41, 4  ;;  %v982_v58 = vsel %vm5996_vm8, %v787_v38, %v981_v25  ;;  %v911_v60 = vld [vmem:[#allocation2 + $0x2c] sm:$0x1]  ;;  %v615_v12 = vor.u32 %v613_v33, %v612_v59  ;;  %v617_v17 = vrot.slane %v612_v59, 4 }
  0x51   : > { %v1010_v63 = vld [vmem:[#allocation2 + $0x1c] sm:$0xf]  ;;  %v1245_v56 = vrot.slane %v1243_v50, 4  ;;  %979 = vst [vmem:[#allocation2 + $0x9c] sm:$0xf] %v978_v57  ;;  %v908_v1 = vsel %vm6009_vm10, %v607_v52, %v907_v34  ;;  %v1248_v10 = vrot.slane %v1246_v51, 5  ;;  %v6157_v46 = vadd.f32 %v5958_v31, %v318_v7 }
  0x52   : > { %v1144_v0 = vld [vmem:[#allocation2 + $0x1c] sm:$0xf]  ;;  %980 = vst [vmem:[#allocation2 + $0xa0] sm:$0xf] %v786_v55  ;;  %983 = vst [vmem:[#allocation2 + $0xa4] sm:$0x1] %v982_v58  ;;  %v616_v20 = vsel %vm6003_vm9, %v608_v39, %v615_v12  ;;  %v912_v25 = vsel %vm5996_vm8, %v617_v17, %v911_v60  ;;  %v339_v47 = vmul.f32 %v5001_v13, %v5953_v27 }
  0x53   : > { %v5588_v8 = vld [vmem:[#allocation3 + $0x360] ss:$36 sps:$4 sm:$0xff]   ;;  %1046 = vst [vmem:[#allocation3 + $0xb4] sm:$0xf] %v1010_v63  ;;  %1076 = vst [vmem:[#allocation3 + $0x78] sm:$0xf] %v1010_v63  ;;  %v1249_v18 = vor.u32 %v1248_v10, %v1245_v56  ;;  %v6161_v48 = vmul.f32 %v5002_v14, %v5953_v27 }
  0x54   : > { %v5590_v9 = vld [vmem:[#allocation3 + $0x364] ss:$36 sps:$4 sm:$0xff]   ;;  %1106 = vst [vmem:[#allocation3 + $0x3c] sm:$0xf] %v1010_v63  ;;  %909 = vst [vmem:[#allocation2 + $0x24] sm:$0xf] %v908_v1 }
  0x55   : > { %v1145_v15 = vld [vmem:[#allocation2 + $0x20] sm:$0x1]  ;;  %v1252_v16 = vshll.u32 %v1144_v0, 16  ;;  %v1256_v4 = vshrl.u32 %v1144_v0, 16  ;;  %v408_v5 = vmax.f32 %v6095_v35, 0.0  ;;  %3727 = vmatprep.mubr.bf16.mxu1 %v5590_v9  ;;  %v409_v21 = vmax.f32 %v6099_v42, 0.0 }
  0x56   : > { %v1262_v19 = vshll.u32 %v1145_v15, 16  ;;  %3728 = vmatmul.mubr.bf16.vlgmr.msra.gmra.mxu1 %v5588_v8  ;;  %910 = vst [vmem:[#allocation2 + $0x28] sm:$0xf] %v616_v20  ;;  %v1250_v28 = vrot.slane %v1249_v18, 4  ;;  %913 = vst [vmem:[#allocation2 + $0x2c] sm:$0x1] %v912_v25  ;;  %v6175_v15 = vadd.f32 %v5958_v31, %v339_v47 }
  0x57   : > { %v1254_v23 = vrot.slane %v1252_v16, 5  ;;  %v1258_v24 = vrot.slane %v1256_v4, 4  ;;  %v6136_v26 = vpack.c.bf16 %v408_v5, %v408_v5  ;;  %5135 = vmatpush3.bf16.msra.mxu1 %v5594_v54  ;;  %v6138_v30 = vpack.c.bf16 %v409_v21, %v409_v21  ;;  %v5602_v33 = vld [vmem:[%s7251_s3 + $0xe8] sm:$0xff]   ;;  %v6149_v37 = vld [vmem:[%s5941_s23 + $0x20] sm:$0xff]  }
  0x58   : > { %v1264_v29 = vrot.slane %v1262_v19, 5  ;;  %5136 = vmatprep.subr.bf16.mxu1 %v5596_v62  ;;  %v1031_v42 = vld [vmem:[#allocation2 + $0x9c] sm:$0xf]  ;;  %v5605_v45 = vld [vmem:[%s7251_s3 + $0xa8] sm:$0xff]   ;;  %v4961_v52 = vunpack.c.l.bf16 %v6149_v37  ;;  %v4962_v39 = vunpack.c.h.bf16 %v6149_v37  ;;  %v5606_v61 = vld [vmem:[%s7251_s3 + $0xe0] sm:$0xff]  }
  0x59   : > { %v1259_v32 = vor.u32 %v1258_v24, %v1254_v23  ;;  %v789_v34 = vshrl.u32 %v6136_v26, 16  ;;  %v792_v35 = vshll.u32 %v6136_v26, 16  ;;  %v1255_v41 = vsel %vm5968_vm5, %v1250_v28, %v1254_v23  ;;  %v1032_v43 = vld [vmem:[#allocation2 + $0xa0] sm:$0xf]  ;;  %v1176_v44 = vld [vmem:[#allocation2 + $0x9c] sm:$0xf] }
  0x5a   : > { %1614 = vst [vmem:[#allocation3 + $0x94] sm:$0xf] %v1255_v41  ;;  %1670 = vst [vmem:[#allocation3 + $0x58] sm:$0xf] %v1255_v41  ;;  %v1177_v38 = vld [vmem:[#allocation2 + $0xa0] sm:$0xf] }
  0x5b   : > { %v1260_v49 = vrot.slane %v1259_v32, 4  ;;  %1726 = vst [vmem:[#allocation3 + $0x1c] sm:$0xf] %v1255_v41  ;;  %1067 = vst [vmem:[#allocation3 + $0x3a8] sm:$0xf] %v1031_v42  ;;  %v1507_v51 = vshrl.u32 %v1176_v44, 16  ;;  %5137 = vmatpush3.bf16.msra.mxu1 %v5597_v22 }
  0x5c   : > { %1068 = vst [vmem:[#allocation3 + $0x3cc] sm:$0xf] %v1032_v43  ;;  %v1178_v50 = vld [vmem:[#allocation2 + $0xa4] sm:$0x1]  ;;  %1097 = vst [vmem:[#allocation3 + $0x36c] sm:$0xf] %v1031_v42  ;;  %5138 = vmatprep.subr.bf16.mxu1 %v5602_v33 }
  0x5d   : > { %1098 = vst [vmem:[#allocation3 + $0x390] sm:$0xf] %v1032_v43  ;;  %1127 = vst [vmem:[#allocation3 + $0x330] sm:$0xf] %v1031_v42  ;;  %v1510_v53 = vshll.u32 %v1176_v44, 16  ;;  %v1516_v54 = vshll.u32 %v1177_v38, 16  ;;  %v1265_v59 = vsel %vm5968_vm5, %v1260_v49, %v1264_v29 }
  0x5e   : > { %1128 = vst [vmem:[#allocation3 + $0x354] sm:$0xf] %v1032_v43  ;;  %v1520_v55 = vshrl.u32 %v1177_v38, 16  ;;  %v1526_v57 = vshll.u32 %v1178_v50, 16  ;;  %v1011_v58 = vld [vmem:[#allocation2 + $0x24] sm:$0xf] }
  0x5f   : > { %v1509_v60 = vrot.slane %v1507_v51, 4  ;;  %1047 = vst [vmem:[#allocation3 + $0xd8] sm:$0xf] %v1011_v58  ;;  %v1146_v62 = vld [vmem:[#allocation2 + $0x24] sm:$0xf]  ;;  %v6170_v63 = vrot.slane %v789_v34, 7  ;;  %5139 = vmatpush3.bf16.msra.mxu1 %v5605_v45 }
  0x60   : > { %1077 = vst [vmem:[#allocation3 + $0x9c] sm:$0xf] %v1011_v58  ;;  %1107 = vst [vmem:[#allocation3 + $0x60] sm:$0xf] %v1011_v58  ;;  %v797_v0 = vshrl.u32 %v6138_v30, 16  ;;  %v1512_v56 = vrot.slane %v1510_v53, 5  ;;  %5140 = vmatprep.subr.bf16.mxu1 %v5606_v61  ;;  %v319_v58 = vmul.f32 %v4961_v52, %v5953_v27 }
  0x61   : > { %1615 = vst [vmem:[#allocation3 + $0xb8] sm:$0xf] %v1265_v59  ;;  %1671 = vst [vmem:[#allocation3 + $0x7c] sm:$0xf] %v1265_v59  ;;  %v1518_v1 = vrot.slane %v1516_v54, 5  ;;  %v1522_v3 = vrot.slane %v1520_v55, 4  ;;  %v794_v14 = vor.u32 %v792_v35, %v6170_v63 }
  0x62   : > { %1727 = vst [vmem:[#allocation3 + $0x40] sm:$0xf] %v1265_v59  ;;  %v1528_v7 = vrot.slane %v1526_v57, 5  ;;  %v1012_v8 = vld [vmem:[#allocation2 + $0x28] sm:$0xf]  ;;  %v1267_v12 = vshrl.u32 %v1146_v62, 16  ;;  %v1513_v16 = vor.u32 %v1512_v56, %v1509_v60  ;;  %v379_v57 = vadd.f32 %v5958_v31, %v6161_v48 }
  0x63   : > { %1048 = vst [vmem:[#allocation3 + $0xfc] sm:$0xf] %v1012_v8  ;;  %v1147_v9 = vld [vmem:[#allocation2 + $0x28] sm:$0xf]  ;;  %v1148_v10 = vld [vmem:[#allocation2 + $0x2c] sm:$0x1]  ;;  %v1523_v4 = vor.u32 %v1522_v3, %v1518_v1 }
  0x64   : > { %v1270_v13 = vshll.u32 %v1146_v62, 16  ;;  %1078 = vst [vmem:[#allocation3 + $0xc0] sm:$0xf] %v1012_v8  ;;  %1108 = vst [vmem:[#allocation3 + $0x84] sm:$0xf] %v1012_v8  ;;  %v5608_v17 = vld [vmem:[%s7251_s3 + $0xa0] sm:$0xff]  }
  0x65   : > { %v1276_v5 = vshll.u32 %v1147_v9, 16  ;;  %v1280_v18 = vshrl.u32 %v1147_v9, 16  ;;  %v5614_v19 = vld [vmem:[%s7251_s3 + $0xd8] sm:$0xff]   ;;  %v1269_v20 = vrot.slane %v1267_v12, 4  ;;  %v1286_v22 = vshll.u32 %v1148_v10, 16  ;;  %v5640_v33 = vld [vmem:[%s7251_s3 + $0x160] sm:$0xff]   ;;  %5141 = vmatpush3.bf16.msra.mxu1 %v5608_v17 }
  0x66   : > { %v1272_v21 = vrot.slane %v1270_v13, 5  ;;  %v795_v23 = vrot.slane %v6170_v63, 4  ;;  %v984_v24 = vld [vmem:[#allocation2 + $0xa8] sm:$0xf]  ;;  %v1514_v25 = vrot.slane %v1513_v16, 4  ;;  %v1524_v26 = vrot.slane %v1523_v4, 4  ;;  %5142 = vmatprep.subr.bf16.mxu1 %v5614_v19  ;;  %5252 = vmatprep.subr.bf16.mxu0 %v5640_v33 }
  0x67   : > { %v1278_v28 = vrot.slane %v1276_v5, 5  ;;  %v1282_v29 = vrot.slane %v1280_v18, 4  ;;  %v5617_v32 = vld [vmem:[%s7251_s3 + $0x98] sm:$0xff]   ;;  %v1288_v35 = vrot.slane %v1286_v22, 5  ;;  %v799_v41 = vrot.slane %v797_v0, 7  ;;  %v5618_v44 = vld [vmem:[%s7251_s3 + $0xd0] sm:$0xff]  }
  0x68   : > { %v1273_v34 = vor.u32 %v1272_v21, %v1269_v20  ;;  %v800_v42 = vshll.u32 %v6138_v30, 16  ;;  %v988_v43 = vld [vmem:[#allocation2 + $0xb0] sm:$0x1]  ;;  %v6194_v45 = vld [vmem:[#allocation2] sm:$0xe]  ;;  %v1519_v49 = vsel %vm5968_vm5, %v1514_v25, %v1518_v1  ;;  %v1529_v38 = vsel %vm5968_vm5, %v1524_v26, %v1528_v7  ;;  %v5624_v9 = vld [vmem:[%s7251_s3 + $0xc8] sm:$0xff]  }
  0x69   : > { %v5641_v47 = vld [vmem:[%s7251_s3 + $0x120] sm:$0xff]   ;;  %v1283_v50 = vor.u32 %v1282_v29, %v1278_v28  ;;  %v985_v30 = vsel %vm6009_vm10, %v794_v14, %v984_v24  ;;  %v5598_v51 = vld [vmem:[#allocation3 + $0x94] ss:$36 sps:$4 sm:$0xff]   ;;  %1636 = vst [vmem:[#allocation3 + $0x3ac] sm:$0xf] %v1519_v49  ;;  %v804_v61 = vrot.slane %v799_v41, 4  ;;  %5143 = vmatpush3.bf16.msra.mxu1 %v5617_v32 }
  0x6a   : > { %1637 = vst [vmem:[#allocation3 + $0x3d0] sm:$0xf] %v1529_v38  ;;  %1692 = vst [vmem:[#allocation3 + $0x370] sm:$0xf] %v1519_v49  ;;  %v5603_v53 = vld [vmem:[#allocation3 + $0x90] ss:$36 sps:$4 sm:$0xff]   ;;  %v802_v55 = vor.u32 %v800_v42, %v799_v41  ;;  %5253 = vmatpush3.bf16.msra.mxu0 %v5641_v47  ;;  %3647 = vmatprep.mubr.bf16.mxu0 %v5598_v51 }
  0x6b   : > { %1693 = vst [vmem:[#allocation3 + $0x394] sm:$0xf] %v1529_v38  ;;  %1748 = vst [vmem:[#allocation3 + $0x334] sm:$0xf] %v1519_v49  ;;  %v1274_v54 = vrot.slane %v1273_v34, 4  ;;  %v1284_v60 = vrot.slane %v1283_v50, 4  ;;  %3648 = vmatmul.mubr.bf16.gmra.mxu0 %v5603_v53  ;;  %5144 = vmatprep.subr.bf16.mxu1 %v5618_v44 }
  0x6c   : > { %1749 = vst [vmem:[#allocation3 + $0x358] sm:$0xf] %v1529_v38  ;;  %986 = vst [vmem:[#allocation2 + $0xa8] sm:$0xf] %v985_v30  ;;  %v6210_v59 = vld [vmem:[#allocation2 + $0x4] sm:$0xf]  ;;  %v803_v31 = vsel %vm6003_vm9, %v795_v23, %v802_v55 }
  0x6d   : > { %v388_v62 = vmax.f32 %v6146_v36, 0.0  ;;  %v389_v63 = vmax.f32 %v6157_v46, 0.0  ;;  %v1279_v0 = vsel %vm5968_vm5, %v1274_v54, %v1278_v28  ;;  %v410_v48 = vmax.f32 %v6175_v15, 0.0  ;;  %987 = vst [vmem:[#allocation2 + $0xac] sm:$0xf] %v803_v31  ;;  %v5619_v46 = vld [vmem:[%s7251_s3 + $0x90] sm:$0xff]  }
  0x6e   : > { %v411_v27 = vmax.f32 %v379_v57, 0.0  ;;  %v1289_v52 = vsel %vm5968_vm5, %v1284_v60, %v1288_v35  ;;  %1616 = vst [vmem:[#allocation3 + $0xdc] sm:$0xf] %v1279_v0  ;;  %1672 = vst [vmem:[#allocation3 + $0xa0] sm:$0xf] %v1279_v0  ;;  %v989_v36 = vsel %vm5996_vm8, %v804_v61, %v988_v43  ;;  %v4675_v1 = vrot.slane %v6194_v45, 9  ;;  %5145 = vmatpush3.bf16.msra.mxu1 %v5619_v46 }
  0x6f   : > { %1728 = vst [vmem:[#allocation3 + $0x64] sm:$0xf] %v1279_v0  ;;  %v4917_v56 = vpack.c.bf16 %v388_v62, %v388_v62  ;;  %1617 = vst [vmem:[#allocation3 + $0x100] sm:$0xf] %v1289_v52  ;;  %v6227_v3 = vpack.c.bf16 %v389_v63, %v389_v63  ;;  %v6229_v7 = vpack.c.bf16 %v410_v48, %v410_v48  ;;  %v6245_v14 = vld [vmem:[%s7249_s1] ss:$0 sm:$0xff]  ;;  %5146 = vmatprep.subr.bf16.mxu1 %v5624_v9 }
  0x70   : > { %1673 = vst [vmem:[#allocation3 + $0xc4] sm:$0xf] %v1289_v52  ;;  %1729 = vst [vmem:[#allocation3 + $0x88] sm:$0xf] %v1289_v52  ;;  %v6231_v8 = vpack.c.bf16 %v411_v27, %v411_v27  ;;  %v320_v15 = vmul.f32 %v6245_v14, %v4962_v39  ;;  %v1865_v16 = vrot.slane %v6210_v59, 5  ;;  %v5011_v4 = vld [vmem:[%s5941_s23 + $0x28] sm:$0xff]  }
  0x71   : > { %990 = vst [vmem:[#allocation2 + $0xb0] sm:$0x1] %v989_v36  ;;  %v619_v12 = vshrl.u32 %v4917_v56, 16  ;;  %v622_v13 = vshll.u32 %v4917_v56, 16  ;;  %v5012_v17 = vld [vmem:[%s5941_s23 + $0x30] sm:$0xff]   ;;  %v627_v5 = vshrl.u32 %v6227_v3, 16  ;;  %v4965_v34 = vunpack.c.l.bf16 %v5011_v4 }
  0x72   : > { %v630_v18 = vshll.u32 %v6227_v3, 16  ;;  %v914_v19 = vld [vmem:[#allocation2 + $0x30] sm:$0xf]  ;;  %v806_v20 = vshrl.u32 %v6229_v7, 16  ;;  %v809_v21 = vshll.u32 %v6229_v7, 16  ;;  %v5628_v22 = vld [vmem:[%s7251_s3 + $0x88] sm:$0xff]   ;;  %v1866_v28 = vsel %vm6238_vm13, %v4675_v1, %v1865_v16 }
  0x73   : > { %v5630_v37 = vld [vmem:[%s7251_s3 + $0xc0] sm:$0xff]   ;;  %v6263_v23 = vrot.slane %v619_v12, 7  ;;  %v814_v24 = vshrl.u32 %v6231_v8, 16  ;;  %v1033_v32 = vld [vmem:[#allocation2 + $0xa8] sm:$0xf]  ;;  %v4966_v35 = vunpack.c.h.bf16 %v5011_v4  ;;  %v4969_v41 = vunpack.c.l.bf16 %v5012_v17  ;;  %v5652_v38 = vld [vmem:[%s7251_s3 + $0x158] sm:$0xff]   ;;  %5147 = vmatpush3.bf16.msra.mxu1 %v5628_v22 }
  0x74   : > { %v5600_v39 = vld [vmem:[#allocation3 + $0x3ac] ss:$36 sps:$4 sm:$0xff]   ;;  %v6269_v25 = vld [vmem:[%s7250_s2] ss:$0 sm:$0xff]  ;;  %2007 = vst [vmem:[#allocation3 + $0x8] sm:$0xf] %v1866_v28  ;;  %v4970_v42 = vunpack.c.h.bf16 %v5012_v17  ;;  %v6293_v57 = vmul.f32 %v6245_v14, %v4965_v34  ;;  %5254 = vmatprep.subr.bf16.mxu0 %v5652_v38  ;;  %5148 = vmatprep.subr.bf16.mxu1 %v5630_v37 }
  0x75   : > { %v6272_v26 = vadd.f32 %v6269_v25, %v319_v58  ;;  %v5604_v29 = vld [vmem:[#allocation3 + $0x3a8] ss:$36 sps:$4 sm:$0xff]   ;;  %v1179_v33 = vld [vmem:[#allocation2 + $0xa8] sm:$0xf]  ;;  %3735 = vmatprep.mubr.bf16.mxu1 %v5600_v39  ;;  %1069 = vst [vmem:[#allocation3 + $0x3f0] sm:$0xf] %v1033_v32  ;;  %v624_v45 = vor.u32 %v622_v13, %v6263_v23  ;;  %v6287_v54 = vadd.f32 %v6269_v25, %v320_v15 }
  0x76   : > { %v1531_v43 = vshrl.u32 %v1179_v33, 16  ;;  %v1534_v44 = vshll.u32 %v1179_v33, 16  ;;  %1099 = vst [vmem:[#allocation3 + $0x3b4] sm:$0xf] %v1033_v32  ;;  %1129 = vst [vmem:[#allocation3 + $0x378] sm:$0xf] %v1033_v32  ;;  %3736 = vmatmul.mubr.bf16.gmra.mxu1 %v5604_v29  ;;  %v6296_v58 = vmul.f32 %v6245_v14, %v4966_v35  ;;  %v6301_v0 = vmul.f32 %v6245_v14, %v4969_v41 }
  0x77   : > { %v625_v47 = vrot.slane %v6263_v23, 4  ;;  %v5631_v49 = vld [vmem:[%s7251_s3 + $0x80] sm:$0xff]   ;;  %v1034_v50 = vld [vmem:[#allocation2 + $0xac] sm:$0xf]  ;;  %v629_v51 = vrot.slane %v627_v5, 7  ;;  %v5637_v55 = vld [vmem:[%s7251_s3 + $0x1f8] sm:$0xff]   ;;  %v915_v63 = vsel %vm6009_vm10, %v624_v45, %v914_v19  ;;  %v6304_v31 = vmul.f32 %v6245_v14, %v4970_v42 }
  0x78   : > { %v1180_v30 = vld [vmem:[#allocation2 + $0xac] sm:$0xf]  ;;  %v918_v53 = vld [vmem:[#allocation2 + $0x38] sm:$0x1]  ;;  %1070 = vst [vmem:[#allocation3 + $0x414] sm:$0xf] %v1034_v50  ;;  %5149 = vmatpush3.bf16.msra.mxu1 %v5631_v49 }
  0x79   : > { %v5610_v60 = vld [vmem:[#allocation3 + $0xdc] ss:$36 sps:$4 sm:$0xff]   ;;  %v1181_v61 = vld [vmem:[#allocation2 + $0xb0] sm:$0x1]  ;;  %v1533_v62 = vrot.slane %v1531_v43, 4  ;;  %v1536_v48 = vrot.slane %v1534_v44, 5  ;;  %v632_v56 = vor.u32 %v630_v18, %v629_v51  ;;  %5358 = vmatprep.subr.bf16.mxu1 %v5637_v55 }
  0x7a   : > { %1100 = vst [vmem:[#allocation3 + $0x3d8] sm:$0xf] %v1034_v50  ;;  %1130 = vst [vmem:[#allocation3 + $0x39c] sm:$0xf] %v1034_v50  ;;  %v1540_v27 = vshll.u32 %v1180_v30, 16  ;;  %v1544_v52 = vshrl.u32 %v1180_v30, 16  ;;  %3655 = vmatprep.mubr.bf16.mxu0 %v5610_v60 }
  0x7b   : > { %v1550_v36 = vshll.u32 %v1181_v61, 16  ;;  %v5615_v46 = vld [vmem:[#allocation3 + $0xd8] ss:$36 sps:$4 sm:$0xff]   ;;  %916 = vst [vmem:[#allocation2 + $0x30] sm:$0xf] %v915_v63  ;;  %v634_v1 = vrot.slane %v629_v51, 4  ;;  %v1537_v12 = vor.u32 %v1536_v48, %v1533_v62  ;;  %v633_v19 = vsel %vm6003_vm9, %v625_v47, %v632_v56 }
  0x7c   : > { %v808_v3 = vrot.slane %v806_v20, 7  ;;  %v816_v9 = vrot.slane %v814_v24, 7  ;;  %v1542_v13 = vrot.slane %v1540_v27, 5  ;;  %v1546_v15 = vrot.slane %v1544_v52, 4  ;;  %3656 = vmatmul.mubr.bf16.gmra.mxu0 %v5615_v46  ;;  %v991_v17 = vld [vmem:[#allocation2 + $0xb4] sm:$0xf] }
  0x7d   : > { %v1552_v4 = vrot.slane %v1550_v36, 5  ;;  %v5656_v5 = vld [vmem:[%s7251_s3 + $0x118] sm:$0xff]   ;;  %v919_v22 = vsel %vm5996_vm8, %v634_v1, %v918_v53  ;;  %v1760_v39 = vld [vmem:[#allocation2 + $0x8] sm:$0x1]  ;;  %v1538_v23 = vrot.slane %v1537_v12, 4  ;;  %v817_v28 = vshll.u32 %v6231_v8, 16 }
  0x7e   : > { %v811_v18 = vor.u32 %v809_v21, %v808_v3  ;;  %v812_v20 = vrot.slane %v808_v3, 4  ;;  %v995_v37 = vld [vmem:[#allocation2 + $0xbc] sm:$0x1]  ;;  %v1547_v24 = vor.u32 %v1546_v15, %v1542_v13  ;;  %917 = vst [vmem:[#allocation2 + $0x34] sm:$0xf] %v633_v19  ;;  %v821_v29 = vrot.slane %v816_v9, 4  ;;  %5255 = vmatpush3.bf16.msra.mxu0 %v5656_v5 }
  0x7f   : > { %920 = vst [vmem:[#allocation2 + $0x38] sm:$0x1] %v919_v22  ;;  %v390_v7 = vmax.f32 %v6272_v26, 0.0  ;;  %v391_v21 = vmax.f32 %v6287_v54, 0.0  ;;  %v1867_v33 = vrot.slane %v1865_v16, 4  ;;  %v1543_v34 = vsel %vm5968_vm5, %v1538_v23, %v1542_v13  ;;  %v5013_v42 = vld [vmem:[%s5941_s23 + $0x38] sm:$0xff]  }
  0x80   : > { %v992_v32 = vsel %vm6009_vm10, %v811_v18, %v991_v17  ;;  %v1548_v35 = vrot.slane %v1547_v24, 4  ;;  %v819_v41 = vor.u32 %v817_v28, %v816_v9  ;;  %v996_v8 = vsel %vm5996_vm8, %v821_v29, %v995_v37  ;;  %v5664_v43 = vld [vmem:[%s7251_s3 + $0x150] sm:$0xff]   ;;  %1638 = vst [vmem:[#allocation3 + $0x3f4] sm:$0xf] %v1543_v34  ;;  %1694 = vst [vmem:[#allocation3 + $0x3b8] sm:$0xf] %v1543_v34 }
  0x81   : > { %993 = vst [vmem:[#allocation2 + $0xb4] sm:$0xf] %v992_v32  ;;  %1750 = vst [vmem:[#allocation3 + $0x37c] sm:$0xf] %v1543_v34  ;;  %v4919_v16 = vpack.c.bf16 %v390_v7, %v390_v7  ;;  %v6330_v44 = vpack.c.bf16 %v391_v21, %v391_v21  ;;  %v1868_v45 = vrot.slane %v1760_v39, 5  ;;  %v6334_v47 = vadd.f32 %v6269_v25, %v6293_v57  ;;  %v5665_v49 = vld [vmem:[%s7251_s3 + $0x110] sm:$0xff]  }
  0x82   : > { %v1013_v26 = vld [vmem:[#allocation2 + $0x30] sm:$0xf]  ;;  %997 = vst [vmem:[#allocation2 + $0xbc] sm:$0x1] %v996_v8  ;;  %v1553_v38 = vsel %vm5968_vm5, %v1548_v35, %v1552_v4  ;;  %v820_v51 = vsel %vm6003_vm9, %v812_v20, %v819_v41  ;;  %5256 = vmatprep.subr.bf16.mxu0 %v5664_v43  ;;  %v6349_v63 = vadd.f32 %v6269_v25, %v6296_v58  ;;  %v4973_v56 = vunpack.c.l.bf16 %v5013_v42  ;;  %v921_v13 = vld [vmem:[#allocation2 + $0x3c] sm:$0xf] }
  0x83   : > { %v1149_v59 = vld [vmem:[#allocation2 + $0x30] sm:$0xf]  ;;  %1049 = vst [vmem:[#allocation3 + $0x120] sm:$0xf] %v1013_v26  ;;  %1079 = vst [vmem:[#allocation3 + $0xe4] sm:$0xf] %v1013_v26  ;;  %5257 = vmatpush3.bf16.msra.mxu0 %v5665_v49  ;;  %v1869_v62 = vsel %vm6238_vm13, %v1867_v33, %v1868_v45  ;;  %v6353_v36 = vadd.f32 %v6269_v25, %v6301_v0  ;;  %v6357_v46 = vadd.f32 %v6269_v25, %v6304_v31 }
  0x84   : > { %v1291_v50 = vshrl.u32 %v1149_v59, 16  ;;  %v1294_v30 = vshll.u32 %v1149_v59, 16  ;;  %1109 = vst [vmem:[#allocation3 + $0xa8] sm:$0xf] %v1013_v26  ;;  %1639 = vst [vmem:[#allocation3 + $0x418] sm:$0xf] %v1553_v38  ;;  %v4974_v1 = vunpack.c.h.bf16 %v5013_v42  ;;  %v325_v0 = vmul.f32 %v6245_v14, %v4973_v56 }
  0x85   : > { %1695 = vst [vmem:[#allocation3 + $0x3dc] sm:$0xf] %v1553_v38  ;;  %1751 = vst [vmem:[#allocation3 + $0x3a0] sm:$0xf] %v1553_v38  ;;  %v636_v53 = vshrl.u32 %v4919_v16, 16  ;;  %v639_v54 = vshll.u32 %v4919_v16, 16 }
  0x86   : > { %994 = vst [vmem:[#allocation2 + $0xb8] sm:$0xf] %v820_v51  ;;  %v644_v55 = vshrl.u32 %v6330_v44, 16  ;;  %v647_v57 = vshll.u32 %v6330_v44, 16  ;;  %v1293_v60 = vrot.slane %v1291_v50, 4  ;;  %v1296_v61 = vrot.slane %v1294_v30, 5 }
  0x87   : > { %v1014_v48 = vld [vmem:[#allocation2 + $0x34] sm:$0xf]  ;;  %v1151_v52 = vld [vmem:[#allocation2 + $0x38] sm:$0x1]  ;;  %2008 = vst [vmem:[#allocation3 + $0x2c] sm:$0xf] %v1869_v62  ;;  %v6361_v19 = vmul.f32 %v6245_v14, %v4974_v1  ;;  %v6368_v16 = vadd.f32 %v6269_v25, %v325_v0 }
  0x88   : > { %v1150_v27 = vld [vmem:[#allocation2 + $0x34] sm:$0xf]  ;;  %1050 = vst [vmem:[#allocation3 + $0x144] sm:$0xf] %v1014_v48  ;;  %v1297_v3 = vor.u32 %v1296_v61, %v1293_v60  ;;  %v1310_v58 = vshll.u32 %v1151_v52, 16  ;;  %v638_v17 = vrot.slane %v636_v53, 7 }
  0x89   : > { %v1300_v9 = vshll.u32 %v1150_v27, 16  ;;  %v1304_v12 = vshrl.u32 %v1150_v27, 16  ;;  %1080 = vst [vmem:[#allocation3 + $0x108] sm:$0xf] %v1014_v48  ;;  %1110 = vst [vmem:[#allocation3 + $0xcc] sm:$0xf] %v1014_v48 }
  0x8a   : > { %v1035_v15 = vld [vmem:[#allocation2 + $0xb4] sm:$0xf]  ;;  %v646_v5 = vrot.slane %v644_v55, 7  ;;  %v1298_v31 = vrot.slane %v1297_v3, 4  ;;  %v1312_v20 = vrot.slane %v1310_v58, 5  ;;  %v641_v24 = vor.u32 %v639_v54, %v638_v17  ;;  %v5678_v48 = vld [vmem:[%s7251_s3 + $0x148] sm:$0xff]  }
  0x8b   : > { %v1182_v4 = vld [vmem:[#allocation2 + $0xb4] sm:$0xf]  ;;  %v1302_v22 = vrot.slane %v1300_v9, 5  ;;  %v1306_v18 = vrot.slane %v1304_v12, 4  ;;  %1071 = vst [vmem:[#allocation3 + $0x438] sm:$0xf] %v1035_v15  ;;  %5258 = vmatprep.subr.bf16.mxu0 %v5678_v48 }
  0x8c   : > { %1101 = vst [vmem:[#allocation3 + $0x3fc] sm:$0xf] %v1035_v15  ;;  %1131 = vst [vmem:[#allocation3 + $0x3c0] sm:$0xf] %v1035_v15  ;;  %v1184_v37 = vld [vmem:[#allocation2 + $0xbc] sm:$0x1]  ;;  %v649_v34 = vor.u32 %v647_v57, %v646_v5  ;;  %v922_v59 = vsel %vm6009_vm10, %v641_v24, %v921_v13  ;;  %v6396_v24 = vadd.f32 %v6269_v25, %v6361_v19 }
  0x8d   : > { %v1555_v39 = vshrl.u32 %v1182_v4, 16  ;;  %v1558_v23 = vshll.u32 %v1182_v4, 16  ;;  %v642_v28 = vrot.slane %v638_v17, 4  ;;  %v5612_v29 = vld [vmem:[#allocation3 + $0x3f4] ss:$36 sps:$4 sm:$0xff]   ;;  %v1303_v7 = vsel %vm5968_vm5, %v1298_v31, %v1302_v22  ;;  %v6385_v4 = vld [vmem:[%s5941_s23 + $0x40] sm:$0xff]  }
  0x8e   : > { %v5616_v32 = vld [vmem:[#allocation3 + $0x3f0] ss:$36 sps:$4 sm:$0xff]   ;;  %v1307_v21 = vor.u32 %v1306_v18, %v1302_v22  ;;  %v1574_v33 = vshll.u32 %v1184_v37, 16  ;;  %v925_v35 = vld [vmem:[#allocation2 + $0x44] sm:$0x1]  ;;  %3743 = vmatprep.mubr.bf16.mxu1 %v5612_v29  ;;  %v651_v51 = vrot.slane %v646_v5, 4 }
  0x8f   : > { %v1761_v41 = vld [vmem:[#allocation2 + $0xc] sm:$0xe]  ;;  %1618 = vst [vmem:[#allocation3 + $0x124] sm:$0xf] %v1303_v7  ;;  %1674 = vst [vmem:[#allocation3 + $0xe8] sm:$0xf] %v1303_v7  ;;  %3744 = vmatmul.mubr.bf16.gmra.mxu1 %v5616_v32  ;;  %v650_v30 = vsel %vm6003_vm9, %v642_v28, %v649_v34 }
  0x90   : > { %1730 = vst [vmem:[#allocation3 + $0xac] sm:$0xf] %v1303_v7  ;;  %v1036_v8 = vld [vmem:[#allocation2 + $0xb8] sm:$0xf]  ;;  %v1557_v43 = vrot.slane %v1555_v39, 4  ;;  %v1560_v26 = vrot.slane %v1558_v23, 5 }
  0x91   : > { %v1183_v42 = vld [vmem:[#allocation2 + $0xb8] sm:$0xf]  ;;  %v1308_v44 = vrot.slane %v1307_v21, 4  ;;  %1072 = vst [vmem:[#allocation3 + $0x45c] sm:$0xf] %v1036_v8  ;;  %v1576_v38 = vrot.slane %v1574_v33, 5 }
  0x92   : > { %v1564_v45 = vshll.u32 %v1183_v42, 16  ;;  %v1568_v49 = vshrl.u32 %v1183_v42, 16  ;;  %1102 = vst [vmem:[#allocation3 + $0x420] sm:$0xf] %v1036_v8  ;;  %1132 = vst [vmem:[#allocation3 + $0x3e4] sm:$0xf] %v1036_v8  ;;  %v1561_v50 = vor.u32 %v1560_v26, %v1557_v43 }
  0x93   : > { %923 = vst [vmem:[#allocation2 + $0x3c] sm:$0xf] %v922_v59  ;;  %v392_v53 = vmax.f32 %v6334_v47, 0.0  ;;  %v1762_v54 = vld [vmem:[#allocation2 + $0x10] sm:$0xf]  ;;  %v1313_v57 = vsel %vm5968_vm5, %v1308_v44, %v1312_v20  ;;  %v393_v62 = vmax.f32 %v6349_v63, 0.0  ;;  %v926_v47 = vsel %vm5996_vm8, %v651_v51, %v925_v35 }
  0x94   : > { %v1763_v55 = vld [vmem:[#allocation2 + $0x14] sm:$0x1]  ;;  %v1566_v60 = vrot.slane %v1564_v45, 5  ;;  %v1570_v61 = vrot.slane %v1568_v49, 4  ;;  %924 = vst [vmem:[#allocation2 + $0x40] sm:$0xf] %v650_v30  ;;  %v4977_v44 = vunpack.c.l.bf16 %v6385_v4  ;;  %v4978_v45 = vunpack.c.h.bf16 %v6385_v4 }
  0x95   : > { %1619 = vst [vmem:[#allocation3 + $0x148] sm:$0xf] %v1313_v57  ;;  %1675 = vst [vmem:[#allocation3 + $0x10c] sm:$0xf] %v1313_v57  ;;  %v1562_v27 = vrot.slane %v1561_v50, 4  ;;  %v4921_v52 = vpack.c.bf16 %v392_v53, %v392_v53  ;;  %v4676_v56 = vrot.slane %v1761_v41, 9  ;;  %v4922_v3 = vpack.c.bf16 %v393_v62, %v393_v62 }
  0x96   : > { %1731 = vst [vmem:[#allocation3 + $0xd0] sm:$0xf] %v1313_v57  ;;  %v1571_v1 = vor.u32 %v1570_v61, %v1566_v60  ;;  %927 = vst [vmem:[#allocation2 + $0x44] sm:$0x1] %v926_v47  ;;  %v1872_v9 = vrot.slane %v1762_v54, 5  ;;  %v1875_v12 = vrot.slane %v1763_v55, 5 }
  0x97   : > { %v1567_v63 = vsel %vm5968_vm5, %v1562_v27, %v1566_v60  ;;  %v653_v58 = vshrl.u32 %v4921_v52, 16  ;;  %v656_v13 = vshll.u32 %v4921_v52, 16  ;;  %v394_v15 = vmax.f32 %v6353_v36, 0.0  ;;  %v5681_v17 = vld [vmem:[%s7251_s3 + $0x108] sm:$0xff]   ;;  %v932_v21 = vld [vmem:[#allocation2 + $0x50] sm:$0x1] }
  0x98   : > { %v1572_v5 = vrot.slane %v1571_v1, 4  ;;  %1640 = vst [vmem:[#allocation3 + $0x43c] sm:$0xf] %v1567_v63  ;;  %1696 = vst [vmem:[#allocation3 + $0x400] sm:$0xf] %v1567_v63  ;;  %v661_v0 = vshrl.u32 %v4922_v3, 16  ;;  %v1873_v22 = vsel %vm6238_vm13, %v4676_v56, %v1872_v9  ;;  %5259 = vmatpush3.bf16.msra.mxu0 %v5681_v17 }
  0x99   : > { %1752 = vst [vmem:[#allocation3 + $0x3c4] sm:$0xf] %v1567_v63  ;;  %v664_v31 = vshll.u32 %v4922_v3, 16  ;;  %v655_v37 = vrot.slane %v653_v58, 7  ;;  %v928_v39 = vld [vmem:[#allocation2 + $0x48] sm:$0xf]  ;;  %v6392_v23 = vpack.c.bf16 %v394_v15, %v394_v15 }
  0x9a   : > { %v1015_v18 = vld [vmem:[#allocation2 + $0x3c] sm:$0xf]  ;;  %v1874_v36 = vrot.slane %v1872_v9, 4  ;;  %2009 = vst [vmem:[#allocation3 + $0x50] sm:$0xf] %v1873_v22  ;;  %v1577_v28 = vsel %vm5968_vm5, %v1572_v5, %v1576_v38  ;;  %v663_v7 = vrot.slane %v661_v0, 7 }
  0x9b   : > { %v1152_v20 = vld [vmem:[#allocation2 + $0x3c] sm:$0xf]  ;;  %2051 = vst [vmem:[#allocation3 + $0x14] sm:$0xf] %v1873_v22  ;;  %1051 = vst [vmem:[#allocation3 + $0x168] sm:$0xf] %v1015_v18  ;;  %v658_v35 = vor.u32 %v656_v13, %v655_v37  ;;  %v6427_v22 = vmul.f32 %v6245_v14, %v4977_v44 }
  0x9c   : > { %v1315_v29 = vshrl.u32 %v1152_v20, 16  ;;  %v1318_v32 = vshll.u32 %v1152_v20, 16  ;;  %1081 = vst [vmem:[#allocation3 + $0x12c] sm:$0xf] %v1015_v18  ;;  %1111 = vst [vmem:[#allocation3 + $0xf0] sm:$0xf] %v1015_v18  ;;  %v1876_v19 = vsel %vm6238_vm13, %v1874_v36, %v1875_v12  ;;  %v666_v59 = vor.u32 %v664_v31, %v663_v7 }
  0x9d   : > { %1641 = vst [vmem:[#allocation3 + $0x460] sm:$0xf] %v1577_v28  ;;  %1697 = vst [vmem:[#allocation3 + $0x424] sm:$0xf] %v1577_v28  ;;  %v1016_v33 = vld [vmem:[#allocation2 + $0x40] sm:$0xf]  ;;  %v929_v54 = vsel %vm6009_vm10, %v658_v35, %v928_v39  ;;  %v6430_v18 = vmul.f32 %v6245_v14, %v4978_v45 }
  0x9e   : > { %1753 = vst [vmem:[#allocation3 + $0x3e8] sm:$0xf] %v1577_v28  ;;  %v1153_v34 = vld [vmem:[#allocation2 + $0x40] sm:$0xf]  ;;  %v659_v41 = vrot.slane %v655_v37, 4  ;;  %v395_v8 = vmax.f32 %v6357_v46, 0.0 }
  0x9f   : > { %v5620_v42 = vld [vmem:[#allocation3 + $0x124] ss:$36 sps:$4 sm:$0xff]   ;;  %1052 = vst [vmem:[#allocation3 + $0x18c] sm:$0xf] %v1016_v33  ;;  %v1317_v26 = vrot.slane %v1315_v29, 4  ;;  %v1320_v38 = vrot.slane %v1318_v32, 5 }
  0xa0   : > { %v5626_v43 = vld [vmem:[#allocation3 + $0x120] ss:$36 sps:$4 sm:$0xff]   ;;  %1082 = vst [vmem:[#allocation3 + $0x150] sm:$0xf] %v1016_v33  ;;  %1112 = vst [vmem:[#allocation3 + $0x114] sm:$0xf] %v1016_v33  ;;  %3663 = vmatprep.mubr.bf16.mxu0 %v5620_v42  ;;  %v667_v53 = vsel %vm6003_vm9, %v659_v41, %v666_v59  ;;  %v4924_v55 = vpack.c.bf16 %v395_v8, %v395_v8 }
  0xa1   : > { %2010 = vst [vmem:[#allocation3 + $0x74] sm:$0xf] %v1876_v19  ;;  %2052 = vst [vmem:[#allocation3 + $0x38] sm:$0xf] %v1876_v19  ;;  %v1154_v49 = vld [vmem:[#allocation2 + $0x44] sm:$0x1]  ;;  %3664 = vmatmul.mubr.bf16.gmra.mxu0 %v5626_v43  ;;  %v1321_v60 = vor.u32 %v1320_v38, %v1317_v26 }
  0xa2   : > { %v1324_v50 = vshll.u32 %v1153_v34, 16  ;;  %v1328_v30 = vshrl.u32 %v1153_v34, 16  ;;  %v668_v51 = vrot.slane %v663_v7, 4  ;;  %v1334_v46 = vshll.u32 %v1154_v49, 16  ;;  %v1764_v57 = vld [vmem:[#allocation2 + $0x18] sm:$0xe] }
  0xa3   : > { %930 = vst [vmem:[#allocation2 + $0x48] sm:$0xf] %v929_v54  ;;  %931 = vst [vmem:[#allocation2 + $0x4c] sm:$0xf] %v667_v53  ;;  %v6411_v27 = vld [vmem:[#allocation2 + $0x1c] sm:$0xf] }
  0xa4   : > { %v1326_v61 = vrot.slane %v1324_v50, 5  ;;  %v1330_v62 = vrot.slane %v1328_v30, 4  ;;  %v933_v48 = vsel %vm5996_vm8, %v668_v51, %v932_v21  ;;  %v6414_v47 = vld [vmem:[%s5941_s23 + $0x48] sm:$0xff]   ;;  %v1336_v52 = vrot.slane %v1334_v46, 5  ;;  %v6418_v9 = vld [vmem:[#allocation2 + $0x20] sm:$0x1] }
  0xa5   : > { %934 = vst [vmem:[#allocation2 + $0x50] sm:$0x1] %v933_v48  ;;  %v670_v56 = vshrl.u32 %v6392_v23, 16  ;;  %v673_v1 = vshll.u32 %v6392_v23, 16  ;;  %v678_v3 = vshrl.u32 %v4924_v55, 16  ;;  %v5690_v12 = vld [vmem:[%s7251_s3 + $0x140] sm:$0xff]   ;;  %v4981_v36 = vunpack.c.l.bf16 %v6414_v47 }
  0xa6   : > { %v1322_v63 = vrot.slane %v1321_v60, 4  ;;  %v1331_v58 = vor.u32 %v1330_v62, %v1326_v61  ;;  %v5636_v13 = vld [vmem:[#allocation3 + $0xc] ss:$36 sps:$4 sm:$0xff]   ;;  %v681_v15 = vshll.u32 %v4924_v55, 16  ;;  %v4677_v4 = vrot.slane %v1764_v57, 9  ;;  %5260 = vmatprep.subr.bf16.mxu0 %v5690_v12  ;;  %v6437_v28 = vld [vmem:[%s5941_s23 + $0x50] sm:$0xff]  }
  0xa7   : > { %v5691_v17 = vld [vmem:[%s7251_s3 + $0x100] sm:$0xff]   ;;  %v5622_v5 = vld [vmem:[#allocation3 + $0x43c] ss:$36 sps:$4 sm:$0xff]   ;;  %v672_v31 = vrot.slane %v670_v56, 7  ;;  %v4982_v23 = vunpack.c.h.bf16 %v6414_v47  ;;  %v680_v7 = vrot.slane %v678_v3, 7  ;;  %v1879_v21 = vrot.slane %v6411_v27, 5 }
  0xa8   : > { %v5627_v0 = vld [vmem:[#allocation3 + $0x438] ss:$36 sps:$4 sm:$0xff]   ;;  %v1327_v20 = vsel %vm5968_vm5, %v1322_v63, %v1326_v61  ;;  %v1332_v37 = vrot.slane %v1331_v58, 4  ;;  %5261 = vmatpush3.bf16.msra.mxu0 %v5691_v17  ;;  %3751 = vmatprep.mubr.bf16.mxu1 %v5622_v5  ;;  %v1882_v34 = vrot.slane %v6418_v9, 5  ;;  %v396_v35 = vmax.f32 %v6368_v16, 0.0  ;;  %v5639_v46 = vld [vmem:[%s7251_s3 + $0x1b8] sm:$0xff]  }
  0xa9   : > { %v935_v39 = vld [vmem:[#allocation2 + $0x54] sm:$0xf]  ;;  %1620 = vst [vmem:[#allocation3 + $0x16c] sm:$0xf] %v1327_v20  ;;  %1676 = vst [vmem:[#allocation3 + $0x130] sm:$0xf] %v1327_v20  ;;  %v675_v29 = vor.u32 %v673_v1, %v672_v31  ;;  %3752 = vmatmul.mubr.bf16.gmra.mxu1 %v5627_v0  ;;  %v683_v43 = vor.u32 %v681_v15, %v680_v7  ;;  %v1880_v44 = vsel %vm6238_vm13, %v4677_v4, %v1879_v21 }
  0xaa   : > { %1732 = vst [vmem:[#allocation3 + $0xf4] sm:$0xf] %v1327_v20  ;;  %v676_v32 = vrot.slane %v672_v31, 4  ;;  %v1337_v33 = vsel %vm5968_vm5, %v1332_v37, %v1336_v52  ;;  %v397_v41 = vmax.f32 %v6396_v24, 0.0  ;;  %3792 = vmatprep.mubr.bf16.mxu1 %v5636_v13  ;;  %v1017_v19 = vld [vmem:[#allocation2 + $0x48] sm:$0xf]  ;;  %v4985_v45 = vunpack.c.l.bf16 %v6437_v28 }
  0xab   : > { %1621 = vst [vmem:[#allocation3 + $0x190] sm:$0xf] %v1337_v33  ;;  %1677 = vst [vmem:[#allocation3 + $0x154] sm:$0xf] %v1337_v33  ;;  %v1018_v8 = vld [vmem:[#allocation2 + $0x4c] sm:$0xf]  ;;  %v936_v26 = vsel %vm6009_vm10, %v675_v29, %v935_v39  ;;  %v4925_v30 = vpack.c.bf16 %v396_v35, %v396_v35 }
  0xac   : > { %1733 = vst [vmem:[#allocation3 + $0x118] sm:$0xf] %v1337_v33  ;;  %v1155_v42 = vld [vmem:[#allocation2 + $0x48] sm:$0xf]  ;;  %v939_v59 = vld [vmem:[#allocation2 + $0x5c] sm:$0x1]  ;;  %v6450_v51 = vpack.c.bf16 %v397_v41, %v397_v41  ;;  %v684_v57 = vsel %vm6003_vm9, %v676_v32, %v683_v43  ;;  %v6484_v33 = vadd.f32 %v6269_v25, %v6427_v22  ;;  %v6496_v41 = vmul.f32 %v6245_v14, %v4981_v36 }
  0xad   : > { %v5634_v16 = vld [vmem:[#allocation3 + $0x8] ss:$36 sps:$4 sm:$0xff]   ;;  %1053 = vst [vmem:[#allocation3 + $0x1b0] sm:$0xf] %v1017_v19  ;;  %1054 = vst [vmem:[#allocation3 + $0x1d4] sm:$0xf] %v1018_v8 }
  0xae   : > { %v1156_v24 = vld [vmem:[#allocation2 + $0x4c] sm:$0xf]  ;;  %v1157_v49 = vld [vmem:[#allocation2 + $0x50] sm:$0x1]  ;;  %v1339_v38 = vshrl.u32 %v1155_v42, 16  ;;  %v1342_v50 = vshll.u32 %v1155_v42, 16 }
  0xaf   : > { %1083 = vst [vmem:[#allocation3 + $0x174] sm:$0xf] %v1017_v19  ;;  %1084 = vst [vmem:[#allocation3 + $0x198] sm:$0xf] %v1018_v8  ;;  %v1348_v53 = vshll.u32 %v1156_v24, 16  ;;  %v1352_v54 = vshrl.u32 %v1156_v24, 16 }
  0xb0   : > { %1113 = vst [vmem:[#allocation3 + $0x138] sm:$0xf] %v1017_v19  ;;  %1114 = vst [vmem:[#allocation3 + $0x15c] sm:$0xf] %v1018_v8  ;;  %v1358_v55 = vshll.u32 %v1157_v49, 16  ;;  %v1341_v60 = vrot.slane %v1339_v38, 4 }
  0xb1   : > { %937 = vst [vmem:[#allocation2 + $0x54] sm:$0xf] %v936_v26  ;;  %2011 = vst [vmem:[#allocation3 + $0x98] sm:$0xf] %v1880_v44  ;;  %v1344_v61 = vrot.slane %v1342_v50, 5  ;;  %v685_v62 = vrot.slane %v680_v7, 4  ;;  %3793 = vmatmul.mubr.bf16.vlgmr.msra.gmra.mxu1 %v5634_v16 }
  0xb2   : > { %2053 = vst [vmem:[#allocation3 + $0x5c] sm:$0xf] %v1880_v44  ;;  %2095 = vst [vmem:[#allocation3 + $0x20] sm:$0xf] %v1880_v44  ;;  %v1881_v48 = vrot.slane %v1879_v21, 4  ;;  %v1350_v27 = vrot.slane %v1348_v53, 5  ;;  %5359 = vmatpush3.bf16.msra.mxu1 %v5639_v46 }
  0xb3   : > { %938 = vst [vmem:[#allocation2 + $0x58] sm:$0xf] %v684_v57  ;;  %v1354_v52 = vrot.slane %v1352_v54, 4  ;;  %v1360_v56 = vrot.slane %v1358_v55, 5  ;;  %v5644_v1 = vld [vmem:[#allocation3 + $0x54] ss:$36 sps:$4 sm:$0xff]   ;;  %v1345_v9 = vor.u32 %v1344_v61, %v1341_v60  ;;  %v940_v12 = vsel %vm5996_vm8, %v685_v62, %v939_v59 }
  0xb4   : > { %v687_v3 = vshrl.u32 %v4925_v30, 16  ;;  %v1883_v63 = vsel %vm6238_vm13, %v1881_v48, %v1882_v34  ;;  %v5653_v58 = vld [vmem:[%s7251_s3 + $0x1f0] sm:$0xff]   ;;  %v690_v13 = vshll.u32 %v4925_v30, 16  ;;  %v6464_v15 = vld [vmem:[#allocation2 + $0x60] sm:$0xf]  ;;  %v695_v0 = vshrl.u32 %v6450_v51, 16  ;;  %3800 = vmatprep.mubr.bf16.mxu1 %v5644_v1 }
  0xb5   : > { %v1355_v4 = vor.u32 %v1354_v52, %v1350_v27  ;;  %941 = vst [vmem:[#allocation2 + $0x5c] sm:$0x1] %v940_v12  ;;  %2012 = vst [vmem:[#allocation3 + $0xbc] sm:$0xf] %v1883_v63  ;;  %v5657_v17 = vld [vmem:[%s7251_s3 + $0x1b0] sm:$0xff]   ;;  %v698_v31 = vshll.u32 %v6450_v51, 16  ;;  %v6488_v34 = vadd.f32 %v6269_v25, %v6430_v18  ;;  %v6502_v25 = vmul.f32 %v6245_v14, %v4982_v23 }
  0xb6   : > { %2054 = vst [vmem:[#allocation3 + $0x80] sm:$0xf] %v1883_v63  ;;  %2096 = vst [vmem:[#allocation3 + $0x44] sm:$0xf] %v1883_v63  ;;  %v6469_v5 = vrot.slane %v687_v3, 7  ;;  %v5703_v37 = vld [vmem:[%s7251_s3 + $0x238] sm:$0xff]   ;;  %v4986_v18 = vunpack.c.h.bf16 %v6437_v28  ;;  %5360 = vmatprep.subr.bf16.mxu1 %v5653_v58 }
  0xb7   : > { %v6473_v20 = vld [vmem:[#allocation2 + $0x24] sm:$0xe]  ;;  %v1346_v32 = vrot.slane %v1345_v9, 4  ;;  %v6478_v7 = vld [vmem:[#allocation2 + $0x28] sm:$0xf]  ;;  %v1356_v19 = vrot.slane %v1355_v4, 4  ;;  %5494 = vmatprep.subr.bf16.mxu0 %v5703_v37  ;;  %5361 = vmatpush3.bf16.msra.mxu1 %v5657_v17 }
  0xb8   : > { %v5632_v39 = vld [vmem:[#allocation3 + $0x16c] ss:$36 sps:$4 sm:$0xff]   ;;  %v6480_v21 = vld [vmem:[#allocation2 + $0x2c] sm:$0x1]  ;;  %v1019_v8 = vld [vmem:[#allocation2 + $0x54] sm:$0xf]  ;;  %v692_v22 = vor.u32 %v690_v13, %v6469_v5 }
  0xb9   : > { %v5638_v29 = vld [vmem:[#allocation3 + $0x168] ss:$36 sps:$4 sm:$0xff]   ;;  %v5670_v35 = vld [vmem:[%s7251_s3 + $0x1e8] sm:$0xff]   ;;  %v1158_v42 = vld [vmem:[#allocation2 + $0x54] sm:$0xf]  ;;  %3671 = vmatprep.mubr.bf16.mxu0 %v5632_v39  ;;  %v1351_v43 = vsel %vm5968_vm5, %v1346_v32, %v1350_v27  ;;  %v693_v44 = vrot.slane %v6469_v5, 4  ;;  %v1361_v14 = vsel %vm5968_vm5, %v1356_v19, %v1360_v56 }
  0xba   : > { %v5647_v36 = vld [vmem:[#allocation3 + $0x50] ss:$36 sps:$4 sm:$0xff]   ;;  %1055 = vst [vmem:[#allocation3 + $0x1f8] sm:$0xf] %v1019_v8  ;;  %v1363_v26 = vshrl.u32 %v1158_v42, 16  ;;  %v1366_v59 = vshll.u32 %v1158_v42, 16  ;;  %3672 = vmatmul.mubr.bf16.gmra.mxu0 %v5638_v29  ;;  %v943_v49 = vsel %vm6009_vm10, %v692_v22, %v6464_v15  ;;  %5362 = vmatprep.subr.bf16.mxu1 %v5670_v35 }
  0xbb   : > { %1085 = vst [vmem:[#allocation3 + $0x1bc] sm:$0xf] %v1019_v8  ;;  %1115 = vst [vmem:[#allocation3 + $0x180] sm:$0xf] %v1019_v8  ;;  %v946_v16 = vld [vmem:[#allocation2 + $0x68] sm:$0x1]  ;;  %3801 = vmatmul.mubr.bf16.gmra.mxu1 %v5647_v36 }
  0xbc   : > { %1622 = vst [vmem:[#allocation3 + $0x1b4] sm:$0xf] %v1351_v43  ;;  %1678 = vst [vmem:[#allocation3 + $0x178] sm:$0xf] %v1351_v43  ;;  %v1020_v47 = vld [vmem:[#allocation2 + $0x58] sm:$0xf] }
  0xbd   : > { %1734 = vst [vmem:[#allocation3 + $0x13c] sm:$0xf] %v1351_v43  ;;  %v1159_v23 = vld [vmem:[#allocation2 + $0x58] sm:$0xf]  ;;  %v697_v24 = vrot.slane %v695_v0, 7  ;;  %v4678_v38 = vrot.slane %v6473_v20, 9 }
  0xbe   : > { %v5673_v50 = vld [vmem:[%s7251_s3 + $0x1a8] sm:$0xff]   ;;  %1623 = vst [vmem:[#allocation3 + $0x1d8] sm:$0xf] %v1361_v14  ;;  %1679 = vst [vmem:[#allocation3 + $0x19c] sm:$0xf] %v1361_v14  ;;  %v1365_v30 = vrot.slane %v1363_v26, 4 }
  0xbf   : > { %1735 = vst [vmem:[#allocation3 + $0x160] sm:$0xf] %v1361_v14  ;;  %1056 = vst [vmem:[#allocation3 + $0x21c] sm:$0xf] %v1020_v47  ;;  %v1368_v51 = vrot.slane %v1366_v59, 5  ;;  %v1372_v46 = vshll.u32 %v1159_v23, 16  ;;  %v700_v57 = vor.u32 %v698_v31, %v697_v24  ;;  %5363 = vmatpush3.bf16.msra.mxu1 %v5673_v50 }
  0xc0   : > { %v1376_v53 = vshrl.u32 %v1159_v23, 16  ;;  %1086 = vst [vmem:[#allocation3 + $0x1e0] sm:$0xf] %v1020_v47  ;;  %1116 = vst [vmem:[#allocation3 + $0x1a4] sm:$0xf] %v1020_v47  ;;  %v702_v60 = vrot.slane %v697_v24, 4 }
  0xc1   : > { %944 = vst [vmem:[#allocation2 + $0x60] sm:$0xf] %v943_v49  ;;  %v1770_v54 = vld [vmem:[#allocation2 + $0x30] sm:$0xe]  ;;  %v6517_v55 = vld [vmem:[#allocation2 + $0x34] sm:$0xf]  ;;  %v1369_v52 = vor.u32 %v1368_v51, %v1365_v30  ;;  %v701_v63 = vsel %vm6003_vm9, %v693_v44, %v700_v57 }
  0xc2   : > { %v1886_v61 = vrot.slane %v6478_v7, 5  ;;  %v1889_v62 = vrot.slane %v6480_v21, 5  ;;  %v5686_v48 = vld [vmem:[%s7251_s3 + $0x1e0] sm:$0xff]   ;;  %v1160_v27 = vld [vmem:[#allocation2 + $0x5c] sm:$0x1]  ;;  %v1374_v56 = vrot.slane %v1372_v46, 5  ;;  %v947_v58 = vsel %vm5996_vm8, %v702_v60, %v946_v16 }
  0xc3   : > { %v1378_v1 = vrot.slane %v1376_v53, 4  ;;  %v398_v3 = vmax.f32 %v6484_v33, 0.0  ;;  %v1382_v9 = vshll.u32 %v1160_v27, 16  ;;  %v5650_v12 = vld [vmem:[#allocation3 + $0x9c] ss:$36 sps:$4 sm:$0xff]   ;;  %v1370_v15 = vrot.slane %v1369_v52, 4  ;;  %5364 = vmatprep.subr.bf16.mxu1 %v5686_v48 }
  0xc4   : > { %v1887_v13 = vsel %vm6238_vm13, %v4678_v38, %v1886_v61  ;;  %945 = vst [vmem:[#allocation2 + $0x64] sm:$0xf] %v701_v63  ;;  %948 = vst [vmem:[#allocation2 + $0x68] sm:$0x1] %v947_v58  ;;  %v1888_v17 = vrot.slane %v1886_v61, 4  ;;  %v399_v5 = vmax.f32 %v6488_v34, 0.0  ;;  %3808 = vmatprep.mubr.bf16.mxu1 %v5650_v12 }
  0xc5   : > { %v1379_v4 = vor.u32 %v1378_v1, %v1374_v56  ;;  %2013 = vst [vmem:[#allocation3 + $0xe0] sm:$0xf] %v1887_v13  ;;  %2097 = vst [vmem:[#allocation3 + $0x68] sm:$0xf] %v1887_v13  ;;  %v1384_v0 = vrot.slane %v1382_v9, 5  ;;  %v4927_v31 = vpack.c.bf16 %v398_v3, %v398_v3  ;;  %v4679_v37 = vrot.slane %v1770_v54, 9 }
  0xc6   : > { %2055 = vst [vmem:[#allocation3 + $0xa4] sm:$0xf] %v1887_v13  ;;  %v6532_v20 = vld [vmem:[#allocation2 + $0x38] sm:$0x1]  ;;  %v1893_v39 = vrot.slane %v6517_v55, 5  ;;  %v5689_v29 = vld [vmem:[%s7251_s3 + $0x1a0] sm:$0xff]   ;;  %v1375_v32 = vsel %vm5968_vm5, %v1370_v15, %v1374_v56  ;;  %v1890_v33 = vsel %vm6238_vm13, %v1888_v17, %v1889_v62  ;;  %v6542_v34 = vpack.c.bf16 %v399_v5, %v399_v5 }
  0xc7   : > { %v1380_v7 = vrot.slane %v1379_v4, 4  ;;  %v5655_v21 = vld [vmem:[#allocation3 + $0x98] ss:$36 sps:$4 sm:$0xff]   ;;  %v5702_v35 = vld [vmem:[%s7251_s3 + $0x1d8] sm:$0xff]   ;;  %v5646_v8 = vld [vmem:[#allocation3 + $0x1b0] ss:$36 sps:$4 sm:$0xff]   ;;  %5365 = vmatpush3.bf16.msra.mxu1 %v5689_v29 }
  0xc8   : > { %v5642_v19 = vld [vmem:[#allocation3 + $0x1b4] ss:$36 sps:$4 sm:$0xff]   ;;  %1624 = vst [vmem:[#allocation3 + $0x1fc] sm:$0xf] %v1375_v32  ;;  %1680 = vst [vmem:[#allocation3 + $0x1c0] sm:$0xf] %v1375_v32  ;;  %v1894_v22 = vsel %vm6238_vm13, %v4679_v37, %v1893_v39  ;;  %5366 = vmatprep.subr.bf16.mxu1 %v5702_v35  ;;  %3809 = vmatmul.mubr.bf16.gmra.mxu1 %v5655_v21 }
  0xc9   : > { %1736 = vst [vmem:[#allocation3 + $0x184] sm:$0xf] %v1375_v32  ;;  %2014 = vst [vmem:[#allocation3 + $0x104] sm:$0xf] %v1890_v33  ;;  %v704_v42 = vshrl.u32 %v4927_v31, 16  ;;  %v1385_v44 = vsel %vm5968_vm5, %v1380_v7, %v1384_v0  ;;  %v707_v47 = vshll.u32 %v4927_v31, 16  ;;  %3679 = vmatprep.mubr.bf16.mxu0 %v5642_v19 }
  0xca   : > { %2098 = vst [vmem:[#allocation3 + $0x8c] sm:$0xf] %v1890_v33  ;;  %2056 = vst [vmem:[#allocation3 + $0xc8] sm:$0xf] %v1890_v33  ;;  %v6552_v43 = vld [vmem:[%s7250_s2] ss:$0 sm:$0xff]  ;;  %3680 = vmatmul.mubr.bf16.gmra.mxu0 %v5646_v8 }
  0xcb   : > { %v6556_v36 = vadd.f32 %v6552_v43, %v6496_v41  ;;  %v6561_v26 = vld [vmem:[%s7249_s1] ss:$0 sm:$0xff]  ;;  %v712_v23 = vshrl.u32 %v6542_v34, 16  ;;  %2015 = vst [vmem:[#allocation3 + $0x128] sm:$0xf] %v1894_v22  ;;  %v715_v49 = vshll.u32 %v6542_v34, 16  ;;  %v369_v48 = vadd.f32 %v6552_v43, %v6502_v25 }
  0xcc   : > { %v331_v59 = vmul.f32 %v6561_v26, %v4985_v45  ;;  %v1021_v16 = vld [vmem:[#allocation2 + $0x60] sm:$0xf]  ;;  %2057 = vst [vmem:[#allocation3 + $0xec] sm:$0xf] %v1894_v22  ;;  %2099 = vst [vmem:[#allocation3 + $0xb0] sm:$0xf] %v1894_v22  ;;  %v332_v27 = vmul.f32 %v6561_v26, %v4986_v18 }
  0xcd   : > { %v1161_v14 = vld [vmem:[#allocation2 + $0x60] sm:$0xf]  ;;  %1625 = vst [vmem:[#allocation3 + $0x220] sm:$0xf] %v1385_v44  ;;  %1681 = vst [vmem:[#allocation3 + $0x1e4] sm:$0xf] %v1385_v44 }
  0xce   : > { %1737 = vst [vmem:[#allocation3 + $0x1a8] sm:$0xf] %v1385_v44  ;;  %1057 = vst [vmem:[#allocation3 + $0x240] sm:$0xf] %v1021_v16  ;;  %v1387_v41 = vshrl.u32 %v1161_v14, 16  ;;  %v1390_v24 = vshll.u32 %v1161_v14, 16  ;;  %v6584_v52 = vadd.f32 %v6552_v43, %v331_v59  ;;  %v371_v8 = vadd.f32 %v6552_v43, %v332_v27 }
  0xcf   : > { %1087 = vst [vmem:[#allocation3 + $0x204] sm:$0xf] %v1021_v16  ;;  %1117 = vst [vmem:[#allocation3 + $0x1c8] sm:$0xf] %v1021_v16  ;;  %v706_v45 = vrot.slane %v704_v42, 7  ;;  %v5706_v50 = vld [vmem:[%s7251_s3 + $0x198] sm:$0xff]  }
  0xd0   : > { %v949_v38 = vld [vmem:[#allocation2 + $0x6c] sm:$0xf]  ;;  %v714_v30 = vrot.slane %v712_v23, 7  ;;  %v953_v51 = vld [vmem:[#allocation2 + $0x74] sm:$0x1]  ;;  %v1895_v46 = vrot.slane %v1893_v39, 4  ;;  %5367 = vmatpush3.bf16.msra.mxu1 %v5706_v50 }
  0xd1   : > { %v1896_v53 = vrot.slane %v6532_v20, 5  ;;  %v400_v54 = vmax.f32 %v6556_v36, 0.0  ;;  %v5717_v55 = vld [vmem:[%s7251_s3 + $0x1d0] sm:$0xff]   ;;  %v1022_v57 = vld [vmem:[#allocation2 + $0x64] sm:$0xf]  ;;  %v709_v62 = vor.u32 %v707_v47, %v706_v45  ;;  %v1389_v56 = vrot.slane %v1387_v41, 4 }
  0xd2   : > { %v1162_v60 = vld [vmem:[#allocation2 + $0x64] sm:$0xf]  ;;  %v1163_v61 = vld [vmem:[#allocation2 + $0x68] sm:$0x1]  ;;  %1058 = vst [vmem:[#allocation3 + $0x264] sm:$0xf] %v1022_v57  ;;  %v717_v25 = vor.u32 %v715_v49, %v714_v30  ;;  %5368 = vmatprep.subr.bf16.mxu1 %v5717_v55 }
  0xd3   : > { %v1392_v1 = vrot.slane %v1390_v24, 5  ;;  %v1396_v3 = vshll.u32 %v1162_v60, 16  ;;  %v1400_v9 = vshrl.u32 %v1162_v60, 16  ;;  %1088 = vst [vmem:[#allocation3 + $0x228] sm:$0xf] %v1022_v57  ;;  %v1406_v58 = vshll.u32 %v1163_v61, 16 }
  0xd4   : > { %1118 = vst [vmem:[#allocation3 + $0x1ec] sm:$0xf] %v1022_v57  ;;  %v1773_v12 = vld [vmem:[#allocation2 + $0x3c] sm:$0xe]  ;;  %v1774_v63 = vld [vmem:[#allocation2 + $0x40] sm:$0xf]  ;;  %v950_v31 = vsel %vm6009_vm10, %v709_v62, %v949_v38  ;;  %v1897_v32 = vsel %vm6238_vm13, %v1895_v46, %v1896_v53  ;;  %v4929_v19 = vpack.c.bf16 %v400_v54, %v400_v54 }
  0xd5   : > { %v710_v13 = vrot.slane %v706_v45, 4  ;;  %v719_v15 = vrot.slane %v714_v30, 4  ;;  %v6586_v28 = vld [vmem:[#allocation2 + $0x44] sm:$0x1]  ;;  %v5721_v18 = vld [vmem:[%s7251_s3 + $0x190] sm:$0xff]   ;;  %v1393_v4 = vor.u32 %v1392_v1, %v1389_v56  ;;  %v1398_v17 = vrot.slane %v1396_v3, 5 }
  0xd6   : > { %v1402_v5 = vrot.slane %v1400_v9, 4  ;;  %v5660_v0 = vld [vmem:[#allocation3 + $0xe4] ss:$36 sps:$4 sm:$0xff]   ;;  %v1408_v20 = vrot.slane %v1406_v58, 5  ;;  %951 = vst [vmem:[#allocation2 + $0x6c] sm:$0xf] %v950_v31  ;;  %5369 = vmatpush3.bf16.msra.mxu1 %v5721_v18 }
  0xd7   : > { %v5663_v37 = vld [vmem:[#allocation3 + $0xe0] ss:$36 sps:$4 sm:$0xff]   ;;  %v718_v39 = vsel %vm6003_vm9, %v710_v13, %v717_v25  ;;  %v954_v29 = vsel %vm5996_vm8, %v719_v15, %v953_v51  ;;  %v6599_v7 = vld [vmem:[#allocation2 + $0x48] sm:$0xe]  ;;  %v5654_v33 = vld [vmem:[#allocation3 + $0x1f8] ss:$36 sps:$4 sm:$0xff]   ;;  %3816 = vmatprep.mubr.bf16.mxu1 %v5660_v0 }
  0xd8   : > { %v5648_v21 = vld [vmem:[#allocation3 + $0x1fc] ss:$36 sps:$4 sm:$0xff]   ;;  %v1394_v34 = vrot.slane %v1393_v4, 4  ;;  %v1403_v35 = vor.u32 %v1402_v5, %v1398_v17  ;;  %952 = vst [vmem:[#allocation2 + $0x70] sm:$0xf] %v718_v39  ;;  %v401_v42 = vmax.f32 %v369_v48, 0.0  ;;  %3817 = vmatmul.mubr.bf16.gmra.mxu1 %v5663_v37 }
  0xd9   : > { %955 = vst [vmem:[#allocation2 + $0x74] sm:$0x1] %v954_v29  ;;  %2016 = vst [vmem:[#allocation3 + $0x14c] sm:$0xf] %v1897_v32  ;;  %v4680_v22 = vrot.slane %v1773_v12, 9  ;;  %v1900_v36 = vrot.slane %v1774_v63, 5  ;;  %3687 = vmatprep.mubr.bf16.mxu0 %v5648_v21 }
  0xda   : > { %2058 = vst [vmem:[#allocation3 + $0x110] sm:$0xf] %v1897_v32  ;;  %2100 = vst [vmem:[#allocation3 + $0xd4] sm:$0xf] %v1897_v32  ;;  %v1903_v59 = vrot.slane %v6586_v28, 5  ;;  %v1399_v16 = vsel %vm5968_vm5, %v1394_v34, %v1398_v17  ;;  %v1404_v14 = vrot.slane %v1403_v35, 4  ;;  %3688 = vmatmul.mubr.bf16.gmra.mxu0 %v5654_v33  ;;  %v4930_v41 = vpack.c.bf16 %v401_v42, %v401_v42 }
  0xdb   : > { %v6603_v44 = vld [vmem:[#allocation2 + $0x4c] sm:$0xf]  ;;  %v721_v47 = vshrl.u32 %v4929_v19, 16  ;;  %v724_v23 = vshll.u32 %v4929_v19, 16  ;;  %1626 = vst [vmem:[#allocation3 + $0x244] sm:$0xf] %v1399_v16  ;;  %v1901_v24 = vsel %vm6238_vm13, %v4680_v22, %v1900_v36 }
  0xdc   : > { %1682 = vst [vmem:[#allocation3 + $0x208] sm:$0xf] %v1399_v16  ;;  %1738 = vst [vmem:[#allocation3 + $0x1cc] sm:$0xf] %v1399_v16  ;;  %v1902_v45 = vrot.slane %v1900_v36, 4  ;;  %v402_v49 = vmax.f32 %v6584_v52, 0.0  ;;  %v1409_v38 = vsel %vm5968_vm5, %v1404_v14, %v1408_v20 }
  0xdd   : > { %v6612_v50 = vrot.slane %v721_v47, 7  ;;  %v956_v30 = vld [vmem:[#allocation2 + $0x78] sm:$0xf]  ;;  %2017 = vst [vmem:[#allocation3 + $0x170] sm:$0xf] %v1901_v24  ;;  %v403_v51 = vmax.f32 %v371_v8, 0.0 }
  0xde   : > { %2059 = vst [vmem:[#allocation3 + $0x134] sm:$0xf] %v1901_v24  ;;  %2101 = vst [vmem:[#allocation3 + $0xf8] sm:$0xf] %v1901_v24  ;;  %v4681_v46 = vrot.slane %v6599_v7, 9  ;;  %v729_v53 = vshrl.u32 %v4930_v41, 16  ;;  %v1904_v55 = vsel %vm6238_vm13, %v1902_v45, %v1903_v59  ;;  %v4931_v1 = vpack.c.bf16 %v402_v49, %v402_v49 }
  0xdf   : > { %1627 = vst [vmem:[#allocation3 + $0x268] sm:$0xf] %v1409_v38  ;;  %1683 = vst [vmem:[#allocation3 + $0x22c] sm:$0xf] %v1409_v38  ;;  %v732_v54 = vshll.u32 %v4930_v41, 16  ;;  %v726_v61 = vor.u32 %v724_v23, %v6612_v50  ;;  %v727_v62 = vrot.slane %v6612_v50, 4  ;;  %v6620_v3 = vpack.c.bf16 %v403_v51, %v403_v51 }
  0xe0   : > { %1739 = vst [vmem:[#allocation3 + $0x1f0] sm:$0xf] %v1409_v38  ;;  %v1023_v57 = vld [vmem:[#allocation2 + $0x6c] sm:$0xf]  ;;  %2018 = vst [vmem:[#allocation3 + $0x194] sm:$0xf] %v1904_v55 }
  0xe1   : > { %v1164_v60 = vld [vmem:[#allocation2 + $0x6c] sm:$0xf]  ;;  %2060 = vst [vmem:[#allocation3 + $0x158] sm:$0xf] %v1904_v55  ;;  %2102 = vst [vmem:[#allocation3 + $0x11c] sm:$0xf] %v1904_v55  ;;  %v957_v4 = vsel %vm6009_vm10, %v726_v61, %v956_v30 }
  0xe2   : > { %v1907_v48 = vrot.slane %v6603_v44, 5  ;;  %v1024_v27 = vld [vmem:[#allocation2 + $0x70] sm:$0xf]  ;;  %1059 = vst [vmem:[#allocation3 + $0x288] sm:$0xf] %v1023_v57  ;;  %v1411_v9 = vshrl.u32 %v1164_v60, 16 }
  0xe3   : > { %v1165_v52 = vld [vmem:[#allocation2 + $0x70] sm:$0xf]  ;;  %v1166_v56 = vld [vmem:[#allocation2 + $0x74] sm:$0x1]  ;;  %1089 = vst [vmem:[#allocation3 + $0x24c] sm:$0xf] %v1023_v57 }
  0xe4   : > { %1119 = vst [vmem:[#allocation3 + $0x210] sm:$0xf] %v1023_v57  ;;  %1060 = vst [vmem:[#allocation3 + $0x2ac] sm:$0xf] %v1024_v27  ;;  %v1414_v12 = vshll.u32 %v1164_v60, 16  ;;  %v1420_v63 = vshll.u32 %v1165_v52, 16  ;;  %v1908_v17 = vsel %vm6238_vm13, %v4681_v46, %v1907_v48 }
  0xe5   : > { %v1424_v58 = vshrl.u32 %v1165_v52, 16  ;;  %1090 = vst [vmem:[#allocation3 + $0x270] sm:$0xf] %v1024_v27  ;;  %1120 = vst [vmem:[#allocation3 + $0x234] sm:$0xf] %v1024_v27  ;;  %v1430_v25 = vshll.u32 %v1166_v56, 16 }
  0xe6   : > { %v960_v13 = vld [vmem:[#allocation2 + $0x80] sm:$0x1]  ;;  %v5668_v15 = vld [vmem:[#allocation3 + $0x12c] ss:$36 sps:$4 sm:$0xff]   ;;  %v731_v18 = vrot.slane %v729_v53, 7  ;;  %v1413_v5 = vrot.slane %v1411_v9, 4 }
  0xe7   : > { %v5672_v28 = vld [vmem:[#allocation3 + $0x128] ss:$36 sps:$4 sm:$0xff]   ;;  %v1416_v0 = vrot.slane %v1414_v12, 5  ;;  %v1422_v31 = vrot.slane %v1420_v63, 5  ;;  %v1426_v20 = vrot.slane %v1424_v58, 4  ;;  %v5732_v37 = vld [vmem:[%s7251_s3 + $0x1c8] sm:$0xff]   ;;  %3824 = vmatprep.mubr.bf16.mxu1 %v5668_v15 }
  0xe8   : > { %958 = vst [vmem:[#allocation2 + $0x78] sm:$0xf] %v957_v4  ;;  %2019 = vst [vmem:[#allocation3 + $0x1b8] sm:$0xf] %v1908_v17  ;;  %v1432_v39 = vrot.slane %v1430_v25, 5  ;;  %v734_v29 = vor.u32 %v732_v54, %v731_v18  ;;  %v736_v32 = vrot.slane %v731_v18, 4  ;;  %3825 = vmatmul.mubr.bf16.gmra.mxu1 %v5672_v28  ;;  %5370 = vmatprep.subr.bf16.mxu1 %v5732_v37 }
  0xe9   : > { %2061 = vst [vmem:[#allocation3 + $0x17c] sm:$0xf] %v1908_v17  ;;  %2103 = vst [vmem:[#allocation3 + $0x140] sm:$0xf] %v1908_v17  ;;  %v738_v7 = vshrl.u32 %v4931_v1, 16  ;;  %v1417_v35 = vor.u32 %v1416_v0, %v1413_v5  ;;  %v1427_v19 = vor.u32 %v1426_v20, %v1422_v31  ;;  %v741_v8 = vshll.u32 %v4931_v1, 16 }
  0xea   : > { %v1778_v21 = vld [vmem:[#allocation2 + $0x50] sm:$0x1]  ;;  %v5658_v33 = vld [vmem:[#allocation3 + $0x244] ss:$36 sps:$4 sm:$0xff]   ;;  %v963_v42 = vld [vmem:[#allocation2 + $0x84] sm:$0xf]  ;;  %v735_v22 = vsel %vm6003_vm9, %v727_v62, %v734_v29  ;;  %v961_v36 = vsel %vm5996_vm8, %v736_v32, %v960_v13 }
  0xeb   : > { %v5662_v34 = vld [vmem:[#allocation3 + $0x240] ss:$36 sps:$4 sm:$0xff]   ;;  %v5676_v59 = vld [vmem:[#allocation3 + $0x174] ss:$36 sps:$4 sm:$0xff]   ;;  %v740_v16 = vrot.slane %v738_v7, 7  ;;  %3695 = vmatprep.mubr.bf16.mxu0 %v5658_v33  ;;  %v1418_v47 = vrot.slane %v1417_v35, 4 }
  0xec   : > { %v1779_v14 = vld [vmem:[#allocation2 + $0x54] sm:$0xe]  ;;  %v1428_v23 = vrot.slane %v1427_v19, 4  ;;  %959 = vst [vmem:[#allocation2 + $0x7c] sm:$0xf] %v735_v22  ;;  %v746_v41 = vshrl.u32 %v6620_v3, 16  ;;  %3696 = vmatmul.mubr.bf16.gmra.mxu0 %v5662_v34  ;;  %3832 = vmatprep.mubr.bf16.mxu1 %v5676_v59 }
  0xed   : > { %962 = vst [vmem:[#allocation2 + $0x80] sm:$0x1] %v961_v36  ;;  %v749_v24 = vshll.u32 %v6620_v3, 16  ;;  %v1780_v45 = vld [vmem:[#allocation2 + $0x58] sm:$0xf]  ;;  %v743_v49 = vor.u32 %v741_v8, %v740_v16  ;;  %v744_v38 = vrot.slane %v740_v16, 4  ;;  %v1423_v46 = vsel %vm5968_vm5, %v1418_v47, %v1422_v31 }
  0xee   : > { %v967_v50 = vld [vmem:[#allocation2 + $0x8c] sm:$0x1]  ;;  %v1909_v30 = vrot.slane %v1907_v48, 4  ;;  %v1910_v51 = vrot.slane %v1778_v21, 5  ;;  %v1433_v53 = vsel %vm5968_vm5, %v1428_v23, %v1432_v39  ;;  %v748_v55 = vrot.slane %v746_v41, 7 }
  0xef   : > { %v5680_v54 = vld [vmem:[#allocation3 + $0x170] ss:$36 sps:$4 sm:$0xff]   ;;  %v1781_v57 = vld [vmem:[#allocation2 + $0x5c] sm:$0x1]  ;;  %v4682_v60 = vrot.slane %v1779_v14, 9  ;;  %v964_v62 = vsel %vm6009_vm10, %v743_v49, %v963_v42  ;;  %v1914_v27 = vrot.slane %v1780_v45, 5 }
  0xf0   : > { %1628 = vst [vmem:[#allocation3 + $0x28c] sm:$0xf] %v1423_v46  ;;  %1629 = vst [vmem:[#allocation3 + $0x2b0] sm:$0xf] %v1433_v53  ;;  %v1025_v61 = vld [vmem:[#allocation2 + $0x78] sm:$0xf]  ;;  %v1911_v48 = vsel %vm6238_vm13, %v1909_v30, %v1910_v51  ;;  %v751_v1 = vor.u32 %v749_v24, %v748_v55  ;;  %3833 = vmatmul.mubr.bf16.gmra.mxu1 %v5680_v54 }
  0xf1   : > { %1684 = vst [vmem:[#allocation3 + $0x250] sm:$0xf] %v1423_v46  ;;  %1685 = vst [vmem:[#allocation3 + $0x274] sm:$0xf] %v1433_v53  ;;  %v1167_v44 = vld [vmem:[#allocation2 + $0x78] sm:$0xf]  ;;  %v1915_v9 = vsel %vm6238_vm13, %v4682_v60, %v1914_v27 }
  0xf2   : > { %1740 = vst [vmem:[#allocation3 + $0x214] sm:$0xf] %v1423_v46  ;;  %1741 = vst [vmem:[#allocation3 + $0x238] sm:$0xf] %v1433_v53  ;;  %v1435_v52 = vshrl.u32 %v1167_v44, 16  ;;  %v1438_v56 = vshll.u32 %v1167_v44, 16  ;;  %v752_v28 = vsel %vm6003_vm9, %v744_v38, %v751_v1 }
  0xf3   : > { %1061 = vst [vmem:[#allocation3 + $0x2d0] sm:$0xf] %v1025_v61  ;;  %1091 = vst [vmem:[#allocation3 + $0x294] sm:$0xf] %v1025_v61  ;;  %v753_v3 = vrot.slane %v748_v55, 4  ;;  %v1916_v12 = vrot.slane %v1914_v27, 4 }
  0xf4   : > { %1121 = vst [vmem:[#allocation3 + $0x258] sm:$0xf] %v1025_v61  ;;  %965 = vst [vmem:[#allocation2 + $0x84] sm:$0xf] %v964_v62  ;;  %v1917_v63 = vrot.slane %v1781_v57, 5  ;;  %v1437_v25 = vrot.slane %v1435_v52, 4 }
  0xf5   : > { %2020 = vst [vmem:[#allocation3 + $0x1dc] sm:$0xf] %v1911_v48  ;;  %2062 = vst [vmem:[#allocation3 + $0x1a0] sm:$0xf] %v1911_v48  ;;  %v1782_v58 = vld [vmem:[#allocation2 + $0x60] sm:$0xe]  ;;  %v968_v18 = vsel %vm5996_vm8, %v753_v3, %v967_v50 }
  0xf6   : > { %2104 = vst [vmem:[#allocation3 + $0x164] sm:$0xf] %v1911_v48  ;;  %v1783_v13 = vld [vmem:[#allocation2 + $0x64] sm:$0xf]  ;;  %v1440_v15 = vrot.slane %v1438_v56, 5  ;;  %v1918_v31 = vsel %vm6238_vm13, %v1916_v12, %v1917_v63  ;;  %v4683_v32 = vrot.slane %v1782_v58, 9 }
  0xf7   : > { %2021 = vst [vmem:[#allocation3 + $0x200] sm:$0xf] %v1915_v9  ;;  %2063 = vst [vmem:[#allocation3 + $0x1c4] sm:$0xf] %v1915_v9  ;;  %v1784_v4 = vld [vmem:[#allocation2 + $0x68] sm:$0x1] }
  0xf8   : > { %2105 = vst [vmem:[#allocation3 + $0x188] sm:$0xf] %v1915_v9  ;;  %v1026_v17 = vld [vmem:[#allocation2 + $0x7c] sm:$0xf]  ;;  %v1169_v0 = vld [vmem:[#allocation2 + $0x80] sm:$0x1]  ;;  %v1441_v20 = vor.u32 %v1440_v15, %v1437_v25 }
  0xf9   : > { %v1168_v5 = vld [vmem:[#allocation2 + $0x7c] sm:$0xf]  ;;  %966 = vst [vmem:[#allocation2 + $0x88] sm:$0xf] %v752_v28  ;;  %969 = vst [vmem:[#allocation2 + $0x8c] sm:$0x1] %v968_v18 }
  0xfa   : > { %1062 = vst [vmem:[#allocation3 + $0x2f4] sm:$0xf] %v1026_v17  ;;  %v1444_v37 = vshll.u32 %v1168_v5, 16  ;;  %v1448_v39 = vshrl.u32 %v1168_v5, 16  ;;  %v1454_v29 = vshll.u32 %v1169_v0, 16  ;;  %v1921_v7 = vrot.slane %v1783_v13, 5 }
  0xfb   : > { %1092 = vst [vmem:[#allocation3 + $0x2b8] sm:$0xf] %v1026_v17  ;;  %1122 = vst [vmem:[#allocation3 + $0x27c] sm:$0xf] %v1026_v17  ;;  %v1924_v21 = vrot.slane %v1784_v4, 5  ;;  %v1442_v34 = vrot.slane %v1441_v20, 4 }
  0xfc   : > { %2022 = vst [vmem:[#allocation3 + $0x224] sm:$0xf] %v1918_v31  ;;  %2064 = vst [vmem:[#allocation3 + $0x1e8] sm:$0xf] %v1918_v31  ;;  %v5666_v33 = vld [vmem:[#allocation3 + $0x28c] ss:$36 sps:$4 sm:$0xff]   ;;  %v1922_v36 = vsel %vm6238_vm13, %v4683_v32, %v1921_v7 }
  0xfd   : > { %2106 = vst [vmem:[#allocation3 + $0x1ac] sm:$0xf] %v1918_v31  ;;  %v1446_v35 = vrot.slane %v1444_v37, 5  ;;  %v5671_v19 = vld [vmem:[#allocation3 + $0x288] ss:$36 sps:$4 sm:$0xff]   ;;  %v1450_v8 = vrot.slane %v1448_v39, 4  ;;  %3703 = vmatprep.mubr.bf16.mxu0 %v5666_v33 }
  0xfe   : > { %v1456_v42 = vrot.slane %v1454_v29, 5  ;;  %v1027_v22 = vld [vmem:[#allocation2 + $0x84] sm:$0xf]  ;;  %v5684_v14 = vld [vmem:[#allocation3 + $0x1bc] ss:$36 sps:$4 sm:$0xff]   ;;  %v1923_v47 = vrot.slane %v1921_v7, 4  ;;  %3704 = vmatmul.mubr.bf16.gmra.mxu0 %v5671_v19 }
  0xff   : > { %v1447_v59 = vsel %vm5968_vm5, %v1442_v34, %v1446_v35  ;;  %1063 = vst [vmem:[#allocation3 + $0x318] sm:$0xf] %v1027_v22  ;;  %v1170_v16 = vld [vmem:[#allocation2 + $0x84] sm:$0xf]  ;;  %1093 = vst [vmem:[#allocation3 + $0x2dc] sm:$0xf] %v1027_v22  ;;  %v1451_v23 = vor.u32 %v1450_v8, %v1446_v35  ;;  %3840 = vmatprep.mubr.bf16.mxu1 %v5684_v14 }
 0x100   : > { %1123 = vst [vmem:[#allocation3 + $0x2a0] sm:$0xf] %v1027_v22  ;;  %2023 = vst [vmem:[#allocation3 + $0x248] sm:$0xf] %v1922_v36  ;;  %v1459_v41 = vshrl.u32 %v1170_v16, 16  ;;  %v1462_v24 = vshll.u32 %v1170_v16, 16  ;;  %v1925_v30 = vsel %vm6238_vm13, %v1923_v47, %v1924_v21 }
 0x101   : > { %2065 = vst [vmem:[#allocation3 + $0x20c] sm:$0xf] %v1922_v36  ;;  %2107 = vst [vmem:[#allocation3 + $0x1d0] sm:$0xf] %v1922_v36  ;;  %v5688_v45 = vld [vmem:[#allocation3 + $0x1b8] ss:$36 sps:$4 sm:$0xff]  }
 0x102   : > { %1630 = vst [vmem:[#allocation3 + $0x2d4] sm:$0xf] %v1447_v59  ;;  %1686 = vst [vmem:[#allocation3 + $0x298] sm:$0xf] %v1447_v59  ;;  %v1028_v49 = vld [vmem:[#allocation2 + $0x88] sm:$0xf]  ;;  %3841 = vmatmul.mubr.bf16.gmra.mxu1 %v5688_v45 }
 0x103   : > { %1742 = vst [vmem:[#allocation3 + $0x25c] sm:$0xf] %v1447_v59  ;;  %v1171_v38 = vld [vmem:[#allocation2 + $0x88] sm:$0xf]  ;;  %v1172_v50 = vld [vmem:[#allocation2 + $0x8c] sm:$0x1] }
 0x104   : > { %v1452_v51 = vrot.slane %v1451_v23, 4  ;;  %1064 = vst [vmem:[#allocation3 + $0x33c] sm:$0xf] %v1028_v49  ;;  %v1461_v46 = vrot.slane %v1459_v41, 4  ;;  %v1464_v53 = vrot.slane %v1462_v24, 5  ;;  %v1468_v54 = vshll.u32 %v1171_v38, 16 }
 0x105   : > { %1094 = vst [vmem:[#allocation3 + $0x300] sm:$0xf] %v1028_v49  ;;  %1124 = vst [vmem:[#allocation3 + $0x2c4] sm:$0xf] %v1028_v49  ;;  %v5736_v55 = vld [vmem:[%s7251_s3 + $0x188] sm:$0xff]   ;;  %v1472_v57 = vshrl.u32 %v1171_v38, 16 }
 0x106   : > { %2024 = vst [vmem:[#allocation3 + $0x26c] sm:$0xf] %v1925_v30  ;;  %2066 = vst [vmem:[#allocation3 + $0x230] sm:$0xf] %v1925_v30  ;;  %v1478_v60 = vshll.u32 %v1172_v50, 16  ;;  %v1457_v44 = vsel %vm5968_vm5, %v1452_v51, %v1456_v42  ;;  %v1465_v62 = vor.u32 %v1464_v53, %v1461_v46  ;;  %v1470_v48 = vrot.slane %v1468_v54, 5  ;;  %5371 = vmatpush3.bf16.msra.mxu1 %v5736_v55 }
 0x107   : > { %2108 = vst [vmem:[#allocation3 + $0x1f4] sm:$0xf] %v1925_v30  ;;  %v5692_v61 = vld [vmem:[#allocation3 + $0x204] ss:$36 sps:$4 sm:$0xff]   ;;  %1631 = vst [vmem:[#allocation3 + $0x2f8] sm:$0xf] %v1457_v44 }
 0x108   : > { %v5697_v27 = vld [vmem:[#allocation3 + $0x200] ss:$36 sps:$4 sm:$0xff]   ;;  %1687 = vst [vmem:[#allocation3 + $0x2bc] sm:$0xf] %v1457_v44  ;;  %1743 = vst [vmem:[#allocation3 + $0x280] sm:$0xf] %v1457_v44  ;;  %3848 = vmatprep.mubr.bf16.mxu1 %v5692_v61 }
 0x109   : > { %v1474_v52 = vrot.slane %v1472_v57, 4  ;;  %v1480_v56 = vrot.slane %v1478_v60, 5  ;;  %v1466_v1 = vrot.slane %v1465_v62, 4  ;;  %v1785_v3 = vld [vmem:[#allocation2 + $0x6c] sm:$0xe]  ;;  %v5747_v35 = vld [vmem:[%s7251_s3 + $0x1c0] sm:$0xff]  }
 0x10a   : > { %v1786_v9 = vld [vmem:[#allocation2 + $0x70] sm:$0xf]  ;;  %v1787_v63 = vld [vmem:[#allocation2 + $0x74] sm:$0x1]  ;;  %v4684_v58 = vrot.slane %v1785_v3, 9  ;;  %3849 = vmatmul.mubr.bf16.gmra.mxu1 %v5697_v27  ;;  %5372 = vmatprep.subr.bf16.mxu1 %v5747_v35  ;;  %v5751_v57 = vld [vmem:[%s7251_s3 + $0x180] sm:$0xff]  }
 0x10b   : > { %v1475_v12 = vor.u32 %v1474_v52, %v1470_v48  ;;  %v1928_v13 = vrot.slane %v1786_v9, 5  ;;  %v1471_v25 = vsel %vm5968_vm5, %v1466_v1, %v1470_v48  ;;  %v1931_v15 = vrot.slane %v1787_v63, 5  ;;  %v5698_v18 = vld [vmem:[#allocation3 + $0x24c] ss:$36 sps:$4 sm:$0xff]   ;;  %v1788_v5 = vld [vmem:[#allocation2 + $0x78] sm:$0xe]  ;;  %5373 = vmatpush3.bf16.msra.mxu1 %v5751_v57 }
 0x10c   : > { %1632 = vst [vmem:[#allocation3 + $0x31c] sm:$0xf] %v1471_v25  ;;  %1688 = vst [vmem:[#allocation3 + $0x2e0] sm:$0xf] %v1471_v25  ;;  %v1789_v0 = vld [vmem:[#allocation2 + $0x7c] sm:$0xf]  ;;  %3856 = vmatprep.mubr.bf16.mxu1 %v5698_v18 }
 0x10d   : > { %v1476_v28 = vrot.slane %v1475_v12, 4  ;;  %1744 = vst [vmem:[#allocation3 + $0x2a4] sm:$0xf] %v1471_v25  ;;  %v1929_v4 = vsel %vm6238_vm13, %v4684_v58, %v1928_v13  ;;  %v1930_v17 = vrot.slane %v1928_v13, 4  ;;  %v1790_v20 = vld [vmem:[#allocation2 + $0x80] sm:$0x1] }
 0x10e   : > { %2025 = vst [vmem:[#allocation3 + $0x290] sm:$0xf] %v1929_v4  ;;  %2067 = vst [vmem:[#allocation3 + $0x254] sm:$0xf] %v1929_v4  ;;  %v4685_v37 = vrot.slane %v1788_v5, 9  ;;  %v1935_v39 = vrot.slane %v1789_v0, 5 }
 0x10f   : > { %2109 = vst [vmem:[#allocation3 + $0x218] sm:$0xf] %v1929_v4  ;;  %v1481_v31 = vsel %vm5968_vm5, %v1476_v28, %v1480_v56  ;;  %v5674_v29 = vld [vmem:[#allocation3 + $0x2d4] ss:$36 sps:$4 sm:$0xff]   ;;  %v1932_v7 = vsel %vm6238_vm13, %v1930_v17, %v1931_v15  ;;  %v1938_v21 = vrot.slane %v1790_v20, 5  ;;  %v5021_v1 = vld [vmem:[%s5941_s23 + $0x78] sm:$0xff]  }
 0x110   : > { %v5679_v32 = vld [vmem:[#allocation3 + $0x2d0] ss:$36 sps:$4 sm:$0xff]   ;;  %1633 = vst [vmem:[#allocation3 + $0x340] sm:$0xf] %v1481_v31  ;;  %1689 = vst [vmem:[#allocation3 + $0x304] sm:$0xf] %v1481_v31  ;;  %v1936_v33 = vsel %vm6238_vm13, %v4685_v37, %v1935_v39  ;;  %3711 = vmatprep.mubr.bf16.mxu0 %v5674_v29  ;;  %v5005_v63 = vunpack.c.l.bf16 %v5021_v1  ;;  %v5006_v58 = vunpack.c.h.bf16 %v5021_v1 }
 0x111   : > { %1745 = vst [vmem:[#allocation3 + $0x2c8] sm:$0xf] %v1481_v31  ;;  %2026 = vst [vmem:[#allocation3 + $0x2b4] sm:$0xf] %v1932_v7  ;;  %v1937_v34 = vrot.slane %v1935_v39, 4  ;;  %3712 = vmatmul.mubr.bf16.gmra.mxu0 %v5679_v32  ;;  %v5718_v28 = vld [vmem:[%s7251_s3 + $0x230] sm:$0xff]  }
 0x112   : > { %2068 = vst [vmem:[#allocation3 + $0x278] sm:$0xf] %v1932_v7  ;;  %2110 = vst [vmem:[#allocation3 + $0x23c] sm:$0xf] %v1932_v7  ;;  %v5704_v19 = vld [vmem:[#allocation3 + $0x248] ss:$36 sps:$4 sm:$0xff]   ;;  %v341_v5 = vmul.f32 %v6561_v26, %v5005_v63  ;;  %v342_v0 = vmul.f32 %v6561_v26, %v5006_v58 }
 0x113   : > { %2027 = vst [vmem:[#allocation3 + $0x2d8] sm:$0xf] %v1936_v33  ;;  %2069 = vst [vmem:[#allocation3 + $0x29c] sm:$0xf] %v1936_v33  ;;  %v1939_v8 = vsel %vm6238_vm13, %v1937_v34, %v1938_v21  ;;  %v1791_v42 = vld [vmem:[#allocation2 + $0x84] sm:$0xe]  ;;  %3857 = vmatmul.mubr.bf16.gmra.mxu1 %v5704_v19 }
 0x114   : > { %2111 = vst [vmem:[#allocation3 + $0x260] sm:$0xf] %v1936_v33  ;;  %2028 = vst [vmem:[#allocation3 + $0x2fc] sm:$0xf] %v1939_v8  ;;  %v1792_v22 = vld [vmem:[#allocation2 + $0x88] sm:$0xf]  ;;  %v380_v7 = vadd.f32 %v6552_v43, %v341_v5  ;;  %v381_v21 = vadd.f32 %v6552_v43, %v342_v0 }
 0x115   : > { %2070 = vst [vmem:[#allocation3 + $0x2c0] sm:$0xf] %v1939_v8  ;;  %2112 = vst [vmem:[#allocation3 + $0x284] sm:$0xf] %v1939_v8  ;;  %v1793_v36 = vld [vmem:[#allocation2 + $0x8c] sm:$0x1] }
 0x116   : > { %v4686_v59 = vrot.slane %v1791_v42, 9  ;;  %v1942_v16 = vrot.slane %v1792_v22, 5  ;;  %v1945_v14 = vrot.slane %v1793_v36, 5  ;;  %v1794_v47 = vld [vmem:[#allocation2 + $0x90] sm:$0xe]  ;;  %v5851_v26 = vld [vmem:[%s7251_s3 + $0x238] sm:$0xff]  }
 0x117   : > { %v1795_v23 = vld [vmem:[#allocation2 + $0x94] sm:$0xf]  ;;  %v5696_v38 = vld [vmem:[#allocation3 + $0x14] ss:$36 sps:$4 sm:$0xff]   ;;  %v4687_v30 = vrot.slane %v1794_v47, 9  ;;  %v412_v43 = vmax.f32 %v380_v7, 0.0 }
 0x118   : > { %v5682_v41 = vld [vmem:[#allocation3 + $0x31c] ss:$36 sps:$4 sm:$0xff]   ;;  %v1943_v45 = vsel %vm6238_vm13, %v4686_v59, %v1942_v16  ;;  %v1944_v49 = vrot.slane %v1942_v16, 4  ;;  %v5707_v50 = vld [vmem:[#allocation3 + $0x294] ss:$36 sps:$4 sm:$0xff]   ;;  %v1949_v54 = vrot.slane %v1795_v23, 5 }
 0x119   : > { %v5687_v24 = vld [vmem:[#allocation3 + $0x318] ss:$36 sps:$4 sm:$0xff]   ;;  %2029 = vst [vmem:[#allocation3 + $0x320] sm:$0xf] %v1943_v45  ;;  %2071 = vst [vmem:[#allocation3 + $0x2e4] sm:$0xf] %v1943_v45  ;;  %3719 = vmatprep.mubr.bf16.mxu0 %v5682_v41  ;;  %3864 = vmatprep.mubr.bf16.mxu1 %v5707_v50  ;;  %v4941_v36 = vpack.c.bf16 %v412_v43, %v412_v43 }
 0x11a   : > { %2113 = vst [vmem:[#allocation3 + $0x2a8] sm:$0xf] %v1943_v45  ;;  %v5711_v51 = vld [vmem:[#allocation3 + $0x290] ss:$36 sps:$4 sm:$0xff]   ;;  %v1946_v46 = vsel %vm6238_vm13, %v1944_v49, %v1945_v14  ;;  %v1796_v53 = vld [vmem:[#allocation2 + $0x98] sm:$0x1]  ;;  %3720 = vmatmul.mubr.bf16.gmra.mxu0 %v5687_v24  ;;  %v1950_v61 = vsel %vm6238_vm13, %v4687_v30, %v1949_v54 }
 0x11b   : > { %2030 = vst [vmem:[#allocation3 + $0x344] sm:$0xf] %v1946_v46  ;;  %2072 = vst [vmem:[#allocation3 + $0x308] sm:$0xf] %v1946_v46  ;;  %v1952_v55 = vrot.slane %v1796_v53, 5  ;;  %v1951_v44 = vrot.slane %v1949_v54, 4  ;;  %3953 = vmatprep.mubr.bf16.mxu0 %v5696_v38  ;;  %3865 = vmatmul.mubr.bf16.gmra.mxu1 %v5711_v51 }
 0x11c   : > { %2114 = vst [vmem:[#allocation3 + $0x2cc] sm:$0xf] %v1946_v46  ;;  %v5713_v60 = vld [vmem:[#allocation3 + $0x2dc] ss:$36 sps:$4 sm:$0xff]   ;;  %2031 = vst [vmem:[#allocation3 + $0x368] sm:$0xf] %v1950_v61 }
 0x11d   : > { %2073 = vst [vmem:[#allocation3 + $0x32c] sm:$0xf] %v1950_v61  ;;  %2115 = vst [vmem:[#allocation3 + $0x2f0] sm:$0xf] %v1950_v61  ;;  %v1953_v62 = vsel %vm6238_vm13, %v1951_v44, %v1952_v55  ;;  %v1797_v48 = vld [vmem:[#allocation2 + $0x9c] sm:$0xe]  ;;  %3872 = vmatprep.mubr.bf16.mxu1 %v5713_v60 }
 0x11e   : > { %2032 = vst [vmem:[#allocation3 + $0x38c] sm:$0xf] %v1953_v62  ;;  %2074 = vst [vmem:[#allocation3 + $0x350] sm:$0xf] %v1953_v62  ;;  %v1798_v27 = vld [vmem:[#allocation2 + $0xa0] sm:$0xf] }
 0x11f   : > { %2116 = vst [vmem:[#allocation3 + $0x314] sm:$0xf] %v1953_v62  ;;  %v1799_v52 = vld [vmem:[#allocation2 + $0xa4] sm:$0x1]  ;;  %v4688_v56 = vrot.slane %v1797_v48, 9  ;;  %v1956_v9 = vrot.slane %v1798_v27, 5 }
 0x120   : > { %v5694_v3 = vld [vmem:[#allocation3 + $0x10] ss:$36 sps:$4 sm:$0xff]   ;;  %v1959_v12 = vrot.slane %v1799_v52, 5  ;;  %v5700_v13 = vld [vmem:[#allocation3 + $0x5c] ss:$36 sps:$4 sm:$0xff]   ;;  %v413_v22 = vmax.f32 %v381_v21, 0.0 }
 0x121   : > { %v1800_v25 = vld [vmem:[#allocation2 + $0xa8] sm:$0xe]  ;;  %v1801_v15 = vld [vmem:[#allocation2 + $0xac] sm:$0xf]  ;;  %v5719_v18 = vld [vmem:[#allocation3 + $0x2d8] ss:$36 sps:$4 sm:$0xff]   ;;  %v1957_v4 = vsel %vm6238_vm13, %v4688_v56, %v1956_v9  ;;  %v5038_v56 = vpop.f32.mrf.mxu0 }
 0x122   : > { %v1958_v17 = vrot.slane %v1956_v9, 4  ;;  %v5722_v31 = vld [vmem:[#allocation3 + $0x324] ss:$36 sps:$4 sm:$0xff]   ;;  %2033 = vst [vmem:[#allocation3 + $0x3b0] sm:$0xf] %v1957_v4  ;;  %v4689_v37 = vrot.slane %v1800_v25, 9  ;;  %3954 = vmatmul.mubr.bf16.vlgmr.msra.gmra.mxu0 %v5694_v3  ;;  %v4942_v41 = vpack.c.bf16 %v413_v22, %v413_v22 }
 0x123   : > { %2075 = vst [vmem:[#allocation3 + $0x374] sm:$0xf] %v1957_v4  ;;  %2117 = vst [vmem:[#allocation3 + $0x338] sm:$0xf] %v1957_v4  ;;  %v1802_v20 = vld [vmem:[#allocation2 + $0xb0] sm:$0x1]  ;;  %3961 = vmatprep.mubr.bf16.mxu0 %v5700_v13  ;;  %5495 = vmatpush3.bf16.msra.mxu0 %v5851_v26  ;;  %v5039_v9 = vpop.f32.mrf.mxu0 }
 0x124   : > { %v1963_v39 = vrot.slane %v1801_v15, 5  ;;  %v1960_v29 = vsel %vm6238_vm13, %v1958_v17, %v1959_v12  ;;  %v1966_v32 = vrot.slane %v1802_v20, 5  ;;  %5496 = vmatprep.subr.bf16.mxu0 %v5718_v28  ;;  %v5733_v35 = vld [vmem:[%s7251_s3 + $0x228] sm:$0xff]   ;;  %v5705_v19 = vld [vmem:[#allocation3 + $0x58] ss:$36 sps:$4 sm:$0xff]   ;;  %3873 = vmatmul.mubr.bf16.gmra.mxu1 %v5719_v18  ;;  %v5748_v23 = vld [vmem:[%s7251_s3 + $0x220] sm:$0xff]   ;;  %v6728_v58 = vadd.f32 %v5039_v9, %v5038_v56 }
 0x125   : > { %2034 = vst [vmem:[#allocation3 + $0x3d4] sm:$0xf] %v1960_v29  ;;  %2076 = vst [vmem:[#allocation3 + $0x398] sm:$0xf] %v1960_v29  ;;  %v5709_v42 = vld [vmem:[#allocation3 + $0xa4] ss:$36 sps:$4 sm:$0xff]   ;;  %3880 = vmatprep.mubr.bf16.mxu1 %v5722_v31 }
 0x126   : > { %2118 = vst [vmem:[#allocation3 + $0x35c] sm:$0xf] %v1960_v29  ;;  %v1964_v33 = vsel %vm6238_vm13, %v4689_v37, %v1963_v39  ;;  %v1965_v34 = vrot.slane %v1963_v39, 4  ;;  %v1803_v59 = vld [vmem:[#allocation2 + $0xb4] sm:$0xe]  ;;  %v823_v24 = vshrl.u32 %v4941_v36, 16  ;;  %v6736_v29 = vpop.f32.mrf.mxu0 }
 0x127   : > { %2035 = vst [vmem:[#allocation3 + $0x3f8] sm:$0xf] %v1964_v33  ;;  %2077 = vst [vmem:[#allocation3 + $0x3bc] sm:$0xf] %v1964_v33  ;;  %5497 = vmatpush3.bf16.msra.mxu0 %v5718_v28  ;;  %v1804_v16 = vld [vmem:[#allocation2 + $0xb8] sm:$0xf] }
 0x128   : > { %2119 = vst [vmem:[#allocation3 + $0x380] sm:$0xf] %v1964_v33  ;;  %v1967_v8 = vsel %vm6238_vm13, %v1965_v34, %v1966_v32  ;;  %v1805_v14 = vld [vmem:[#allocation2 + $0xbc] sm:$0x1]  ;;  %v4690_v47 = vrot.slane %v1803_v59, 9  ;;  %5498 = vmatprep.subr.bf16.mxu0 %v5733_v35  ;;  %v826_v45 = vshll.u32 %v4941_v36, 16 }
 0x129   : > { %2036 = vst [vmem:[#allocation3 + $0x41c] sm:$0xf] %v1967_v8  ;;  %2078 = vst [vmem:[#allocation3 + $0x3e0] sm:$0xf] %v1967_v8  ;;  %v1970_v49 = vrot.slane %v1804_v16, 5  ;;  %v1973_v50 = vrot.slane %v1805_v14, 5  ;;  %v6743_v14 = vpop.f32.mrf.mxu0 }
 0x12a   : > { %2120 = vst [vmem:[#allocation3 + $0x3a4] sm:$0xf] %v1967_v8  ;;  %v5726_v38 = vld [vmem:[#allocation3 + $0x320] ss:$36 sps:$4 sm:$0xff]   ;;  %3962 = vmatmul.mubr.bf16.gmra.mxu0 %v5705_v19  ;;  %v5728_v30 = vld [vmem:[#allocation3 + $0x36c] ss:$36 sps:$4 sm:$0xff]  }
 0x12b   : > { %v825_v51 = vrot.slane %v823_v24, 7  ;;  %v998_v46 = vld [vmem:[#allocation2 + $0xc0] sm:$0xf]  ;;  %v1971_v53 = vsel %vm6238_vm13, %v4690_v47, %v1970_v49  ;;  %3969 = vmatprep.mubr.bf16.mxu0 %v5709_v42  ;;  %5499 = vmatpush3.bf16.msra.mxu0 %v5733_v35  ;;  %v831_v54 = vshrl.u32 %v4942_v41, 16  ;;  %v834_v55 = vshll.u32 %v4942_v41, 16  ;;  %v5763_v61 = vld [vmem:[%s7251_s3 + $0x218] sm:$0xff]  }
 0x12c   : > { %v1972_v57 = vrot.slane %v1970_v49, 4  ;;  %2037 = vst [vmem:[#allocation3 + $0x440] sm:$0xf] %v1971_v53  ;;  %2079 = vst [vmem:[#allocation3 + $0x404] sm:$0xf] %v1971_v53  ;;  %5500 = vmatprep.subr.bf16.mxu0 %v5748_v23  ;;  %3881 = vmatmul.mubr.bf16.gmra.mxu1 %v5726_v38  ;;  %v5788_v17 = vld [vmem:[%s7251_s3 + $0x208] sm:$0xff]  }
 0x12d   : > { %2121 = vst [vmem:[#allocation3 + $0x3c8] sm:$0xf] %v1971_v53  ;;  %v828_v60 = vor.u32 %v826_v45, %v825_v51  ;;  %v829_v44 = vrot.slane %v825_v51, 4  ;;  %v833_v62 = vrot.slane %v831_v54, 7  ;;  %v5712_v27 = vld [vmem:[#allocation3 + $0xa0] ss:$36 sps:$4 sm:$0xff]   ;;  %3888 = vmatprep.mubr.bf16.mxu1 %v5728_v30  ;;  %v5044_v30 = vpop.f32.mrf.mxu0 }
 0x12e   : > { %v1974_v48 = vsel %vm6238_vm13, %v1972_v57, %v1973_v50  ;;  %v5715_v1 = vld [vmem:[#allocation3 + $0xec] ss:$36 sps:$4 sm:$0xff]   ;;  %v5737_v13 = vld [vmem:[#allocation3 + $0x3b4] ss:$36 sps:$4 sm:$0xff]   ;;  %v5743_v4 = vld [vmem:[#allocation3 + $0x3fc] ss:$36 sps:$4 sm:$0xff]  }
 0x12f   : > { %v999_v52 = vsel %vm6009_vm10, %v828_v60, %v998_v46  ;;  %2038 = vst [vmem:[#allocation3 + $0x464] sm:$0xf] %v1974_v48  ;;  %2080 = vst [vmem:[#allocation3 + $0x428] sm:$0xf] %v1974_v48  ;;  %5501 = vmatpush3.bf16.msra.mxu0 %v5748_v23  ;;  %v836_v3 = vor.u32 %v834_v55, %v833_v62  ;;  %v5734_v12 = vld [vmem:[#allocation3 + $0x368] ss:$36 sps:$4 sm:$0xff]  }
 0x130   : > { %2122 = vst [vmem:[#allocation3 + $0x3ec] sm:$0xf] %v1974_v48  ;;  %1000 = vst [vmem:[#allocation2 + $0xc0] sm:$0xf] %v999_v52  ;;  %5502 = vmatprep.subr.bf16.mxu0 %v5763_v61  ;;  %v5720_v25 = vld [vmem:[#allocation3 + $0xe8] ss:$36 sps:$4 sm:$0xff]  }
 0x131   : > { %v837_v63 = vsel %vm6003_vm9, %v829_v44, %v836_v3  ;;  %v5724_v28 = vld [vmem:[#allocation3 + $0x134] ss:$36 sps:$4 sm:$0xff]   ;;  %v838_v5 = vrot.slane %v833_v62, 4  ;;  %v5730_v31 = vld [vmem:[#allocation3 + $0x17c] ss:$36 sps:$4 sm:$0xff]  }
 0x132   : > { %3970 = vmatmul.mubr.bf16.gmra.mxu0 %v5712_v27  ;;  %1001 = vst [vmem:[#allocation2 + $0xc4] sm:$0xf] %v837_v63  ;;  %v5741_v6 = vld [vmem:[#allocation3 + $0x3b0] ss:$36 sps:$4 sm:$0xff]   ;;  %v5749_v34 = vld [vmem:[#allocation3 + $0x3f8] ss:$36 sps:$4 sm:$0xff]   ;;  %v5110_v27 = vpop.f32.mrf.mxu1 }
 0x133   : > { %3977 = vmatprep.mubr.bf16.mxu0 %v5715_v1  ;;  %5503 = vmatpush3.bf16.msra.mxu0 %v5763_v61  ;;  %v5727_v0 = vld [vmem:[#allocation3 + $0x130] ss:$36 sps:$4 sm:$0xff]   ;;  %v5735_v23 = vld [vmem:[#allocation3 + $0x178] ss:$36 sps:$4 sm:$0xff]   ;;  %v5739_v49 = vld [vmem:[#allocation3 + $0x1c4] ss:$36 sps:$4 sm:$0xff]   ;;  %v5045_v61 = vpop.f32.mrf.mxu0 }
 0x134   : > { %3889 = vmatmul.mubr.bf16.gmra.mxu1 %v5734_v12  ;;  %5504 = vmatprep.subr.bf16.mxu0 %v5775_v11  ;;  %v1002_v20 = vld [vmem:[#allocation2 + $0xc8] sm:$0x1]  ;;  %v5762_v60 = vld [vmem:[#allocation3 + $0x1c] ss:$36 sps:$4 sm:$0xff]   ;;  %v6749_v44 = vadd.f32 %v5045_v61, %v5044_v30  ;;  %v5111_v3 = vpop.f32.mrf.mxu1  ;;  %v5767_v63 = vld [vmem:[#allocation3 + $0x64] ss:$36 sps:$4 sm:$0xff]  }
 0x135   : > { %3896 = vmatprep.mubr.bf16.mxu1 %v5737_v13  ;;  %v1003_v32 = vsel %vm5996_vm8, %v838_v5, %v1002_v20  ;;  %v5742_v56 = vld [vmem:[#allocation3 + $0x1c0] ss:$36 sps:$4 sm:$0xff]   ;;  %v5745_v1 = vld [vmem:[#allocation3 + $0x20c] ss:$36 sps:$4 sm:$0xff]   ;;  %v6755_v9 = vadd.f32 %v5111_v3, %v5110_v27  ;;  %v5760_v12 = vld [vmem:[#allocation3 + $0x18] ss:$36 sps:$4 sm:$0xff]  }
 0x136   : > { %1004 = vst [vmem:[#allocation2 + $0xc8] sm:$0x1] %v1003_v32  ;;  %v5756_v38 = vld [vmem:[#allocation3 + $0x440] ss:$36 sps:$4 sm:$0xff]   ;;  %v5750_v13 = vld [vmem:[#allocation3 + $0x208] ss:$36 sps:$4 sm:$0xff]  }
 0x137   : > { %v1037_v15 = vld [vmem:[#allocation2 + $0xc0] sm:$0xf]  ;;  %5505 = vmatpush3.bf16.msra.mxu0 %v5775_v11  ;;  %v6757_v11 = vpop.f32.mrf.mxu0  ;;  %v5758_v5 = vld [vmem:[#allocation3 + $0x29c] ss:$36 sps:$4 sm:$0xff]   ;;  %v1809_v32 = vld [vmem:[#allocation2 + $0xcc] sm:$0xe] }
 0x138   : > { %1103 = vst [vmem:[#allocation3 + $0x444] sm:$0xf] %v1037_v15  ;;  %1133 = vst [vmem:[#allocation3 + $0x408] sm:$0xf] %v1037_v15  ;;  %5506 = vmatprep.subr.bf16.mxu0 %v5788_v17  ;;  %v1185_v37 = vld [vmem:[#allocation2 + $0xc0] sm:$0xf] }
 0x139   : > { %v1038_v18 = vld [vmem:[#allocation2 + $0xc4] sm:$0xf]  ;;  %v1643_v7 = vshrl.u32 %v1185_v37, 16  ;;  %v1646_v21 = vshll.u32 %v1185_v37, 16  ;;  %v1806_v33 = vld [vmem:[#allocation2 + $0xc0] sm:$0xe] }
 0x13a   : > { %3978 = vmatmul.mubr.bf16.gmra.mxu0 %v5720_v25  ;;  %1104 = vst [vmem:[#allocation3 + $0x468] sm:$0xf] %v1038_v18  ;;  %1134 = vst [vmem:[#allocation3 + $0x42c] sm:$0xf] %v1038_v18  ;;  %v1186_v39 = vld [vmem:[#allocation2 + $0xc4] sm:$0xf]  ;;  %v6761_v18 = vpop.f32.mrf.mxu1 }
 0x13b   : > { %3985 = vmatprep.mubr.bf16.mxu0 %v5724_v28  ;;  %5507 = vmatpush3.bf16.msra.mxu0 %v5788_v17  ;;  %v1652_v26 = vshll.u32 %v1186_v39, 16  ;;  %v1656_v43 = vshrl.u32 %v1186_v39, 16  ;;  %v1645_v19 = vrot.slane %v1643_v7, 4  ;;  %v1648_v8 = vrot.slane %v1646_v21, 5  ;;  %v1807_v22 = vld [vmem:[#allocation2 + $0xc4] sm:$0xf] }
 0x13c   : > { %3897 = vmatmul.mubr.bf16.gmra.mxu1 %v5741_v6  ;;  %v4691_v36 = vrot.slane %v1806_v33, 9  ;;  %v2044_v16 = vrot.slane %v1807_v22, 5  ;;  %5508 = vmatprep.subr.bf16.mxu0 %v5801_v2  ;;  %v5754_v25 = vld [vmem:[#allocation3 + $0x254] ss:$36 sps:$4 sm:$0xff]   ;;  %v5770_v15 = vld [vmem:[#allocation3 + $0x60] ss:$36 sps:$4 sm:$0xff]   ;;  %v6759_v6 = vpop.f32.mrf.mxu0  ;;  %v6763_v37 = vpop.f32.mrf.mxu1 }
 0x13d   : > { %3904 = vmatprep.mubr.bf16.mxu1 %v5743_v4  ;;  %v1654_v42 = vrot.slane %v1652_v26, 5  ;;  %v1658_v59 = vrot.slane %v1656_v43, 4  ;;  %v1649_v47 = vor.u32 %v1648_v8, %v1645_v19  ;;  %v1187_v51 = vld [vmem:[#allocation2 + $0xc8] sm:$0x1]  ;;  %v1810_v7 = vld [vmem:[#allocation2 + $0xd0] sm:$0xf] }
 0x13e   : > { %v2045_v24 = vsel %vm6238_vm13, %v4691_v36, %v2044_v16  ;;  %v2046_v50 = vrot.slane %v2044_v16, 4  ;;  %v1808_v53 = vld [vmem:[#allocation2 + $0xc8] sm:$0x1]  ;;  %v1662_v55 = vshll.u32 %v1187_v51, 16  ;;  %v5050_v17 = vpop.f32.mrf.mxu0  ;;  %v1811_v21 = vld [vmem:[#allocation2 + $0xd4] sm:$0x1] }
 0x13f   : > { %v1659_v41 = vor.u32 %v1658_v59, %v1654_v42  ;;  %v1650_v45 = vrot.slane %v1649_v47, 4  ;;  %2081 = vst [vmem:[#allocation3 + $0x44c] sm:$0xf] %v2045_v24  ;;  %2123 = vst [vmem:[#allocation3 + $0x410] sm:$0xf] %v2045_v24  ;;  %5509 = vmatpush3.bf16.msra.mxu0 %v5801_v2  ;;  %v2047_v57 = vrot.slane %v1808_v53, 5  ;;  %v5116_v47 = vpop.f32.mrf.mxu1 }
 0x140   : > { %v1664_v62 = vrot.slane %v1662_v55, 5  ;;  %v5773_v28 = vld [vmem:[#allocation3 + $0xac] ss:$36 sps:$4 sm:$0xff]   ;;  %v5051_v20 = vpop.f32.mrf.mxu0  ;;  %v4692_v33 = vrot.slane %v1809_v32, 9  ;;  %v1039_v43 = vld [vmem:[#allocation2 + $0xcc] sm:$0xf] }
 0x141   : > { %v5752_v35 = vld [vmem:[#allocation3 + $0x444] ss:$36 sps:$4 sm:$0xff]   ;;  %v1655_v46 = vsel %vm5968_vm5, %v1650_v45, %v1654_v42  ;;  %v1660_v54 = vrot.slane %v1659_v41, 4  ;;  %v2048_v48 = vsel %vm6238_vm13, %v2046_v50, %v2047_v57  ;;  %v5757_v4 = vld [vmem:[#allocation3 + $0x250] ss:$36 sps:$4 sm:$0xff]   ;;  %v6765_v39 = vadd.f32 %v5051_v20, %v5050_v17 }
 0x142   : > { %3986 = vmatmul.mubr.bf16.gmra.mxu0 %v5727_v0  ;;  %1698 = vst [vmem:[#allocation3 + $0x448] sm:$0xf] %v1655_v46  ;;  %1754 = vst [vmem:[#allocation3 + $0x40c] sm:$0xf] %v1655_v46  ;;  %v5777_v0 = vld [vmem:[#allocation3 + $0xa8] ss:$36 sps:$4 sm:$0xff]   ;;  %v6767_v26 = vpop.f32.mrf.mxu0  ;;  %v5117_v46 = vpop.f32.mrf.mxu1 }
 0x143   : > { %3993 = vmatprep.mubr.bf16.mxu0 %v5730_v31  ;;  %2082 = vst [vmem:[#allocation3 + $0x470] sm:$0xf] %v2048_v48  ;;  %2124 = vst [vmem:[#allocation3 + $0x434] sm:$0xf] %v2048_v48  ;;  %v1665_v52 = vsel %vm5968_vm5, %v1660_v54, %v1664_v62  ;;  %v5780_v31 = vld [vmem:[#allocation3 + $0xf4] ss:$36 sps:$4 sm:$0xff]   ;;  %v6775_v55 = vadd.f32 %v5117_v46, %v5116_v47 }
 0x144   : > { %3905 = vmatmul.mubr.bf16.gmra.mxu1 %v5749_v34  ;;  %1699 = vst [vmem:[#allocation3 + $0x46c] sm:$0xf] %v1665_v52  ;;  %1755 = vst [vmem:[#allocation3 + $0x430] sm:$0xf] %v1665_v52  ;;  %v2088_v34 = vrot.slane %v1810_v7, 5  ;;  %v5119_v61 = vpop.f32.mrf.mxu1 }
 0x145   : > { %3912 = vmatprep.mubr.bf16.mxu1 %v5752_v35  ;;  %v2091_v35 = vrot.slane %v1811_v21, 5  ;;  %v1040_v19 = vld [vmem:[#allocation2 + $0xd0] sm:$0xf]  ;;  %1135 = vst [vmem:[#allocation3 + $0x450] sm:$0xf] %v1039_v43 }
 0x146   : > { %v1188_v8 = vld [vmem:[#allocation2 + $0xcc] sm:$0xf]  ;;  %v1189_v42 = vld [vmem:[#allocation2 + $0xd0] sm:$0xf]  ;;  %v2089_v22 = vsel %vm6238_vm13, %v4692_v33, %v2088_v34  ;;  %v2090_v36 = vrot.slane %v2088_v34, 4  ;;  %v5120_v10 = vpop.f32.mrf.mxu1 }
 0x147   : > { %1136 = vst [vmem:[#allocation3 + $0x474] sm:$0xf] %v1040_v19  ;;  %v1190_v59 = vld [vmem:[#allocation2 + $0xd4] sm:$0x1]  ;;  %v1701_v16 = vshrl.u32 %v1188_v8, 16  ;;  %v1704_v2 = vshll.u32 %v1188_v8, 16 }
 0x148   : > { %2125 = vst [vmem:[#allocation3 + $0x458] sm:$0xf] %v2089_v22  ;;  %v1710_v41 = vshll.u32 %v1189_v42, 16  ;;  %v1714_v24 = vshrl.u32 %v1189_v42, 16  ;;  %v1720_v45 = vshll.u32 %v1190_v59, 16 }
 0x149   : > { %v1703_v50 = vrot.slane %v1701_v16, 4  ;;  %v1706_v30 = vrot.slane %v1704_v2, 5  ;;  %v5765_v51 = vld [vmem:[#allocation3 + $0x2e4] ss:$36 sps:$4 sm:$0xff]   ;;  %v5786_v52 = vld [vmem:[#allocation3 + $0x13c] ss:$36 sps:$4 sm:$0xff]  }
 0x14a   : > { %3994 = vmatmul.mubr.bf16.gmra.mxu0 %v5735_v23  ;;  %v6771_v23 = vpop.f32.mrf.mxu0  ;;  %v1712_v53 = vrot.slane %v1710_v41, 5  ;;  %v1716_v54 = vrot.slane %v1714_v24, 4  ;;  %v1722_v27 = vrot.slane %v1720_v45, 5  ;;  %v5793_v17 = vld [vmem:[#allocation3 + $0x184] ss:$36 sps:$4 sm:$0xff]  }
 0x14b   : > { %4001 = vmatprep.mubr.bf16.mxu0 %v5739_v49  ;;  %v5764_v49 = vld [vmem:[#allocation3 + $0x298] ss:$36 sps:$4 sm:$0xff]   ;;  %v1707_v57 = vor.u32 %v1706_v30, %v1703_v50  ;;  %v5799_v20 = vld [vmem:[#allocation3 + $0x1cc] ss:$36 sps:$4 sm:$0xff]   ;;  %v5791_v16 = vld [vmem:[#allocation3 + $0x404] ss:$36 sps:$4 sm:$0xff]  }
 0x14c   : > { %3913 = vmatmul.mubr.bf16.gmra.mxu1 %v5756_v38  ;;  %v2092_v38 = vsel %vm6238_vm13, %v2090_v36, %v2091_v35  ;;  %v5056_v62 = vpop.f32.mrf.mxu0  ;;  %v1717_v48 = vor.u32 %v1716_v54, %v1712_v53  ;;  %v5782_v21 = vld [vmem:[#allocation3 + $0x370] ss:$36 sps:$4 sm:$0xff]   ;;  %v5784_v35 = vld [vmem:[#allocation3 + $0x3bc] ss:$36 sps:$4 sm:$0xff]   ;;  %v5803_v19 = vld [vmem:[#allocation3 + $0x1c8] ss:$36 sps:$4 sm:$0xff]  }
 0x14d   : > { %4114 = vmatprep.mubr.bf16.mxu1 %v5762_v60  ;;  %2126 = vst [vmem:[#allocation3 + $0x47c] sm:$0xf] %v2092_v38  ;;  %v5783_v60 = vld [vmem:[#allocation3 + $0xf0] ss:$36 sps:$4 sm:$0xff]   ;;  %v5789_v36 = vld [vmem:[#allocation3 + $0x3b8] ss:$36 sps:$4 sm:$0xff]  }
 0x14e   : > { %v1718_v3 = vrot.slane %v1717_v48, 4  ;;  %v5804_v22 = vld [vmem:[#allocation3 + $0x214] ss:$36 sps:$4 sm:$0xff]   ;;  %v5811_v45 = vld [vmem:[#allocation3 + $0x25c] ss:$36 sps:$4 sm:$0xff]  }
 0x14f   : > { %v5122_v32 = vpop.f32.mrf.mxu1  ;;  %v5807_v47 = vld [vmem:[#allocation3 + $0x210] ss:$36 sps:$4 sm:$0xff]   ;;  %v5795_v30 = vld [vmem:[#allocation3 + $0x400] ss:$36 sps:$4 sm:$0xff]  }
 0x150   : > { %v5797_v46 = vld [vmem:[#allocation3 + $0x44c] ss:$36 sps:$4 sm:$0xff]  }
 0x151   : > { %v5123_v40 = vpop.f32.mrf.mxu1 }
 0x152   : > { %4002 = vmatmul.mubr.bf16.gmra.mxu0 %v5742_v56  ;;  %v1708_v56 = vrot.slane %v1707_v57, 4  ;;  %v6785_v7 = vadd.f32 %v5123_v40, %v5122_v32  ;;  %v5809_v57 = vld [vmem:[#allocation3 + $0x258] ss:$36 sps:$4 sm:$0xff]  }
 0x153   : > { %4009 = vmatprep.mubr.bf16.mxu0 %v5745_v1  ;;  %v5057_v1 = vpop.f32.mrf.mxu0  ;;  %v5125_v34 = vpop.f32.mrf.mxu1 }
 0x154   : > { %4115 = vmatmul.mubr.bf16.vlgmr.msra.gmra.mxu1 %v5760_v12  ;;  %v6777_v12 = vadd.f32 %v5120_v10, %v5119_v61  ;;  %v5816_v61 = vld [vmem:[#allocation3 + $0x2a4] ss:$36 sps:$4 sm:$0xff]  }
 0x155   : > { %4122 = vmatprep.mubr.bf16.mxu1 %v5767_v63  ;;  %v6779_v63 = vadd.f32 %v5057_v1, %v5056_v62  ;;  %v6787_v33 = vpop.f32.mrf.mxu0  ;;  %v5126_v43 = vpop.f32.mrf.mxu1 }
 0x156   : > { %v6789_v8 = vadd.f32 %v5126_v43, %v5125_v34 }
 0x157   : > { %v6791_v42 = vpop.f32.mrf.mxu0 }
 0x15a   : > { %4010 = vmatmul.mubr.bf16.gmra.mxu0 %v5750_v13  ;;  %v1713_v13 = vsel %vm5968_vm5, %v1708_v56, %v1712_v53  ;;  %v5806_v56 = vld [vmem:[#allocation3 + $0x20] ss:$36 sps:$4 sm:$0xff]  }
 0x15b   : > { %4017 = vmatprep.mubr.bf16.mxu0 %v5754_v25  ;;  %v1723_v25 = vsel %vm5968_vm5, %v1718_v3, %v1722_v27  ;;  %1756 = vst [vmem:[#allocation3 + $0x454] sm:$0xf] %v1713_v13  ;;  %v5802_v27 = vld [vmem:[#allocation3 + $0x448] ss:$36 sps:$4 sm:$0xff]  }
 0x15c   : > { %4123 = vmatmul.mubr.bf16.gmra.mxu1 %v5770_v15  ;;  %v5769_v15 = vld [vmem:[#allocation3 + $0x2e0] ss:$36 sps:$4 sm:$0xff]   ;;  %1757 = vst [vmem:[#allocation3 + $0x478] sm:$0xf] %v1723_v25 }
 0x15d   : > { %4130 = vmatprep.mubr.bf16.mxu1 %v5773_v28  ;;  %v5771_v28 = vld [vmem:[#allocation3 + $0x32c] ss:$36 sps:$4 sm:$0xff]  }
 0x161   : > { %v5062_v59 = vpop.f32.mrf.mxu0 }
 0x162   : > { %4018 = vmatmul.mubr.bf16.gmra.mxu0 %v5757_v4  ;;  %v5790_v4 = vld [vmem:[#allocation3 + $0x138] ss:$36 sps:$4 sm:$0xff]  }
 0x163   : > { %4025 = vmatprep.mubr.bf16.mxu0 %v5758_v5  ;;  %v5776_v5 = vld [vmem:[#allocation3 + $0x328] ss:$36 sps:$4 sm:$0xff]   ;;  %v5063_v2 = vpop.f32.mrf.mxu0 }
 0x164   : > { %4131 = vmatmul.mubr.bf16.gmra.mxu1 %v5777_v0  ;;  %v5778_v0 = vld [vmem:[#allocation3 + $0x374] ss:$36 sps:$4 sm:$0xff]   ;;  %v6793_v41 = vadd.f32 %v5063_v2, %v5062_v59 }
 0x165   : > { %4138 = vmatprep.mubr.bf16.mxu1 %v5780_v31  ;;  %v5796_v31 = vld [vmem:[#allocation3 + $0x180] ss:$36 sps:$4 sm:$0xff]   ;;  %v5065_v24 = vpop.f32.mrf.mxu0  ;;  %v5826_v59 = vld [vmem:[#allocation3 + $0x334] ss:$36 sps:$4 sm:$0xff]  }
 0x167   : > { %v5066_v38 = vpop.f32.mrf.mxu0 }
 0x168   : > { %v6795_v50 = vadd.f32 %v5066_v38, %v5065_v24  ;;  %v5813_v38 = vld [vmem:[#allocation3 + $0xf8] ss:$36 sps:$4 sm:$0xff]  }
 0x16a   : > { %4026 = vmatmul.mubr.bf16.gmra.mxu0 %v5764_v49  ;;  %v5128_v49 = vpop.f32.mrf.mxu1 }
 0x16b   : > { %4033 = vmatprep.mubr.bf16.mxu0 %v5765_v51 }
 0x16c   : > { %4139 = vmatmul.mubr.bf16.gmra.mxu1 %v5783_v60  ;;  %v5129_v51 = vpop.f32.mrf.mxu1 }
 0x16d   : > { %4146 = vmatprep.mubr.bf16.mxu1 %v5786_v52  ;;  %v6797_v53 = vadd.f32 %v5129_v51, %v5128_v49  ;;  %v5817_v51 = vld [vmem:[#allocation3 + $0x140] ss:$36 sps:$4 sm:$0xff]  }
 0x16e   : > { %v5131_v54 = vpop.f32.mrf.mxu1 }
 0x170   : > { %v5132_v60 = vpop.f32.mrf.mxu1 }
 0x171   : > { %v6799_v62 = vadd.f32 %v5132_v60, %v5131_v54 }
 0x172   : > { %4034 = vmatmul.mubr.bf16.gmra.mxu0 %v5769_v15  ;;  %v5150_v48 = vpop.f32.mrf.mxu1  ;;  %v5814_v15 = vld [vmem:[#allocation3 + $0x2a0] ss:$36 sps:$4 sm:$0xff]  }
 0x173   : > { %4041 = vmatprep.mubr.bf16.mxu0 %v5771_v28 }
 0x174   : > { %4147 = vmatmul.mubr.bf16.gmra.mxu1 %v5790_v4  ;;  %v5151_v52 = vpop.f32.mrf.mxu1 }
 0x175   : > { %4154 = vmatprep.mubr.bf16.mxu1 %v5793_v17  ;;  %v5152_v1 = vadd.f32 %v5151_v52, %v5150_v48  ;;  %v5821_v17 = vld [vmem:[#allocation3 + $0x2ec] ss:$36 sps:$4 sm:$0xff]   ;;  %v5831_v48 = vld [vmem:[#allocation3 + $0x37c] ss:$36 sps:$4 sm:$0xff]  }
 0x176   : > { %v5153_v3 = vpop.f32.mrf.mxu1 }
 0x177   : > { %v6802_v25 = vadd.f32 %v5152_v1, %v6728_v58 }
 0x178   : > { %v5154_v4 = vpop.f32.mrf.mxu1 }
 0x17a   : > { %4042 = vmatmul.mubr.bf16.gmra.mxu0 %v5776_v5  ;;  %v5068_v10 = vpop.f32.mrf.mxu0  ;;  %v5043_v5 = vadd.f32 %v6743_v14, %v6736_v29  ;;  %v5819_v29 = vld [vmem:[#allocation3 + $0x2e8] ss:$36 sps:$4 sm:$0xff]  }
 0x17b   : > { %4049 = vmatprep.mubr.bf16.mxu0 %v5778_v0 }
 0x17c   : > { %4155 = vmatmul.mubr.bf16.gmra.mxu1 %v5796_v31  ;;  %v5069_v13 = vpop.f32.mrf.mxu0  ;;  %v5155_v31 = vadd.f32 %v5154_v4, %v5153_v3  ;;  %v5822_v4 = vld [vmem:[#allocation3 + $0x1d0] ss:$36 sps:$4 sm:$0xff]  }
 0x17d   : > { %4162 = vmatprep.mubr.bf16.mxu1 %v5799_v20  ;;  %v6804_v28 = vadd.f32 %v5069_v13, %v5068_v10  ;;  %v5156_v20 = vpop.f32.mrf.mxu1  ;;  %v5818_v13 = vld [vmem:[#allocation3 + $0x188] ss:$36 sps:$4 sm:$0xff]  }
 0x17e   : > { %v5071_v0 = vpop.f32.mrf.mxu0  ;;  %v6808_v40 = vadd.f32 %v5155_v31, %v5043_v5 }
 0x17f   : > { %v5157_v34 = vpop.f32.mrf.mxu1 }
 0x180   : > { %v5072_v32 = vpop.f32.mrf.mxu0  ;;  %v5158_v43 = vadd.f32 %v5157_v34, %v5156_v20  ;;  %v5061_v34 = vadd.f32 %v6791_v42, %v6787_v33 }
 0x181   : > { %v6810_v58 = vadd.f32 %v5072_v32, %v5071_v0 }
 0x182   : > { %4050 = vmatmul.mubr.bf16.gmra.mxu0 %v5782_v21  ;;  %v5808_v21 = vld [vmem:[#allocation3 + $0x68] ss:$36 sps:$4 sm:$0xff]  }
 0x183   : > { %4057 = vmatprep.mubr.bf16.mxu0 %v5784_v35  ;;  %v5812_v35 = vld [vmem:[#allocation3 + $0xb0] ss:$36 sps:$4 sm:$0xff]  }
 0x184   : > { %4163 = vmatmul.mubr.bf16.gmra.mxu1 %v5803_v19  ;;  %v5159_v19 = vpop.f32.mrf.mxu1 }
 0x185   : > { %4170 = vmatprep.mubr.bf16.mxu1 %v5804_v22  ;;  %v6813_v22 = vadd.f32 %v5158_v43, %v6749_v44 }
 0x18a   : > { %4058 = vmatmul.mubr.bf16.gmra.mxu0 %v5789_v36  ;;  %v5074_v14 = vpop.f32.mrf.mxu0  ;;  %v5160_v36 = vpop.f32.mrf.mxu1 }
 0x18b   : > { %4065 = vmatprep.mubr.bf16.mxu0 %v5791_v16  ;;  %v5049_v16 = vadd.f32 %v6759_v6, %v6757_v11  ;;  %v5161_v2 = vadd.f32 %v5160_v36, %v5159_v19  ;;  %v5824_v6 = vld [vmem:[#allocation3 + $0x330] ss:$36 sps:$4 sm:$0xff]  }
 0x18c   : > { %4171 = vmatmul.mubr.bf16.gmra.mxu1 %v5807_v47  ;;  %v5075_v47 = vpop.f32.mrf.mxu0  ;;  %v5162_v24 = vpop.f32.mrf.mxu1 }
 0x18d   : > { %4178 = vmatprep.mubr.bf16.mxu1 %v5811_v45  ;;  %v6817_v45 = vadd.f32 %v5075_v47, %v5074_v14  ;;  %v6819_v49 = vadd.f32 %v5161_v2, %v5049_v16 }
 0x18e   : > { %v5077_v44 = vpop.f32.mrf.mxu0 }
 0x190   : > { %v5078_v54 = vpop.f32.mrf.mxu0 }
 0x191   : > { %v6821_v60 = vadd.f32 %v5078_v54, %v5077_v44 }
 0x192   : > { %4066 = vmatmul.mubr.bf16.gmra.mxu0 %v5795_v30  ;;  %v5163_v30 = vpop.f32.mrf.mxu1 }
 0x193   : > { %4073 = vmatprep.mubr.bf16.mxu0 %v5797_v46  ;;  %v5164_v46 = vadd.f32 %v5163_v30, %v5162_v24  ;;  %v5834_v24 = vld [vmem:[#allocation3 + $0x3c0] ss:$36 sps:$4 sm:$0xff]  }
 0x194   : > { %4179 = vmatmul.mubr.bf16.gmra.mxu1 %v5809_v57  ;;  %v5165_v57 = vpop.f32.mrf.mxu1 }
 0x195   : > { %4186 = vmatprep.mubr.bf16.mxu1 %v5816_v61  ;;  %v6824_v11 = vadd.f32 %v5164_v46, %v6765_v39 }
 0x196   : > { %v5166_v61 = vpop.f32.mrf.mxu1 }
 0x198   : > { %v5168_v10 = vpop.f32.mrf.mxu1 }
 0x19a   : > { %4074 = vmatmul.mubr.bf16.gmra.mxu0 %v5802_v27  ;;  %v5055_v27 = vadd.f32 %v6771_v23, %v6767_v26  ;;  %v5080_v52 = vpop.f32.mrf.mxu0  ;;  %v5169_v39 = vpop.f32.mrf.mxu1  ;;  %v5829_v23 = vld [vmem:[#allocation3 + $0x378] ss:$36 sps:$4 sm:$0xff]  }
 0x19b   : > { %5510 = vmatprep.mubr.bf16.mxu0 %v5806_v56  ;;  %v5167_v56 = vadd.f32 %v5166_v61, %v5165_v57  ;;  %v5170_v5 = vadd.f32 %v5169_v39, %v5168_v10  ;;  %v5828_v57 = vld [vmem:[#allocation3 + $0x2a8] ss:$36 sps:$4 sm:$0xff]   ;;  %v5832_v61 = vld [vmem:[#allocation3 + $0x2f0] ss:$36 sps:$4 sm:$0xff]  }
 0x19c   : > { %4187 = vmatmul.mubr.bf16.gmra.mxu1 %v5814_v15  ;;  %v5081_v1 = vpop.f32.mrf.mxu0  ;;  %v5171_v0 = vpop.f32.mrf.mxu1 }
 0x19d   : > { %4194 = vmatprep.mubr.bf16.mxu1 %v5821_v17  ;;  %v6828_v3 = vadd.f32 %v5167_v56, %v5055_v27  ;;  %v6830_v15 = vadd.f32 %v5081_v1, %v5080_v52  ;;  %v6833_v26 = vadd.f32 %v5170_v5, %v6779_v63  ;;  %v5827_v63 = vld [vmem:[#allocation3 + $0x260] ss:$36 sps:$4 sm:$0xff]   ;;  %v5839_v56 = vld [vmem:[#allocation3 + $0x408] ss:$36 sps:$4 sm:$0xff]   ;;  %v5846_v1 = vld [vmem:[#allocation3 + $0x454] ss:$36 sps:$4 sm:$0xff]  }
 0x19e   : > { %v5083_v17 = vpop.f32.mrf.mxu0  ;;  %v5172_v32 = vpop.f32.mrf.mxu1  ;;  %v5833_v5 = vld [vmem:[#allocation3 + $0x338] ss:$36 sps:$4 sm:$0xff]  }
 0x1a0   : > { %v5084_v31 = vpop.f32.mrf.mxu0 }
 0x1a1   : > { %v6835_v20 = vadd.f32 %v5084_v31, %v5083_v17 }
 0x1a2   : > { %5511 = vmatmul.mubr.bf16.vlgmr.msra.gmra.mxu0 %v5808_v21  ;;  %v5836_v21 = vld [vmem:[#allocation3 + $0x3c4] ss:$36 sps:$4 sm:$0xff]  }
 0x1a3   : > { %5514 = vmatprep.mubr.bf16.mxu0 %v5812_v35  ;;  %v5173_v35 = vadd.f32 %v5172_v32, %v5171_v0 }
 0x1a4   : > { %4195 = vmatmul.mubr.bf16.gmra.mxu1 %v5819_v29  ;;  %v5823_v29 = vld [vmem:[#allocation3 + $0x218] ss:$36 sps:$4 sm:$0xff]  }
 0x1a5   : > { %4202 = vmatprep.mubr.bf16.mxu1 %v5826_v59  ;;  %v6839_v19 = vadd.f32 %v5173_v35, %v5061_v34  ;;  %v5844_v35 = vld [vmem:[#allocation3 + $0x450] ss:$36 sps:$4 sm:$0xff]  }
 0x1a8   : > { %v5174_v43 = vpop.f32.mrf.mxu1 }
 0x1aa   : > { %5515 = vmatmul.mubr.bf16.gmra.mxu0 %v5813_v38  ;;  %v5175_v14 = vpop.f32.mrf.mxu1  ;;  %v5841_v38 = vld [vmem:[#allocation3 + $0x40c] ss:$36 sps:$4 sm:$0xff]  }
 0x1ab   : > { %5518 = vmatprep.mubr.bf16.mxu0 %v5817_v51  ;;  %v5176_v59 = vadd.f32 %v5175_v14, %v5174_v43 }
 0x1ac   : > { %4203 = vmatmul.mubr.bf16.gmra.mxu1 %v5824_v6  ;;  %v5086_v36 = vpop.f32.mrf.mxu0  ;;  %v5177_v16 = vpop.f32.mrf.mxu1 }
 0x1ad   : > { %4210 = vmatprep.mubr.bf16.mxu1 %v5831_v48  ;;  %v6842_v47 = vadd.f32 %v5176_v59, %v6793_v41 }
 0x1ae   : > { %v5087_v2 = vpop.f32.mrf.mxu0  ;;  %v5178_v42 = vpop.f32.mrf.mxu1 }
 0x1af   : > { %v6844_v33 = vadd.f32 %v5087_v2, %v5086_v36  ;;  %v5179_v30 = vadd.f32 %v5178_v42, %v5177_v16  ;;  %v5838_v36 = vld [vmem:[#allocation3 + $0x3c8] ss:$36 sps:$4 sm:$0xff]   ;;  %v5842_v16 = vld [vmem:[#allocation3 + $0x410] ss:$36 sps:$4 sm:$0xff]  }
 0x1b0   : > { %v5089_v44 = vpop.f32.mrf.mxu0  ;;  %v5180_v51 = vpop.f32.mrf.mxu1 }
 0x1b1   : > { %v6847_v54 = vadd.f32 %v5179_v30, %v6795_v50 }
 0x1b2   : > { %5519 = vmatmul.mubr.bf16.gmra.mxu0 %v5818_v13  ;;  %v5090_v46 = vpop.f32.mrf.mxu0  ;;  %v5181_v41 = vpop.f32.mrf.mxu1 }
 0x1b3   : > { %5522 = vmatprep.mubr.bf16.mxu0 %v5822_v4  ;;  %v6849_v6 = vadd.f32 %v5090_v46, %v5089_v44  ;;  %v5182_v48 = vadd.f32 %v5181_v41, %v5180_v51 }
 0x1b4   : > { %4211 = vmatmul.mubr.bf16.gmra.mxu1 %v5829_v23  ;;  %v5183_v27 = vpop.f32.mrf.mxu1  ;;  %v5837_v23 = vld [vmem:[#allocation3 + $0x380] ss:$36 sps:$4 sm:$0xff]  }
 0x1b5   : > { %4218 = vmatprep.mubr.bf16.mxu1 %v5836_v21  ;;  %v6852_v52 = vadd.f32 %v5182_v48, %v6804_v28 }
 0x1b6   : > { %v5184_v10 = vpop.f32.mrf.mxu1 }
 0x1b7   : > { %v5185_v50 = vadd.f32 %v5184_v10, %v5183_v27 }
 0x1b9   : > { %v6855_v4 = vadd.f32 %v5185_v50, %v6810_v58 }
 0x1ba   : > { %5523 = vmatmul.mubr.bf16.gmra.mxu0 %v5823_v29 }
 0x1bb   : > { %5526 = vmatprep.mubr.bf16.mxu0 %v5827_v63 }
 0x1bc   : > { %4219 = vmatmul.mubr.bf16.gmra.mxu1 %v5834_v24 }
 0x1bd   : > { %4226 = vmatprep.mubr.bf16.mxu1 %v5841_v38 }
 0x1be   : > { %v5092_v13 = vpop.f32.mrf.mxu0 }
 0x1c0   : > { %v5093_v39 = vpop.f32.mrf.mxu0 }
 0x1c1   : > { %v5094_v0 = vadd.f32 %v5093_v39, %v5092_v13 }
 0x1c2   : > { %5527 = vmatmul.mubr.bf16.gmra.mxu0 %v5828_v57  ;;  %v5186_v17 = vpop.f32.mrf.mxu1  ;;  %v5095_v31 = vpop.f32.mrf.mxu0 }
 0x1c3   : > { %5530 = vmatprep.mubr.bf16.mxu0 %v5832_v61  ;;  %v5843_v61 = vld [vmem:[#allocation3 + $0x458] ss:$36 sps:$4 sm:$0xff]  }
 0x1c4   : > { %4227 = vmatmul.mubr.bf16.gmra.mxu1 %v5839_v56  ;;  %v5187_v28 = vpop.f32.mrf.mxu1  ;;  %v5096_v21 = vpop.f32.mrf.mxu0 }
 0x1c5   : > { %4234 = vmatprep.mubr.bf16.mxu1 %v5846_v1  ;;  %v5188_v32 = vadd.f32 %v5187_v28, %v5186_v17  ;;  %v5097_v43 = vadd.f32 %v5096_v21, %v5095_v31 }
 0x1c6   : > { %v5189_v34 = vpop.f32.mrf.mxu1 }
 0x1c7   : > { %v6858_v29 = vadd.f32 %v5188_v32, %v6817_v45 }
 0x1c8   : > { %v5190_v58 = vpop.f32.mrf.mxu1 }
 0x1c9   : > { %v5191_v14 = vadd.f32 %v5190_v58, %v5189_v34 }
 0x1ca   : > { %5531 = vmatmul.mubr.bf16.gmra.mxu0 %v5833_v5  ;;  %v5192_v63 = vpop.f32.mrf.mxu1 }
 0x1cb   : > { %5534 = vmatprep.mubr.bf16.mxu0 %v5837_v23  ;;  %v6861_v59 = vadd.f32 %v5191_v14, %v6821_v60 }
 0x1cc   : > { %4235 = vmatmul.mubr.bf16.gmra.mxu1 %v5844_v35  ;;  %v5193_v2 = vpop.f32.mrf.mxu1 }
 0x1cd   : > { %v5194_v24 = vadd.f32 %v5193_v2, %v5192_v63 }
 0x1ce   : > { %v5195_v42 = vpop.f32.mrf.mxu1 }
 0x1cf   : > { %v6864_v44 = vadd.f32 %v5194_v24, %v6830_v15 }
 0x1d0   : > { %v5196_v45 = vpop.f32.mrf.mxu1 }
 0x1d1   : > { %v5098_v38 = vpop.f32.mrf.mxu0  ;;  %v5197_v51 = vadd.f32 %v5196_v45, %v5195_v42 }
 0x1d2   : > { %5535 = vmatmul.mubr.bf16.gmra.mxu0 %v5838_v36 }
 0x1d3   : > { %5538 = vmatprep.mubr.bf16.mxu0 %v5842_v16  ;;  %v5099_v30 = vpop.f32.mrf.mxu0  ;;  %v5198_v57 = vpop.f32.mrf.mxu1  ;;  %v6867_v60 = vadd.f32 %v5197_v51, %v6835_v20 }
 0x1d4   : > { %v5100_v46 = vadd.f32 %v5099_v30, %v5098_v38 }
 0x1d5   : > { %v5101_v41 = vpop.f32.mrf.mxu0  ;;  %v5199_v48 = vpop.f32.mrf.mxu1 }
 0x1d6   : > { %v5200_v56 = vadd.f32 %v5199_v48, %v5198_v57 }
 0x1d7   : > { %v5102_v27 = vpop.f32.mrf.mxu0  ;;  %v5201_v1 = vpop.f32.mrf.mxu1 }
 0x1d8   : > { %v5103_v10 = vadd.f32 %v5102_v27, %v5101_v41  ;;  %v6870_v15 = vadd.f32 %v5200_v56, %v6844_v33 }
 0x1d9   : > { %v5202_v50 = vpop.f32.mrf.mxu1 }
 0x1da   : > { %v5104_v13 = vpop.f32.mrf.mxu0  ;;  %5539 = vmatmul.mubr.bf16.gmra.mxu0 %v5843_v61  ;;  %v5203_v17 = vadd.f32 %v5202_v50, %v5201_v1 }
 0x1db   : > { %v5204_v31 = vpop.f32.mrf.mxu1 }
 0x1dc   : > { %v5105_v39 = vpop.f32.mrf.mxu0  ;;  %v6873_v28 = vadd.f32 %v5203_v17, %v6849_v6 }
 0x1dd   : > { %v5106_v5 = vadd.f32 %v5105_v39, %v5104_v13  ;;  %v5205_v20 = vpop.f32.mrf.mxu1 }
 0x1de   : > { %v5107_v23 = vpop.f32.mrf.mxu0  ;;  %v5206_v21 = vadd.f32 %v5205_v20, %v5204_v31 }
 0x1df   : > { %v5207_v35 = vpop.f32.mrf.mxu1 }
 0x1e0   : > { %v5108_v32 = vpop.f32.mrf.mxu0  ;;  %v6875_v14 = vadd.f32 %v5206_v21, %v5094_v0 }
 0x1e1   : > { %v5109_v34 = vadd.f32 %v5108_v32, %v5107_v23  ;;  %v5208_v63 = vpop.f32.mrf.mxu1 }
 0x1e2   : > { %v5262_v58 = vpop.f32.mrf.mxu0  ;;  %v5209_v36 = vadd.f32 %v5208_v63, %v5207_v35 }
 0x1e4   : > { %v5263_v33 = vpop.f32.mrf.mxu0  ;;  %v5210_v2 = vpop.f32.mrf.mxu1  ;;  %v6877_v42 = vadd.f32 %v5209_v36, %v5097_v43 }
 0x1e5   : > { %v5264_v16 = vadd.f32 %v5263_v33, %v5262_v58 }
 0x1e6   : > { %v5265_v24 = vpop.f32.mrf.mxu0  ;;  %v5211_v6 = vpop.f32.mrf.mxu1 }
 0x1e7   : > { %v6880_v38 = vadd.f32 %v5264_v16, %v6802_v25  ;;  %v5212_v30 = vadd.f32 %v5211_v6, %v5210_v2 }
 0x1e8   : > { %v5266_v45 = vpop.f32.mrf.mxu0  ;;  %v5213_v57 = vpop.f32.mrf.mxu1 }
 0x1e9   : > { %v5267_v51 = vadd.f32 %v5266_v45, %v5265_v24  ;;  %v6882_v61 = vadd.f32 %v5212_v30, %v5100_v46 }
 0x1ea   : > { %v5268_v41 = vpop.f32.mrf.mxu0  ;;  %v5214_v48 = vpop.f32.mrf.mxu1 }
 0x1eb   : > { %v6885_v0 = vadd.f32 %v5267_v51, %v6808_v40  ;;  %v5215_v56 = vadd.f32 %v5214_v48, %v5213_v57 }
 0x1ec   : > { %v5269_v27 = vpop.f32.mrf.mxu0  ;;  %v5216_v43 = vpop.f32.mrf.mxu1 }
 0x1ed   : > { %v5270_v1 = vadd.f32 %v5269_v27, %v5268_v41  ;;  %v6887_v50 = vadd.f32 %v5215_v56, %v5103_v10 }
 0x1ee   : > { %v5271_v13 = vpop.f32.mrf.mxu0  ;;  %v5217_v39 = vpop.f32.mrf.mxu1 }
 0x1ef   : > { %v6890_v25 = vadd.f32 %v5270_v1, %v6813_v22  ;;  %v5218_v31 = vadd.f32 %v5217_v39, %v5216_v43 }
 0x1f0   : > { %v5272_v17 = vpop.f32.mrf.mxu0  ;;  %v5219_v46 = vpop.f32.mrf.mxu1 }
 0x1f1   : > { %v5273_v23 = vadd.f32 %v5272_v17, %v5271_v13  ;;  %v6892_v32 = vadd.f32 %v5218_v31, %v5106_v5 }
 0x1f2   : > { %v5274_v20 = vpop.f32.mrf.mxu0  ;;  %v5220_v21 = vpop.f32.mrf.mxu1 }
 0x1f3   : > { %v6895_v40 = vadd.f32 %v5273_v23, %v6819_v49  ;;  %v5221_v58 = vadd.f32 %v5220_v21, %v5219_v46 }
 0x1f4   : > { %v5275_v35 = vpop.f32.mrf.mxu0  ;;  %v5222_v10 = vpop.f32.mrf.mxu1 }
 0x1f5   : > { %v5276_v63 = vadd.f32 %v5275_v35, %v5274_v20  ;;  %v6897_v36 = vadd.f32 %v5221_v58, %v5109_v34  ;;  %v5115_v34 = vadd.f32 %v6763_v37, %v6761_v18 }
 0x1f6   : > { %v5277_v33 = vpop.f32.mrf.mxu0  ;;  %v5223_v16 = vpop.f32.mrf.mxu1 }
 0x1f7   : > { %v6900_v22 = vadd.f32 %v5276_v63, %v6824_v11  ;;  %v5224_v24 = vadd.f32 %v5223_v16, %v5222_v10 }
 0x1f8   : > { %v5278_v2 = vpop.f32.mrf.mxu0  ;;  %v5225_v5 = vpop.f32.mrf.mxu1 }
 0x1f9   : > { %v5279_v6 = vadd.f32 %v5278_v2, %v5277_v33  ;;  %v6903_v49 = vadd.f32 %v5224_v24, %v6755_v9 }
 0x1fa   : > { %v5280_v45 = vpop.f32.mrf.mxu0  ;;  %v5226_v51 = vpop.f32.mrf.mxu1 }
 0x1fb   : > { %v6906_v30 = vadd.f32 %v5279_v6, %v6828_v3  ;;  %v5227_v41 = vadd.f32 %v5226_v51, %v5225_v5 }
 0x1fc   : > { %v5281_v57 = vpop.f32.mrf.mxu0  ;;  %v5228_v48 = vpop.f32.mrf.mxu1 }
 0x1fd   : > { %v5282_v11 = vadd.f32 %v5281_v57, %v5280_v45  ;;  %v6910_v56 = vadd.f32 %v5227_v41, %v5115_v34 }
 0x1fe   : > { %v5283_v27 = vpop.f32.mrf.mxu0  ;;  %v5229_v43 = vpop.f32.mrf.mxu1 }
 0x1ff   : > { %v6913_v1 = vadd.f32 %v5282_v11, %v6833_v26  ;;  %v5230_v13 = vadd.f32 %v5229_v43, %v5228_v48 }
 0x200   : > { %v5284_v9 = vpop.f32.mrf.mxu0  ;;  %v5231_v3 = vpop.f32.mrf.mxu1 }
 0x201   : > { %v5285_v39 = vadd.f32 %v5284_v9, %v5283_v27  ;;  %v6916_v31 = vadd.f32 %v5230_v13, %v6775_v55 }
 0x202   : > { %v5286_v17 = vpop.f32.mrf.mxu0  ;;  %v5232_v37 = vpop.f32.mrf.mxu1 }
 0x203   : > { %v6919_v18 = vadd.f32 %v5285_v39, %v6839_v19  ;;  %v5233_v46 = vadd.f32 %v5232_v37, %v5231_v3 }
 0x204   : > { %v5287_v23 = vpop.f32.mrf.mxu0  ;;  %v5234_v21 = vpop.f32.mrf.mxu1 }
 0x205   : > { %v5288_v20 = vadd.f32 %v5287_v23, %v5286_v17  ;;  %v6922_v26 = vadd.f32 %v5233_v46, %v6777_v12 }
 0x206   : > { %v5289_v35 = vpop.f32.mrf.mxu0  ;;  %v5235_v63 = vpop.f32.mrf.mxu1 }
 0x207   : > { %v6925_v58 = vadd.f32 %v5288_v20, %v6842_v47  ;;  %v5236_v33 = vadd.f32 %v5235_v63, %v5234_v21 }
 0x208   : > { %v5290_v10 = vpop.f32.mrf.mxu0  ;;  %v5237_v16 = vpop.f32.mrf.mxu1 }
 0x209   : > { %v5291_v55 = vadd.f32 %v5290_v10, %v5289_v35  ;;  %v6928_v19 = vadd.f32 %v5236_v33, %v6785_v7 }
 0x20a   : > { %v5292_v2 = vpop.f32.mrf.mxu0  ;;  %v5238_v6 = vpop.f32.mrf.mxu1 }
 0x20b   : > { %v6931_v24 = vadd.f32 %v5291_v55, %v6847_v54  ;;  %v5239_v45 = vadd.f32 %v5238_v6, %v5237_v16 }
 0x20c   : > { %v5293_v5 = vpop.f32.mrf.mxu0  ;;  %v5240_v51 = vpop.f32.mrf.mxu1 }
 0x20d   : > { %v5294_v12 = vadd.f32 %v5293_v5, %v5292_v2  ;;  %v6934_v47 = vadd.f32 %v5239_v45, %v6789_v8 }
 0x20e   : > { %v5295_v34 = vpop.f32.mrf.mxu0  ;;  %v5241_v41 = vpop.f32.mrf.mxu1 }
 0x20f   : > { %v6937_v57 = vadd.f32 %v5294_v12, %v6852_v52  ;;  %v5242_v48 = vadd.f32 %v5241_v41, %v5240_v51 }
 0x210   : > { %v5296_v11 = vpop.f32.mrf.mxu0  ;;  %v5243_v27 = vpop.f32.mrf.mxu1 }
 0x211   : > { %v5297_v7 = vadd.f32 %v5296_v11, %v5295_v34  ;;  %v6940_v54 = vadd.f32 %v5242_v48, %v6797_v53 }
 0x212   : > { %v5298_v43 = vpop.f32.mrf.mxu0  ;;  %v5244_v13 = vpop.f32.mrf.mxu1 }
 0x213   : > { %7264 = vst [vmem:[#allocation4_spill] sm:$0xff] %v6940_v54  ;;  %v6943_v9 = vadd.f32 %v5297_v7, %v6855_v4  ;;  %v5245_v3 = vadd.f32 %v5244_v13, %v5243_v27 }
 0x214   : > { %v5299_v39 = vpop.f32.mrf.mxu0  ;;  %v5374_v17 = vpop.f32.mrf.mxu1 }
 0x215   : > { %v5300_v8 = vadd.f32 %v5299_v39, %v5298_v43  ;;  %v6946_v52 = vadd.f32 %v5245_v3, %v6799_v62 }
 0x216   : > { %v5301_v37 = vpop.f32.mrf.mxu0  ;;  %v5375_v46 = vpop.f32.mrf.mxu1 }
 0x217   : > { %7265 = vst [vmem:[#allocation5_spill] sm:$0xff] %v6946_v52  ;;  %v6949_v23 = vadd.f32 %v5300_v8, %v6858_v29  ;;  %v5376_v21 = vadd.f32 %v5375_v46, %v5374_v17 }
 0x218   : > { %v5302_v20 = vpop.f32.mrf.mxu0  ;;  %v5377_v35 = vpop.f32.mrf.mxu1 }
 0x219   : > { %v5303_v53 = vadd.f32 %v5302_v20, %v5301_v37  ;;  %v6952_v4 = vadd.f32 %v5376_v21, %v6880_v38 }
 0x21a   : > { %v5304_v63 = vpop.f32.mrf.mxu0  ;;  %v5378_v33 = vpop.f32.mrf.mxu1 }
 0x21b   : > { %v6955_v10 = vadd.f32 %v5303_v53, %v6861_v59  ;;  %v5379_v16 = vadd.f32 %v5378_v33, %v5377_v35 }
 0x21c   : > { %v5305_v55 = vpop.f32.mrf.mxu0  ;;  %v6957_v2 = vpop.f32.mrf.mxu1 }
 0x21d   : > { %v5306_v62 = vadd.f32 %v5305_v55, %v5304_v63  ;;  %v6960_v6 = vadd.f32 %v5379_v16, %v6885_v0 }
 0x21e   : > { %v5307_v29 = vpop.f32.mrf.mxu0  ;;  %v6965_v45 = vpop.f32.mrf.mxu1 }
 0x21f   : > { %v6963_v5 = vadd.f32 %v5306_v62, %v6864_v44 }
 0x220   : > { %v5308_v38 = vpop.f32.mrf.mxu0  ;;  %v6967_v51 = vpop.f32.mrf.mxu1 }
 0x221   : > { %v5309_v12 = vadd.f32 %v5308_v38, %v5307_v29 }
 0x222   : > { %v5310_v59 = vpop.f32.mrf.mxu0  ;;  %v6972_v41 = vpop.f32.mrf.mxu1 }
 0x223   : > { %v6970_v34 = vadd.f32 %v5309_v12, %v6867_v60 }
 0x224   : > { %v5311_v11 = vpop.f32.mrf.mxu0  ;;  %v6974_v7 = vpop.f32.mrf.mxu1 }
 0x225   : > { %v5312_v48 = vadd.f32 %v5311_v11, %v5310_v59 }
 0x226   : > { %v5313_v0 = vpop.f32.mrf.mxu0  ;;  %v6979_v27 = vpop.f32.mrf.mxu1 }
 0x227   : > { %v6977_v44 = vadd.f32 %v5312_v48, %v6870_v15 }
 0x228   : > { %v5314_v43 = vpop.f32.mrf.mxu0  ;;  %v6981_v39 = vpop.f32.mrf.mxu1 }
 0x229   : > { %v5315_v13 = vadd.f32 %v5314_v43, %v5313_v0 }
 0x22a   : > { %v5316_v3 = vpop.f32.mrf.mxu0  ;;  %v6986_v8 = vpop.f32.mrf.mxu1 }
 0x22b   : > { %v6984_v60 = vadd.f32 %v5315_v13, %v6873_v28 }
 0x22c   : > { %v5317_v17 = vpop.f32.mrf.mxu0  ;;  %v6988_v46 = vpop.f32.mrf.mxu1 }
 0x22d   : > { %v5318_v37 = vadd.f32 %v5317_v17, %v5316_v3 }
 0x22e   : > { %v5319_v20 = vpop.f32.mrf.mxu0  ;;  %v6993_v21 = vpop.f32.mrf.mxu1 }
 0x22f   : > { %v6991_v15 = vadd.f32 %v5318_v37, %v6875_v14 }
 0x230   : > { %v5320_v53 = vpop.f32.mrf.mxu0  ;;  %v6995_v63 = vpop.f32.mrf.mxu1 }
 0x231   : > { %v5321_v35 = vadd.f32 %v5320_v53, %v5319_v20 }
 0x232   : > { %v5322_v33 = vpop.f32.mrf.mxu0  ;;  %v7000_v55 = vpop.f32.mrf.mxu1 }
 0x233   : > { %v6998_v28 = vadd.f32 %v5321_v35, %v6877_v42 }
 0x234   : > { %v5323_v16 = vpop.f32.mrf.mxu0  ;;  %v7002_v29 = vpop.f32.mrf.mxu1 }
 0x235   : > { %v5324_v62 = vadd.f32 %v5323_v16, %v5322_v33 }
 0x236   : > { %v5325_v38 = vpop.f32.mrf.mxu0  ;;  %v7007_v12 = vpop.f32.mrf.mxu1 }
 0x237   : > { %v7005_v14 = vadd.f32 %v5324_v62, %v6882_v61 }
 0x238   : > { %v5326_v59 = vpop.f32.mrf.mxu0  ;;  %v7009_v48 = vpop.f32.mrf.mxu1 }
 0x239   : > { %7266 = vst [vmem:[#allocation6_spill] sm:$0xff] %v7005_v14  ;;  %v5327_v11 = vadd.f32 %v5326_v59, %v5325_v38 }
 0x23a   : > { %v5328_v0 = vpop.f32.mrf.mxu0  ;;  %v7014_v43 = vpop.f32.mrf.mxu1 }
 0x23b   : > { %v7012_v42 = vadd.f32 %v5327_v11, %v6887_v50 }
 0x23c   : > { %v5329_v13 = vpop.f32.mrf.mxu0  ;;  %v7016_v17 = vpop.f32.mrf.mxu1 }
 0x23d   : > { %7267 = vst [vmem:[#allocation7_spill] sm:$0xff] %v7012_v42  ;;  %v5330_v3 = vadd.f32 %v5329_v13, %v5328_v0 }
 0x23e   : > { %v5331_v37 = vpop.f32.mrf.mxu0  ;;  %v7021_v20 = vpop.f32.mrf.mxu1 }
 0x23f   : > { %v7019_v61 = vadd.f32 %v5330_v3, %v6892_v32 }
 0x240   : > { %v5332_v53 = vpop.f32.mrf.mxu0  ;;  %v7023_v33 = vpop.f32.mrf.mxu1 }
 0x241   : > { %7268 = vst [vmem:[#allocation8_spill] sm:$0xff] %v7019_v61  ;;  %v5333_v35 = vadd.f32 %v5332_v53, %v5331_v37 }
 0x242   : > { %v5334_v16 = vpop.f32.mrf.mxu0  ;;  %v7028_v62 = vpop.f32.mrf.mxu1 }
 0x243   : > { %v7026_v50 = vadd.f32 %v5333_v35, %v6897_v36 }
 0x244   : > { %v5335_v38 = vpop.f32.mrf.mxu0  ;;  %v7030_v11 = vpop.f32.mrf.mxu1 }
 0x245   : > { %7269 = vst [vmem:[#allocation9_spill] sm:$0xff] %v7026_v50  ;;  %v5336_v59 = vadd.f32 %v5335_v38, %v5334_v16 }
 0x246   : > { %v5337_v0 = vpop.f32.mrf.mxu0  ;;  %v7035_v13 = vpop.f32.mrf.mxu1 }
 0x247   : > { %v7033_v32 = vadd.f32 %v5336_v59, %v6903_v49 }
 0x248   : > { %v5338_v3 = vpop.f32.mrf.mxu0  ;;  %v7037_v53 = vpop.f32.mrf.mxu1 }
 0x249   : > { %7270 = vst [vmem:[#allocation10_spill] sm:$0xff] %v7033_v32  ;;  %v5339_v37 = vadd.f32 %v5338_v3, %v5337_v0 }
 0x24a   : > { %v5340_v52 = vpop.f32.mrf.mxu0  ;;  %v7042_v35 = vpop.f32.mrf.mxu1 }
 0x24b   : > { %v7040_v36 = vadd.f32 %v5339_v37, %v6910_v56 }
 0x24c   : > { %v5341_v54 = vpop.f32.mrf.mxu0  ;;  %v7044_v38 = vpop.f32.mrf.mxu1 }
 0x24d   : > { %7271 = vst [vmem:[#allocation11_spill] sm:$0xff] %v7040_v36  ;;  %v5342_v16 = vadd.f32 %v5341_v54, %v5340_v52 }
 0x24e   : > { %v5343_v42 = vpop.f32.mrf.mxu0  ;;  %v7049_v59 = vpop.f32.mrf.mxu1 }
 0x24f   : > { %v7047_v49 = vadd.f32 %v5342_v16, %v6916_v31 }
 0x250   : > { %v5344_v32 = vpop.f32.mrf.mxu0  ;;  %v7051_v3 = vpop.f32.mrf.mxu1 }
 0x251   : > { %7272 = vst [vmem:[#allocation12_spill] sm:$0xff] %v7047_v49  ;;  %v5345_v0 = vadd.f32 %v5344_v32, %v5343_v42 }
 0x252   : > { %v5346_v50 = vpop.f32.mrf.mxu0  ;;  %v7056_v37 = vpop.f32.mrf.mxu1 }
 0x253   : > { %v7054_v56 = vadd.f32 %v5345_v0, %v6922_v26 }
 0x254   : > { %v5347_v36 = vpop.f32.mrf.mxu0  ;;  %v7058_v52 = vpop.f32.mrf.mxu1 }
 0x255   : > { %7273 = vst [vmem:[#allocation13_spill] sm:$0xff] %v7054_v56  ;;  %v5348_v54 = vadd.f32 %v5347_v36, %v5346_v50  ;;  %v5382_v36 = vadd.f32 %v6965_v45, %v6957_v2 }
 0x256   : > { %v5349_v14 = vpop.f32.mrf.mxu0  ;;  %v7063_v16 = vpop.f32.mrf.mxu1 }
 0x257   : > { %v7061_v31 = vadd.f32 %v5348_v54, %v6928_v19 }
 0x258   : > { %v5350_v42 = vpop.f32.mrf.mxu0  ;;  %v7065_v49 = vpop.f32.mrf.mxu1 }
 0x259   : > { %7274 = vst [vmem:[#allocation14_spill] sm:$0xff] %v7061_v31  ;;  %v5351_v32 = vadd.f32 %v5350_v42, %v5349_v14 }
 0x25a   : > { %v7067_v61 = vpop.f32.mrf.mxu0  ;;  %v7072_v0 = vpop.f32.mrf.mxu1 }
 0x25b   : > { %7275 = vst [vmem:[#allocation15_spill] sm:$0xff] %v7067_v61  ;;  %v7070_v26 = vadd.f32 %v5351_v32, %v6934_v47  ;;  %v5385_v47 = vadd.f32 %v6972_v41, %v6967_v51  ;;  %v4125_v32 = vadd.f32 %v5382_v36, %v6890_v25  ;;  %v5394_v51 = vadd.f32 %v6993_v21, %v6988_v46 }
 0x25c   : > { %v7074_v50 = vpop.f32.mrf.mxu0  ;;  %v7078_v19 = vpop.f32.mrf.mxu1 }
 0x25d   : > { %7276 = vst [vmem:[#allocation16_spill] sm:$0xff] %v7070_v26  ;;  %7277 = vst [vmem:[#allocation17_spill] sm:$0xff] %v7074_v50  ;;  %v4128_v41 = vadd.f32 %v5385_v47, %v6895_v40  ;;  %v5397_v50 = vadd.f32 %v7000_v55, %v6995_v63  ;;  %v4141_v40 = vadd.f32 %v5394_v51, %v6913_v1 }
 0x25e   : > { %v7080_v54 = vpop.f32.mrf.mxu0  ;;  %v7083_v14 = vpop.f32.mrf.mxu1  ;;  %v5406_v1 = vadd.f32 %v7021_v20, %v7016_v17 }
 0x25f   : > { %7278 = vst [vmem:[#allocation18_spill] sm:$0xff] %v7080_v54  ;;  %v5388_v54 = vadd.f32 %v6979_v27, %v6974_v7  ;;  %v5391_v7 = vadd.f32 %v6986_v8, %v6981_v39  ;;  %v4144_v51 = vadd.f32 %v5397_v50, %v6919_v18  ;;  %v5409_v50 = vadd.f32 %v7028_v62, %v7023_v33 }
 0x260   : > { %v7085_v42 = vpop.f32.mrf.mxu0  ;;  %v7090_v26 = vpop.f32.mrf.mxu1 }
 0x261   : > { %7279 = vst [vmem:[#allocation19_spill] sm:$0xff] %v7085_v42 }
 0x262   : > { %v5512_v2 = vpop.f32.mrf.mxu0  ;;  %v7097_v31 = vpop.f32.mrf.mxu1 }
 0x263   : > { %v4286_v45 = vadd.f32 %v5512_v2, %v4125_v32 }
 0x264   : > { %v4277_v42 = vpop.f32.mrf.mxu0  ;;  %v7104_v36 = vpop.f32.mrf.mxu1 }
 0x265   : > { %4406 = vst [vmem:[%s7095_s12 + $0x10] sm:$0xff] %v4286_v45  ;;  %v4278_v25 = vadd.f32 %v4277_v42, %v6952_v4 }
 0x266   : > { %v5513_v56 = vpop.f32.mrf.mxu0  ;;  %v7109_v2 = vpop.f32.mrf.mxu1 }
 0x267   : > { %4404 = vst [vmem:[%s7095_s12] sm:$0xff] %v4278_v25  ;;  %v4289_v32 = vadd.f32 %v5513_v56, %v4128_v41  ;;  %v4133_v56 = vadd.f32 %v5388_v54, %v6900_v22  ;;  %v4474_v42 = vmul.f32 %v4278_v25, %v4278_v25  ;;  %v5400_v54 = vadd.f32 %v7007_v12, %v7002_v29 }
 0x268   : > { %v4280_v46 = vpop.f32.mrf.mxu0  ;;  %v7116_v21 = vpop.f32.mrf.mxu1 }
 0x269   : > { %4407 = vst [vmem:[%s7095_s12 + $0x18] sm:$0xff] %v4289_v32  ;;  %v4281_v4 = vadd.f32 %v4280_v46, %v6960_v6  ;;  %v4476_v46 = vmul.f32 %v4286_v45, %v4286_v45 }
 0x26a   : > { %v5516_v27 = vpop.f32.mrf.mxu0  ;;  %v7122_v55 = vpop.f32.mrf.mxu1 }
 0x26b   : > { %4405 = vst [vmem:[%s7095_s12 + $0x8] sm:$0xff] %v4281_v4  ;;  %v4436_v47 = vadd.f32 %v4281_v4, %v4278_v25  ;;  %v4475_v41 = vmul.f32 %v4281_v4, %v4281_v4  ;;  %v4302_v63 = vadd.f32 %v5516_v27, %v4141_v40  ;;  %v4136_v4 = vadd.f32 %v5391_v7, %v6906_v30 }
 0x26c   : > { %v4293_v6 = vpop.f32.mrf.mxu0  ;;  %v7128_v22 = vpop.f32.mrf.mxu1  ;;  %v4477_v40 = vmul.f32 %v4289_v32, %v4289_v32  ;;  %v4149_v7 = vadd.f32 %v5400_v54, %v6925_v58  ;;  %v5412_v54 = vadd.f32 %v7035_v13, %v7030_v11 }
 0x26d   : > { %v4437_v61 = vadd.f32 %v4436_v47, %v4286_v45  ;;  %v4506_v39 = vadd.f32 %v4475_v41, %v4474_v42  ;;  %4410 = vst [vmem:[%s7095_s12 + $0x30] sm:$0xff] %v4302_v63  ;;  %v4294_v8 = vadd.f32 %v4293_v6, %v4133_v56  ;;  %v4157_v56 = vadd.f32 %v5406_v1, %v6937_v57 }
 0x26e   : > { %v5517_v25 = vpop.f32.mrf.mxu0  ;;  %v7134_v20 = vpop.f32.mrf.mxu1  ;;  %v5418_v1 = vadd.f32 %v7049_v59, %v7044_v38 }
 0x26f   : > { %v4507_v27 = vadd.f32 %v4506_v39, %v4476_v46  ;;  %4408 = vst [vmem:[%s7095_s12 + $0x20] sm:$0xff] %v4294_v8  ;;  %v4438_v17 = vadd.f32 %v4437_v61, %v4289_v32  ;;  %v4305_v18 = vadd.f32 %v5517_v25, %v4144_v51  ;;  %v4478_v47 = vmul.f32 %v4294_v8, %v4294_v8 }
 0x270   : > { %v4296_v45 = vpop.f32.mrf.mxu0  ;;  %v7140_v30 = vpop.f32.mrf.mxu1  ;;  %v5403_v61 = vadd.f32 %v7014_v43, %v7009_v48  ;;  %v4160_v46 = vadd.f32 %v5409_v50, %v6943_v9  ;;  %v4480_v39 = vmul.f32 %v4302_v63, %v4302_v63  ;;  %v4173_v50 = vadd.f32 %v5418_v1, %v6963_v5 }
 0x271   : > { %v4439_v42 = vadd.f32 %v4438_v17, %v4294_v8  ;;  %v4508_v29 = vadd.f32 %v4507_v27, %v4477_v40  ;;  %4411 = vst [vmem:[%s7095_s12 + $0x38] sm:$0xff] %v4305_v18  ;;  %v4297_v12 = vadd.f32 %v4296_v45, %v4136_v4  ;;  %v4481_v40 = vmul.f32 %v4305_v18, %v4305_v18 }
 0x272   : > { %v5520_v32 = vpop.f32.mrf.mxu0  ;;  %v7146_v57 = vpop.f32.mrf.mxu1  ;;  %v4152_v4 = vadd.f32 %v5403_v61, %v6931_v24  ;;  %v5430_v61 = vadd.f32 %v7083_v14, %v7078_v19 }
 0x273   : > { %v4509_v41 = vadd.f32 %v4508_v29, %v4478_v47  ;;  %4409 = vst [vmem:[%s7095_s12 + $0x28] sm:$0xff] %v4297_v12  ;;  %v4440_v33 = vadd.f32 %v4439_v42, %v4297_v12  ;;  %v4479_v62 = vmul.f32 %v4297_v12, %v4297_v12  ;;  %v4318_v6 = vadd.f32 %v5520_v32, %v4157_v56 }
 0x274   : > { %v4309_v51 = vpop.f32.mrf.mxu0  ;;  %v7152_v58 = vpop.f32.mrf.mxu1  ;;  %v4165_v47 = vadd.f32 %v5412_v54, %v6949_v23 }
 0x275   : > { %v4441_v8 = vadd.f32 %v4440_v33, %v4302_v63  ;;  %v4510_v48 = vadd.f32 %v4509_v41, %v4479_v62  ;;  %4414 = vst [vmem:[%s7095_s12 + $0x50] sm:$0xff] %v4318_v6  ;;  %v4310_v43 = vadd.f32 %v4309_v51, %v4149_v7  ;;  %v5421_v63 = vadd.f32 %v7056_v37, %v7051_v3 }
 0x276   : > { %v5521_v25 = vpop.f32.mrf.mxu0  ;;  %v7158_v59 = vpop.f32.mrf.mxu1  ;;  %v4484_v41 = vmul.f32 %v4318_v6, %v4318_v6  ;;  %v5424_v62 = vadd.f32 %v7063_v16, %v7058_v52 }
 0x277   : > { %v4511_v27 = vadd.f32 %v4510_v48, %v4480_v39  ;;  %4412 = vst [vmem:[%s7095_s12 + $0x40] sm:$0xff] %v4310_v43  ;;  %v4442_v38 = vadd.f32 %v4441_v8, %v4305_v18  ;;  %v4321_v9 = vadd.f32 %v5521_v25, %v4160_v46  ;;  %v4482_v56 = vmul.f32 %v4310_v43, %v4310_v43 }
 0x278   : > { %v4312_v17 = vpop.f32.mrf.mxu0  ;;  %v7164_v24 = vpop.f32.mrf.mxu1  ;;  %v5415_v18 = vadd.f32 %v7042_v35, %v7037_v53  ;;  %v4176_v7 = vadd.f32 %v5421_v63, %v6970_v34  ;;  %v4189_v48 = vadd.f32 %v5430_v61, %v6991_v15 }
 0x279   : > { %v4443_v45 = vadd.f32 %v4442_v38, %v4310_v43  ;;  %v4512_v11 = vadd.f32 %v4511_v27, %v4481_v40  ;;  %4415 = vst [vmem:[%s7095_s12 + $0x58] sm:$0xff] %v4321_v9  ;;  %v4313_v13 = vadd.f32 %v4312_v17, %v4152_v4  ;;  %v4485_v46 = vmul.f32 %v4321_v9, %v4321_v9 }
 0x27a   : > { %v5524_v42 = vpop.f32.mrf.mxu0  ;;  %v7170_v5 = vpop.f32.mrf.mxu1  ;;  %v4168_v51 = vadd.f32 %v5415_v18, %v6955_v10  ;;  %v5427_v10 = vadd.f32 %v7072_v0, %v7065_v49  ;;  %v4181_v40 = vadd.f32 %v5424_v62, %v6977_v44  ;;  %v5436_v44 = vadd.f32 %v7109_v2, %v7104_v36 }
 0x27b   : > { %v4513_v29 = vadd.f32 %v4512_v11, %v4482_v56  ;;  %4413 = vst [vmem:[%s7095_s12 + $0x48] sm:$0xff] %v4313_v13  ;;  %v4444_v3 = vadd.f32 %v4443_v45, %v4313_v13  ;;  %v4483_v37 = vmul.f32 %v4313_v13, %v4313_v13  ;;  %v4334_v12 = vadd.f32 %v5524_v42, %v4173_v50 }
 0x27c   : > { %v4325_v32 = vpop.f32.mrf.mxu0  ;;  %v5452_v23 = vpop.f32.mrf.mxu1  ;;  %v4184_v13 = vadd.f32 %v5427_v10, %v6984_v60  ;;  %v5439_v60 = vadd.f32 %v7122_v55, %v7116_v21  ;;  %v5448_v55 = vadd.f32 %v7158_v59, %v7152_v58 }
 0x27d   : > { %v4445_v33 = vadd.f32 %v4444_v3, %v4318_v6  ;;  %v4514_v53 = vadd.f32 %v4513_v29, %v4483_v37  ;;  %4418 = vst [vmem:[%s7095_s12 + $0x70] sm:$0xff] %v4334_v12  ;;  %v4326_v35 = vadd.f32 %v4325_v32, %v4165_v47  ;;  %v5433_v6 = vadd.f32 %v7097_v31, %v7090_v26  ;;  %v7280_v3 = vld [vmem:[#allocation8_spill] sm:$0xff] }
 0x27e   : > { %v5525_v1 = vpop.f32.mrf.mxu0  ;;  %v5453_v34 = vpop.f32.mrf.mxu1  ;;  %v4488_v50 = vmul.f32 %v4334_v12, %v4334_v12  ;;  %v5445_v47 = vadd.f32 %v7146_v57, %v7140_v30 }
 0x27f   : > { %v4515_v39 = vadd.f32 %v4514_v53, %v4484_v41  ;;  %4416 = vst [vmem:[%s7095_s12 + $0x60] sm:$0xff] %v4326_v35  ;;  %v4446_v19 = vadd.f32 %v4445_v33, %v4321_v9  ;;  %v4337_v14 = vadd.f32 %v5525_v1, %v4176_v7  ;;  %v4486_v54 = vmul.f32 %v4326_v35, %v4326_v35  ;;  %v7281_v41 = vld [vmem:[#allocation6_spill] sm:$0xff] }
 0x280   : > { %v4328_v8 = vpop.f32.mrf.mxu0  ;;  %v5455_v16 = vpop.f32.mrf.mxu1  ;;  %v5442_v9 = vadd.f32 %v7134_v20, %v7128_v22  ;;  %v4192_v17 = vadd.f32 %v5433_v6, %v6998_v28  ;;  %v4197_v33 = vadd.f32 %v5436_v44, %v7281_v41  ;;  %v5454_v53 = vadd.f32 %v5453_v34, %v5452_v23  ;;  %v7283_v34 = vld [vmem:[#allocation7_spill] sm:$0xff] }
 0x281   : > { %v4447_v43 = vadd.f32 %v4446_v19, %v4326_v35  ;;  %v4516_v25 = vadd.f32 %v4515_v39, %v4485_v46  ;;  %4419 = vst [vmem:[%s7095_s12 + $0x78] sm:$0xff] %v4337_v14  ;;  %v4329_v52 = vadd.f32 %v4328_v8, %v4168_v51  ;;  %v4489_v18 = vmul.f32 %v4337_v14, %v4337_v14  ;;  %v7282_v46 = vld [vmem:[#allocation9_spill] sm:$0xff] }
 0x282   : > { %v5528_v4 = vpop.f32.mrf.mxu0  ;;  %v5456_v15 = vpop.f32.mrf.mxu1  ;;  %v4205_v37 = vadd.f32 %v5442_v9, %v7280_v3  ;;  %v4208_v39 = vadd.f32 %v5445_v47, %v7282_v46  ;;  %v7289_v47 = vld [vmem:[#allocation4_spill] sm:$0xff]  ;;  %v7290_v3 = vld [vmem:[#allocation18_spill] sm:$0xff] }
 0x283   : > { %v4517_v27 = vadd.f32 %v4516_v25, %v4486_v54  ;;  %4417 = vst [vmem:[%s7095_s12 + $0x68] sm:$0xff] %v4329_v52  ;;  %v4448_v38 = vadd.f32 %v4447_v43, %v4329_v52  ;;  %v4487_v31 = vmul.f32 %v4329_v52, %v4329_v52  ;;  %v4350_v26 = vadd.f32 %v5528_v4, %v4189_v48  ;;  %v7284_v43 = vld [vmem:[#allocation12_spill] sm:$0xff] }
 0x284   : > { %v4341_v63 = vpop.f32.mrf.mxu0  ;;  %v7192_v0 = vpop.f32.mrf.mxu1  ;;  %v4200_v48 = vadd.f32 %v5439_v60, %v7283_v34  ;;  %v4221_v54 = vadd.f32 %v5454_v53, %v7284_v43  ;;  %v5457_v25 = vadd.f32 %v5456_v15, %v5455_v16  ;;  %v5451_v16 = vadd.f32 %v7170_v5, %v7164_v24 }
 0x285   : > { %v4449_v45 = vadd.f32 %v4448_v38, %v4334_v12  ;;  %v4518_v56 = vadd.f32 %v4517_v27, %v4487_v31  ;;  %4422 = vst [vmem:[%s7095_s12 + $0x90] sm:$0xff] %v4350_v26  ;;  %v4342_v49 = vadd.f32 %v4341_v63, %v4181_v40  ;;  %v4492_v19 = vmul.f32 %v4350_v26, %v4350_v26  ;;  %v7285_v38 = vld [vmem:[#allocation15_spill] sm:$0xff]  ;;  %v7286_v31 = vld [vmem:[#allocation17_spill] sm:$0xff] }
 0x286   : > { %v5529_v11 = vpop.f32.mrf.mxu0  ;;  %v5459_v28 = vpop.f32.mrf.mxu1 }
 0x287   : > { %v4519_v42 = vadd.f32 %v4518_v56, %v4488_v50  ;;  %4420 = vst [vmem:[%s7095_s12 + $0x80] sm:$0xff] %v4342_v49  ;;  %v4450_v22 = vadd.f32 %v4449_v45, %v4337_v14  ;;  %v4353_v20 = vadd.f32 %v5529_v11, %v4192_v17  ;;  %v4490_v61 = vmul.f32 %v4342_v49, %v4342_v49  ;;  %v7287_v45 = vld [vmem:[#allocation10_spill] sm:$0xff] }
 0x288   : > { %v4344_v29 = vpop.f32.mrf.mxu0  ;;  %v7202_v2 = vpop.f32.mrf.mxu1  ;;  %v4213_v56 = vadd.f32 %v5448_v55, %v7287_v45  ;;  %v5460_v5 = vadd.f32 %v5459_v28, %v7192_v0  ;;  %v7294_v28 = vld [vmem:[#allocation14_spill] sm:$0xff] }
 0x289   : > { %v4451_v12 = vadd.f32 %v4450_v22, %v4342_v49  ;;  %v4520_v32 = vadd.f32 %v4519_v42, %v4489_v18  ;;  %4423 = vst [vmem:[%s7095_s12 + $0x98] sm:$0xff] %v4353_v20  ;;  %v4345_v36 = vadd.f32 %v4344_v29, %v4184_v13  ;;  %v4493_v52 = vmul.f32 %v4353_v20, %v4353_v20  ;;  %v7288_v49 = vld [vmem:[#allocation13_spill] sm:$0xff] }
 0x28a   : > { %v5532_v7 = vpop.f32.mrf.mxu0  ;;  %v5462_v1 = vpop.f32.mrf.mxu1  ;;  %v4224_v44 = vadd.f32 %v5457_v25, %v7288_v49 }
 0x28b   : > { %v4521_v35 = vadd.f32 %v4520_v32, %v4490_v61  ;;  %4421 = vst [vmem:[%s7095_s12 + $0x88] sm:$0xff] %v4345_v36  ;;  %v4452_v30 = vadd.f32 %v4451_v12, %v4345_v36  ;;  %v4491_v57 = vmul.f32 %v4345_v36, %v4345_v36  ;;  %v4366_v62 = vadd.f32 %v5532_v7, %v4205_v37  ;;  %v7291_v37 = vld [vmem:[#allocation19_spill] sm:$0xff] }
 0x28c   : > { %v4357_v51 = vpop.f32.mrf.mxu0  ;;  %v5464_v21 = vpop.f32.mrf.mxu1  ;;  %v5357_v12 = vadd.f32 %v7291_v37, %v7290_v3 }
 0x28d   : > { %v4453_v14 = vadd.f32 %v4452_v30, %v4350_v26  ;;  %v4522_v6 = vadd.f32 %v4521_v35, %v4491_v57  ;;  %4426 = vst [vmem:[%s7095_s12 + $0xb0] sm:$0xff] %v4366_v62  ;;  %v4358_v8 = vadd.f32 %v4357_v51, %v4197_v33  ;;  %v5354_v26 = vadd.f32 %v7286_v31, %v7285_v38  ;;  %v7292_v33 = vld [vmem:[#allocation11_spill] sm:$0xff] }
 0x28e   : > { %v5533_v23 = vpop.f32.mrf.mxu0  ;;  %v5465_v27 = vpop.f32.mrf.mxu1  ;;  %v4496_v61 = vmul.f32 %v4366_v62, %v4366_v62  ;;  %v4216_v53 = vadd.f32 %v5451_v16, %v7292_v33 }
 0x28f   : > { %v4523_v10 = vadd.f32 %v4522_v6, %v4492_v19  ;;  %4424 = vst [vmem:[%s7095_s12 + $0xa0] sm:$0xff] %v4358_v8  ;;  %v4454_v4 = vadd.f32 %v4453_v14, %v4353_v20  ;;  %v4369_v40 = vadd.f32 %v5533_v23, %v4208_v39  ;;  %v4494_v58 = vmul.f32 %v4358_v8, %v4358_v8  ;;  %v7293_v39 = vld [vmem:[#allocation5_spill] sm:$0xff] }
 0x290   : > { %v4360_v9 = vpop.f32.mrf.mxu0  ;;  %v5467_v50 = vpop.f32.mrf.mxu1  ;;  %v5466_v11 = vadd.f32 %v5465_v27, %v5464_v21  ;;  %v4076_v29 = vadd.f32 %v5354_v26, %v7289_v47  ;;  %v4079_v19 = vadd.f32 %v5357_v12, %v7293_v39  ;;  %v5463_v14 = vadd.f32 %v5462_v1, %v7202_v2 }
 0x291   : > { %v4455_v63 = vadd.f32 %v4454_v4, %v4358_v8  ;;  %v4524_v59 = vadd.f32 %v4523_v10, %v4493_v52  ;;  %4427 = vst [vmem:[%s7095_s12 + $0xb8] sm:$0xff] %v4369_v40  ;;  %v4361_v17 = vadd.f32 %v4360_v9, %v4200_v48  ;;  %v4497_v7 = vmul.f32 %v4369_v40, %v4369_v40  ;;  %v7295_v4 = vld [vmem:[#allocation16_spill] sm:$0xff] }
 0x292   : > { %v5536_v15 = vpop.f32.mrf.mxu0  ;;  %v5468_v20 = vpop.f32.mrf.mxu1  ;;  %v4237_v46 = vadd.f32 %v5466_v11, %v4076_v29 }
 0x293   : > { %v4525_v13 = vadd.f32 %v4524_v59, %v4494_v58  ;;  %4425 = vst [vmem:[%s7095_s12 + $0xa8] sm:$0xff] %v4361_v17  ;;  %v4456_v18 = vadd.f32 %v4455_v63, %v4361_v17  ;;  %v4495_v42 = vmul.f32 %v4361_v17, %v4361_v17  ;;  %v4382_v22 = vadd.f32 %v5536_v15, %v4221_v54 }
 0x294   : > { %v4373_v24 = vpop.f32.mrf.mxu0  ;;  %v5469_v35 = vadd.f32 %v5468_v20, %v5467_v50 }
 0x295   : > { %v4457_v32 = vadd.f32 %v4456_v18, %v4366_v62  ;;  %v4526_v36 = vadd.f32 %v4525_v13, %v4495_v42  ;;  %4430 = vst [vmem:[%s7095_s12 + $0xd0] sm:$0xff] %v4382_v22  ;;  %v4374_v60 = vadd.f32 %v4373_v24, %v4213_v56  ;;  %v4229_v62 = vadd.f32 %v5460_v5, %v7294_v28 }
 0x296   : > { %v5537_v41 = vpop.f32.mrf.mxu0  ;;  %v4240_v34 = vadd.f32 %v5469_v35, %v4079_v19  ;;  %v4500_v52 = vmul.f32 %v4382_v22, %v4382_v22 }
 0x297   : > { %v4527_v30 = vadd.f32 %v4526_v36, %v4496_v61  ;;  %4428 = vst [vmem:[%s7095_s12 + $0xc0] sm:$0xff] %v4374_v60  ;;  %v4458_v57 = vadd.f32 %v4457_v32, %v4369_v40  ;;  %v4385_v51 = vadd.f32 %v5537_v41, %v4224_v44  ;;  %v4498_v8 = vmul.f32 %v4374_v60, %v4374_v60 }
 0x298   : > { %v4376_v0 = vpop.f32.mrf.mxu0  ;;  %v4232_v40 = vadd.f32 %v5463_v14, %v7295_v4 }
 0x299   : > { %v4459_v6 = vadd.f32 %v4458_v57, %v4374_v60  ;;  %v4528_v21 = vadd.f32 %v4527_v30, %v4497_v7  ;;  %4431 = vst [vmem:[%s7095_s12 + $0xd8] sm:$0xff] %v4385_v51  ;;  %v4377_v55 = vadd.f32 %v4376_v0, %v4216_v53  ;;  %v4501_v2 = vmul.f32 %v4385_v51, %v4385_v51 }
 0x29a   : > { %v5540_v23 = vpop.f32.mrf.mxu0 }
 0x29b   : > { %v4529_v48 = vadd.f32 %v4528_v21, %v4498_v8  ;;  %4429 = vst [vmem:[%s7095_s12 + $0xc8] sm:$0xff] %v4377_v55  ;;  %v4460_v43 = vadd.f32 %v4459_v6, %v4377_v55  ;;  %v4499_v54 = vmul.f32 %v4377_v55, %v4377_v55  ;;  %v4398_v25 = vadd.f32 %v5540_v23, %v4237_v46 }
 0x29c   : > { %v4389_v10 = vpop.f32.mrf.mxu0 }
 0x29d   : > { %v4461_v1 = vadd.f32 %v4460_v43, %v4382_v22  ;;  %v4530_v27 = vadd.f32 %v4529_v48, %v4499_v54  ;;  %v4390_v38 = vadd.f32 %v4389_v10, %v4229_v62  ;;  %4434 = vst [vmem:[%s7095_s12 + $0xf0] sm:$0xff] %v4398_v25  ;;  %v4504_v49 = vmul.f32 %v4398_v25, %v4398_v25 }
 0x29e   : > { %v5541_v31 = vpop.f32.mrf.mxu0 }
 0x29f   : > { %v4531_v26 = vadd.f32 %v4530_v27, %v4500_v52  ;;  %4432 = vst [vmem:[%s7095_s12 + $0xe0] sm:$0xff] %v4390_v38  ;;  %v4462_v9 = vadd.f32 %v4461_v1, %v4385_v51  ;;  %v4502_v63 = vmul.f32 %v4390_v38, %v4390_v38  ;;  %v4401_v58 = vadd.f32 %v5541_v31, %v4240_v34 }
 0x2a0   : > { %v4392_v59 = vpop.f32.mrf.mxu0 }
 0x2a1   : > { %v4463_v17 = vadd.f32 %v4462_v9, %v4390_v38  ;;  %v4532_v50 = vadd.f32 %v4531_v26, %v4501_v2  ;;  %v4393_v16 = vadd.f32 %v4392_v59, %v4232_v40  ;;  %4435 = vst [vmem:[%s7095_s12 + $0xf8] sm:$0xff] %v4401_v58  ;;  %v4505_v13 = vmul.f32 %v4401_v58, %v4401_v58 }
 0x2a3   : > { %v4533_v15 = vadd.f32 %v4532_v50, %v4502_v63  ;;  %4433 = vst [vmem:[%s7095_s12 + $0xe8] sm:$0xff] %v4393_v16  ;;  %v4464_v45 = vadd.f32 %v4463_v17, %v4393_v16  ;;  %v4503_v56 = vmul.f32 %v4393_v16, %v4393_v16 }
 0x2a5   : > { %v4534_v44 = vadd.f32 %v4533_v15, %v4503_v56  ;;  %v4465_v11 = vadd.f32 %v4464_v45, %v4398_v25 }
 0x2a7   : > { %v4535_v18 = vadd.f32 %v4534_v44, %v4504_v49  ;;  %v4466_v42 = vadd.f32 %v4465_v11, %v4401_v58 }
 0x2a9   : > { %v4467_v22 = vrot.slane %v4466_v42, 4  ;;  %v4536_v20 = vadd.f32 %v4535_v18, %v4505_v13 }
 0x2ab   : > { %v4468_v47 = vadd.f32 %v4467_v22, %v4466_v42  ;;  %v4537_v29 = vrot.slane %v4536_v20, 4 }
 0x2ad   : > { %v4469_v3 = vrot.slane %v4468_v47, 2  ;;  %v4538_v37 = vadd.f32 %v4537_v29, %v4536_v20 }
 0x2af   : > { %v4470_v12 = vadd.f32 %v4469_v3, %v4468_v47  ;;  %v4539_v24 = vrot.slane %v4538_v37, 2 }
 0x2b1   : > { %v4471_v5 = vrot.slane %v4470_v12, 1  ;;  %v4540_v61 = vadd.f32 %v4539_v24, %v4538_v37 }
 0x2b3   : > { %v4472_v32 = vadd.f32 %v4471_v5, %v4470_v12  ;;  %v4541_v36 = vrot.slane %v4540_v61, 1 }
 0x2b5   : > { %4473 = vst [vmem:[%s238_s15] sm:$0x1] %v4472_v32  ;;  %v4542_v60 = vadd.f32 %v4541_v36, %v4540_v61 }
 0x2b7   : > { %4543 = vst [vmem:[%s238_s15 + $0x1] sm:$0x1] %v4542_v60 }
 0x2b8 PF: > { %s16_s18 = sadd.s32 1, %s5858_s18  }
 0x2b9   : > { %p13_p5 = scmp.ge.s32.totalorder %s16_s18, 4  }
 0x2bb   :  { %15 = sbr.rel (!%p13_p5) target bundleno = 1 (0x1), region = 79 }

</bundles_post_ra>
